<compile_context>
chip_gen: v5e
topology: v5e:2x2
jax: 0.10.0
libtpu: 0.0.40
codegen_flags: <defaults>
</compile_context>

<pallas_src>
import functools

import jax
import jax.numpy as jnp
from jax.experimental import pallas as pl
from jax.experimental.pallas import tpu as pltpu

# ----------------------------- config ---------------------------------------
C_IN = 1
C_HIDDEN = 32
C_OUT = 2                        # c_in == 1  ->  c_out = 2
DEFAULT_SHAPE = 16               # default_x = default_y
KERNEL_SHAPES = [3, 3, 3]
LINEAR_DIM = DEFAULT_SHAPE * DEFAULT_SHAPE
BN_EPS = 1e-5
KRN_HIDDEN = 16

# 3x3 tap enumeration (dy-major, dx-minor); matches the tap-major conv-weight
# layout built in build_conv_mats().
TAP_OFFSETS = [(dy - 1, dx - 1) for dy in range(3) for dx in range(3)]
N_TAPS = len(TAP_OFFSETS)
CENTER_TAP = 4                   # (dy, dx) == (0, 0): no roll, no mask


def _softplus(x):
    # Matches torch.nn.Softplus(beta=1, threshold=20); shared by kernel + ref.
    return jnp.where(x > 20.0, x, jnp.log(1.0 + jnp.exp(jnp.minimum(x, 20.0))))


# ----------------------------- fused Pallas kernel ---------------------------
def _fused_forward_kernel(H, W, B,
                          x0_ref,
                          w1_ref, b1_ref, w2_ref, b2_ref, w3_ref, b3_ref,
                          fw1_ref, fb1_ref, fw2_ref, fb2_ref, fw3_ref, fb3_ref,
                          o_ref):
    """Whole NeuropCNN forward; activations stay in registers as (C, B*H*W)."""
    HW = H * W
    log2_w = W.bit_length() - 1          # W is a power of two (asserted outside)

    def shifted_masked_tap(a, dy, dx):
        # tap[:, n] = a[:, n + dy*W + dx] for in-image neighbours, else 0.
        # The shift is a circular pltpu.roll (XLU slot, no VMEM round trip);
        # every wrapped / cross-image column is zeroed by the (1, N) edge mask,
        # so no padded scratch or lane-unaligned windows are needed.
        n = a.shape[-1]
        s = dy * W + dx
        r = a if s % n == 0 else pltpu.roll(a, shift=(-s) % n, axis=1)
        col = jax.lax.broadcasted_iota(jnp.int32, (1, n), 1)
        xs = col & (W - 1)                       # x coordinate of column n
        ys = (col >> log2_w) & (H - 1)           # y coordinate of column n
        ok = None
        if dx > 0:
            ok = xs < (W - dx)
        elif dx < 0:
            ok = xs >= (-dx)
        if dy > 0:
            c = ys < (H - dy)
            ok = c if ok is None else jnp.logical_and(ok, c)
        elif dy < 0:
            c = ys >= (-dy)
            ok = c if ok is None else jnp.logical_and(ok, c)
        return r if ok is None else jnp.where(ok, r, 0.0)

    def softplus_bn(v):
        # Softplus + training-mode BatchNorm2d (gamma=1, beta=0), one-pass
        # sum / sum-of-squares statistics over the (B, H, W) columns.
        s = _softplus(v)
        inv_n = 1.0 / v.shape[-1]
        mean = jnp.sum(s, axis=1, keepdims=True) * inv_n
        mean_sq = jnp.sum(s * s, axis=1, keepdims=True) * inv_n
        var = jnp.maximum(mean_sq - mean * mean, 0.0)
        return (s - mean) * jax.lax.rsqrt(var + BN_EPS)

    def conv3x3(a, w_ref, b_ref):
        # 3x3 conv (pad=1) as 9 per-tap (c_out, C_HIDDEN) @ (C_HIDDEN, N) MXU
        # matmuls accumulated in registers (no im2col materialization).
        acc = jnp.dot(w_ref[CENTER_TAP], a, preferred_element_type=jnp.float32)
        for t, (dy, dx) in enumerate(TAP_OFFSETS):
            if t == CENTER_TAP:
                continue
            tap = shifted_masked_tap(a, dy, dx)
            acc = acc + jnp.dot(w_ref[t], tap,
                                preferred_element_type=jnp.float32)
        return acc + b_ref[...]

    # ---- conv1: c_in == 1, so each tap is a (C_HIDDEN,1) x (1,N) outer
    #      product on the VPU (no K=1 matmuls, no concatenate).
    x0 = x0_ref[...]                                       # (C_IN, N)
    a = None
    for t, (dy, dx) in enumerate(TAP_OFFSETS):
        contrib = w1_ref[t] * shifted_masked_tap(x0, dy, dx)
        a = contrib if a is None else a + contrib
    a = softplus_bn(a + b1_ref[...])
    # ---- conv2 + Softplus + BatchNorm
    a = softplus_bn(conv3x3(a, w2_ref, b2_ref))
    # ---- conv3 (no activation after the last conv)
    a = conv3x3(a, w3_ref, b3_ref)                         # (C_OUT, N)

    # ---- nn.Flatten built in registers: flat[b, c*HW+m] = a[c, b*HW+m].
    #      All lane slices start at multiples of 128 (HW = 256).
    rows = []
    for b in range(B):
        chunks = [a[c:c + 1, b * HW:(b + 1) * HW] for c in range(C_OUT)]
        rows.append(chunks[0] if C_OUT == 1 else jnp.concatenate(chunks, axis=1))
    flat = rows[0] if B == 1 else jnp.concatenate(rows, axis=0)   # (B, C_OUT*HW)

    # ---- Linear -> Softplus -> Linear -> Softplus -> Linear
    h = _softplus(jnp.dot(flat, fw1_ref[...],
                          preferred_element_type=jnp.float32) + fb1_ref[...])
    h = _softplus(jnp.dot(h, fw2_ref[...],
                          preferred_element_type=jnp.float32) + fb2_ref[...])
    o_ref[...] = (jnp.dot(h, fw3_ref[...],
                          preferred_element_type=jnp.float32) + fb3_ref[...])


def _fused_pallas_forward(x0, conv_mats, fcl, B, H, W):
    # Gridless call: every operand is a whole-array VMEM block (total < 1 MiB),
    # weights are DMA'd once and the only HBM writeback is the (B, 512) output.
    (w1, b1), (w2, b2), (w3, b3) = conv_mats
    kernel = functools.partial(_fused_forward_kernel, H, W, B)
    return pl.pallas_call(
        kernel,
        out_shape=jax.ShapeDtypeStruct((B, C_OUT * H * W), jnp.float32),
    )(x0, w1, b1, w2, b2, w3, b3,
      fcl["w1"], fcl["b1"], fcl["w2"], fcl["b2"], fcl["w3"], fcl["b3"])


# --------------------- kernel-generating coordinate MLP ---------------------
def neurop_krn_mlp(p, coord, k, c_in, c_out):
    """coord: (k*k, 2) -> conv kernel (c_out, c_in, k, k).  Plain-JAX glue."""
    h = jnp.tanh(coord @ p["w1"] + p["b1"])
    out = h @ p["w2"] + p["b2"]                    # (k*k, c_in*c_out)
    kern = out.reshape(k, k, c_out, c_in)
    return jnp.transpose(kern, (2, 3, 0, 1)).astype(jnp.float32)


# ----------------------------- _get_params ----------------------------------
def get_params(shape, mode="interpolate"):
    ratio = shape[-1] / DEFAULT_SHAPE
    idc, props = [], []
    for ksz in KERNEL_SHAPES:
        k = round(ratio * ksz)
        if k % 2 == 0:
            k += 1
        props.append((k - 1) // 2)
        if mode == "interpolate":
            vals = jnp.array([1.0 / (2 * k) + i / k for i in range(k)], jnp.float32)
        else:
            vals = jnp.array([0.5 + i for i in range(k)], jnp.float32)
        X, Y = jnp.meshgrid(vals, vals, indexing="xy")
        idc.append(jnp.stack([X, Y], axis=2).reshape(-1, 2))
    return idc, props


# ----------------------- once-per-shape precomputation ----------------------
def build_conv_mats(params, shape):
    """Tap-major conv weights (k*k, c_out, c_in) + (c_out, 1) biases.

    Tap t = (dy+1)*k + (dx+1), so w_ref[t] inside the kernel is the (c_out,
    c_in) block for offset (dy, dx) -- first-axis indexing, no lane slicing.
    """
    idc, props = get_params(shape, mode="interpolate")
    c_ins = [C_IN, C_HIDDEN, C_HIDDEN]
    c_outs = [C_HIDDEN, C_HIDDEN, C_OUT]
    mats = []
    for i in range(len(KERNEL_SHAPES)):
        coord = idc[i]
        k = int(round(coord.shape[0] ** 0.5))
        kern = neurop_krn_mlp(params["krn"][i], coord, k, c_ins[i], c_outs[i])
        wtaps = jnp.transpose(kern, (2, 3, 0, 1)).reshape(k * k, c_outs[i], c_ins[i])
        bias = params["conv_bias"][i].reshape(c_outs[i], 1)
        mats.append((wtaps, bias))
    return mats, props


def make_forward(params, shape):
    """Shape-specialized forward.  Conv-kernel generation (coordinate MLPs) is
    done here ONCE per (params, shape); the per-call work is one fused kernel."""
    H, W = int(shape[-2]), int(shape[-1])
    assert H == DEFAULT_SHAPE and W == DEFAULT_SHAPE   # TODO(synk): pool/interp head
    assert (W & (W - 1)) == 0 and (H & (H - 1)) == 0   # in-kernel mask bit tricks
    conv_mats, props = build_conv_mats(params, shape)
    assert all(p == 1 for p in props), props           # fused path assumes 3x3/pad=1
    fcl = params["fcl"]
    side = int(LINEAR_DIM ** 0.5)
    out_ch = 2 * shape[1]

    @jax.jit
    def forward(x):
        B, c_in, Hx, Wx = x.shape
        assert c_in == C_IN and Hx == H and Wx == W
        assert (B * Hx * Wx) % 128 == 0                # lane-dense layout
        # lane-dense (C_IN, B*H*W) layout; column n = b*H*W + y*W + x
        x0 = jnp.transpose(x, (1, 0, 2, 3)).reshape(c_in, B * Hx * Wx)
        y = _fused_pallas_forward(x0, conv_mats, fcl, B, Hx, Wx)
        return y.reshape(-1, out_ch, side, side)

    return forward


# ----------------------------- pure-JAX reference ----------------------------
def reference_forward(x, shape, params):
    idc, props = get_params(shape, mode="interpolate")
    c_ins = [C_IN, C_HIDDEN, C_HIDDEN]
    c_outs = [C_HIDDEN, C_HIDDEN, C_OUT]
    hp = jax.lax.Precision.HIGHEST
    h = x
    for i in range(len(KERNEL_SHAPES)):
        coord = idc[i]
        k = int(round(coord.shape[0] ** 0.5))
        kern = neurop_krn_mlp(params["krn"][i], coord, k, c_ins[i], c_outs[i])
        h = jax.lax.conv_general_dilated(
            h, kern, window_strides=(1, 1),
            padding=[(props[i], props[i])] * 2,
            dimension_numbers=("NCHW", "OIHW", "NCHW"), precision=hp)
        h = h + params["conv_bias"][i].reshape(1, -1, 1, 1)
        if i < len(KERNEL_SHAPES) - 1:
            s = _softplus(h)
            mean = jnp.mean(s, axis=(0, 2, 3), keepdims=True)
            var = jnp.mean((s - mean) ** 2, axis=(0, 2, 3), keepdims=True)
            h = (s - mean) * jax.lax.rsqrt(var + BN_EPS)
    B = x.shape[0]
    flat = h.reshape(B, -1)
    f = params["fcl"]
    z = _softplus(jnp.dot(flat, f["w1"], precision=hp) + f["b1"])
    z = _softplus(jnp.dot(z, f["w2"], precision=hp) + f["b2"])
    z = jnp.dot(z, f["w3"], precision=hp) + f["b3"]
    side = int(LINEAR_DIM ** 0.5)
    return z.reshape(-1, 2 * shape[1], side, side)


# ----------------------------- parameters -----------------------------------
def init_params(key):
    keys = jax.random.split(key, 12)

    def krn_p(k1, k2, ci, co):
        return dict(
            w1=jax.random.normal(k1, (2, KRN_HIDDEN), jnp.float32) * 0.5,
            b1=jnp.zeros((KRN_HIDDEN,), jnp.float32),
            w2=jax.random.normal(k2, (KRN_HIDDEN, ci * co), jnp.float32)
            * (0.5 / KRN_HIDDEN ** 0.5),
            b2=jnp.zeros((ci * co,), jnp.float32),
        )

    def lin_p(k, din, dout):
        bound = 1.0 / (din ** 0.5)
        kw, kb = jax.random.split(k)
        return (
            jax.random.uniform(kw, (din, dout), jnp.float32, -bound, bound),
            jax.random.uniform(kb, (1, dout), jnp.float32, -bound, bound),
        )

    d_full = LINEAR_DIM * C_OUT          # 512
    d_hid = d_full // 4                  # 128
    w1, b1 = lin_p(keys[6], d_full, d_hid)
    w2, b2 = lin_p(keys[7], d_hid, d_hid)
    w3, b3 = lin_p(keys[8], d_hid, d_full)

    return dict(
        krn=[
            krn_p(keys[0], keys[1], C_IN, C_HIDDEN),
            krn_p(keys[2], keys[3], C_HIDDEN, C_HIDDEN),
            krn_p(keys[4], keys[5], C_HIDDEN, C_OUT),
        ],
        conv_bias=[
            jnp.zeros((C_HIDDEN,), jnp.float32),
            jnp.zeros((C_HIDDEN,), jnp.float32),
            jnp.zeros((C_OUT,), jnp.float32),
        ],
        fcl=dict(w1=w1, b1=b1, w2=w2, b2=b2, w3=w3, b3=b3),
    )


# ----------------------------- main ------------------------------------------
if __name__ == "__main__":
    key = jax.random.PRNGKey(0)
    k_x, k_p = jax.random.split(key)

    B = 2
    x = jax.random.normal(k_x, (B, C_IN, DEFAULT_SHAPE, DEFAULT_SHAPE), jnp.float32)
    shape = x.shape                      # forward(x, shape) with shape == x.shape

    params = init_params(k_p)
    forward = make_forward(params, shape)
    out = jax.block_until_ready(forward(x))

    assert out.shape == (B, 2 * C_IN, DEFAULT_SHAPE, DEFAULT_SHAPE), out.shape
    assert bool(jnp.all(jnp.isfinite(out)))

    ref = jax.block_until_ready(reference_forward(x, shape, params))
    # Tolerance leaves headroom for MXU matmul rounding vs the HIGHEST-precision
    # XLA reference; a wrong tap/roll/mask would produce O(1) errors.
    assert bool(jnp.allclose(out, ref, rtol=3e-2, atol=1e-1)), float(
        jnp.max(jnp.abs(out - ref)))

    print("KERNEL_OK")
</pallas_src>

<mosaic_0001>
module attributes {stable_mosaic.version = 11 : i64} {
  func.func @_fused_forward_kernel(%arg0: memref<1x512xf32, #tpu.memory_space<vmem>>, %arg1: memref<9x32x1xf32, #tpu.memory_space<vmem>>, %arg2: memref<32x1xf32, #tpu.memory_space<vmem>>, %arg3: memref<9x32x32xf32, #tpu.memory_space<vmem>>, %arg4: memref<32x1xf32, #tpu.memory_space<vmem>>, %arg5: memref<9x2x32xf32, #tpu.memory_space<vmem>>, %arg6: memref<2x1xf32, #tpu.memory_space<vmem>>, %arg7: memref<512x128xf32, #tpu.memory_space<vmem>>, %arg8: memref<1x128xf32, #tpu.memory_space<vmem>>, %arg9: memref<128x128xf32, #tpu.memory_space<vmem>>, %arg10: memref<1x128xf32, #tpu.memory_space<vmem>>, %arg11: memref<128x512xf32, #tpu.memory_space<vmem>>, %arg12: memref<1x512xf32, #tpu.memory_space<vmem>>, %arg13: memref<2x512xf32, #tpu.memory_space<vmem>>) attributes {dimension_semantics = [], scalar_prefetch = 0 : i64, scratch_operands = 0 : i64, tpu.core_type = #tpu.core_type<tc>} {
    %c0 = arith.constant 0 : index
    %c0_0 = arith.constant 0 : index
    %0 = vector.load %arg0[%c0, %c0_0] : memref<1x512xf32, #tpu.memory_space<vmem>>, vector<1x512xf32>
    %c0_1 = arith.constant 0 : index
    %c0_2 = arith.constant 0 : index
    %c0_3 = arith.constant 0 : index
    %1 = vector.load %arg1[%c0_1, %c0_2, %c0_3] : memref<9x32x1xf32, #tpu.memory_space<vmem>>, vector<1x32x1xf32>
    %2 = vector.shape_cast %1 : vector<1x32x1xf32> to vector<32x1xf32>
    %c17_i32 = arith.constant 17 : i32
    %3 = tpu.dynamic_rotate %0 by %c17_i32 dim 1 : vector<1x512xf32>, i32 -> vector<1x512xf32>
    %4 = tpu.iota {dimensions = array<i32: 1>} : vector<1x512xi32>
    %c15_i32 = arith.constant 15 : i32
    %5 = vector.broadcast %c15_i32 : i32 to vector<1x512xi32>
    %6 = arith.andi %4, %5 : vector<1x512xi32>
    %c4_i32 = arith.constant 4 : i32
    %7 = vector.broadcast %c4_i32 : i32 to vector<1x512xi32>
    %8 = arith.shrsi %4, %7 : vector<1x512xi32>
    %c15_i32_4 = arith.constant 15 : i32
    %9 = vector.broadcast %c15_i32_4 : i32 to vector<1x512xi32>
    %10 = arith.andi %8, %9 : vector<1x512xi32>
    %c1_i32 = arith.constant 1 : i32
    %11 = vector.broadcast %c1_i32 : i32 to vector<1x512xi32>
    %12 = arith.cmpi sge, %6, %11 : vector<1x512xi32>
    %c1_i32_5 = arith.constant 1 : i32
    %13 = vector.broadcast %c1_i32_5 : i32 to vector<1x512xi32>
    %14 = arith.cmpi sge, %10, %13 : vector<1x512xi32>
    %15 = arith.andi %12, %14 : vector<1x512xi1>
    %cst = arith.constant 0.000000e+00 : f32
    %16 = vector.broadcast %cst : f32 to vector<1x512xf32>
    %17 = arith.select %15, %3, %16 : vector<1x512xi1>, vector<1x512xf32>
    %18 = vector.broadcast %2 : vector<32x1xf32> to vector<32x512xf32>
    %19 = vector.broadcast %17 : vector<1x512xf32> to vector<32x512xf32>
    %20 = arith.mulf %18, %19 : vector<32x512xf32>
    %c1 = arith.constant 1 : index
    %c0_6 = arith.constant 0 : index
    %c0_7 = arith.constant 0 : index
    %21 = vector.load %arg1[%c1, %c0_6, %c0_7] : memref<9x32x1xf32, #tpu.memory_space<vmem>>, vector<1x32x1xf32>
    %22 = vector.shape_cast %21 : vector<1x32x1xf32> to vector<32x1xf32>
    %c16_i32 = arith.constant 16 : i32
    %23 = tpu.dynamic_rotate %0 by %c16_i32 dim 1 : vector<1x512xf32>, i32 -> vector<1x512xf32>
    %24 = tpu.iota {dimensions = array<i32: 1>} : vector<1x512xi32>
    %c4_i32_8 = arith.constant 4 : i32
    %25 = vector.broadcast %c4_i32_8 : i32 to vector<1x512xi32>
    %26 = arith.shrsi %24, %25 : vector<1x512xi32>
    %c15_i32_9 = arith.constant 15 : i32
    %27 = vector.broadcast %c15_i32_9 : i32 to vector<1x512xi32>
    %28 = arith.andi %26, %27 : vector<1x512xi32>
    %c1_i32_10 = arith.constant 1 : i32
    %29 = vector.broadcast %c1_i32_10 : i32 to vector<1x512xi32>
    %30 = arith.cmpi sge, %28, %29 : vector<1x512xi32>
    %cst_11 = arith.constant 0.000000e+00 : f32
    %31 = vector.broadcast %cst_11 : f32 to vector<1x512xf32>
    %32 = arith.select %30, %23, %31 : vector<1x512xi1>, vector<1x512xf32>
    %33 = vector.broadcast %22 : vector<32x1xf32> to vector<32x512xf32>
    %34 = vector.broadcast %32 : vector<1x512xf32> to vector<32x512xf32>
    %35 = arith.mulf %33, %34 : vector<32x512xf32>
    %36 = arith.addf %20, %35 : vector<32x512xf32>
    %c2 = arith.constant 2 : index
    %c0_12 = arith.constant 0 : index
    %c0_13 = arith.constant 0 : index
    %37 = vector.load %arg1[%c2, %c0_12, %c0_13] : memref<9x32x1xf32, #tpu.memory_space<vmem>>, vector<1x32x1xf32>
    %38 = vector.shape_cast %37 : vector<1x32x1xf32> to vector<32x1xf32>
    %c15_i32_14 = arith.constant 15 : i32
    %39 = tpu.dynamic_rotate %0 by %c15_i32_14 dim 1 : vector<1x512xf32>, i32 -> vector<1x512xf32>
    %40 = tpu.iota {dimensions = array<i32: 1>} : vector<1x512xi32>
    %c15_i32_15 = arith.constant 15 : i32
    %41 = vector.broadcast %c15_i32_15 : i32 to vector<1x512xi32>
    %42 = arith.andi %40, %41 : vector<1x512xi32>
    %c4_i32_16 = arith.constant 4 : i32
    %43 = vector.broadcast %c4_i32_16 : i32 to vector<1x512xi32>
    %44 = arith.shrsi %40, %43 : vector<1x512xi32>
    %c15_i32_17 = arith.constant 15 : i32
    %45 = vector.broadcast %c15_i32_17 : i32 to vector<1x512xi32>
    %46 = arith.andi %44, %45 : vector<1x512xi32>
    %c15_i32_18 = arith.constant 15 : i32
    %47 = vector.broadcast %c15_i32_18 : i32 to vector<1x512xi32>
    %48 = arith.cmpi slt, %42, %47 : vector<1x512xi32>
    %c1_i32_19 = arith.constant 1 : i32
    %49 = vector.broadcast %c1_i32_19 : i32 to vector<1x512xi32>
    %50 = arith.cmpi sge, %46, %49 : vector<1x512xi32>
    %51 = arith.andi %48, %50 : vector<1x512xi1>
    %cst_20 = arith.constant 0.000000e+00 : f32
    %52 = vector.broadcast %cst_20 : f32 to vector<1x512xf32>
    %53 = arith.select %51, %39, %52 : vector<1x512xi1>, vector<1x512xf32>
    %54 = vector.broadcast %38 : vector<32x1xf32> to vector<32x512xf32>
    %55 = vector.broadcast %53 : vector<1x512xf32> to vector<32x512xf32>
    %56 = arith.mulf %54, %55 : vector<32x512xf32>
    %57 = arith.addf %36, %56 : vector<32x512xf32>
    %c3 = arith.constant 3 : index
    %c0_21 = arith.constant 0 : index
    %c0_22 = arith.constant 0 : index
    %58 = vector.load %arg1[%c3, %c0_21, %c0_22] : memref<9x32x1xf32, #tpu.memory_space<vmem>>, vector<1x32x1xf32>
    %59 = vector.shape_cast %58 : vector<1x32x1xf32> to vector<32x1xf32>
    %c1_i32_23 = arith.constant 1 : i32
    %60 = tpu.dynamic_rotate %0 by %c1_i32_23 dim 1 : vector<1x512xf32>, i32 -> vector<1x512xf32>
    %61 = tpu.iota {dimensions = array<i32: 1>} : vector<1x512xi32>
    %c15_i32_24 = arith.constant 15 : i32
    %62 = vector.broadcast %c15_i32_24 : i32 to vector<1x512xi32>
    %63 = arith.andi %61, %62 : vector<1x512xi32>
    %c1_i32_25 = arith.constant 1 : i32
    %64 = vector.broadcast %c1_i32_25 : i32 to vector<1x512xi32>
    %65 = arith.cmpi sge, %63, %64 : vector<1x512xi32>
    %cst_26 = arith.constant 0.000000e+00 : f32
    %66 = vector.broadcast %cst_26 : f32 to vector<1x512xf32>
    %67 = arith.select %65, %60, %66 : vector<1x512xi1>, vector<1x512xf32>
    %68 = vector.broadcast %59 : vector<32x1xf32> to vector<32x512xf32>
    %69 = vector.broadcast %67 : vector<1x512xf32> to vector<32x512xf32>
    %70 = arith.mulf %68, %69 : vector<32x512xf32>
    %71 = arith.addf %57, %70 : vector<32x512xf32>
    %c4 = arith.constant 4 : index
    %c0_27 = arith.constant 0 : index
    %c0_28 = arith.constant 0 : index
    %72 = vector.load %arg1[%c4, %c0_27, %c0_28] : memref<9x32x1xf32, #tpu.memory_space<vmem>>, vector<1x32x1xf32>
    %73 = vector.shape_cast %72 : vector<1x32x1xf32> to vector<32x1xf32>
    %74 = vector.broadcast %73 : vector<32x1xf32> to vector<32x512xf32>
    %75 = vector.broadcast %0 : vector<1x512xf32> to vector<32x512xf32>
    %76 = arith.mulf %74, %75 : vector<32x512xf32>
    %77 = arith.addf %71, %76 : vector<32x512xf32>
    %c5 = arith.constant 5 : index
    %c0_29 = arith.constant 0 : index
    %c0_30 = arith.constant 0 : index
    %78 = vector.load %arg1[%c5, %c0_29, %c0_30] : memref<9x32x1xf32, #tpu.memory_space<vmem>>, vector<1x32x1xf32>
    %79 = vector.shape_cast %78 : vector<1x32x1xf32> to vector<32x1xf32>
    %c511_i32 = arith.constant 511 : i32
    %80 = tpu.dynamic_rotate %0 by %c511_i32 dim 1 : vector<1x512xf32>, i32 -> vector<1x512xf32>
    %81 = tpu.iota {dimensions = array<i32: 1>} : vector<1x512xi32>
    %c15_i32_31 = arith.constant 15 : i32
    %82 = vector.broadcast %c15_i32_31 : i32 to vector<1x512xi32>
    %83 = arith.andi %81, %82 : vector<1x512xi32>
    %c15_i32_32 = arith.constant 15 : i32
    %84 = vector.broadcast %c15_i32_32 : i32 to vector<1x512xi32>
    %85 = arith.cmpi slt, %83, %84 : vector<1x512xi32>
    %cst_33 = arith.constant 0.000000e+00 : f32
    %86 = vector.broadcast %cst_33 : f32 to vector<1x512xf32>
    %87 = arith.select %85, %80, %86 : vector<1x512xi1>, vector<1x512xf32>
    %88 = vector.broadcast %79 : vector<32x1xf32> to vector<32x512xf32>
    %89 = vector.broadcast %87 : vector<1x512xf32> to vector<32x512xf32>
    %90 = arith.mulf %88, %89 : vector<32x512xf32>
    %91 = arith.addf %77, %90 : vector<32x512xf32>
    %c6 = arith.constant 6 : index
    %c0_34 = arith.constant 0 : index
    %c0_35 = arith.constant 0 : index
    %92 = vector.load %arg1[%c6, %c0_34, %c0_35] : memref<9x32x1xf32, #tpu.memory_space<vmem>>, vector<1x32x1xf32>
    %93 = vector.shape_cast %92 : vector<1x32x1xf32> to vector<32x1xf32>
    %c497_i32 = arith.constant 497 : i32
    %94 = tpu.dynamic_rotate %0 by %c497_i32 dim 1 : vector<1x512xf32>, i32 -> vector<1x512xf32>
    %95 = tpu.iota {dimensions = array<i32: 1>} : vector<1x512xi32>
    %c15_i32_36 = arith.constant 15 : i32
    %96 = vector.broadcast %c15_i32_36 : i32 to vector<1x512xi32>
    %97 = arith.andi %95, %96 : vector<1x512xi32>
    %c4_i32_37 = arith.constant 4 : i32
    %98 = vector.broadcast %c4_i32_37 : i32 to vector<1x512xi32>
    %99 = arith.shrsi %95, %98 : vector<1x512xi32>
    %c15_i32_38 = arith.constant 15 : i32
    %100 = vector.broadcast %c15_i32_38 : i32 to vector<1x512xi32>
    %101 = arith.andi %99, %100 : vector<1x512xi32>
    %c1_i32_39 = arith.constant 1 : i32
    %102 = vector.broadcast %c1_i32_39 : i32 to vector<1x512xi32>
    %103 = arith.cmpi sge, %97, %102 : vector<1x512xi32>
    %c15_i32_40 = arith.constant 15 : i32
    %104 = vector.broadcast %c15_i32_40 : i32 to vector<1x512xi32>
    %105 = arith.cmpi slt, %101, %104 : vector<1x512xi32>
    %106 = arith.andi %103, %105 : vector<1x512xi1>
    %cst_41 = arith.constant 0.000000e+00 : f32
    %107 = vector.broadcast %cst_41 : f32 to vector<1x512xf32>
    %108 = arith.select %106, %94, %107 : vector<1x512xi1>, vector<1x512xf32>
    %109 = vector.broadcast %93 : vector<32x1xf32> to vector<32x512xf32>
    %110 = vector.broadcast %108 : vector<1x512xf32> to vector<32x512xf32>
    %111 = arith.mulf %109, %110 : vector<32x512xf32>
    %112 = arith.addf %91, %111 : vector<32x512xf32>
    %c7 = arith.constant 7 : index
    %c0_42 = arith.constant 0 : index
    %c0_43 = arith.constant 0 : index
    %113 = vector.load %arg1[%c7, %c0_42, %c0_43] : memref<9x32x1xf32, #tpu.memory_space<vmem>>, vector<1x32x1xf32>
    %114 = vector.shape_cast %113 : vector<1x32x1xf32> to vector<32x1xf32>
    %c496_i32 = arith.constant 496 : i32
    %115 = tpu.dynamic_rotate %0 by %c496_i32 dim 1 : vector<1x512xf32>, i32 -> vector<1x512xf32>
    %116 = tpu.iota {dimensions = array<i32: 1>} : vector<1x512xi32>
    %c4_i32_44 = arith.constant 4 : i32
    %117 = vector.broadcast %c4_i32_44 : i32 to vector<1x512xi32>
    %118 = arith.shrsi %116, %117 : vector<1x512xi32>
    %c15_i32_45 = arith.constant 15 : i32
    %119 = vector.broadcast %c15_i32_45 : i32 to vector<1x512xi32>
    %120 = arith.andi %118, %119 : vector<1x512xi32>
    %c15_i32_46 = arith.constant 15 : i32
    %121 = vector.broadcast %c15_i32_46 : i32 to vector<1x512xi32>
    %122 = arith.cmpi slt, %120, %121 : vector<1x512xi32>
    %cst_47 = arith.constant 0.000000e+00 : f32
    %123 = vector.broadcast %cst_47 : f32 to vector<1x512xf32>
    %124 = arith.select %122, %115, %123 : vector<1x512xi1>, vector<1x512xf32>
    %125 = vector.broadcast %114 : vector<32x1xf32> to vector<32x512xf32>
    %126 = vector.broadcast %124 : vector<1x512xf32> to vector<32x512xf32>
    %127 = arith.mulf %125, %126 : vector<32x512xf32>
    %128 = arith.addf %112, %127 : vector<32x512xf32>
    %c8 = arith.constant 8 : index
    %c0_48 = arith.constant 0 : index
    %c0_49 = arith.constant 0 : index
    %129 = vector.load %arg1[%c8, %c0_48, %c0_49] : memref<9x32x1xf32, #tpu.memory_space<vmem>>, vector<1x32x1xf32>
    %130 = vector.shape_cast %129 : vector<1x32x1xf32> to vector<32x1xf32>
    %c495_i32 = arith.constant 495 : i32
    %131 = tpu.dynamic_rotate %0 by %c495_i32 dim 1 : vector<1x512xf32>, i32 -> vector<1x512xf32>
    %132 = tpu.iota {dimensions = array<i32: 1>} : vector<1x512xi32>
    %c15_i32_50 = arith.constant 15 : i32
    %133 = vector.broadcast %c15_i32_50 : i32 to vector<1x512xi32>
    %134 = arith.andi %132, %133 : vector<1x512xi32>
    %c4_i32_51 = arith.constant 4 : i32
    %135 = vector.broadcast %c4_i32_51 : i32 to vector<1x512xi32>
    %136 = arith.shrsi %132, %135 : vector<1x512xi32>
    %c15_i32_52 = arith.constant 15 : i32
    %137 = vector.broadcast %c15_i32_52 : i32 to vector<1x512xi32>
    %138 = arith.andi %136, %137 : vector<1x512xi32>
    %c15_i32_53 = arith.constant 15 : i32
    %139 = vector.broadcast %c15_i32_53 : i32 to vector<1x512xi32>
    %140 = arith.cmpi slt, %134, %139 : vector<1x512xi32>
    %c15_i32_54 = arith.constant 15 : i32
    %141 = vector.broadcast %c15_i32_54 : i32 to vector<1x512xi32>
    %142 = arith.cmpi slt, %138, %141 : vector<1x512xi32>
    %143 = arith.andi %140, %142 : vector<1x512xi1>
    %cst_55 = arith.constant 0.000000e+00 : f32
    %144 = vector.broadcast %cst_55 : f32 to vector<1x512xf32>
    %145 = arith.select %143, %131, %144 : vector<1x512xi1>, vector<1x512xf32>
    %146 = vector.broadcast %130 : vector<32x1xf32> to vector<32x512xf32>
    %147 = vector.broadcast %145 : vector<1x512xf32> to vector<32x512xf32>
    %148 = arith.mulf %146, %147 : vector<32x512xf32>
    %149 = arith.addf %128, %148 : vector<32x512xf32>
    %c0_56 = arith.constant 0 : index
    %c0_57 = arith.constant 0 : index
    %150 = vector.load %arg2[%c0_56, %c0_57] : memref<32x1xf32, #tpu.memory_space<vmem>>, vector<32x1xf32>
    %151 = vector.broadcast %150 : vector<32x1xf32> to vector<32x512xf32>
    %152 = arith.addf %149, %151 : vector<32x512xf32>
    %cst_58 = arith.constant 2.000000e+01 : f32
    %153 = vector.broadcast %cst_58 : f32 to vector<32x512xf32>
    %154 = arith.cmpf ogt, %152, %153 : vector<32x512xf32>
    %cst_59 = arith.constant 2.000000e+01 : f32
    %155 = vector.broadcast %cst_59 : f32 to vector<32x512xf32>
    %156 = arith.minimumf %152, %155 : vector<32x512xf32>
    %157 = math.exp %156 : vector<32x512xf32>
    %cst_60 = arith.constant 1.000000e+00 : f32
    %158 = vector.broadcast %cst_60 : f32 to vector<32x512xf32>
    %159 = arith.addf %158, %157 : vector<32x512xf32>
    %160 = math.log %159 : vector<32x512xf32>
    %161 = arith.select %154, %152, %160 : vector<32x512xi1>, vector<32x512xf32>
    %cst_61 = arith.constant dense<0.000000e+00> : vector<32xf32>
    %162 = vector.multi_reduction <add>, %161, %cst_61 [1] : vector<32x512xf32> to vector<32xf32>
    %163 = vector.shape_cast %162 : vector<32xf32> to vector<32x1xf32>
    %cst_62 = arith.constant 0.001953125 : f32
    %164 = vector.broadcast %cst_62 : f32 to vector<32x1xf32>
    %165 = arith.mulf %163, %164 : vector<32x1xf32>
    %166 = arith.mulf %161, %161 : vector<32x512xf32>
    %cst_63 = arith.constant dense<0.000000e+00> : vector<32xf32>
    %167 = vector.multi_reduction <add>, %166, %cst_63 [1] : vector<32x512xf32> to vector<32xf32>
    %168 = vector.shape_cast %167 : vector<32xf32> to vector<32x1xf32>
    %cst_64 = arith.constant 0.001953125 : f32
    %169 = vector.broadcast %cst_64 : f32 to vector<32x1xf32>
    %170 = arith.mulf %168, %169 : vector<32x1xf32>
    %171 = arith.mulf %165, %165 : vector<32x1xf32>
    %172 = arith.subf %170, %171 : vector<32x1xf32>
    %cst_65 = arith.constant 0.000000e+00 : f32
    %173 = vector.broadcast %cst_65 : f32 to vector<32x1xf32>
    %174 = arith.maximumf %172, %173 : vector<32x1xf32>
    %175 = vector.broadcast %165 : vector<32x1xf32> to vector<32x512xf32>
    %176 = arith.subf %161, %175 : vector<32x512xf32>
    %cst_66 = arith.constant 9.99999974E-6 : f32
    %177 = vector.broadcast %cst_66 : f32 to vector<32x1xf32>
    %178 = arith.addf %174, %177 : vector<32x1xf32>
    %179 = math.rsqrt %178 : vector<32x1xf32>
    %180 = vector.broadcast %179 : vector<32x1xf32> to vector<32x512xf32>
    %181 = arith.mulf %176, %180 : vector<32x512xf32>
    %c4_67 = arith.constant 4 : index
    %c0_68 = arith.constant 0 : index
    %c0_69 = arith.constant 0 : index
    %182 = vector.load %arg3[%c4_67, %c0_68, %c0_69] : memref<9x32x32xf32, #tpu.memory_space<vmem>>, vector<1x32x32xf32>
    %183 = vector.shape_cast %182 : vector<1x32x32xf32> to vector<32x32xf32>
    %cst_70 = arith.constant dense<0.000000e+00> : vector<32x512xf32>
    %184 = tpu.matmul %183, %181, %cst_70 {dimension_numbers = #tpu.dot_dimension_numbers<[1], [0], [0], [1], [0, 0, 1, 1], [], []>} : vector<32x32xf32>, vector<32x512xf32>, vector<32x512xf32> -> vector<32x512xf32>
    %c17_i32_71 = arith.constant 17 : i32
    %185 = tpu.dynamic_rotate %181 by %c17_i32_71 dim 1 : vector<32x512xf32>, i32 -> vector<32x512xf32>
    %186 = tpu.iota {dimensions = array<i32: 1>} : vector<1x512xi32>
    %c15_i32_72 = arith.constant 15 : i32
    %187 = vector.broadcast %c15_i32_72 : i32 to vector<1x512xi32>
    %188 = arith.andi %186, %187 : vector<1x512xi32>
    %c4_i32_73 = arith.constant 4 : i32
    %189 = vector.broadcast %c4_i32_73 : i32 to vector<1x512xi32>
    %190 = arith.shrsi %186, %189 : vector<1x512xi32>
    %c15_i32_74 = arith.constant 15 : i32
    %191 = vector.broadcast %c15_i32_74 : i32 to vector<1x512xi32>
    %192 = arith.andi %190, %191 : vector<1x512xi32>
    %c1_i32_75 = arith.constant 1 : i32
    %193 = vector.broadcast %c1_i32_75 : i32 to vector<1x512xi32>
    %194 = arith.cmpi sge, %188, %193 : vector<1x512xi32>
    %c1_i32_76 = arith.constant 1 : i32
    %195 = vector.broadcast %c1_i32_76 : i32 to vector<1x512xi32>
    %196 = arith.cmpi sge, %192, %195 : vector<1x512xi32>
    %197 = arith.andi %194, %196 : vector<1x512xi1>
    %cst_77 = arith.constant 0.000000e+00 : f32
    %198 = vector.shape_cast %197 : vector<1x512xi1> to vector<1x512xi1>
    %199 = vector.broadcast %198 : vector<1x512xi1> to vector<32x512xi1>
    %200 = vector.broadcast %cst_77 : f32 to vector<32x512xf32>
    %201 = arith.select %199, %185, %200 : vector<32x512xi1>, vector<32x512xf32>
    %c0_78 = arith.constant 0 : index
    %c0_79 = arith.constant 0 : index
    %c0_80 = arith.constant 0 : index
    %202 = vector.load %arg3[%c0_78, %c0_79, %c0_80] : memref<9x32x32xf32, #tpu.memory_space<vmem>>, vector<1x32x32xf32>
    %203 = vector.shape_cast %202 : vector<1x32x32xf32> to vector<32x32xf32>
    %cst_81 = arith.constant dense<0.000000e+00> : vector<32x512xf32>
    %204 = tpu.matmul %203, %201, %cst_81 {dimension_numbers = #tpu.dot_dimension_numbers<[1], [0], [0], [1], [0, 0, 1, 1], [], []>} : vector<32x32xf32>, vector<32x512xf32>, vector<32x512xf32> -> vector<32x512xf32>
    %205 = arith.addf %184, %204 : vector<32x512xf32>
    %c16_i32_82 = arith.constant 16 : i32
    %206 = tpu.dynamic_rotate %181 by %c16_i32_82 dim 1 : vector<32x512xf32>, i32 -> vector<32x512xf32>
    %207 = tpu.iota {dimensions = array<i32: 1>} : vector<1x512xi32>
    %c4_i32_83 = arith.constant 4 : i32
    %208 = vector.broadcast %c4_i32_83 : i32 to vector<1x512xi32>
    %209 = arith.shrsi %207, %208 : vector<1x512xi32>
    %c15_i32_84 = arith.constant 15 : i32
    %210 = vector.broadcast %c15_i32_84 : i32 to vector<1x512xi32>
    %211 = arith.andi %209, %210 : vector<1x512xi32>
    %c1_i32_85 = arith.constant 1 : i32
    %212 = vector.broadcast %c1_i32_85 : i32 to vector<1x512xi32>
    %213 = arith.cmpi sge, %211, %212 : vector<1x512xi32>
    %cst_86 = arith.constant 0.000000e+00 : f32
    %214 = vector.shape_cast %213 : vector<1x512xi1> to vector<1x512xi1>
    %215 = vector.broadcast %214 : vector<1x512xi1> to vector<32x512xi1>
    %216 = vector.broadcast %cst_86 : f32 to vector<32x512xf32>
    %217 = arith.select %215, %206, %216 : vector<32x512xi1>, vector<32x512xf32>
    %c1_87 = arith.constant 1 : index
    %c0_88 = arith.constant 0 : index
    %c0_89 = arith.constant 0 : index
    %218 = vector.load %arg3[%c1_87, %c0_88, %c0_89] : memref<9x32x32xf32, #tpu.memory_space<vmem>>, vector<1x32x32xf32>
    %219 = vector.shape_cast %218 : vector<1x32x32xf32> to vector<32x32xf32>
    %cst_90 = arith.constant dense<0.000000e+00> : vector<32x512xf32>
    %220 = tpu.matmul %219, %217, %cst_90 {dimension_numbers = #tpu.dot_dimension_numbers<[1], [0], [0], [1], [0, 0, 1, 1], [], []>} : vector<32x32xf32>, vector<32x512xf32>, vector<32x512xf32> -> vector<32x512xf32>
    %221 = arith.addf %205, %220 : vector<32x512xf32>
    %c15_i32_91 = arith.constant 15 : i32
    %222 = tpu.dynamic_rotate %181 by %c15_i32_91 dim 1 : vector<32x512xf32>, i32 -> vector<32x512xf32>
    %223 = tpu.iota {dimensions = array<i32: 1>} : vector<1x512xi32>
    %c15_i32_92 = arith.constant 15 : i32
    %224 = vector.broadcast %c15_i32_92 : i32 to vector<1x512xi32>
    %225 = arith.andi %223, %224 : vector<1x512xi32>
    %c4_i32_93 = arith.constant 4 : i32
    %226 = vector.broadcast %c4_i32_93 : i32 to vector<1x512xi32>
    %227 = arith.shrsi %223, %226 : vector<1x512xi32>
    %c15_i32_94 = arith.constant 15 : i32
    %228 = vector.broadcast %c15_i32_94 : i32 to vector<1x512xi32>
    %229 = arith.andi %227, %228 : vector<1x512xi32>
    %c15_i32_95 = arith.constant 15 : i32
    %230 = vector.broadcast %c15_i32_95 : i32 to vector<1x512xi32>
    %231 = arith.cmpi slt, %225, %230 : vector<1x512xi32>
    %c1_i32_96 = arith.constant 1 : i32
    %232 = vector.broadcast %c1_i32_96 : i32 to vector<1x512xi32>
    %233 = arith.cmpi sge, %229, %232 : vector<1x512xi32>
    %234 = arith.andi %231, %233 : vector<1x512xi1>
    %cst_97 = arith.constant 0.000000e+00 : f32
    %235 = vector.shape_cast %234 : vector<1x512xi1> to vector<1x512xi1>
    %236 = vector.broadcast %235 : vector<1x512xi1> to vector<32x512xi1>
    %237 = vector.broadcast %cst_97 : f32 to vector<32x512xf32>
    %238 = arith.select %236, %222, %237 : vector<32x512xi1>, vector<32x512xf32>
    %c2_98 = arith.constant 2 : index
    %c0_99 = arith.constant 0 : index
    %c0_100 = arith.constant 0 : index
    %239 = vector.load %arg3[%c2_98, %c0_99, %c0_100] : memref<9x32x32xf32, #tpu.memory_space<vmem>>, vector<1x32x32xf32>
    %240 = vector.shape_cast %239 : vector<1x32x32xf32> to vector<32x32xf32>
    %cst_101 = arith.constant dense<0.000000e+00> : vector<32x512xf32>
    %241 = tpu.matmul %240, %238, %cst_101 {dimension_numbers = #tpu.dot_dimension_numbers<[1], [0], [0], [1], [0, 0, 1, 1], [], []>} : vector<32x32xf32>, vector<32x512xf32>, vector<32x512xf32> -> vector<32x512xf32>
    %242 = arith.addf %221, %241 : vector<32x512xf32>
    %c1_i32_102 = arith.constant 1 : i32
    %243 = tpu.dynamic_rotate %181 by %c1_i32_102 dim 1 : vector<32x512xf32>, i32 -> vector<32x512xf32>
    %244 = tpu.iota {dimensions = array<i32: 1>} : vector<1x512xi32>
    %c15_i32_103 = arith.constant 15 : i32
    %245 = vector.broadcast %c15_i32_103 : i32 to vector<1x512xi32>
    %246 = arith.andi %244, %245 : vector<1x512xi32>
    %c1_i32_104 = arith.constant 1 : i32
    %247 = vector.broadcast %c1_i32_104 : i32 to vector<1x512xi32>
    %248 = arith.cmpi sge, %246, %247 : vector<1x512xi32>
    %cst_105 = arith.constant 0.000000e+00 : f32
    %249 = vector.shape_cast %248 : vector<1x512xi1> to vector<1x512xi1>
    %250 = vector.broadcast %249 : vector<1x512xi1> to vector<32x512xi1>
    %251 = vector.broadcast %cst_105 : f32 to vector<32x512xf32>
    %252 = arith.select %250, %243, %251 : vector<32x512xi1>, vector<32x512xf32>
    %c3_106 = arith.constant 3 : index
    %c0_107 = arith.constant 0 : index
    %c0_108 = arith.constant 0 : index
    %253 = vector.load %arg3[%c3_106, %c0_107, %c0_108] : memref<9x32x32xf32, #tpu.memory_space<vmem>>, vector<1x32x32xf32>
    %254 = vector.shape_cast %253 : vector<1x32x32xf32> to vector<32x32xf32>
    %cst_109 = arith.constant dense<0.000000e+00> : vector<32x512xf32>
    %255 = tpu.matmul %254, %252, %cst_109 {dimension_numbers = #tpu.dot_dimension_numbers<[1], [0], [0], [1], [0, 0, 1, 1], [], []>} : vector<32x32xf32>, vector<32x512xf32>, vector<32x512xf32> -> vector<32x512xf32>
    %256 = arith.addf %242, %255 : vector<32x512xf32>
    %c511_i32_110 = arith.constant 511 : i32
    %257 = tpu.dynamic_rotate %181 by %c511_i32_110 dim 1 : vector<32x512xf32>, i32 -> vector<32x512xf32>
    %258 = tpu.iota {dimensions = array<i32: 1>} : vector<1x512xi32>
    %c15_i32_111 = arith.constant 15 : i32
    %259 = vector.broadcast %c15_i32_111 : i32 to vector<1x512xi32>
    %260 = arith.andi %258, %259 : vector<1x512xi32>
    %c15_i32_112 = arith.constant 15 : i32
    %261 = vector.broadcast %c15_i32_112 : i32 to vector<1x512xi32>
    %262 = arith.cmpi slt, %260, %261 : vector<1x512xi32>
    %cst_113 = arith.constant 0.000000e+00 : f32
    %263 = vector.shape_cast %262 : vector<1x512xi1> to vector<1x512xi1>
    %264 = vector.broadcast %263 : vector<1x512xi1> to vector<32x512xi1>
    %265 = vector.broadcast %cst_113 : f32 to vector<32x512xf32>
    %266 = arith.select %264, %257, %265 : vector<32x512xi1>, vector<32x512xf32>
    %c5_114 = arith.constant 5 : index
    %c0_115 = arith.constant 0 : index
    %c0_116 = arith.constant 0 : index
    %267 = vector.load %arg3[%c5_114, %c0_115, %c0_116] : memref<9x32x32xf32, #tpu.memory_space<vmem>>, vector<1x32x32xf32>
    %268 = vector.shape_cast %267 : vector<1x32x32xf32> to vector<32x32xf32>
    %cst_117 = arith.constant dense<0.000000e+00> : vector<32x512xf32>
    %269 = tpu.matmul %268, %266, %cst_117 {dimension_numbers = #tpu.dot_dimension_numbers<[1], [0], [0], [1], [0, 0, 1, 1], [], []>} : vector<32x32xf32>, vector<32x512xf32>, vector<32x512xf32> -> vector<32x512xf32>
    %270 = arith.addf %256, %269 : vector<32x512xf32>
    %c497_i32_118 = arith.constant 497 : i32
    %271 = tpu.dynamic_rotate %181 by %c497_i32_118 dim 1 : vector<32x512xf32>, i32 -> vector<32x512xf32>
    %272 = tpu.iota {dimensions = array<i32: 1>} : vector<1x512xi32>
    %c15_i32_119 = arith.constant 15 : i32
    %273 = vector.broadcast %c15_i32_119 : i32 to vector<1x512xi32>
    %274 = arith.andi %272, %273 : vector<1x512xi32>
    %c4_i32_120 = arith.constant 4 : i32
    %275 = vector.broadcast %c4_i32_120 : i32 to vector<1x512xi32>
    %276 = arith.shrsi %272, %275 : vector<1x512xi32>
    %c15_i32_121 = arith.constant 15 : i32
    %277 = vector.broadcast %c15_i32_121 : i32 to vector<1x512xi32>
    %278 = arith.andi %276, %277 : vector<1x512xi32>
    %c1_i32_122 = arith.constant 1 : i32
    %279 = vector.broadcast %c1_i32_122 : i32 to vector<1x512xi32>
    %280 = arith.cmpi sge, %274, %279 : vector<1x512xi32>
    %c15_i32_123 = arith.constant 15 : i32
    %281 = vector.broadcast %c15_i32_123 : i32 to vector<1x512xi32>
    %282 = arith.cmpi slt, %278, %281 : vector<1x512xi32>
    %283 = arith.andi %280, %282 : vector<1x512xi1>
    %cst_124 = arith.constant 0.000000e+00 : f32
    %284 = vector.shape_cast %283 : vector<1x512xi1> to vector<1x512xi1>
    %285 = vector.broadcast %284 : vector<1x512xi1> to vector<32x512xi1>
    %286 = vector.broadcast %cst_124 : f32 to vector<32x512xf32>
    %287 = arith.select %285, %271, %286 : vector<32x512xi1>, vector<32x512xf32>
    %c6_125 = arith.constant 6 : index
    %c0_126 = arith.constant 0 : index
    %c0_127 = arith.constant 0 : index
    %288 = vector.load %arg3[%c6_125, %c0_126, %c0_127] : memref<9x32x32xf32, #tpu.memory_space<vmem>>, vector<1x32x32xf32>
    %289 = vector.shape_cast %288 : vector<1x32x32xf32> to vector<32x32xf32>
    %cst_128 = arith.constant dense<0.000000e+00> : vector<32x512xf32>
    %290 = tpu.matmul %289, %287, %cst_128 {dimension_numbers = #tpu.dot_dimension_numbers<[1], [0], [0], [1], [0, 0, 1, 1], [], []>} : vector<32x32xf32>, vector<32x512xf32>, vector<32x512xf32> -> vector<32x512xf32>
    %291 = arith.addf %270, %290 : vector<32x512xf32>
    %c496_i32_129 = arith.constant 496 : i32
    %292 = tpu.dynamic_rotate %181 by %c496_i32_129 dim 1 : vector<32x512xf32>, i32 -> vector<32x512xf32>
    %293 = tpu.iota {dimensions = array<i32: 1>} : vector<1x512xi32>
    %c4_i32_130 = arith.constant 4 : i32
    %294 = vector.broadcast %c4_i32_130 : i32 to vector<1x512xi32>
    %295 = arith.shrsi %293, %294 : vector<1x512xi32>
    %c15_i32_131 = arith.constant 15 : i32
    %296 = vector.broadcast %c15_i32_131 : i32 to vector<1x512xi32>
    %297 = arith.andi %295, %296 : vector<1x512xi32>
    %c15_i32_132 = arith.constant 15 : i32
    %298 = vector.broadcast %c15_i32_132 : i32 to vector<1x512xi32>
    %299 = arith.cmpi slt, %297, %298 : vector<1x512xi32>
    %cst_133 = arith.constant 0.000000e+00 : f32
    %300 = vector.shape_cast %299 : vector<1x512xi1> to vector<1x512xi1>
    %301 = vector.broadcast %300 : vector<1x512xi1> to vector<32x512xi1>
    %302 = vector.broadcast %cst_133 : f32 to vector<32x512xf32>
    %303 = arith.select %301, %292, %302 : vector<32x512xi1>, vector<32x512xf32>
    %c7_134 = arith.constant 7 : index
    %c0_135 = arith.constant 0 : index
    %c0_136 = arith.constant 0 : index
    %304 = vector.load %arg3[%c7_134, %c0_135, %c0_136] : memref<9x32x32xf32, #tpu.memory_space<vmem>>, vector<1x32x32xf32>
    %305 = vector.shape_cast %304 : vector<1x32x32xf32> to vector<32x32xf32>
    %cst_137 = arith.constant dense<0.000000e+00> : vector<32x512xf32>
    %306 = tpu.matmul %305, %303, %cst_137 {dimension_numbers = #tpu.dot_dimension_numbers<[1], [0], [0], [1], [0, 0, 1, 1], [], []>} : vector<32x32xf32>, vector<32x512xf32>, vector<32x512xf32> -> vector<32x512xf32>
    %307 = arith.addf %291, %306 : vector<32x512xf32>
    %c495_i32_138 = arith.constant 495 : i32
    %308 = tpu.dynamic_rotate %181 by %c495_i32_138 dim 1 : vector<32x512xf32>, i32 -> vector<32x512xf32>
    %309 = tpu.iota {dimensions = array<i32: 1>} : vector<1x512xi32>
    %c15_i32_139 = arith.constant 15 : i32
    %310 = vector.broadcast %c15_i32_139 : i32 to vector<1x512xi32>
    %311 = arith.andi %309, %310 : vector<1x512xi32>
    %c4_i32_140 = arith.constant 4 : i32
    %312 = vector.broadcast %c4_i32_140 : i32 to vector<1x512xi32>
    %313 = arith.shrsi %309, %312 : vector<1x512xi32>
    %c15_i32_141 = arith.constant 15 : i32
    %314 = vector.broadcast %c15_i32_141 : i32 to vector<1x512xi32>
    %315 = arith.andi %313, %314 : vector<1x512xi32>
    %c15_i32_142 = arith.constant 15 : i32
    %316 = vector.broadcast %c15_i32_142 : i32 to vector<1x512xi32>
    %317 = arith.cmpi slt, %311, %316 : vector<1x512xi32>
    %c15_i32_143 = arith.constant 15 : i32
    %318 = vector.broadcast %c15_i32_143 : i32 to vector<1x512xi32>
    %319 = arith.cmpi slt, %315, %318 : vector<1x512xi32>
    %320 = arith.andi %317, %319 : vector<1x512xi1>
    %cst_144 = arith.constant 0.000000e+00 : f32
    %321 = vector.shape_cast %320 : vector<1x512xi1> to vector<1x512xi1>
    %322 = vector.broadcast %321 : vector<1x512xi1> to vector<32x512xi1>
    %323 = vector.broadcast %cst_144 : f32 to vector<32x512xf32>
    %324 = arith.select %322, %308, %323 : vector<32x512xi1>, vector<32x512xf32>
    %c8_145 = arith.constant 8 : index
    %c0_146 = arith.constant 0 : index
    %c0_147 = arith.constant 0 : index
    %325 = vector.load %arg3[%c8_145, %c0_146, %c0_147] : memref<9x32x32xf32, #tpu.memory_space<vmem>>, vector<1x32x32xf32>
    %326 = vector.shape_cast %325 : vector<1x32x32xf32> to vector<32x32xf32>
    %cst_148 = arith.constant dense<0.000000e+00> : vector<32x512xf32>
    %327 = tpu.matmul %326, %324, %cst_148 {dimension_numbers = #tpu.dot_dimension_numbers<[1], [0], [0], [1], [0, 0, 1, 1], [], []>} : vector<32x32xf32>, vector<32x512xf32>, vector<32x512xf32> -> vector<32x512xf32>
    %328 = arith.addf %307, %327 : vector<32x512xf32>
    %c0_149 = arith.constant 0 : index
    %c0_150 = arith.constant 0 : index
    %329 = vector.load %arg4[%c0_149, %c0_150] : memref<32x1xf32, #tpu.memory_space<vmem>>, vector<32x1xf32>
    %330 = vector.broadcast %329 : vector<32x1xf32> to vector<32x512xf32>
    %331 = arith.addf %328, %330 : vector<32x512xf32>
    %cst_151 = arith.constant 2.000000e+01 : f32
    %332 = vector.broadcast %cst_151 : f32 to vector<32x512xf32>
    %333 = arith.cmpf ogt, %331, %332 : vector<32x512xf32>
    %cst_152 = arith.constant 2.000000e+01 : f32
    %334 = vector.broadcast %cst_152 : f32 to vector<32x512xf32>
    %335 = arith.minimumf %331, %334 : vector<32x512xf32>
    %336 = math.exp %335 : vector<32x512xf32>
    %cst_153 = arith.constant 1.000000e+00 : f32
    %337 = vector.broadcast %cst_153 : f32 to vector<32x512xf32>
    %338 = arith.addf %337, %336 : vector<32x512xf32>
    %339 = math.log %338 : vector<32x512xf32>
    %340 = arith.select %333, %331, %339 : vector<32x512xi1>, vector<32x512xf32>
    %cst_154 = arith.constant dense<0.000000e+00> : vector<32xf32>
    %341 = vector.multi_reduction <add>, %340, %cst_154 [1] : vector<32x512xf32> to vector<32xf32>
    %342 = vector.shape_cast %341 : vector<32xf32> to vector<32x1xf32>
    %cst_155 = arith.constant 0.001953125 : f32
    %343 = vector.broadcast %cst_155 : f32 to vector<32x1xf32>
    %344 = arith.mulf %342, %343 : vector<32x1xf32>
    %345 = arith.mulf %340, %340 : vector<32x512xf32>
    %cst_156 = arith.constant dense<0.000000e+00> : vector<32xf32>
    %346 = vector.multi_reduction <add>, %345, %cst_156 [1] : vector<32x512xf32> to vector<32xf32>
    %347 = vector.shape_cast %346 : vector<32xf32> to vector<32x1xf32>
    %cst_157 = arith.constant 0.001953125 : f32
    %348 = vector.broadcast %cst_157 : f32 to vector<32x1xf32>
    %349 = arith.mulf %347, %348 : vector<32x1xf32>
    %350 = arith.mulf %344, %344 : vector<32x1xf32>
    %351 = arith.subf %349, %350 : vector<32x1xf32>
    %cst_158 = arith.constant 0.000000e+00 : f32
    %352 = vector.broadcast %cst_158 : f32 to vector<32x1xf32>
    %353 = arith.maximumf %351, %352 : vector<32x1xf32>
    %354 = vector.broadcast %344 : vector<32x1xf32> to vector<32x512xf32>
    %355 = arith.subf %340, %354 : vector<32x512xf32>
    %cst_159 = arith.constant 9.99999974E-6 : f32
    %356 = vector.broadcast %cst_159 : f32 to vector<32x1xf32>
    %357 = arith.addf %353, %356 : vector<32x1xf32>
    %358 = math.rsqrt %357 : vector<32x1xf32>
    %359 = vector.broadcast %358 : vector<32x1xf32> to vector<32x512xf32>
    %360 = arith.mulf %355, %359 : vector<32x512xf32>
    %c4_160 = arith.constant 4 : index
    %c0_161 = arith.constant 0 : index
    %c0_162 = arith.constant 0 : index
    %361 = vector.load %arg5[%c4_160, %c0_161, %c0_162] : memref<9x2x32xf32, #tpu.memory_space<vmem>>, vector<1x2x32xf32>
    %362 = vector.shape_cast %361 : vector<1x2x32xf32> to vector<2x32xf32>
    %cst_163 = arith.constant dense<0.000000e+00> : vector<2x512xf32>
    %363 = tpu.matmul %362, %360, %cst_163 {dimension_numbers = #tpu.dot_dimension_numbers<[1], [0], [0], [1], [0, 0, 1, 1], [], []>} : vector<2x32xf32>, vector<32x512xf32>, vector<2x512xf32> -> vector<2x512xf32>
    %c17_i32_164 = arith.constant 17 : i32
    %364 = tpu.dynamic_rotate %360 by %c17_i32_164 dim 1 : vector<32x512xf32>, i32 -> vector<32x512xf32>
    %365 = tpu.iota {dimensions = array<i32: 1>} : vector<1x512xi32>
    %c15_i32_165 = arith.constant 15 : i32
    %366 = vector.broadcast %c15_i32_165 : i32 to vector<1x512xi32>
    %367 = arith.andi %365, %366 : vector<1x512xi32>
    %c4_i32_166 = arith.constant 4 : i32
    %368 = vector.broadcast %c4_i32_166 : i32 to vector<1x512xi32>
    %369 = arith.shrsi %365, %368 : vector<1x512xi32>
    %c15_i32_167 = arith.constant 15 : i32
    %370 = vector.broadcast %c15_i32_167 : i32 to vector<1x512xi32>
    %371 = arith.andi %369, %370 : vector<1x512xi32>
    %c1_i32_168 = arith.constant 1 : i32
    %372 = vector.broadcast %c1_i32_168 : i32 to vector<1x512xi32>
    %373 = arith.cmpi sge, %367, %372 : vector<1x512xi32>
    %c1_i32_169 = arith.constant 1 : i32
    %374 = vector.broadcast %c1_i32_169 : i32 to vector<1x512xi32>
    %375 = arith.cmpi sge, %371, %374 : vector<1x512xi32>
    %376 = arith.andi %373, %375 : vector<1x512xi1>
    %cst_170 = arith.constant 0.000000e+00 : f32
    %377 = vector.shape_cast %376 : vector<1x512xi1> to vector<1x512xi1>
    %378 = vector.broadcast %377 : vector<1x512xi1> to vector<32x512xi1>
    %379 = vector.broadcast %cst_170 : f32 to vector<32x512xf32>
    %380 = arith.select %378, %364, %379 : vector<32x512xi1>, vector<32x512xf32>
    %c0_171 = arith.constant 0 : index
    %c0_172 = arith.constant 0 : index
    %c0_173 = arith.constant 0 : index
    %381 = vector.load %arg5[%c0_171, %c0_172, %c0_173] : memref<9x2x32xf32, #tpu.memory_space<vmem>>, vector<1x2x32xf32>
    %382 = vector.shape_cast %381 : vector<1x2x32xf32> to vector<2x32xf32>
    %cst_174 = arith.constant dense<0.000000e+00> : vector<2x512xf32>
    %383 = tpu.matmul %382, %380, %cst_174 {dimension_numbers = #tpu.dot_dimension_numbers<[1], [0], [0], [1], [0, 0, 1, 1], [], []>} : vector<2x32xf32>, vector<32x512xf32>, vector<2x512xf32> -> vector<2x512xf32>
    %384 = arith.addf %363, %383 : vector<2x512xf32>
    %c16_i32_175 = arith.constant 16 : i32
    %385 = tpu.dynamic_rotate %360 by %c16_i32_175 dim 1 : vector<32x512xf32>, i32 -> vector<32x512xf32>
    %386 = tpu.iota {dimensions = array<i32: 1>} : vector<1x512xi32>
    %c4_i32_176 = arith.constant 4 : i32
    %387 = vector.broadcast %c4_i32_176 : i32 to vector<1x512xi32>
    %388 = arith.shrsi %386, %387 : vector<1x512xi32>
    %c15_i32_177 = arith.constant 15 : i32
    %389 = vector.broadcast %c15_i32_177 : i32 to vector<1x512xi32>
    %390 = arith.andi %388, %389 : vector<1x512xi32>
    %c1_i32_178 = arith.constant 1 : i32
    %391 = vector.broadcast %c1_i32_178 : i32 to vector<1x512xi32>
    %392 = arith.cmpi sge, %390, %391 : vector<1x512xi32>
    %cst_179 = arith.constant 0.000000e+00 : f32
    %393 = vector.shape_cast %392 : vector<1x512xi1> to vector<1x512xi1>
    %394 = vector.broadcast %393 : vector<1x512xi1> to vector<32x512xi1>
    %395 = vector.broadcast %cst_179 : f32 to vector<32x512xf32>
    %396 = arith.select %394, %385, %395 : vector<32x512xi1>, vector<32x512xf32>
    %c1_180 = arith.constant 1 : index
    %c0_181 = arith.constant 0 : index
    %c0_182 = arith.constant 0 : index
    %397 = vector.load %arg5[%c1_180, %c0_181, %c0_182] : memref<9x2x32xf32, #tpu.memory_space<vmem>>, vector<1x2x32xf32>
    %398 = vector.shape_cast %397 : vector<1x2x32xf32> to vector<2x32xf32>
    %cst_183 = arith.constant dense<0.000000e+00> : vector<2x512xf32>
    %399 = tpu.matmul %398, %396, %cst_183 {dimension_numbers = #tpu.dot_dimension_numbers<[1], [0], [0], [1], [0, 0, 1, 1], [], []>} : vector<2x32xf32>, vector<32x512xf32>, vector<2x512xf32> -> vector<2x512xf32>
    %400 = arith.addf %384, %399 : vector<2x512xf32>
    %c15_i32_184 = arith.constant 15 : i32
    %401 = tpu.dynamic_rotate %360 by %c15_i32_184 dim 1 : vector<32x512xf32>, i32 -> vector<32x512xf32>
    %402 = tpu.iota {dimensions = array<i32: 1>} : vector<1x512xi32>
    %c15_i32_185 = arith.constant 15 : i32
    %403 = vector.broadcast %c15_i32_185 : i32 to vector<1x512xi32>
    %404 = arith.andi %402, %403 : vector<1x512xi32>
    %c4_i32_186 = arith.constant 4 : i32
    %405 = vector.broadcast %c4_i32_186 : i32 to vector<1x512xi32>
    %406 = arith.shrsi %402, %405 : vector<1x512xi32>
    %c15_i32_187 = arith.constant 15 : i32
    %407 = vector.broadcast %c15_i32_187 : i32 to vector<1x512xi32>
    %408 = arith.andi %406, %407 : vector<1x512xi32>
    %c15_i32_188 = arith.constant 15 : i32
    %409 = vector.broadcast %c15_i32_188 : i32 to vector<1x512xi32>
    %410 = arith.cmpi slt, %404, %409 : vector<1x512xi32>
    %c1_i32_189 = arith.constant 1 : i32
    %411 = vector.broadcast %c1_i32_189 : i32 to vector<1x512xi32>
    %412 = arith.cmpi sge, %408, %411 : vector<1x512xi32>
    %413 = arith.andi %410, %412 : vector<1x512xi1>
    %cst_190 = arith.constant 0.000000e+00 : f32
    %414 = vector.shape_cast %413 : vector<1x512xi1> to vector<1x512xi1>
    %415 = vector.broadcast %414 : vector<1x512xi1> to vector<32x512xi1>
    %416 = vector.broadcast %cst_190 : f32 to vector<32x512xf32>
    %417 = arith.select %415, %401, %416 : vector<32x512xi1>, vector<32x512xf32>
    %c2_191 = arith.constant 2 : index
    %c0_192 = arith.constant 0 : index
    %c0_193 = arith.constant 0 : index
    %418 = vector.load %arg5[%c2_191, %c0_192, %c0_193] : memref<9x2x32xf32, #tpu.memory_space<vmem>>, vector<1x2x32xf32>
    %419 = vector.shape_cast %418 : vector<1x2x32xf32> to vector<2x32xf32>
    %cst_194 = arith.constant dense<0.000000e+00> : vector<2x512xf32>
    %420 = tpu.matmul %419, %417, %cst_194 {dimension_numbers = #tpu.dot_dimension_numbers<[1], [0], [0], [1], [0, 0, 1, 1], [], []>} : vector<2x32xf32>, vector<32x512xf32>, vector<2x512xf32> -> vector<2x512xf32>
    %421 = arith.addf %400, %420 : vector<2x512xf32>
    %c1_i32_195 = arith.constant 1 : i32
    %422 = tpu.dynamic_rotate %360 by %c1_i32_195 dim 1 : vector<32x512xf32>, i32 -> vector<32x512xf32>
    %423 = tpu.iota {dimensions = array<i32: 1>} : vector<1x512xi32>
    %c15_i32_196 = arith.constant 15 : i32
    %424 = vector.broadcast %c15_i32_196 : i32 to vector<1x512xi32>
    %425 = arith.andi %423, %424 : vector<1x512xi32>
    %c1_i32_197 = arith.constant 1 : i32
    %426 = vector.broadcast %c1_i32_197 : i32 to vector<1x512xi32>
    %427 = arith.cmpi sge, %425, %426 : vector<1x512xi32>
    %cst_198 = arith.constant 0.000000e+00 : f32
    %428 = vector.shape_cast %427 : vector<1x512xi1> to vector<1x512xi1>
    %429 = vector.broadcast %428 : vector<1x512xi1> to vector<32x512xi1>
    %430 = vector.broadcast %cst_198 : f32 to vector<32x512xf32>
    %431 = arith.select %429, %422, %430 : vector<32x512xi1>, vector<32x512xf32>
    %c3_199 = arith.constant 3 : index
    %c0_200 = arith.constant 0 : index
    %c0_201 = arith.constant 0 : index
    %432 = vector.load %arg5[%c3_199, %c0_200, %c0_201] : memref<9x2x32xf32, #tpu.memory_space<vmem>>, vector<1x2x32xf32>
    %433 = vector.shape_cast %432 : vector<1x2x32xf32> to vector<2x32xf32>
    %cst_202 = arith.constant dense<0.000000e+00> : vector<2x512xf32>
    %434 = tpu.matmul %433, %431, %cst_202 {dimension_numbers = #tpu.dot_dimension_numbers<[1], [0], [0], [1], [0, 0, 1, 1], [], []>} : vector<2x32xf32>, vector<32x512xf32>, vector<2x512xf32> -> vector<2x512xf32>
    %435 = arith.addf %421, %434 : vector<2x512xf32>
    %c511_i32_203 = arith.constant 511 : i32
    %436 = tpu.dynamic_rotate %360 by %c511_i32_203 dim 1 : vector<32x512xf32>, i32 -> vector<32x512xf32>
    %437 = tpu.iota {dimensions = array<i32: 1>} : vector<1x512xi32>
    %c15_i32_204 = arith.constant 15 : i32
    %438 = vector.broadcast %c15_i32_204 : i32 to vector<1x512xi32>
    %439 = arith.andi %437, %438 : vector<1x512xi32>
    %c15_i32_205 = arith.constant 15 : i32
    %440 = vector.broadcast %c15_i32_205 : i32 to vector<1x512xi32>
    %441 = arith.cmpi slt, %439, %440 : vector<1x512xi32>
    %cst_206 = arith.constant 0.000000e+00 : f32
    %442 = vector.shape_cast %441 : vector<1x512xi1> to vector<1x512xi1>
    %443 = vector.broadcast %442 : vector<1x512xi1> to vector<32x512xi1>
    %444 = vector.broadcast %cst_206 : f32 to vector<32x512xf32>
    %445 = arith.select %443, %436, %444 : vector<32x512xi1>, vector<32x512xf32>
    %c5_207 = arith.constant 5 : index
    %c0_208 = arith.constant 0 : index
    %c0_209 = arith.constant 0 : index
    %446 = vector.load %arg5[%c5_207, %c0_208, %c0_209] : memref<9x2x32xf32, #tpu.memory_space<vmem>>, vector<1x2x32xf32>
    %447 = vector.shape_cast %446 : vector<1x2x32xf32> to vector<2x32xf32>
    %cst_210 = arith.constant dense<0.000000e+00> : vector<2x512xf32>
    %448 = tpu.matmul %447, %445, %cst_210 {dimension_numbers = #tpu.dot_dimension_numbers<[1], [0], [0], [1], [0, 0, 1, 1], [], []>} : vector<2x32xf32>, vector<32x512xf32>, vector<2x512xf32> -> vector<2x512xf32>
    %449 = arith.addf %435, %448 : vector<2x512xf32>
    %c497_i32_211 = arith.constant 497 : i32
    %450 = tpu.dynamic_rotate %360 by %c497_i32_211 dim 1 : vector<32x512xf32>, i32 -> vector<32x512xf32>
    %451 = tpu.iota {dimensions = array<i32: 1>} : vector<1x512xi32>
    %c15_i32_212 = arith.constant 15 : i32
    %452 = vector.broadcast %c15_i32_212 : i32 to vector<1x512xi32>
    %453 = arith.andi %451, %452 : vector<1x512xi32>
    %c4_i32_213 = arith.constant 4 : i32
    %454 = vector.broadcast %c4_i32_213 : i32 to vector<1x512xi32>
    %455 = arith.shrsi %451, %454 : vector<1x512xi32>
    %c15_i32_214 = arith.constant 15 : i32
    %456 = vector.broadcast %c15_i32_214 : i32 to vector<1x512xi32>
    %457 = arith.andi %455, %456 : vector<1x512xi32>
    %c1_i32_215 = arith.constant 1 : i32
    %458 = vector.broadcast %c1_i32_215 : i32 to vector<1x512xi32>
    %459 = arith.cmpi sge, %453, %458 : vector<1x512xi32>
    %c15_i32_216 = arith.constant 15 : i32
    %460 = vector.broadcast %c15_i32_216 : i32 to vector<1x512xi32>
    %461 = arith.cmpi slt, %457, %460 : vector<1x512xi32>
    %462 = arith.andi %459, %461 : vector<1x512xi1>
    %cst_217 = arith.constant 0.000000e+00 : f32
    %463 = vector.shape_cast %462 : vector<1x512xi1> to vector<1x512xi1>
    %464 = vector.broadcast %463 : vector<1x512xi1> to vector<32x512xi1>
    %465 = vector.broadcast %cst_217 : f32 to vector<32x512xf32>
    %466 = arith.select %464, %450, %465 : vector<32x512xi1>, vector<32x512xf32>
    %c6_218 = arith.constant 6 : index
    %c0_219 = arith.constant 0 : index
    %c0_220 = arith.constant 0 : index
    %467 = vector.load %arg5[%c6_218, %c0_219, %c0_220] : memref<9x2x32xf32, #tpu.memory_space<vmem>>, vector<1x2x32xf32>
    %468 = vector.shape_cast %467 : vector<1x2x32xf32> to vector<2x32xf32>
    %cst_221 = arith.constant dense<0.000000e+00> : vector<2x512xf32>
    %469 = tpu.matmul %468, %466, %cst_221 {dimension_numbers = #tpu.dot_dimension_numbers<[1], [0], [0], [1], [0, 0, 1, 1], [], []>} : vector<2x32xf32>, vector<32x512xf32>, vector<2x512xf32> -> vector<2x512xf32>
    %470 = arith.addf %449, %469 : vector<2x512xf32>
    %c496_i32_222 = arith.constant 496 : i32
    %471 = tpu.dynamic_rotate %360 by %c496_i32_222 dim 1 : vector<32x512xf32>, i32 -> vector<32x512xf32>
    %472 = tpu.iota {dimensions = array<i32: 1>} : vector<1x512xi32>
    %c4_i32_223 = arith.constant 4 : i32
    %473 = vector.broadcast %c4_i32_223 : i32 to vector<1x512xi32>
    %474 = arith.shrsi %472, %473 : vector<1x512xi32>
    %c15_i32_224 = arith.constant 15 : i32
    %475 = vector.broadcast %c15_i32_224 : i32 to vector<1x512xi32>
    %476 = arith.andi %474, %475 : vector<1x512xi32>
    %c15_i32_225 = arith.constant 15 : i32
    %477 = vector.broadcast %c15_i32_225 : i32 to vector<1x512xi32>
    %478 = arith.cmpi slt, %476, %477 : vector<1x512xi32>
    %cst_226 = arith.constant 0.000000e+00 : f32
    %479 = vector.shape_cast %478 : vector<1x512xi1> to vector<1x512xi1>
    %480 = vector.broadcast %479 : vector<1x512xi1> to vector<32x512xi1>
    %481 = vector.broadcast %cst_226 : f32 to vector<32x512xf32>
    %482 = arith.select %480, %471, %481 : vector<32x512xi1>, vector<32x512xf32>
    %c7_227 = arith.constant 7 : index
    %c0_228 = arith.constant 0 : index
    %c0_229 = arith.constant 0 : index
    %483 = vector.load %arg5[%c7_227, %c0_228, %c0_229] : memref<9x2x32xf32, #tpu.memory_space<vmem>>, vector<1x2x32xf32>
    %484 = vector.shape_cast %483 : vector<1x2x32xf32> to vector<2x32xf32>
    %cst_230 = arith.constant dense<0.000000e+00> : vector<2x512xf32>
    %485 = tpu.matmul %484, %482, %cst_230 {dimension_numbers = #tpu.dot_dimension_numbers<[1], [0], [0], [1], [0, 0, 1, 1], [], []>} : vector<2x32xf32>, vector<32x512xf32>, vector<2x512xf32> -> vector<2x512xf32>
    %486 = arith.addf %470, %485 : vector<2x512xf32>
    %c495_i32_231 = arith.constant 495 : i32
    %487 = tpu.dynamic_rotate %360 by %c495_i32_231 dim 1 : vector<32x512xf32>, i32 -> vector<32x512xf32>
    %488 = tpu.iota {dimensions = array<i32: 1>} : vector<1x512xi32>
    %c15_i32_232 = arith.constant 15 : i32
    %489 = vector.broadcast %c15_i32_232 : i32 to vector<1x512xi32>
    %490 = arith.andi %488, %489 : vector<1x512xi32>
    %c4_i32_233 = arith.constant 4 : i32
    %491 = vector.broadcast %c4_i32_233 : i32 to vector<1x512xi32>
    %492 = arith.shrsi %488, %491 : vector<1x512xi32>
    %c15_i32_234 = arith.constant 15 : i32
    %493 = vector.broadcast %c15_i32_234 : i32 to vector<1x512xi32>
    %494 = arith.andi %492, %493 : vector<1x512xi32>
    %c15_i32_235 = arith.constant 15 : i32
    %495 = vector.broadcast %c15_i32_235 : i32 to vector<1x512xi32>
    %496 = arith.cmpi slt, %490, %495 : vector<1x512xi32>
    %c15_i32_236 = arith.constant 15 : i32
    %497 = vector.broadcast %c15_i32_236 : i32 to vector<1x512xi32>
    %498 = arith.cmpi slt, %494, %497 : vector<1x512xi32>
    %499 = arith.andi %496, %498 : vector<1x512xi1>
    %cst_237 = arith.constant 0.000000e+00 : f32
    %500 = vector.shape_cast %499 : vector<1x512xi1> to vector<1x512xi1>
    %501 = vector.broadcast %500 : vector<1x512xi1> to vector<32x512xi1>
    %502 = vector.broadcast %cst_237 : f32 to vector<32x512xf32>
    %503 = arith.select %501, %487, %502 : vector<32x512xi1>, vector<32x512xf32>
    %c8_238 = arith.constant 8 : index
    %c0_239 = arith.constant 0 : index
    %c0_240 = arith.constant 0 : index
    %504 = vector.load %arg5[%c8_238, %c0_239, %c0_240] : memref<9x2x32xf32, #tpu.memory_space<vmem>>, vector<1x2x32xf32>
    %505 = vector.shape_cast %504 : vector<1x2x32xf32> to vector<2x32xf32>
    %cst_241 = arith.constant dense<0.000000e+00> : vector<2x512xf32>
    %506 = tpu.matmul %505, %503, %cst_241 {dimension_numbers = #tpu.dot_dimension_numbers<[1], [0], [0], [1], [0, 0, 1, 1], [], []>} : vector<2x32xf32>, vector<32x512xf32>, vector<2x512xf32> -> vector<2x512xf32>
    %507 = arith.addf %486, %506 : vector<2x512xf32>
    %c0_242 = arith.constant 0 : index
    %c0_243 = arith.constant 0 : index
    %508 = vector.load %arg6[%c0_242, %c0_243] : memref<2x1xf32, #tpu.memory_space<vmem>>, vector<2x1xf32>
    %509 = vector.broadcast %508 : vector<2x1xf32> to vector<2x512xf32>
    %510 = arith.addf %507, %509 : vector<2x512xf32>
    %511 = vector.extract_strided_slice %510 {offsets = [0, 0], sizes = [1, 256], strides = [1, 1]} : vector<2x512xf32> to vector<1x256xf32>
    %512 = vector.extract_strided_slice %510 {offsets = [1, 0], sizes = [1, 256], strides = [1, 1]} : vector<2x512xf32> to vector<1x256xf32>
    %513 = tpu.concatenate %511, %512 in 1 : vector<1x256xf32>, vector<1x256xf32> -> vector<1x512xf32>
    %514 = vector.extract_strided_slice %510 {offsets = [0, 256], sizes = [1, 256], strides = [1, 1]} : vector<2x512xf32> to vector<1x256xf32>
    %515 = vector.extract_strided_slice %510 {offsets = [1, 256], sizes = [1, 256], strides = [1, 1]} : vector<2x512xf32> to vector<1x256xf32>
    %516 = tpu.concatenate %514, %515 in 1 : vector<1x256xf32>, vector<1x256xf32> -> vector<1x512xf32>
    %517 = tpu.concatenate %513, %516 in 0 : vector<1x512xf32>, vector<1x512xf32> -> vector<2x512xf32>
    %c0_244 = arith.constant 0 : index
    %c0_245 = arith.constant 0 : index
    %518 = vector.load %arg7[%c0_244, %c0_245] : memref<512x128xf32, #tpu.memory_space<vmem>>, vector<512x128xf32>
    %cst_246 = arith.constant dense<0.000000e+00> : vector<2x128xf32>
    %519 = tpu.matmul %517, %518, %cst_246 {dimension_numbers = #tpu.dot_dimension_numbers<[1], [0], [0], [1], [0, 0, 1, 1], [], []>} : vector<2x512xf32>, vector<512x128xf32>, vector<2x128xf32> -> vector<2x128xf32>
    %c0_247 = arith.constant 0 : index
    %c0_248 = arith.constant 0 : index
    %520 = vector.load %arg8[%c0_247, %c0_248] : memref<1x128xf32, #tpu.memory_space<vmem>>, vector<1x128xf32>
    %521 = vector.broadcast %520 : vector<1x128xf32> to vector<2x128xf32>
    %522 = arith.addf %519, %521 : vector<2x128xf32>
    %cst_249 = arith.constant 2.000000e+01 : f32
    %523 = vector.broadcast %cst_249 : f32 to vector<2x128xf32>
    %524 = arith.cmpf ogt, %522, %523 : vector<2x128xf32>
    %cst_250 = arith.constant 2.000000e+01 : f32
    %525 = vector.broadcast %cst_250 : f32 to vector<2x128xf32>
    %526 = arith.minimumf %522, %525 : vector<2x128xf32>
    %527 = math.exp %526 : vector<2x128xf32>
    %cst_251 = arith.constant 1.000000e+00 : f32
    %528 = vector.broadcast %cst_251 : f32 to vector<2x128xf32>
    %529 = arith.addf %528, %527 : vector<2x128xf32>
    %530 = math.log %529 : vector<2x128xf32>
    %531 = arith.select %524, %522, %530 : vector<2x128xi1>, vector<2x128xf32>
    %c0_252 = arith.constant 0 : index
    %c0_253 = arith.constant 0 : index
    %532 = vector.load %arg9[%c0_252, %c0_253] : memref<128x128xf32, #tpu.memory_space<vmem>>, vector<128x128xf32>
    %cst_254 = arith.constant dense<0.000000e+00> : vector<2x128xf32>
    %533 = tpu.matmul %531, %532, %cst_254 {dimension_numbers = #tpu.dot_dimension_numbers<[1], [0], [0], [1], [0, 0, 1, 1], [], []>} : vector<2x128xf32>, vector<128x128xf32>, vector<2x128xf32> -> vector<2x128xf32>
    %c0_255 = arith.constant 0 : index
    %c0_256 = arith.constant 0 : index
    %534 = vector.load %arg10[%c0_255, %c0_256] : memref<1x128xf32, #tpu.memory_space<vmem>>, vector<1x128xf32>
    %535 = vector.broadcast %534 : vector<1x128xf32> to vector<2x128xf32>
    %536 = arith.addf %533, %535 : vector<2x128xf32>
    %cst_257 = arith.constant 2.000000e+01 : f32
    %537 = vector.broadcast %cst_257 : f32 to vector<2x128xf32>
    %538 = arith.cmpf ogt, %536, %537 : vector<2x128xf32>
    %cst_258 = arith.constant 2.000000e+01 : f32
    %539 = vector.broadcast %cst_258 : f32 to vector<2x128xf32>
    %540 = arith.minimumf %536, %539 : vector<2x128xf32>
    %541 = math.exp %540 : vector<2x128xf32>
    %cst_259 = arith.constant 1.000000e+00 : f32
    %542 = vector.broadcast %cst_259 : f32 to vector<2x128xf32>
    %543 = arith.addf %542, %541 : vector<2x128xf32>
    %544 = math.log %543 : vector<2x128xf32>
    %545 = arith.select %538, %536, %544 : vector<2x128xi1>, vector<2x128xf32>
    %c0_260 = arith.constant 0 : index
    %c0_261 = arith.constant 0 : index
    %546 = vector.load %arg11[%c0_260, %c0_261] : memref<128x512xf32, #tpu.memory_space<vmem>>, vector<128x512xf32>
    %cst_262 = arith.constant dense<0.000000e+00> : vector<2x512xf32>
    %547 = tpu.matmul %545, %546, %cst_262 {dimension_numbers = #tpu.dot_dimension_numbers<[1], [0], [0], [1], [0, 0, 1, 1], [], []>} : vector<2x128xf32>, vector<128x512xf32>, vector<2x512xf32> -> vector<2x512xf32>
    %c0_263 = arith.constant 0 : index
    %c0_264 = arith.constant 0 : index
    %548 = vector.load %arg12[%c0_263, %c0_264] : memref<1x512xf32, #tpu.memory_space<vmem>>, vector<1x512xf32>
    %549 = vector.broadcast %548 : vector<1x512xf32> to vector<2x512xf32>
    %550 = arith.addf %547, %549 : vector<2x512xf32>
    %c0_265 = arith.constant 0 : index
    %c0_266 = arith.constant 0 : index
    %551 = vector.load %arg13[%c0_265, %c0_266] : memref<2x512xf32, #tpu.memory_space<vmem>>, vector<2x512xf32>
    tpu.vector_store %arg13[%c0_265, %c0_266], %550 {strides = array<i32>} : memref<2x512xf32, #tpu.memory_space<vmem>>, vector<2x512xf32>,
    return
  }
}

</mosaic_0001>

<bundles_post_ra>
// kernel: forward.1
= control target key start
LH: loop header
LB: loop body
LE: loop exit
PB: predicated region body
PF: predicated region fallthrough
CT: control target
= control target key end

     0   :  { %18 = vsyncpa [#allocation3], 0  ;;  %s10145_s0 = inlined_call_operand.vmem [shape: f32[1,512], index: 0, kind: input, shape index: {}]   ;;  %s10146_s1 = inlined_call_operand.hbm [shape: f32[9,32,1], index: 1, kind: input, shape index: {}]   ;;  %s10147_s2 = inlined_call_operand.vmem [shape: f32[32,1], index: 2, kind: input, shape index: {}, may-alias: {2,4}]   ;;  %s10148_s3 = inlined_call_operand.hbm [shape: f32[9,32,32], index: 3, kind: input, shape index: {}]   ;;  %s10149_s4 = inlined_call_operand.vmem [shape: f32[32,1], index: 4, kind: input, shape index: {}, may-alias: {2,4}]   ;;  %s10150_s5 = inlined_call_operand.vmem [shape: f32[9,2,32], index: 5, kind: input, shape index: {}]   ;;  %s10151_s6 = inlined_call_operand.vmem [shape: f32[2,1], index: 6, kind: input, shape index: {}]   ;;  %s10152_s7 = inlined_call_operand.hbm [shape: f32[512,128], index: 7, kind: input, shape index: {}]   ;;  %s10153_s8 = inlined_call_operand.vmem [shape: f32[1,128], index: 8, kind: input, shape index: {}]   ;;  %s10154_s9 = inlined_call_operand.hbm [shape: f32[128,128], index: 9, kind: input, shape index: {}]   ;;  %s10155_s10 = inlined_call_operand.vmem [shape: f32[1,128], index: 10, kind: input, shape index: {}]   ;;  %s10156_s11 = inlined_call_operand.hbm [shape: f32[128,512], index: 11, kind: input, shape index: {}]   ;;  %s10157_s12 = inlined_call_operand.vmem [shape: f32[1,512], index: 12, kind: input, shape index: {}]   ;;  %s10158_s13 = inlined_call_operand.vmem [shape: f32[2,512], index: 13, kind: output, shape index: {}]  }
   0x1   :  { %19 = vsyncpa [#allocation5], 0 }
   0x2   :  { %20 = vsyncpa [#allocation8], 0  ;;  %s42_s27 = sshll.u32 %s10148_s3, 4  ;;  %s5846_s28 = smov [#allocation4]   ;;  %s43_s27 = int_to_ptr.hbm [resolvable:$true] %s42_s27 }
   0x3   :  { %s44_s29 = sshll.u32 %s5846_s28, 4  ;;  %s76_s15 = sshll.u32 %s10154_s9, 4  ;;  %s45_s29 = int_to_ptr.vmem [resolvable:$true] %s44_s29  ;;  %s77_s15 = int_to_ptr.hbm [resolvable:$true] %s76_s15 }
   0x4   :  { %s5847_s16 = smov 128   ;;  %s5848_s17 = smov 8  }
   0x5   :  { %50 = dma.hbm_to_vmem [thread:$0]  %s43_s27, 4608, %s45_s29, [#allocation5], %s5847_s16, %s5847_s16, %s5848_s17  }
   0x6   :  { %s5849_s18 = smov [#allocation7]   ;;  %s27_s22 = sshll.u32 %s10146_s1, 4  ;;  %s28_s22 = int_to_ptr.hbm [resolvable:$true] %s27_s22 }
   0x7   :  { %s78_s19 = sshll.u32 %s5849_s18, 4  ;;  %s61_s24 = sshll.u32 %s10152_s7, 4  ;;  %s79_s19 = int_to_ptr.vmem [resolvable:$true] %s78_s19  ;;  %s62_s24 = int_to_ptr.hbm [resolvable:$true] %s61_s24 }
   0x8   :  { %84 = dma.hbm_to_vmem [thread:$0]  %s77_s15, 2048, %s79_s19, [#allocation8], %s5847_s16, %s5847_s16, %s5848_s17  }
   0x9   :  { %s5850_s25 = smov [#allocation2]   ;;  %s5851_s9 = smov [#allocation6]  }
   0xa   :  { %s29_s26 = sshll.u32 %s5850_s25, 4  ;;  %s63_s27 = sshll.u32 %s5851_s9, 4  ;;  %s30_s26 = int_to_ptr.vmem [resolvable:$true] %s29_s26  ;;  %s64_s27 = int_to_ptr.vmem [resolvable:$true] %s63_s27 }
   0xb   :  { %35 = dma.hbm_to_vmem [thread:$0]  %s28_s22, 4608, %s30_s26, [#allocation3], %s5847_s16, %s5847_s16, %s5848_s17  }
   0xc   :  { %s91_s30 = sshll.u32 %s10156_s11, 4  ;;  %s5852_s1 = smov [#allocation9]   ;;  %s92_s30 = int_to_ptr.hbm [resolvable:$true] %s91_s30 }
   0xd   :  { %69 = dma.hbm_to_vmem [thread:$0]  %s62_s24, 8192, %s64_s27, [#allocation5], %s5847_s16, %s5847_s16, %s5848_s17  }
   0xe   :  { %s93_s14 = sshll.u32 %s5852_s1, 4  ;;  %s5853_s15 = smov 512   ;;  %s94_s14 = int_to_ptr.vmem [resolvable:$true] %s93_s14 }
   0xf   :  { %s5854_s18 = smov 32  }
  0x10   :  { %99 = dma.hbm_to_vmem [thread:$0]  %s92_s30, 8192, %s94_s14, [#allocation8], %s5853_s15, %s5853_s15, %s5854_s18  }
  0x11   :  { %5840 = dma.done.wait [#allocation3], 4608  }
  0x12   :  { %5841 = vsyncadd [#allocation3], 4294962688 }
  0x13   :  { %5842 = dma.done.wait [#allocation5], 12800  }
  0x14   :  { %5843 = vsyncadd [#allocation5], 4294954496 }
  0x15   :  { %5844 = dma.done.wait [#allocation8], 10240  }
  0x16   :  { %5845 = vsyncadd [#allocation8], 4294957056  ;;  %v5855_v0 = vmov 0   ;;  %v122_v1 = vld [vmem:[%s10145_s0] sm:$0xf]  ;;  %s5856_s16 = smov 17  }
  0x17   :  { %5563 = vset.pattern.permute.xlu2 %v5855_v0  ;;  %5564 = vset.pattern.permute.xlu0 %v5855_v0  ;;  %v5952_v2 = vperm.slane %v122_v1, 3  ;;  %v5954_v3 = vperm.slane %v122_v1, 1  ;;  %v5956_v4 = vperm.slane %v122_v1, 0  ;;  %s5857_s17 = smov 16   ;;  %v5970_v5 = vperm.slane %v122_v1, 2  ;;  %s5858_s0 = smov 15  }
  0x18   :  { %5565 = vset.pattern.permute.xlu1 %v5855_v0  ;;  %v126_v6 = vld [vmem:[#allocation2 + $0x18] sm:$0xff]  ;;  %s5859_s19 = smov 1   ;;  %v125_v8 = vld [vmem:[#allocation2 + $0x10] sm:$0xff]  ;;  %v224_v11 = vld [vmem:[#allocation2 + $0x28] sm:$0xff]  ;;  %s5860_s20 = smov 127  }
  0x19   :  { %10329 = vst [vmem:[#allocation13_spill] sm:$0xff] %v5952_v2  ;;  %142 = vrot.lane.b32.xlu1 %v5952_v2, %s5856_s16  ;;  %229 = vrot.lane.b32.xlu2 %v5954_v3, %s5857_s17  ;;  %v226_v7 = vld [vmem:[#allocation2 + $0x38] sm:$0xff]  ;;  %v225_v10 = vld [vmem:[#allocation2 + $0x30] sm:$0xff]  ;;  %v124_v12 = vld [vmem:[#allocation2 + $0x8] sm:$0xff]  ;;  %s5861_s21 = smov 113   ;;  %s5862_s22 = smov 112  }
  0x1a   :  { %10330 = vst [vmem:[#allocation14_spill] sm:$0xff] %v5954_v3  ;;  %136 = vrot.lane.b32.xlu0 %v5956_v4, %s5856_s16  ;;  %v304_v9 = vld [vmem:[#allocation2 + $0x58] sm:$0xff]  ;;  %v303_v13 = vld [vmem:[#allocation2 + $0x50] sm:$0xff]  ;;  %v123_v15 = vld [vmem:[#allocation2] sm:$0xff]  ;;  %s5863_s3 = smov 111  }
  0x1b   :  { %10331 = vst [vmem:[#allocation15_spill] sm:$0xff] %v5956_v4  ;;  %v390_v14 = vld [vmem:[#allocation2 + $0x78] sm:$0xff]  ;;  %v223_v16 = vld [vmem:[#allocation2 + $0x20] sm:$0xff]  ;;  %v389_v17 = vld [vmem:[#allocation2 + $0x70] sm:$0xff] }
  0x1c   :  { %10332 = vst [vmem:[#allocation16_spill] sm:$0xff] %v5970_v5  ;;  %v302_v18 = vld [vmem:[#allocation2 + $0x48] sm:$0xff]  ;;  %v468_v19 = vld [vmem:[#allocation2 + $0x98] sm:$0xff]  ;;  %v301_v21 = vld [vmem:[#allocation2 + $0x40] sm:$0xff] }
  0x1d   :  { %v388_v22 = vld [vmem:[#allocation2 + $0x68] sm:$0xff]  ;;  %v525_v24 = vld [vmem:[#allocation2 + $0xb8] sm:$0xff]  ;;  %v467_v25 = vld [vmem:[#allocation2 + $0x90] sm:$0xff] }
  0x1e   :  { %v466_v30 = vld [vmem:[#allocation2 + $0x88] sm:$0xff]  ;;  %v387_v31 = vld [vmem:[#allocation2 + $0x60] sm:$0xff]  ;;  %v524_v32 = vld [vmem:[#allocation2 + $0xb0] sm:$0xff] }
  0x1f   :  { %v603_v36 = vld [vmem:[#allocation2 + $0xd8] sm:$0xff]  ;;  %v465_v40 = vld [vmem:[#allocation2 + $0x80] sm:$0xff]  ;;  %v602_v44 = vld [vmem:[#allocation2 + $0xd0] sm:$0xff] }
  0x20   :  { %v523_v45 = vld [vmem:[#allocation2 + $0xa8] sm:$0xff]  ;;  %v689_v46 = vld [vmem:[#allocation2 + $0xf8] sm:$0xff]  ;;  %v522_v50 = vld [vmem:[#allocation2 + $0xa0] sm:$0xff] }
  0x21   :  { %233 = vrot.lane.b32.xlu2 %v5952_v2, %s5857_s17  ;;  %227 = vrot.lane.b32.xlu1 %v5956_v4, %s5857_s17  ;;  %v601_v51 = vld [vmem:[#allocation2 + $0xc8] sm:$0xff]  ;;  %v767_v55 = vld [vmem:[#allocation2 + $0x118] sm:$0xff]  ;;  %v688_v56 = vld [vmem:[#allocation2 + $0xf0] sm:$0xff] }
  0x22   :  { %138 = vrot.lane.b32.xlu0 %v5954_v3, %s5856_s16  ;;  %v600_v57 = vld [vmem:[#allocation2 + $0xc0] sm:$0xff]  ;;  %v766_v61 = vld [vmem:[#allocation2 + $0x110] sm:$0xff]  ;;  %v687_v62 = vld [vmem:[#allocation2 + $0xe8] sm:$0xff] }
  0x23   :  { %v686_v63 = vld [vmem:[#allocation2 + $0xe0] sm:$0xff] }
  0x29   :  { %305 = vrot.lane.b32.xlu2 %v5956_v4, %s5858_s0  ;;  %231 = vrot.lane.b32.xlu1 %v5970_v5, %s5857_s17 }
  0x2a   :  { %140 = vrot.lane.b32.xlu0 %v5970_v5, %s5856_s16 }
  0x31   :  { %199 = vperm.xlu2 %5563, %v126_v6   ;;  %311 = vrot.lane.b32.xlu1 %v5952_v2, %s5858_s0 }
  0x32   :  { %307 = vrot.lane.b32.xlu0 %v5954_v3, %s5858_s0 }
  0x39   :  { %391 = vrot.lane.b32.xlu2 %v5956_v4, %s5859_s19  ;;  %309 = vrot.lane.b32.xlu1 %v5970_v5, %s5858_s0 }
  0x3a   :  { %261 = vperm.xlu0 %5564, %v226_v7   ;;  %v848_v7 = vld [vmem:[%s10147_s2 + $0x18] sm:$0xff] }
  0x41   :  { %397 = vrot.lane.b32.xlu2 %v5952_v2, %s5859_s19  ;;  %393 = vrot.lane.b32.xlu1 %v5954_v3, %s5859_s19 }
  0x42   :  { %194 = vperm.xlu0 %5564, %v125_v8   ;;  %v765_v8 = vld [vmem:[#allocation2 + $0x108] sm:$0xff] }
  0x49   :  { %347 = vperm.xlu2 %5563, %v304_v9   ;;  %256 = vperm.xlu1 %5565, %v225_v10   ;;  %v764_v9 = vld [vmem:[#allocation2 + $0x100] sm:$0xff]  ;;  %v144_v10 = vlaneseq }
  0x4a   :  { %395 = vrot.lane.b32.xlu0 %v5970_v5, %s5859_s19 }
  0x51   :  { %251 = vperm.xlu2 %5563, %v224_v11   ;;  %189 = vperm.xlu1 %5565, %v124_v12  }
  0x52   :  { %342 = vperm.xlu0 %5564, %v303_v13   ;;  %v6085_v13 = vand.u32 127, %v144_v10 }
  0x54   :  { %10334 = vst [vmem:[#allocation18_spill] sm:$0xff] %v6085_v13  ;;  %vm10159_vm2 = vcmp.lt.s32.totalorder %v6085_v13, 17  ;;  %vm10160_vm3 = vcmp.lt.s32.totalorder %v6085_v13, 16  ;;  %vm10381_vm15 = vcmp.lt.s32.totalorder %v6085_v13, 16 }
  0x59   :  { %526 = vrot.lane.b32.xlu2 %v5956_v4, %s5860_s20  ;;  %425 = vperm.xlu1 %5565, %v390_v14  }
  0x5a   :  { %528 = vrot.lane.b32.xlu0 %v5954_v3, %s5860_s20 }
  0x61   :  { %184 = vperm.xlu2 %5563, %v123_v15   ;;  %530 = vrot.lane.b32.xlu1 %v5970_v5, %s5860_s20  ;;  %v153_v15 = vadd.s32 384, %v6085_v13 }
  0x62   :  { %246 = vperm.xlu0 %5564, %v223_v16   ;;  %v846_v16 = vld [vmem:[%s10147_s2 + $0x8] sm:$0xff] }
  0x69   :  { %420 = vperm.xlu2 %5563, %v389_v17   ;;  %337 = vperm.xlu1 %5565, %v302_v18   ;;  %v847_v17 = vld [vmem:[%s10147_s2 + $0x10] sm:$0xff]  ;;  %v151_v18 = vadd.s32 128, %v6085_v13 }
  0x6a   :  { %486 = vperm.xlu0 %5564, %v468_v19   ;;  %v845_v19 = vld [vmem:[%s10147_s2] sm:$0xff] }
  0x71   :  { %604 = vrot.lane.b32.xlu2 %v5956_v4, %s5861_s21  ;;  %532 = vrot.lane.b32.xlu1 %v5952_v2, %s5860_s20 }
  0x72   :  { %606 = vrot.lane.b32.xlu0 %v5954_v3, %s5861_s21 }
  0x73   :  { %v6004_v20 = vpop.permute.xlu2 %229 }
  0x79   :  { %332 = vperm.xlu2 %5563, %v301_v21   ;;  %608 = vrot.lane.b32.xlu1 %v5970_v5, %s5861_s21  ;;  %v158_v21 = vshra.s32 %v6085_v13, 4 }
  0x7a   :  { %415 = vperm.xlu0 %5564, %v388_v22   ;;  %v152_v22 = vadd.s32 256, %v6085_v13 }
  0x7b   :  { %v6008_v23 = vpop.permute.xlu2 %233 }
  0x81   :  { %560 = vperm.xlu2 %5563, %v525_v24   ;;  %481 = vperm.xlu1 %5565, %v467_v25   ;;  %v161_v24 = vshra.s32 %v153_v15, 4  ;;  %v159_v25 = vshra.s32 %v151_v18, 4 }
  0x82   :  { %610 = vrot.lane.b32.xlu0 %v5952_v2, %s5861_s21 }
  0x83   :  { %v6012_v26 = vpop.permute.xlu2 %305 }
  0x89   :  { %692 = vrot.lane.b32.xlu2 %v5954_v3, %s5862_s22  ;;  %690 = vrot.lane.b32.xlu1 %v5956_v4, %s5862_s22 }
  0x8a   :  { %694 = vrot.lane.b32.xlu0 %v5970_v5, %s5862_s22 }
  0x8b   :  { %v6020_v27 = vpop.permute.xlu1 %142  ;;  %v6022_v28 = vpop.permute.xlu2 %199 }
  0x8c   :  { %v6024_v29 = vpop.permute.xlu0 %136 }
  0x8d   :  { %v150_v10 = vsel %vm10159_vm2, %v6020_v27, %v6024_v29 }
  0x91   :  { %476 = vperm.xlu2 %5563, %v466_v30   ;;  %410 = vperm.xlu1 %5565, %v387_v31  }
  0x92   :  { %555 = vperm.xlu0 %5564, %v524_v32   ;;  %v154_v32 = vand.u32 15, %v6085_v13 }
  0x93   :  { %v6026_v33 = vpop.permute.xlu2 %391  ;;  %v6028_v34 = vpop.permute.xlu1 %227 }
  0x94   :  { %v6030_v35 = vpop.permute.xlu0 %138  ;;  %vm6115_vm0 = vcmp.ge.s32.totalorder %v154_v32, 1  ;;  %vm6166_vm11 = vcmp.lt.s32.totalorder %v154_v32, 15 }
  0x99   :  { %696 = vrot.lane.b32.xlu2 %v5952_v2, %s5862_s22  ;;  %646 = vperm.xlu1 %5565, %v603_v36   ;;  %v6107_v36 = vand.u32 15, %v158_v21  ;;  %v149_v21 = vsel %vm10159_vm2, %v6024_v29, %v6030_v35  ;;  %v10369_v29 = vmov 0 }
  0x9a   :  { %768 = vrot.lane.b32.xlu0 %v5956_v4, %s5863_s3 }
  0x9b   :  { %v6036_v37 = vpop.permute.xlu2 %397  ;;  %v6038_v38 = vpop.permute.xlu1 %231  ;;  %10335 = vst [vmem:[#allocation19_spill] sm:$0xff] %v6107_v36  ;;  %vm10163_vm1 = vcmp.ge.s32.totalorder %v6107_v36, 1 }
  0x9c   :  { %v6040_v39 = vpop.permute.xlu0 %140  ;;  %vm6137_vm7 = vmand %vm6115_vm0, %vm10163_vm1 }
  0xa1   :  { %772 = vrot.lane.b32.xlu2 %v5970_v5, %s5863_s3  ;;  %770 = vrot.lane.b32.xlu1 %v5954_v3, %s5863_s3 }
  0xa2   :  { %471 = vperm.xlu0 %5564, %v465_v40  }
  0xa3   :  { %v6046_v41 = vpop.permute.xlu2 %347  ;;  %v6048_v42 = vpop.permute.xlu1 %311 }
  0xa4   :  { %v6050_v43 = vpop.permute.xlu0 %307 }
  0xa9   :  { %641 = vperm.xlu2 %5563, %v602_v44   ;;  %550 = vperm.xlu1 %5565, %v523_v45   ;;  %v155_v44 = vand.u32 15, %v151_v18  ;;  %v160_v45 = vshra.s32 %v152_v22, 4 }
  0xaa   :  { %724 = vperm.xlu0 %5564, %v689_v46   ;;  %v6111_v46 = vand.u32 15, %v161_v24  ;;  %v10366_v24 = vmov 0 }
  0xab   :  { %v6052_v47 = vpop.permute.xlu2 %251  ;;  %v6054_v48 = vpop.permute.xlu1 %309  ;;  %vm6122_vm4 = vcmp.ge.s32.totalorder %v155_v44, 1 }
  0xac   :  { %v6056_v49 = vpop.permute.xlu0 %261  ;;  %10336 = vst [vmem:[#allocation20_spill] sm:$0xff] %v6111_v46  ;;  %vm10161_vm5 = vcmp.ge.s32.totalorder %v6111_v46, 1 }
  0xb1   :  { %545 = vperm.xlu2 %5563, %v522_v50   ;;  %774 = vrot.lane.b32.xlu1 %v5952_v2, %s5863_s3  ;;  %v157_v50 = vand.u32 15, %v153_v15  ;;  %v239_v15 = vsel %vm10160_vm3, %v6008_v23, %v6028_v34 }
  0xb2   :  { %636 = vperm.xlu0 %5564, %v601_v51   ;;  %v6113_v51 = vand.u32 15, %v159_v25  ;;  %v178_v25 = vsel %vm6137_vm7, %v150_v10, 0.0  ;;  %v240_v32 = vsel %vm10163_vm1, %v239_v15, 0.0  ;;  %v237_v15 = vsel %vm10381_vm15, %v6004_v20, %v6038_v38 }
  0xb3   :  { %v6060_v52 = vpop.permute.xlu2 %526  ;;  %v6062_v53 = vpop.permute.xlu1 %393  ;;  %vm6129_vm6 = vcmp.ge.s32.totalorder %v157_v50, 1 }
  0xb4   :  { %v6064_v54 = vpop.permute.xlu0 %194  ;;  %10337 = vst [vmem:[#allocation21_spill] sm:$0xff] %v6113_v51  ;;  %vm10170_vm8 = vcmp.ge.s32.totalorder %v6113_v51, 1  ;;  %vm6185_vm13 = vmand %vm6129_vm6, %vm10161_vm5 }
  0xb5   :  { %vm6162_vm10 = vmand %vm6122_vm4, %vm10170_vm8 }
  0xb6   :  { %vm6215_vm5 = vmand %vm6166_vm11, %vm10163_vm1  ;;  %v179_v10 = vsel %vm6162_vm10, %v149_v21, 0.0  ;;  %vm10382_vm1 = vcmp.lt.s32.totalorder %v6085_v13, 17 }
  0xb9   :  { %806 = vperm.xlu2 %5563, %v767_v55   ;;  %719 = vperm.xlu1 %5565, %v688_v56   ;;  %v156_v55 = vand.u32 15, %v152_v22  ;;  %v10338_v56 = vmov 0  ;;  %v10363_v22 = vmov 0 }
  0xba   :  { %631 = vperm.xlu0 %5564, %v600_v57   ;;  %v10339_v56 = vsel %vm6115_vm0, 4294967295, %v10338_v56  ;;  %v10341_v57 = vmov 0  ;;  %v10364_v22 = vsel %vm6185_vm13, 4294967295, %v10363_v22 }
  0xbb   :  { %v6066_v58 = vpop.permute.xlu2 %184  ;;  %v6068_v59 = vpop.permute.xlu1 %256  ;;  %10340 = vst [vmem:[#allocation22_spill] sm:$0xff] %v10339_v56  ;;  %v10342_v57 = vsel %vm6122_vm4, 4294967295, %v10341_v57  ;;  %vm6142_vm9 = vcmp.ge.s32.totalorder %v156_v55, 1  ;;  %vm6189_vm14 = vcmp.lt.s32.totalorder %v156_v55, 15 }
  0xbc   :  { %v6070_v60 = vpop.permute.xlu0 %395  ;;  %10343 = vst [vmem:[#allocation23_spill] sm:$0xff] %v10342_v57  ;;  %v10367_v24 = vsel %vm6189_vm14, 4294967295, %v10366_v24 }
  0xbd   :  { %10365 = vst [vmem:[#allocation33_spill] sm:$0xff] %v10364_v22 }
  0xbe   :  { %10368 = vst [vmem:[#allocation34_spill] sm:$0xff] %v10367_v24 }
  0xc1   :  { %801 = vperm.xlu2 %5563, %v766_v61   ;;  %714 = vperm.xlu1 %5565, %v687_v62   ;;  %v6126_v61 = vand.u32 15, %v160_v45  ;;  %v10345_v62 = vmov 0  ;;  %v10375_v45 = vmov 0 }
  0xc2   :  { %709 = vperm.xlu0 %5564, %v686_v63   ;;  %v10346_v62 = vsel %vm6129_vm6, 4294967295, %v10345_v62  ;;  %v10348_v63 = vmov 0  ;;  %v10376_v45 = vsel %vm6215_vm5, 4294967295, %v10375_v45 }
  0xc3   :  { %v6072_v0 = vpop.permute.xlu2 %420  ;;  %v6074_v1 = vpop.permute.xlu1 %189  ;;  %10344 = vst [vmem:[#allocation24_spill] sm:$0xff] %v6126_v61  ;;  %v10349_v63 = vsel %vm6137_vm7, 4294967295, %v10348_v63  ;;  %vm10162_vm12 = vcmp.ge.s32.totalorder %v6126_v61, 1  ;;  %vm10383_vm7 = vcmp.ge.s32.totalorder %v6126_v61, 1 }
  0xc4   :  { %v6076_v6 = vpop.permute.xlu0 %342  ;;  %10347 = vst [vmem:[#allocation25_spill] sm:$0xff] %v10346_v62  ;;  %vm6198_vm2 = vmand %vm6142_vm9, %vm10162_vm12  ;;  %vm6219_vm12 = vcmp.lt.s32.totalorder %v155_v44, 15  ;;  %v10384_v44 = vmov 0 }
  0xc5   :  { %10350 = vst [vmem:[#allocation26_spill] sm:$0xff] %v10349_v63  ;;  %v10370_v29 = vsel %vm6198_vm2, 4294967295, %v10369_v29  ;;  %v148_v63 = vsel %vm10382_vm1, %v6030_v35, %v6040_v39  ;;  %v10390_v35 = vmov 0 }
  0xc6   :  { %10371 = vst [vmem:[#allocation35_spill] sm:$0xff] %v10370_v29  ;;  %v180_v2 = vsel %vm6198_vm2, %v148_v63, 0.0 }
  0xc7   :  { %10377 = vst [vmem:[#allocation37_spill] sm:$0xff] %v10376_v45 }
  0xc9   :  { %866 = vperm.xlu2 %5563, %v848_v7   ;;  %796 = vperm.xlu1 %5565, %v765_v8   ;;  %v10351_v7 = vmov 0 }
  0xca   :  { %791 = vperm.xlu0 %5564, %v764_v9   ;;  %v10352_v7 = vsel %vm6142_vm9, 4294967295, %v10351_v7 }
  0xcb   :  { %v6081_v11 = vpop.permute.xlu2 %604  ;;  %v6083_v12 = vpop.permute.xlu1 %425  ;;  %10353 = vst [vmem:[#allocation27_spill] sm:$0xff] %v10352_v7 }
  0xcc   :  { %10333 = vst [vmem:[#allocation17_spill] sm:$0xff] %v6081_v11  ;;  %v6087_v14 = vpop.permute.xlu0 %528 }
  0xd1   :  { %856 = vperm.xlu2 %5563, %v846_v16   ;;  %861 = vperm.xlu1 %5565, %v847_v17   ;;  %v10356_v16 = vmov 0  ;;  %v10359_v17 = vmov 0 }
  0xd2   :  { %851 = vperm.xlu0 %5564, %v845_v19   ;;  %v10357_v16 = vsel %vm6162_vm10, 4294967295, %v10356_v16  ;;  %v10360_v17 = vsel %vm6166_vm11, 4294967295, %v10359_v17  ;;  %v238_v19 = vsel %vm10160_vm3, %v6028_v34, %v6004_v20  ;;  %vm6202_vm3 = vcmp.lt.s32.totalorder %v157_v50, 15  ;;  %vm6239_vm11 = vmand %vm6189_vm14, %vm10383_vm7 }
  0xd3   :  { %v6102_v30 = vpop.permute.xlu2 %332  ;;  %v6104_v31 = vpop.permute.xlu1 %530  ;;  %10358 = vst [vmem:[#allocation30_spill] sm:$0xff] %v10357_v16  ;;  %v10372_v34 = vmov 0  ;;  %v10378_v50 = vmov 0  ;;  %v241_v55 = vsel %vm10170_vm8, %v238_v19, 0.0  ;;  %v10385_v44 = vsel %vm6239_vm11, 4294967295, %v10384_v44  ;;  %vm10387_vm8 = vmmov %vm10381_vm15 }
  0xd4   :  { %v6109_v40 = vpop.permute.xlu0 %246  ;;  %10361 = vst [vmem:[#allocation31_spill] sm:$0xff] %v10360_v17  ;;  %v10373_v34 = vsel %vm6202_vm3, 4294967295, %v10372_v34  ;;  %v10379_v50 = vsel %vm6219_vm12, 4294967295, %v10378_v50  ;;  %v236_v19 = vsel %vm10387_vm8, %v6038_v38, %v6008_v23  ;;  %vm10388_vm15 = vmmov %vm10382_vm1  ;;  %vm10389_vm1 = vcmp.ge.s32.totalorder %v6111_v46, 1 }
  0xd5   :  { %10374 = vst [vmem:[#allocation36_spill] sm:$0xff] %v10373_v34  ;;  %v147_v20 = vsel %vm10388_vm15, %v6040_v39, %v6020_v27  ;;  %vm6255_vm10 = vmand %vm6202_vm3, %vm10389_vm1  ;;  %vm10393_vm7 = vcmp.lt.s32.totalorder %v6085_v13, 15  ;;  %v6267_v38 = vperm.slane %v178_v25, 0  ;;  %v6269_v27 = vperm.slane %v240_v32, 0 }
  0xd6   :  { %10380 = vst [vmem:[#allocation38_spill] sm:$0xff] %v10379_v50  ;;  %v10391_v35 = vsel %vm6255_vm10, 4294967295, %v10390_v35  ;;  %v314_v21 = vsel %vm10393_vm7, %v6054_v48, %v6048_v42  ;;  %vm10394_vm8 = vmmov %vm10393_vm7  ;;  %vm10396_vm1 = vcmp.ge.s32.totalorder %v6113_v51, 1  ;;  %v10397_v16 = vmov 0 }
  0xd7   :  { %10386 = vst [vmem:[#allocation39_spill] sm:$0xff] %v10385_v44  ;;  %v315_v23 = vsel %vm10394_vm8, %v6050_v43, %v6054_v48  ;;  %vm10395_vm15 = vmmov %vm10393_vm7  ;;  %v316_v48 = vsel %vm10393_vm7, %v6012_v26, %v6050_v43  ;;  %v6287_v25 = vperm.slane %v241_v55, 0  ;;  %v6289_v32 = vperm.slane %v179_v10, 0 }
  0xd8   :  { %10392 = vst [vmem:[#allocation40_spill] sm:$0xff] %v10391_v35  ;;  %v317_v39 = vsel %vm10395_vm15, %v6048_v42, %v6012_v26  ;;  %vm6279_vm3 = vmand %vm6219_vm12, %vm10396_vm1  ;;  %vm10400_vm8 = vcmp.ge.s32.totalorder %v6126_v61, 1  ;;  %vm10402_vm15 = vcmp.ge.s32.totalorder %v6111_v46, 1  ;;  %v181_v26 = vsel %vm6185_vm13, %v147_v20, 0.0 }
  0xd9   :  { %v10398_v16 = vsel %vm6279_vm3, 4294967295, %v10397_v16  ;;  %v242_v42 = vsel %vm10400_vm8, %v237_v15, 0.0  ;;  %v328_v43 = vsel %vm6239_vm11, %v315_v23, 0.0  ;;  %v329_v55 = vsel %vm6255_vm10, %v314_v21, 0.0 }
  0xda   :  { %10399 = vst [vmem:[#allocation41_spill] sm:$0xff] %v10398_v16  ;;  %vm10404_vm1 = vcmp.lt.s32.totalorder %v6085_v13, 1  ;;  %v326_v15 = vsel %vm6215_vm5, %v317_v39, 0.0  ;;  %v6317_v20 = vperm.slane %v242_v42, 0  ;;  %v6319_v44 = vperm.slane %v180_v2, 0 }
  0xdb   :  { %v6146_v8 = vpop.permute.xlu2 %560  ;;  %v6148_v9 = vpop.permute.xlu1 %337  ;;  %v403_v63 = vsel %vm10404_vm1, %v6036_v37, %v6026_v33  ;;  %v280_v21 = vmul.f32 %v6269_v27, %v6056_v49  ;;  %v281_v23 = vmul.f32 %v6287_v25, %v6056_v49  ;;  %v6327_v22 = vperm.slane %v181_v26, 0  ;;  %vm10405_vm7 = vmmov %vm10404_vm1 }
  0xdc   :  { %10354 = vst [vmem:[#allocation28_spill] sm:$0xff] %v6146_v8  ;;  %v6170_v18 = vpop.permute.xlu0 %486  ;;  %v243_v8 = vsel %vm10402_vm15, %v236_v19, 0.0  ;;  %v327_v19 = vsel %vm6279_vm3, %v316_v48, 0.0  ;;  %v6329_v29 = vperm.slane %v328_v43, 0  ;;  %v6331_v39 = vperm.slane %v329_v55, 0  ;;  %vm10410_vm15 = vmmov %vm10404_vm1 }
  0xdd   :  { %10355 = vst [vmem:[#allocation29_spill] sm:$0xff] %v6148_v9  ;;  %v6325_v35 = vperm.slane %v243_v8, 0  ;;  %v6333_v45 = vperm.slane %v326_v15, 0  ;;  %v6335_v48 = vperm.slane %v327_v19, 0  ;;  %v218_v2 = vmul.f32 %v6267_v38, %v6022_v28 }
  0xde   :  { %10362 = vst [vmem:[#allocation32_spill] sm:$0xff] %v6170_v18  ;;  %v219_v42 = vmul.f32 %v6289_v32, %v6022_v28  ;;  %v404_v8 = vsel %vm6115_vm0, %v403_v63, 0.0  ;;  %v282_v26 = vmul.f32 %v6317_v20, %v6056_v49  ;;  %v220_v55 = vmul.f32 %v6319_v44, %v6022_v28 }
  0xdf   :  { %v283_v43 = vmul.f32 %v6325_v35, %v6056_v49  ;;  %v296_v15 = vadd.f32 %v280_v21, %v218_v2  ;;  %v368_v16 = vmul.f32 %v6329_v29, %v6046_v41  ;;  %v221_v63 = vmul.f32 %v6327_v22, %v6022_v28 }
  0xe0   :  { %v297_v19 = vadd.f32 %v281_v23, %v219_v42  ;;  %v6363_v21 = vperm.slane %v404_v8, 0  ;;  %v366_v23 = vmul.f32 %v6333_v45, %v6046_v41  ;;  %v367_v2 = vmul.f32 %v6335_v48, %v6046_v41 }
  0xe1   :  { %v272_v28 = vmul.f32 %v6269_v27, %v6052_v47  ;;  %v299_v8 = vadd.f32 %v283_v43, %v221_v63  ;;  %v275_v46 = vmul.f32 %v6325_v35, %v6052_v47  ;;  %v215_v4 = vmul.f32 %v6289_v32, %v6064_v54 }
  0xe2   :  { %10408 = vst [vmem:[#allocation46_spill] sm:$0xff] %v6363_v21  ;;  %v6383_v18 = vadd.f32 %v367_v2, %v297_v19  ;;  %vm10221_vm8 = vcmp.lt.s32.totalorder %v6085_v13, 127  ;;  %v400_v43 = vsel %vm10410_vm15, %v6070_v60, %v6036_v37  ;;  %v207_v19 = vmul.f32 %v6289_v32, %v6066_v58 }
  0xe3   :  { %v6295_v11 = vpop.permute.xlu2 %692  ;;  %v6297_v5 = vpop.permute.xlu1 %532  ;;  %v208_v37 = vmul.f32 %v6319_v44, %v6066_v58  ;;  %v210_v9 = vmul.f32 %v6267_v38, %v6074_v1  ;;  %v211_v34 = vmul.f32 %v6289_v32, %v6074_v1  ;;  %v213_v32 = vmul.f32 %v6327_v22, %v6074_v1 }
  0xe4   :  { %10401 = vst [vmem:[#allocation42_spill] sm:$0xff] %v6295_v11  ;;  %v6307_v10 = vpop.permute.xlu0 %606  ;;  %v369_v11 = vmul.f32 %v6331_v39, %v6046_v41  ;;  %v6381_v41 = vadd.f32 %v366_v23, %v296_v15  ;;  %v206_v15 = vmul.f32 %v6267_v38, %v6066_v58  ;;  %v407_v23 = vsel %vm6129_vm6, %v400_v43, 0.0 }
  0xe5   :  { %10403 = vst [vmem:[#allocation43_spill] sm:$0xff] %v6307_v10  ;;  %v402_v10 = vsel %vm10405_vm7, %v6026_v33, %v6062_v53  ;;  %v273_v33 = vmul.f32 %v6287_v25, %v6052_v47  ;;  %v363_v43 = vmul.f32 %v6335_v48, %v6076_v6  ;;  %vm10414_vm7 = vnez %v10360_v17 }
  0xe6   :  { %v405_v3 = vsel %vm6122_vm4, %v402_v10, 0.0  ;;  %v277_v10 = vmul.f32 %v6287_v25, %v6068_v59  ;;  %vm10437_vm15 = vcmp.lt.s32.totalorder %v6085_v13, 113 }
  0xe8   :  { %v293_v57 = vadd.f32 %v277_v10, %v215_v4  ;;  %v365_v4 = vmul.f32 %v6331_v39, %v6076_v6 }
  0xeb   :  { %v6359_v49 = vpop.permute.xlu2 %476  ;;  %v6361_v56 = vpop.permute.xlu1 %608 }
  0xec   :  { %10406 = vst [vmem:[#allocation44_spill] sm:$0xff] %v6359_v49  ;;  %v6371_v42 = vpop.permute.xlu0 %415  ;;  %v274_v49 = vmul.f32 %v6317_v20, %v6052_v47  ;;  %v276_v47 = vmul.f32 %v6269_v27, %v6068_v59 }
  0xed   :  { %10407 = vst [vmem:[#allocation45_spill] sm:$0xff] %v6361_v56  ;;  %v298_v56 = vadd.f32 %v282_v26, %v220_v55  ;;  %v6391_v26 = vadd.f32 %v369_v11, %v299_v8  ;;  %v6406_v11 = vperm.slane %v405_v3, 0  ;;  %v217_v55 = vmul.f32 %v6327_v22, %v6064_v54 }
  0xee   :  { %10409 = vst [vmem:[#allocation47_spill] sm:$0xff] %v6371_v42  ;;  %v214_v42 = vmul.f32 %v6267_v38, %v6064_v54  ;;  %v362_v3 = vmul.f32 %v6333_v45, %v6076_v6  ;;  %v6452_v38 = vperm.slane %v407_v23, 0  ;;  %v6466_v23 = vadd.f32 %v273_v33, %v211_v34 }
  0xef   :  { %v6389_v61 = vadd.f32 %v368_v16, %v298_v56  ;;  %v401_v56 = vsel %vm10404_vm1, %v6062_v53, %v6070_v60  ;;  %v216_v16 = vmul.f32 %v6319_v44, %v6064_v54  ;;  %v6420_v53 = vmul.f32 %v6327_v22, %v6066_v58 }
  0xf0   :  { %v278_v60 = vmul.f32 %v6317_v20, %v6068_v59  ;;  %v279_v54 = vmul.f32 %v6325_v35, %v6068_v59  ;;  %v406_v63 = vsel %vm6142_vm9, %v401_v56, 0.0  ;;  %v292_v58 = vadd.f32 %v276_v47, %v214_v42 }
  0xf1   :  { %v212_v59 = vmul.f32 %v6319_v44, %v6074_v1  ;;  %v364_v56 = vmul.f32 %v6329_v29, %v6076_v6  ;;  %v6450_v42 = vperm.slane %v406_v63, 0  ;;  %v440_v44 = vmul.f32 %v6363_v21, %v6072_v0 }
  0xf2   :  { %v378_v47 = vadd.f32 %v362_v3, %v292_v58  ;;  %v294_v10 = vadd.f32 %v278_v60, %v216_v16  ;;  %v443_v6 = vmul.f32 %v6452_v38, %v6072_v0  ;;  %v6464_v63 = vadd.f32 %v272_v28, %v210_v9 }
  0xf3   :  { %v6432_v2 = vpop.permute.xlu2 %696  ;;  %v6434_v8 = vpop.permute.xlu1 %481  ;;  %v6468_v1 = vadd.f32 %v274_v49, %v212_v59  ;;  %v379_v22 = vadd.f32 %v363_v43, %v293_v57  ;;  %v6470_v3 = vadd.f32 %v275_v46, %v213_v32  ;;  %v444_v60 = vmul.f32 %v6363_v21, %v6083_v12 }
  0xf4   :  { %10411 = vst [vmem:[#allocation48_spill] sm:$0xff] %v6432_v2  ;;  %v6440_v24 = vpop.permute.xlu0 %610  ;;  %v295_v2 = vadd.f32 %v279_v54, %v217_v55  ;;  %v380_v16 = vadd.f32 %v364_v56, %v294_v10  ;;  %v537_v54 = vsel %vm10221_vm8, %v6060_v52, %v6087_v14  ;;  %v536_v9 = vsel %vm10221_vm8, %v6087_v14, %v6104_v31 }
  0xf5   :  { %10412 = vst [vmem:[#allocation49_spill] sm:$0xff] %v6434_v8  ;;  %v441_v8 = vmul.f32 %v6406_v11, %v6072_v0  ;;  %v268_v57 = vmul.f32 %v6269_v27, %v6109_v40  ;;  %v269_v46 = vmul.f32 %v6287_v25, %v6109_v40  ;;  %v270_v34 = vmul.f32 %v6317_v20, %v6109_v40 }
  0xf6   :  { %10413 = vst [vmem:[#allocation50_spill] sm:$0xff] %v6440_v24  ;;  %v442_v24 = vmul.f32 %v6450_v42, %v6072_v0  ;;  %v381_v55 = vadd.f32 %v365_v4, %v295_v2  ;;  %v6478_v0 = vadd.f32 %v440_v44, %v378_v47  ;;  %v445_v14 = vmul.f32 %v6406_v11, %v6083_v12 }
  0xf7   :  { %v446_v27 = vmul.f32 %v6450_v42, %v6083_v12  ;;  %v447_v25 = vmul.f32 %v6452_v38, %v6083_v12  ;;  %v271_v20 = vmul.f32 %v6325_v35, %v6109_v40  ;;  %v6507_v2 = vadd.f32 %v441_v8, %v379_v22  ;;  %v10419_v22 = vld [vmem:[#allocation24_spill] sm:$0xff] }
  0xf8   :  { %v6509_v58 = vadd.f32 %v442_v24, %v380_v16  ;;  %v6511_v59 = vadd.f32 %v443_v6, %v381_v55  ;;  %v460_v43 = vadd.f32 %v444_v60, %v6381_v41  ;;  %v539_v56 = vsel %vm10414_vm7, %v537_v54, 0.0 }
  0xf9   :  { %v540_v12 = vsel %vm6219_vm12, %v536_v9, 0.0  ;;  %v535_v40 = vsel %vm10221_vm8, %v6104_v31, %v6297_v5  ;;  %v284_v35 = vadd.f32 %v268_v57, %v206_v15  ;;  %v285_v8 = vadd.f32 %v269_v46, %v207_v19  ;;  %v10424_v57 = vld [vmem:[#allocation32_spill] sm:$0xff] }
  0xfa   :  { %v286_v4 = vadd.f32 %v270_v34, %v208_v37  ;;  %v538_v24 = vsel %vm10221_vm8, %v6297_v5, %v6060_v52  ;;  %v461_v41 = vadd.f32 %v445_v14, %v6383_v18  ;;  %v462_v32 = vadd.f32 %v446_v27, %v6389_v61  ;;  %v10425_v34 = vld [vmem:[#allocation14_spill] sm:$0xff] }
  0xfb   :  { %v6492_v49 = vpop.permute.xlu2 %772  ;;  %v6494_v28 = vpop.permute.xlu1 %690  ;;  %v463_v47 = vadd.f32 %v447_v25, %v6391_v26  ;;  %v287_v10 = vadd.f32 %v271_v20, %v6420_v53  ;;  %v354_v44 = vmul.f32 %v6333_v45, %v6102_v30  ;;  %v355_v31 = vmul.f32 %v6335_v48, %v6102_v30  ;;  %v10416_v26 = vld [vmem:[#allocation36_spill] sm:$0xff]  ;;  %v10418_v53 = vld [vmem:[#allocation29_spill] sm:$0xff] }
  0xfc   :  { %v6504_v33 = vpop.permute.xlu0 %694  ;;  %v356_v15 = vmul.f32 %v6329_v29, %v6102_v30  ;;  %v541_v5 = vsel %vm6189_vm14, %v535_v40, 0.0  ;;  %v6538_v52 = vperm.slane %v539_v56, 0  ;;  %v357_v61 = vmul.f32 %v6331_v39, %v6102_v30  ;;  %v10423_v30 = vld [vmem:[#allocation15_spill] sm:$0xff] }
  0xfd   :  { %v6542_v18 = vperm.slane %v540_v12, 0  ;;  %vm10417_vm8 = vnez %v10416_v26  ;;  %v358_v6 = vmul.f32 %v6333_v45, %v10418_v53  ;;  %v6553_v60 = vadd.f32 %v354_v44, %v284_v35  ;;  %v10426_v45 = vld [vmem:[#allocation20_spill] sm:$0xff] }
  0xfe   :  { %v542_v37 = vsel %vm10417_vm8, %v538_v24, 0.0  ;;  %v6555_v54 = vadd.f32 %v355_v31, %v285_v8  ;;  %v6557_v9 = vadd.f32 %v356_v15, %v286_v4  ;;  %v501_v46 = vmul.f32 %v10424_v57, %v10423_v30  ;;  %v10428_v35 = vld [vmem:[#allocation28_spill] sm:$0xff]  ;;  %v10436_v31 = vld [vmem:[#allocation17_spill] sm:$0xff] }
  0xff   :  { %10420 = vst [vmem:[#allocation29_spill] sm:$0xff] %v6553_v60  ;;  %v502_v14 = vmul.f32 %v10424_v57, %v10425_v34  ;;  %v6563_v27 = vperm.slane %v541_v5, 0  ;;  %v6566_v25 = vadd.f32 %v357_v61, %v287_v10  ;;  %v359_v56 = vmul.f32 %v6335_v48, %v10418_v53  ;;  %v10429_v24 = vld [vmem:[#allocation16_spill] sm:$0xff]  ;;  %v10438_v61 = vld [vmem:[#allocation13_spill] sm:$0xff] }
 0x100   :  { %10421 = vst [vmem:[#allocation51_spill] sm:$0xff] %v6555_v54  ;;  %v360_v12 = vmul.f32 %v6329_v29, %v10418_v53  ;;  %v6574_v40 = vperm.slane %v542_v37, 0  ;;  %v579_v8 = vmul.f32 %v6538_v52, %v10428_v35  ;;  %v361_v4 = vmul.f32 %v6331_v39, %v10418_v53  ;;  %v10435_v29 = vld [vmem:[#allocation43_spill] sm:$0xff] }
 0x101   :  { %10422 = vst [vmem:[#allocation52_spill] sm:$0xff] %v6557_v9  ;;  %v503_v10 = vmul.f32 %v10424_v57, %v10429_v24  ;;  %vm10430_vm1 = vcmp.lt.s32.totalorder %v6107_v36, 15  ;;  %v10432_v48 = vmov 0  ;;  %v615_v15 = vsel %vm10437_vm15, %v10436_v31, %v10435_v29  ;;  %v10439_v53 = vld [vmem:[#allocation47_spill] sm:$0xff] }
 0x102   :  { %10427 = vst [vmem:[#allocation15_spill] sm:$0xff] %v6566_v25  ;;  %vm6587_vm10 = vmand %vm6115_vm0, %vm10430_vm1  ;;  %v580_v5 = vmul.f32 %v6542_v18, %v10428_v35  ;;  %v374_v39 = vadd.f32 %v358_v6, %v6464_v63  ;;  %v504_v37 = vmul.f32 %v10424_v57, %v10438_v61  ;;  %v436_v44 = vmul.f32 %v6363_v21, %v10439_v53  ;;  %v10445_v63 = vld [vmem:[#allocation45_spill] sm:$0xff] }
 0x103   :  { %v6549_v16 = vpop.permute.xlu2 %641  ;;  %v6551_v55 = vpop.permute.xlu1 %410  ;;  %v10433_v48 = vsel %vm6587_vm10, 4294967295, %v10432_v48  ;;  %v517_v26 = vadd.f32 %v501_v46, %v460_v43  ;;  %v518_v19 = vadd.f32 %v502_v14, %v461_v41  ;;  %v581_v25 = vmul.f32 %v6563_v27, %v10428_v35 }
 0x104   :  { %v6568_v20 = vpop.permute.xlu0 %555  ;;  %10434 = vst [vmem:[#allocation32_spill] sm:$0xff] %v10433_v48  ;;  %vm10440_vm1 = vcmp.lt.s32.totalorder %v6113_v51, 15  ;;  %v10442_v54 = vmov 0  ;;  %vm10446_vm0 = vcmp.lt.s32.totalorder %v6085_v13, 113  ;;  %v375_v57 = vadd.f32 %v359_v56, %v6466_v23 }
 0x105   :  { %vm6608_vm15 = vmand %vm6122_vm4, %vm10440_vm1  ;;  %v614_v6 = vsel %vm10446_vm0, %v10435_v29, %v10445_v63  ;;  %v376_v43 = vadd.f32 %v360_v12, %v6468_v1  ;;  %v582_v41 = vmul.f32 %v6574_v40, %v10428_v35  ;;  %v625_v46 = vsel %vm6587_vm10, %v615_v15, 0.0  ;;  %v10447_v15 = vld [vmem:[#allocation44_spill] sm:$0xff] }
 0x106   :  { %v10443_v54 = vsel %vm6608_vm15, 4294967295, %v10442_v54  ;;  %v377_v14 = vadd.f32 %v361_v4, %v6470_v3  ;;  %v519_v9 = vadd.f32 %v503_v10, %v462_v32  ;;  %v437_v60 = vmul.f32 %v6406_v11, %v10439_v53 }
 0x107   :  { %10444 = vst [vmem:[#allocation14_spill] sm:$0xff] %v10443_v54  ;;  %v438_v21 = vmul.f32 %v6450_v42, %v10439_v53  ;;  %v520_v29 = vadd.f32 %v504_v37, %v463_v47  ;;  %v626_v23 = vsel %vm6608_vm15, %v614_v6, 0.0  ;;  %v439_v1 = vmul.f32 %v6452_v38, %v10439_v53 }
 0x108   :  { %v452_v56 = vadd.f32 %v436_v44, %v374_v39  ;;  %v6635_v3 = vperm.slane %v625_v46, 0  ;;  %v6637_v32 = vadd.f32 %v579_v8, %v517_v26  ;;  %v6639_v4 = vadd.f32 %v580_v5, %v518_v19 }
 0x109   :  { %v6641_v10 = vadd.f32 %v581_v25, %v519_v9  ;;  %v493_v37 = vmul.f32 %v10447_v15, %v10423_v30  ;;  %v494_v44 = vmul.f32 %v10447_v15, %v10425_v34  ;;  %v495_v39 = vmul.f32 %v10447_v15, %v10429_v24 }
 0x10a   :  { %v6651_v53 = vadd.f32 %v582_v41, %v520_v29  ;;  %v496_v26 = vmul.f32 %v10447_v15, %v10438_v61  ;;  %v6655_v19 = vperm.slane %v626_v23, 0  ;;  %v453_v9 = vadd.f32 %v437_v60, %v375_v57  ;;  %v10456_v41 = vld [vmem:[#allocation50_spill] sm:$0xff] }
 0x10b   :  { %v6631_v12 = vpop.permute.xlu2 %545  ;;  %v6633_v35 = vpop.permute.xlu1 %646  ;;  %v454_v25 = vadd.f32 %v438_v21, %v376_v43  ;;  %vm10448_vm0 = vcmp.lt.s32.totalorder %v10419_v22, 15  ;;  %v10449_v8 = vmov 0  ;;  %v455_v5 = vadd.f32 %v439_v1, %v377_v14  ;;  %v10460_v43 = vld [vmem:[#allocation49_spill] sm:$0xff]  ;;  %v10461_v29 = vld [vmem:[#allocation42_spill] sm:$0xff] }
 0x10c   :  { %v6643_v47 = vpop.permute.xlu0 %768  ;;  %vm6661_vm1 = vmand %vm6142_vm9, %vm10448_vm0  ;;  %vm10452_vm15 = vcmp.lt.s32.totalorder %v10426_v45, 15  ;;  %v10453_v6 = vmov 0  ;;  %vm10457_vm4 = vcmp.lt.s32.totalorder %v6085_v13, 113  ;;  %v6681_v57 = vadd.f32 %v493_v37, %v452_v56 }
 0x10d   :  { %v10450_v8 = vsel %vm6661_vm1, 4294967295, %v10449_v8  ;;  %vm6669_vm10 = vmand %vm6129_vm6, %vm10452_vm15  ;;  %v613_v21 = vsel %vm10457_vm4, %v10445_v63, %v10456_v41  ;;  %v497_v46 = vmul.f32 %v10460_v43, %v10423_v30  ;;  %v498_v14 = vmul.f32 %v10460_v43, %v10425_v34  ;;  %v10463_v63 = vld [vmem:[#allocation48_spill] sm:$0xff] }
 0x10e   :  { %10451 = vst [vmem:[#allocation28_spill] sm:$0xff] %v10450_v8  ;;  %v10454_v6 = vsel %vm6669_vm10, 4294967295, %v10453_v6  ;;  %vm10458_vm0 = vmmov %vm10457_vm4  ;;  %vm10462_vm15 = vcmp.lt.s32.totalorder %v6085_v13, 112  ;;  %v500_v56 = vmul.f32 %v10460_v43, %v10438_v61  ;;  %v6711_v54 = vadd.f32 %v494_v44, %v453_v9 }
 0x10f   :  { %10455 = vst [vmem:[#allocation16_spill] sm:$0xff] %v10454_v6  ;;  %v616_v60 = vsel %vm10458_vm0, %v10456_v41, %v10436_v31  ;;  %v701_v23 = vsel %vm10462_vm15, %v6494_v28, %v10461_v29  ;;  %vm10464_vm4 = vmmov %vm10462_vm15  ;;  %v499_v31 = vmul.f32 %v10460_v43, %v10429_v24  ;;  %v627_v41 = vsel %vm6661_vm1, %v613_v21, 0.0  ;;  %v10480_v6 = vld [vmem:[#allocation46_spill] sm:$0xff] }
 0x110   :  { %10459 = vst [vmem:[#allocation43_spill] sm:$0xff] %v6681_v57  ;;  %v702_v1 = vsel %vm10464_vm4, %v10463_v63, %v6494_v28  ;;  %vm10465_vm0 = vmmov %vm10464_vm4  ;;  %v628_v28 = vsel %vm6669_vm10, %v616_v60, 0.0  ;;  %v6713_v48 = vadd.f32 %v495_v39, %v454_v25  ;;  %vm10469_vm4 = vcmp.lt.s32.totalorder %v6107_v36, 15 }
 0x111   :  { %v699_v15 = vsel %vm10465_vm0, %v6504_v33, %v10463_v63  ;;  %vm10466_vm15 = vmmov %vm10465_vm0  ;;  %10467 = vst [vmem:[#allocation17_spill] sm:$0xff] %v6711_v54  ;;  %v703_v43 = vsel %vm10469_vm4, %v701_v23, 0.0  ;;  %vm10470_vm0 = vcmp.lt.s32.totalorder %v10426_v45, 15  ;;  %v513_v21 = vadd.f32 %v497_v46, %v6478_v0  ;;  %v10483_v54 = vld [vmem:[#allocation52_spill] sm:$0xff] }
 0x112   :  { %v700_v37 = vsel %vm10466_vm15, %v10461_v29, %v6504_v33  ;;  %10468 = vst [vmem:[#allocation13_spill] sm:$0xff] %v6713_v48  ;;  %v706_v63 = vsel %vm10470_vm0, %v702_v1, 0.0  ;;  %vm10261_vm15 = vcmp.lt.s32.totalorder %v6085_v13, 111  ;;  %v6722_v29 = vadd.f32 %v496_v26, %v455_v5  ;;  %vm6742_vm0 = vmand %vm10414_vm7, %vm10469_vm4 }
 0x113   :  { %v6719_v7 = vpop.permute.xlu2 %806  ;;  %v771_v33 = vpop.permute.xlu1 %770  ;;  %v514_v44 = vadd.f32 %v498_v14, %v6507_v2  ;;  %vm10472_vm10 = vcmp.lt.s32.totalorder %v6113_v51, 15  ;;  %vm10473_vm1 = vcmp.lt.s32.totalorder %v10419_v22, 15  ;;  %v515_v60 = vadd.f32 %v499_v31, %v6509_v58 }
 0x114   :  { %10471 = vst [vmem:[#allocation47_spill] sm:$0xff] %v6722_v29  ;;  %v704_v39 = vsel %vm10472_vm10, %v700_v37, 0.0  ;;  %v705_v9 = vsel %vm10473_vm1, %v699_v15, 0.0  ;;  %v6730_v25 = vpop.permute.xlu0 %471  ;;  %v516_v23 = vadd.f32 %v500_v56, %v6511_v59  ;;  %v6734_v1 = vperm.slane %v627_v41, 0  ;;  %vm6754_vm1 = vmand %vm6219_vm12, %vm10472_vm10 }
 0x115   :  { %v6736_v26 = vperm.slane %v628_v28, 0  ;;  %v10474_v0 = vmov 0  ;;  %v6746_v2 = vperm.slane %v703_v43, 0  ;;  %v6748_v5 = vperm.slane %v706_v63, 0 }
 0x116   :  { %v10475_v0 = vsel %vm6742_vm0, 4294967295, %v10474_v0  ;;  %v10477_v58 = vmov 0  ;;  %v778_v59 = vsel %vm10261_vm15, %v771_v33, %v6492_v49  ;;  %v779_v46 = vsel %vm10261_vm15, %v6643_v47, %v771_v33 }
 0x117   :  { %10476 = vst [vmem:[#allocation45_spill] sm:$0xff] %v10475_v0  ;;  %v10478_v58 = vsel %vm6754_vm1, 4294967295, %v10477_v58  ;;  %v6764_v14 = vperm.slane %v704_v39, 0  ;;  %v6766_v31 = vperm.slane %v705_v9, 0  ;;  %v575_v56 = vmul.f32 %v6538_v52, %v6568_v20 }
 0x118   :  { %10479 = vst [vmem:[#allocation44_spill] sm:$0xff] %v10478_v58  ;;  %v576_v15 = vmul.f32 %v6542_v18, %v6568_v20  ;;  %v661_v37 = vmul.f32 %v6635_v3, %v6549_v16  ;;  %v662_v41 = vmul.f32 %v6655_v19, %v6549_v16  ;;  %v577_v28 = vmul.f32 %v6563_v27, %v6568_v20 }
 0x119   :  { %v578_v43 = vmul.f32 %v6574_v40, %v6568_v20  ;;  %v665_v63 = vmul.f32 %v6635_v3, %v6633_v35  ;;  %v666_v33 = vmul.f32 %v6655_v19, %v6633_v35  ;;  %v785_v39 = vsel %vm6742_vm0, %v779_v46, 0.0 }
 0x11a   :  { %v786_v9 = vsel %vm6754_vm1, %v778_v59, 0.0  ;;  %v432_v8 = vmul.f32 %v10480_v6, %v6551_v55  ;;  %v433_v17 = vmul.f32 %v6406_v11, %v6551_v55  ;;  %v434_v20 = vmul.f32 %v6450_v42, %v6551_v55 }
 0x11b   :  { %v435_v50 = vmul.f32 %v6452_v38, %v6551_v55  ;;  %v663_v62 = vmul.f32 %v6734_v1, %v6549_v16  ;;  %v664_v46 = vmul.f32 %v6736_v26, %v6549_v16  ;;  %v591_v0 = vadd.f32 %v575_v56, %v513_v21  ;;  %v6800_v58 = vpop.permute.xlu2 %801  ;;  %v6802_v6 = vpop.permute.xlu1 %550  ;;  %v10481_v21 = vld [vmem:[#allocation29_spill] sm:$0xff]  ;;  %v10482_v56 = vld [vmem:[#allocation51_spill] sm:$0xff] }
 0x11c   :  { %v592_v59 = vadd.f32 %v576_v15, %v514_v44  ;;  %v593_v51 = vadd.f32 %v577_v28, %v515_v60  ;;  %v594_v11 = vadd.f32 %v578_v43, %v516_v23  ;;  %v6804_v36 = vperm.slane %v785_v39, 0  ;;  %v725_v29 = vpop.permute.xlu0 %724  ;;  %v10484_v23 = vld [vmem:[#allocation15_spill] sm:$0xff] }
 0x11d   :  { %v6806_v42 = vperm.slane %v786_v9, 0  ;;  %v681_v38 = vadd.f32 %v665_v63, %v6637_v32  ;;  %v682_v55 = vadd.f32 %v666_v33, %v6639_v4  ;;  %v743_v48 = vmul.f32 %v6746_v2, %v725_v29 }
 0x11e   :  { %v744_v16 = vmul.f32 %v6764_v14, %v725_v29  ;;  %v448_v44 = vadd.f32 %v432_v8, %v10481_v21  ;;  %v449_v15 = vadd.f32 %v433_v17, %v10482_v56  ;;  %v450_v60 = vadd.f32 %v434_v20, %v10483_v54 }
 0x11f   :  { %v451_v28 = vadd.f32 %v435_v50, %v10484_v23  ;;  %v759_v43 = vadd.f32 %v743_v48, %v681_v38  ;;  %v6816_v9 = vadd.f32 %v661_v37, %v591_v0  ;;  %v6818_v57 = vadd.f32 %v662_v41, %v592_v59 }
 0x120   :  { %v760_v39 = vadd.f32 %v744_v16, %v682_v55  ;;  %v825_v32 = vmul.f32 %v6804_v36, %v6719_v7  ;;  %v826_v4 = vmul.f32 %v6806_v42, %v6719_v7  ;;  %v6824_v63 = vadd.f32 %v663_v62, %v593_v51 }
 0x121   :  { %v6826_v8 = vadd.f32 %v664_v46, %v594_v11  ;;  %v567_v17 = vmul.f32 %v6538_v52, %v6631_v12  ;;  %v568_v50 = vmul.f32 %v6542_v18, %v6631_v12  ;;  %v569_v54 = vmul.f32 %v6563_v27, %v6631_v12 }
 0x122   :  { %v489_v48 = vmul.f32 %v6730_v25, %v10423_v30  ;;  %vm10485_vm4 = vcmp.lt.s32.totalorder %v10419_v22, 15  ;;  %v10487_v51 = vmov 0  ;;  %v570_v62 = vmul.f32 %v6574_v40, %v6631_v12 }
 0x123   :  { %vm6840_vm10 = vmand %vm6189_vm14, %vm10485_vm4  ;;  %v667_v37 = vmul.f32 %v6734_v1, %v6633_v35  ;;  %v841_v41 = vadd.f32 %v825_v32, %v759_v43  ;;  %v842_v33 = vadd.f32 %v826_v4, %v760_v39  ;;  %vm10490_vm15 = vcmp.lt.s32.totalorder %v10426_v45, 15  ;;  %v867_v38 = vpop.permute.xlu2 %866  ;;  %v775_v55 = vpop.permute.xlu1 %774 }
 0x124   :  { %v10488_v51 = vsel %vm6840_vm10, 4294967295, %v10487_v51  ;;  %vm6852_vm0 = vmand %vm10417_vm8, %vm10490_vm15  ;;  %v10492_v30 = vmov 0  ;;  %v668_v46 = vmul.f32 %v6736_v26, %v6633_v35  ;;  %v490_v59 = vmul.f32 %v6730_v25, %v10425_v34  ;;  %v637_v35 = vpop.permute.xlu0 %636 }
 0x125   :  { %10489 = vst [vmem:[#allocation50_spill] sm:$0xff] %v10488_v51  ;;  %v10493_v30 = vsel %vm6852_vm0, 4294967295, %v10492_v30  ;;  %v491_v12 = vmul.f32 %v6730_v25, %v10429_v24  ;;  %v492_v11 = vmul.f32 %v6730_v25, %v10438_v61  ;;  %v6864_v16 = vadd.f32 %v867_v38, %v841_v41 }
 0x126   :  { %10494 = vst [vmem:[#allocation49_spill] sm:$0xff] %v10493_v30  ;;  %v6866_v21 = vadd.f32 %v867_v38, %v842_v33  ;;  %vm10495_vm15 = vcmp.lt.s32.totalorder %v6085_v13, 111  ;;  %v505_v23 = vadd.f32 %v489_v48, %v448_v44  ;;  %v745_v24 = vmul.f32 %v6766_v31, %v725_v29 }
 0x127   :  { %v777_v56 = vsel %vm10495_vm15, %v6492_v49, %v775_v55  ;;  %vm10496_vm4 = vmmov %vm10495_vm15  ;;  %v913_v43 = vmin.f32 %v6864_v16, 20.0  ;;  %v684_v44 = vadd.f32 %v668_v46, %v6651_v53  ;;  %v506_v4 = vadd.f32 %v490_v59, %v449_v15 }
 0x128   :  { %v780_v34 = vsel %vm10496_vm4, %v775_v55, %v6643_v47  ;;  %v787_v61 = vsel %vm6840_vm10, %v777_v56, 0.0  ;;  %v914_v39 = vmin.f32 %v6866_v21, 20.0  ;;  %v683_v47 = vadd.f32 %v667_v37, %v6641_v10 }
 0x129   :  { %v788_v25 = vsel %vm6852_vm0, %v780_v34, 0.0  ;;  %v6881_v32 = vperm.slane %v787_v61, 0  ;;  %v746_v48 = vmul.f32 %v6748_v5, %v725_v29  ;;  %v507_v41 = vadd.f32 %v491_v12, %v450_v60 }
 0x12a   :  { %v6883_v49 = vperm.slane %v788_v25, 0  ;;  %v941_v33 = vmul.f32 1.442695, %v913_v43  ;;  %v943_v55 = vmul.f32 1.442695, %v914_v39  ;;  %v508_v34 = vadd.f32 %v492_v11, %v451_v28  ;;  %v10499_v43 = vld [vmem:[#allocation13_spill] sm:$0xff] }
 0x12b   :  { %v827_v56 = vmul.f32 %v6881_v32, %v6719_v7  ;;  %v571_v61 = vmul.f32 %v6538_v52, %v6802_v6  ;;  %v583_v30 = vadd.f32 %v567_v17, %v505_v23  ;;  %v572_v10 = vmul.f32 %v6542_v18, %v6802_v6  ;;  %v720_v52 = vpop.permute.xlu1 %719 }
 0x12c   :  { %v828_v25 = vmul.f32 %v6883_v49, %v6719_v7  ;;  %v573_v53 = vmul.f32 %v6563_v27, %v6802_v6  ;;  %v761_v29 = vadd.f32 %v745_v24, %v683_v47  ;;  %5568 = vpow2.f32 %v941_v33  ;;  %v632_v46 = vpop.permute.xlu0 %631  ;;  %v10497_v27 = vld [vmem:[#allocation43_spill] sm:$0xff] }
 0x12d   :  { %v574_v15 = vmul.f32 %v6574_v40, %v6802_v6  ;;  %v762_v60 = vadd.f32 %v746_v48, %v684_v44  ;;  %5570 = vpow2.f32 %v943_v55  ;;  %v657_v28 = vmul.f32 %v6635_v3, %v637_v35  ;;  %v10498_v6 = vld [vmem:[#allocation17_spill] sm:$0xff] }
 0x12e   :  { %v658_v17 = vmul.f32 %v6655_v19, %v637_v35  ;;  %v584_v37 = vadd.f32 %v568_v50, %v506_v4  ;;  %v585_v7 = vadd.f32 %v569_v54, %v507_v41  ;;  %v843_v59 = vadd.f32 %v827_v56, %v761_v29  ;;  %v10500_v50 = vld [vmem:[#allocation47_spill] sm:$0xff] }
 0x12f   :  { %v821_v18 = vmul.f32 %v6804_v36, %v6800_v58  ;;  %v587_v12 = vadd.f32 %v571_v61, %v10497_v27  ;;  %v586_v11 = vadd.f32 %v570_v62, %v508_v34  ;;  %v844_v23 = vadd.f32 %v828_v25, %v762_v60 }
 0x130   :  { %v822_v40 = vmul.f32 %v6806_v42, %v6800_v58  ;;  %v588_v24 = vadd.f32 %v572_v10, %v10498_v6  ;;  %v589_v39 = vadd.f32 %v573_v53, %v10499_v43  ;;  %v659_v47 = vmul.f32 %v6734_v1, %v637_v35 }
 0x131   :  { %v590_v54 = vadd.f32 %v574_v15, %v10500_v50  ;;  %v660_v44 = vmul.f32 %v6736_v26, %v637_v35  ;;  %v673_v4 = vadd.f32 %v657_v28, %v587_v12  ;;  %v739_v48 = vmul.f32 %v6746_v2, %v720_v52 }
 0x132   :  { %v5569_v41 = vpop.eup %5568  ;;  %v674_v33 = vadd.f32 %v658_v17, %v588_v24  ;;  %v740_v62 = vmul.f32 %v6764_v14, %v720_v52  ;;  %v741_v55 = vmul.f32 %v6766_v31, %v720_v52  ;;  %v6915_v56 = vadd.f32 %v867_v38, %v843_v59 }
 0x133   :  { %v5571_v34 = vpop.eup %5570  ;;  %v742_v61 = vmul.f32 %v6748_v5, %v720_v52  ;;  %v653_v25 = vmul.f32 %v6635_v3, %v632_v46  ;;  %v6919_v10 = vadd.f32 %v867_v38, %v844_v23  ;;  %v961_v53 = vadd.f32 1.0, %v5569_v41  ;;  %v715_v27 = vpop.permute.xlu1 %714 }
 0x134   :  { %v675_v35 = vadd.f32 %v659_v47, %v589_v39  ;;  %v654_v29 = vmul.f32 %v6655_v19, %v632_v46  ;;  %v655_v15 = vmul.f32 %v6734_v1, %v632_v46  ;;  %v823_v60 = vmul.f32 %v6881_v32, %v6800_v58  ;;  %v710_v38 = vpop.permute.xlu0 %709 }
 0x135   :  { %v676_v28 = vadd.f32 %v660_v44, %v590_v54  ;;  %v755_v17 = vadd.f32 %v739_v48, %v6816_v9  ;;  %v656_v59 = vmul.f32 %v6736_v26, %v632_v46  ;;  %5572 = vlog2.f32 %v961_v53 }
 0x136   :  { %v756_v3 = vadd.f32 %v740_v62, %v6818_v57  ;;  %v915_v52 = vmin.f32 %v6915_v56, 20.0  ;;  %v916_v12 = vmin.f32 %v6919_v10, 20.0  ;;  %v962_v19 = vadd.f32 1.0, %v5571_v34 }
 0x137   :  { %v757_v1 = vadd.f32 %v741_v55, %v6824_v63  ;;  %v6932_v23 = vadd.f32 %v742_v61, %v6826_v8  ;;  %v669_v6 = vadd.f32 %v653_v25, %v583_v30  ;;  %v6936_v9 = vmul.f32 %v6883_v49, %v6800_v58 }
 0x138   :  { %v670_v26 = vadd.f32 %v654_v29, %v584_v37  ;;  %v671_v46 = vadd.f32 %v655_v15, %v585_v7  ;;  %v735_v57 = vmul.f32 %v6746_v2, %v715_v27  ;;  %v736_v24 = vmul.f32 %v6764_v14, %v715_v27 }
 0x139   :  { %v672_v43 = vadd.f32 %v656_v59, %v586_v11  ;;  %v737_v39 = vmul.f32 %v6766_v31, %v715_v27  ;;  %v738_v47 = vmul.f32 %v6748_v5, %v715_v27  ;;  %v837_v63 = vadd.f32 %v821_v18, %v755_v17 }
 0x13a   :  { %vm897_vm15 = vcmp.gt.f32.partialorder %v6864_v16, 20.0  ;;  %v838_v8 = vadd.f32 %v822_v40, %v756_v3  ;;  %v945_v30 = vmul.f32 1.442695, %v915_v52  ;;  %v947_v50 = vmul.f32 1.442695, %v916_v12 }
 0x13b   :  { %5574 = vlog2.f32 %v962_v19  ;;  %v5573_v58 = vpop.eup %5572  ;;  %v731_v37 = vmul.f32 %v6746_v2, %v710_v38  ;;  %v732_v7 = vmul.f32 %v6764_v14, %v710_v38  ;;  %v733_v54 = vmul.f32 %v6766_v31, %v710_v38  ;;  %v797_v62 = vpop.permute.xlu1 %796 }
 0x13c   :  { %v839_v44 = vadd.f32 %v823_v60, %v757_v1  ;;  %v751_v11 = vadd.f32 %v735_v57, %v673_v4  ;;  %v752_v48 = vadd.f32 %v736_v24, %v674_v33  ;;  %v734_v41 = vmul.f32 %v6748_v5, %v710_v38  ;;  %v792_v4 = vpop.permute.xlu0 %791 }
 0x13d   :  { %vm898_vm4 = vcmp.gt.f32.partialorder %v6866_v21, 20.0  ;;  %5576 = vpow2.f32 %v945_v30  ;;  %v753_v18 = vadd.f32 %v737_v39, %v675_v35  ;;  %v754_v40 = vadd.f32 %v738_v47, %v676_v28  ;;  %v857_v28 = vpop.permute.xlu2 %856 }
 0x13e   :  { %5578 = vpow2.f32 %v947_v50  ;;  %v990_v55 = vmul.f32 0.6931472, %v5573_v58  ;;  %v817_v34 = vmul.f32 %v6804_v36, %v797_v62  ;;  %v818_v2 = vmul.f32 %v6806_v42, %v797_v62 }
 0x13f   :  { %v819_v14 = vmul.f32 %v6881_v32, %v797_v62  ;;  %v820_v31 = vmul.f32 %v6883_v49, %v797_v62  ;;  %v747_v33 = vadd.f32 %v731_v37, %v669_v6  ;;  %v813_v5 = vmul.f32 %v6804_v36, %v792_v4 }
 0x140   :  { %v814_v61 = vmul.f32 %v6806_v42, %v792_v4  ;;  %v815_v25 = vmul.f32 %v6881_v32, %v792_v4  ;;  %v748_v35 = vadd.f32 %v732_v7, %v670_v26  ;;  %v833_v29 = vadd.f32 %v817_v34, %v751_v11 }
 0x141   :  { %v5575_v53 = vpop.eup %5574  ;;  %v834_v15 = vadd.f32 %v818_v2, %v752_v48  ;;  %v816_v60 = vmul.f32 %v6883_v49, %v792_v4  ;;  %v749_v17 = vadd.f32 %v733_v54, %v671_v46  ;;  %v750_v59 = vadd.f32 %v734_v41, %v672_v43 }
 0x142   :  { %v835_v27 = vadd.f32 %v819_v14, %v753_v18  ;;  %v836_v3 = vadd.f32 %v820_v31, %v754_v40  ;;  %v6956_v52 = vadd.f32 %v857_v28, %v833_v29  ;;  %v992_v36 = vmul.f32 0.6931472, %v5575_v53 }
 0x143   :  { %v5577_v38 = vpop.eup %5576  ;;  %v6958_v12 = vadd.f32 %v857_v28, %v834_v15  ;;  %v6963_v42 = vsel %vm897_vm15, %v6864_v16, %v990_v55  ;;  %v829_v19 = vadd.f32 %v813_v5, %v747_v33  ;;  %v830_v1 = vadd.f32 %v814_v61, %v748_v35  ;;  %v862_v43 = vpop.permute.xlu1 %861 }
 0x144   :  { %v5579_v32 = vpop.eup %5578  ;;  %v831_v49 = vadd.f32 %v815_v25, %v749_v17  ;;  %v963_v6 = vadd.f32 1.0, %v5577_v38  ;;  %v905_v26 = vmin.f32 %v6956_v52, 20.0  ;;  %v832_v57 = vadd.f32 %v816_v60, %v750_v59  ;;  %v852_v7 = vpop.permute.xlu0 %851 }
 0x145   :  { %v906_v46 = vmin.f32 %v6958_v12, 20.0  ;;  %v1049_v24 = vmul.f32 %v6963_v42, %v6963_v42  ;;  %v964_v39 = vadd.f32 1.0, %v5579_v32  ;;  %v6972_v16 = vsel %vm898_vm4, %v6866_v21, %v992_v36 }
 0x146   :  { %5580 = vlog2.f32 %v963_v6  ;;  %v6974_v47 = vadd.f32 %v857_v28, %v835_v27  ;;  %v925_v30 = vmul.f32 1.442695, %v905_v26  ;;  %v6976_v58 = vadd.f32 %v862_v43, %v837_v63 }
 0x147   :  { %v927_v50 = vmul.f32 1.442695, %v906_v46  ;;  %v6978_v37 = vadd.f32 %v862_v43, %v838_v8  ;;  %v6980_v54 = vadd.f32 %v862_v43, %v839_v44  ;;  %v6982_v11 = vadd.f32 %v852_v7, %v829_v19 }
 0x148   :  { %v6984_v48 = vadd.f32 %v852_v7, %v830_v1  ;;  %v6986_v41 = vadd.f32 %v852_v7, %v831_v49  ;;  %5582 = vpow2.f32 %v925_v30  ;;  %v909_v21 = vmin.f32 %v6976_v58, 20.0 }
 0x149   :  { %v910_v18 = vmin.f32 %v6978_v37, 20.0  ;;  %v6990_v40 = vadd.f32 %v852_v7, %v832_v57  ;;  %5584 = vpow2.f32 %v927_v50  ;;  %v911_v63 = vmin.f32 %v6980_v54, 20.0 }
 0x14a   :  { %v901_v8 = vmin.f32 %v6982_v11, 20.0  ;;  %v902_v44 = vmin.f32 %v6984_v48, 20.0  ;;  %v933_v62 = vmul.f32 1.442695, %v909_v21  ;;  %v903_v34 = vmin.f32 %v6986_v41, 20.0 }
 0x14b   :  { %v935_v55 = vmul.f32 1.442695, %v910_v18  ;;  %v904_v2 = vmin.f32 %v6990_v40, 20.0  ;;  %v937_v31 = vmul.f32 1.442695, %v911_v63  ;;  %5586 = vlog2.f32 %v964_v39 }
 0x14c   :  { %v5581_v14 = vpop.eup %5580  ;;  %v917_v4 = vmul.f32 1.442695, %v901_v8  ;;  %v6997_v33 = vadd.f32 %v857_v28, %v836_v3  ;;  %5588 = vpow2.f32 %v933_v62  ;;  %v919_v5 = vmul.f32 1.442695, %v902_v44 }
 0x14d   :  { %v994_v61 = vmul.f32 0.6931472, %v5581_v14  ;;  %v1050_v25 = vmul.f32 %v6972_v16, %v6972_v16  ;;  %5590 = vpow2.f32 %v935_v55  ;;  %v921_v53 = vmul.f32 1.442695, %v903_v34 }
 0x14e   :  { %vm899_vm15 = vcmp.gt.f32.partialorder %v6915_v56, 20.0  ;;  %v1028_v35 = vadd.f32 %v6972_v16, %v6963_v42  ;;  %v5583_v29 = vpop.eup %5582  ;;  %5592 = vpow2.f32 %v937_v31  ;;  %v923_v15 = vmul.f32 1.442695, %v904_v2 }
 0x14f   :  { %v7005_v60 = vsel %vm899_vm15, %v6915_v56, %v994_v61  ;;  %v907_v28 = vmin.f32 %v6974_v47, 20.0  ;;  %v5585_v17 = vpop.eup %5584  ;;  %5594 = vpow2.f32 %v917_v4  ;;  %v908_v27 = vmin.f32 %v6997_v33, 20.0 }
 0x150   :  { %v1051_v59 = vmul.f32 %v7005_v60, %v7005_v60  ;;  %v840_v3 = vadd.f32 %v6936_v9, %v6932_v23  ;;  %5596 = vpow2.f32 %v919_v5  ;;  %v1029_v38 = vadd.f32 %v1028_v35, %v7005_v60 }
 0x151   :  { %v1068_v36 = vadd.f32 %v1050_v25, %v1049_v24  ;;  %v929_v32 = vmul.f32 1.442695, %v907_v28  ;;  %v5587_v19 = vpop.eup %5586  ;;  %5598 = vpow2.f32 %v921_v53  ;;  %v931_v56 = vmul.f32 1.442695, %v908_v27 }
 0x152   :  { %v953_v1 = vadd.f32 1.0, %v5583_v29  ;;  %v7014_v49 = vadd.f32 %v862_v43, %v840_v3  ;;  %v5589_v6 = vpop.eup %5588  ;;  %5600 = vpow2.f32 %v923_v15  ;;  %v996_v26 = vmul.f32 0.6931472, %v5587_v19 }
 0x153   :  { %v954_v46 = vadd.f32 1.0, %v5585_v17  ;;  %v5591_v57 = vpop.eup %5590  ;;  %vm900_vm4 = vcmp.gt.f32.partialorder %v6919_v10, 20.0  ;;  %v1069_v39 = vadd.f32 %v1068_v36, %v1051_v59  ;;  %5602 = vpow2.f32 %v929_v32 }
 0x154   :  { %v912_v23 = vmin.f32 %v7014_v49, 20.0  ;;  %v5593_v9 = vpop.eup %5592  ;;  %v7019_v24 = vsel %vm900_vm4, %v6919_v10, %v996_v26  ;;  %5604 = vpow2.f32 %v931_v56  ;;  %v957_v30 = vadd.f32 1.0, %v5589_v6 }
 0x155   :  { %v958_v50 = vadd.f32 1.0, %v5591_v57  ;;  %v5595_v43 = vpop.eup %5594  ;;  %v1030_v7 = vadd.f32 %v1029_v38, %v7019_v24  ;;  %v1052_v21 = vmul.f32 %v7019_v24, %v7019_v24  ;;  %5606 = vlog2.f32 %v953_v1 }
 0x156   :  { %v939_v18 = vmul.f32 1.442695, %v912_v23  ;;  %v5597_v63 = vpop.eup %5596  ;;  %5608 = vlog2.f32 %v954_v46  ;;  %v959_v8 = vadd.f32 1.0, %v5593_v9  ;;  %v949_v62 = vadd.f32 1.0, %v5595_v43 }
 0x157   :  { %v5599_v44 = vpop.eup %5598  ;;  %1031 = vadd.xlane.f32.xlu1 %v1030_v7  ;;  %v1070_v55 = vadd.f32 %v1069_v39, %v1052_v21  ;;  %v950_v14 = vadd.f32 1.0, %v5597_v63  ;;  %vm889_vm15 = vcmp.gt.f32.partialorder %v6956_v52, 20.0  ;;  %vm890_vm4 = vcmp.gt.f32.partialorder %v6958_v12, 20.0 }
 0x158   :  { %5610 = vpow2.f32 %v939_v18  ;;  %v5601_v10 = vpop.eup %5600  ;;  %v951_v61 = vadd.f32 1.0, %v5599_v44  ;;  %vm891_vm0 = vcmp.gt.f32.partialorder %v6974_v47, 20.0  ;;  %vm893_vm10 = vcmp.gt.f32.partialorder %v6976_v58, 20.0 }
 0x159   :  { %5612 = vlog2.f32 %v957_v30  ;;  %v5603_v34 = vpop.eup %5602  ;;  %1071 = vadd.xlane.f32.xlu0 %v1070_v55  ;;  %v952_v59 = vadd.f32 1.0, %v5601_v10  ;;  %vm895_vm1 = vcmp.gt.f32.partialorder %v6980_v54, 20.0 }
 0x15a   :  { %5614 = vlog2.f32 %v958_v50  ;;  %v5605_v2 = vpop.eup %5604  ;;  %v955_v31 = vadd.f32 1.0, %v5603_v34 }
 0x15b   :  { %5616 = vlog2.f32 %v959_v8  ;;  %v5607_v4 = vpop.eup %5606  ;;  %v956_v5 = vadd.f32 1.0, %v5605_v2 }
 0x15c   :  { %5618 = vlog2.f32 %v949_v62  ;;  %v5609_v25 = vpop.eup %5608  ;;  %v974_v53 = vmul.f32 0.6931472, %v5607_v4 }
 0x15d   :  { %5620 = vlog2.f32 %v955_v31  ;;  %v976_v29 = vmul.f32 0.6931472, %v5609_v25 }
 0x15e   :  { %v5611_v35 = vpop.eup %5610  ;;  %5622 = vlog2.f32 %v956_v5  ;;  %v7029_v28 = vsel %vm889_vm15, %v6956_v52, %v974_v53  ;;  %vm894_vm15 = vcmp.gt.f32.partialorder %v6978_v37, 20.0 }
 0x15f   :  { %v5613_v15 = vpop.eup %5612  ;;  %v960_v17 = vadd.f32 1.0, %v5611_v35  ;;  %5624 = vlog2.f32 %v950_v14  ;;  %v7032_v3 = vsel %vm890_vm4, %v6958_v12, %v976_v29  ;;  %v1041_v32 = vmul.f32 %v7029_v28, %v7029_v28 }
 0x160   :  { %v5615_v27 = vpop.eup %5614  ;;  %v982_v38 = vmul.f32 0.6931472, %v5613_v15  ;;  %5626 = vlog2.f32 %v951_v61  ;;  %v1042_v19 = vmul.f32 %v7032_v3, %v7032_v3  ;;  %vm886_vm4 = vcmp.gt.f32.partialorder %v6984_v48, 20.0 }
 0x161   :  { %v5617_v36 = vpop.eup %5616  ;;  %v984_v52 = vmul.f32 0.6931472, %v5615_v27  ;;  %5628 = vlog2.f32 %v960_v17  ;;  %v1018_v35 = vadd.f32 %v7032_v3, %v7029_v28 }
 0x162   :  { %v5619_v56 = vpop.eup %5618  ;;  %v986_v12 = vmul.f32 0.6931472, %v5617_v36  ;;  %v7042_v1 = vsel %vm893_vm10, %v6976_v58, %v982_v38  ;;  %5630 = vlog2.f32 %v952_v59  ;;  %vm885_vm10 = vcmp.gt.f32.partialorder %v6982_v11, 20.0 }
 0x163   :  { %v5621_v6 = vpop.eup %5620  ;;  %v7045_v26 = vsel %vm894_vm15, %v6978_v37, %v984_v52  ;;  %v1045_v46 = vmul.f32 %v7042_v1, %v7042_v1  ;;  %v966_v57 = vmul.f32 0.6931472, %v5619_v56  ;;  %v1058_v37 = vadd.f32 %v1042_v19, %v1041_v32 }
 0x164   :  { %v5623_v39 = vpop.eup %5622  ;;  %v978_v23 = vmul.f32 0.6931472, %v5621_v6  ;;  %v7050_v9 = vsel %vm895_vm1, %v6980_v54, %v986_v12  ;;  %v1023_v30 = vadd.f32 %v7045_v26, %v7042_v1  ;;  %v1046_v58 = vmul.f32 %v7045_v26, %v7045_v26 }
 0x165   :  { %v5625_v50 = vpop.eup %5624  ;;  %v980_v43 = vmul.f32 0.6931472, %v5623_v39  ;;  %v1047_v54 = vmul.f32 %v7050_v9, %v7050_v9  ;;  %vm10501_vm1 = vcmp.gt.f32.partialorder %v6997_v33, 20.0  ;;  %v7074_v10 = vsel %vm885_vm10, %v6982_v11, %v966_v57 }
 0x166   :  { %v5627_v7 = vpop.eup %5626  ;;  %v7061_v21 = vsel %vm891_vm0, %v6974_v47, %v978_v23  ;;  %v1063_v18 = vadd.f32 %v1046_v58, %v1045_v46  ;;  %v968_v63 = vmul.f32 0.6931472, %v5625_v50  ;;  %v1024_v55 = vadd.f32 %v1023_v30, %v7050_v9 }
 0x167   :  { %v5629_v8 = vpop.eup %5628  ;;  %v7068_v44 = vsel %vm10501_vm1, %v6997_v33, %v980_v43  ;;  %v1043_v62 = vmul.f32 %v7061_v21, %v7061_v21  ;;  %v970_v34 = vmul.f32 0.6931472, %v5627_v7  ;;  %vm896_vm0 = vcmp.gt.f32.partialorder %v7014_v49, 20.0 }
 0x168   :  { %v988_v47 = vmul.f32 0.6931472, %v5629_v8  ;;  %v7077_v2 = vsel %vm886_vm4, %v6984_v48, %v968_v63  ;;  %v5631_v14 = vpop.eup %5630  ;;  %v1044_v31 = vmul.f32 %v7068_v44, %v7068_v44  ;;  %v1064_v33 = vadd.f32 %v1063_v18, %v1047_v54 }
 0x169   :  { %v1059_v4 = vadd.f32 %v1058_v37, %v1043_v62  ;;  %vm887_vm15 = vcmp.gt.f32.partialorder %v6986_v41, 20.0  ;;  %v1037_v11 = vmul.f32 %v7074_v10, %v7074_v10  ;;  %v1038_v48 = vmul.f32 %v7077_v2, %v7077_v2 }
 0x16a   :  { %v7083_v5 = vsel %vm896_vm0, %v7014_v49, %v988_v47  ;;  %v972_v29 = vmul.f32 0.6931472, %v5631_v14  ;;  %v7096_v49 = vsel %vm887_vm15, %v6986_v41, %v970_v34  ;;  %v1019_v59 = vadd.f32 %v1018_v35, %v7061_v21 }
 0x16b   :  { %v1060_v61 = vadd.f32 %v1059_v4, %v1044_v31  ;;  %v1025_v25 = vadd.f32 %v1024_v55, %v7083_v5  ;;  %v1048_v53 = vmul.f32 %v7083_v5, %v7083_v5  ;;  %v1053_v17 = vadd.f32 %v1038_v48, %v1037_v11 }
 0x16c   :  { %vm888_vm10 = vcmp.gt.f32.partialorder %v6990_v40, 20.0  ;;  %v1039_v27 = vmul.f32 %v7096_v49, %v7096_v49  ;;  %v1020_v32 = vadd.f32 %v1019_v59, %v7068_v44  ;;  %v1013_v19 = vadd.f32 %v7077_v2, %v7074_v10 }
 0x16d   :  { %1061 = vadd.xlane.f32.xlu0 %v1060_v61  ;;  %1026 = vadd.xlane.f32.xlu2 %v1025_v25  ;;  %v1065_v15 = vadd.f32 %v1064_v33, %v1048_v53  ;;  %v7103_v38 = vsel %vm888_vm10, %v6990_v40, %v972_v29 }
 0x16e   :  { %v1054_v36 = vadd.f32 %v1053_v17, %v1039_v27  ;;  %v1040_v41 = vmul.f32 %v7103_v38, %v7103_v38  ;;  %v1014_v56 = vadd.f32 %v1013_v19, %v7096_v49 }
 0x16f   :  { %1066 = vadd.xlane.f32.xlu1 %v1065_v15 }
 0x170   :  { %v1055_v52 = vadd.f32 %v1054_v36, %v1040_v41  ;;  %v1015_v12 = vadd.f32 %v1014_v56, %v7103_v38 }
 0x175   :  { %1021 = vadd.xlane.f32.xlu2 %v1020_v32 }
 0x177   :  { %1056 = vadd.xlane.f32.xlu1 %v1055_v52 }
 0x17d   :  { %1016 = vadd.xlane.f32.xlu2 %v1015_v12 }
 0x1ca   :  { %v1032_v6 = vpop.xlane.xlu1 %1031 }
 0x1cb   :  { %v7112_v40 = vmul.f32 0.001953125, %v1032_v6 }
 0x1cc   :  { %v1072_v46 = vpop.xlane.xlu0 %1071 }
 0x1cd   :  { %v1080_v57 = vmul.f32 %v7112_v40, %v7112_v40  ;;  %v1076_v39 = vmul.f32 0.001953125, %v1072_v46  ;;  %v1101_v14 = vsub.f32 %v6963_v42, %v7112_v40  ;;  %v1104_v31 = vsub.f32 %v7019_v24, %v7112_v40 }
 0x1cf   :  { %v1084_v23 = vsub.f32 %v1076_v39, %v1080_v57 }
 0x1d1   :  { %v1088_v30 = vmax.f32 %v1084_v23, 0.0 }
 0x1d3   :  { %v1108_v58 = vadd.f32 1e-05, %v1088_v30 }
 0x1d5   :  { %5632 = vrsqrt.f32 %v1108_v58  ;;  %vm1145_vm1 = vweird.f32 %v1108_v58 }
 0x1db   :  { %v5633_v50 = vpop.eup %5632 }
 0x1dc   :  { %v1140_v43 = vmul.f32 %v5633_v50, %v1108_v58  ;;  %vm1146_vm4 = vweird.f32 %v5633_v50 }
 0x1dd   :  { %vm1147_vm0 = vmor %vm1145_vm1, %vm1146_vm4 }
 0x1de   :  { %v1141_v37 = vmul.f32 %v5633_v50, %v1140_v43 }
 0x1e0   :  { %v1027_v7 = vpop.xlane.xlu2 %1026  ;;  %v1142_v18 = vmul.f32 0.5, %v1141_v37  ;;  %v1062_v25 = vpop.xlane.xlu0 %1061 }
 0x1e1   :  { %v7116_v54 = vmul.f32 0.001953125, %v1027_v7  ;;  %v1074_v42 = vmul.f32 0.001953125, %v1062_v25 }
 0x1e2   :  { %v1067_v63 = vpop.xlane.xlu1 %1066  ;;  %v1143_v8 = vsub.f32 1.5, %v1142_v18 }
 0x1e3   :  { %v1079_v62 = vmul.f32 %v7116_v54, %v7116_v54  ;;  %v1075_v55 = vmul.f32 0.001953125, %v1067_v63  ;;  %v1100_v43 = vsub.f32 %v7083_v5, %v7116_v54 }
 0x1e4   :  { %v1144_v47 = vmul.f32 %v5633_v50, %v1143_v8 }
 0x1e5   :  { %v1083_v34 = vsub.f32 %v1075_v55, %v1079_v62 }
 0x1e6   :  { %v7124_v4 = vsel %vm1147_vm0, %v5633_v50, %v1144_v47  ;;  %v1097_v50 = vsub.f32 %v7042_v1, %v7116_v54 }
 0x1e7   :  { %v1087_v33 = vmax.f32 %v1083_v34, 0.0  ;;  %v7127_v48 = vmul.f32 %v7124_v4, %v1101_v14  ;;  %v7130_v61 = vmul.f32 %v7124_v4, %v1104_v31 }
 0x1e8   :  { %v1022_v11 = vpop.xlane.xlu2 %1021 }
 0x1e9   :  { %v1107_v53 = vadd.f32 1e-05, %v1087_v33  ;;  %v7132_v35 = vmul.f32 0.001953125, %v1022_v11  ;;  %1200 = vrot.lane.b32.xlu0 %v7130_v61, %s5856_s16  ;;  %1176 = vrot.lane.b32.xlu2 %v7127_v48, %s5856_s16 }
 0x1ea   :  { %v1057_v17 = vpop.xlane.xlu1 %1056 }
 0x1eb   :  { %5634 = vrsqrt.f32 %v1107_v53  ;;  %v1078_v24 = vmul.f32 %v7132_v35, %v7132_v35  ;;  %v1073_v19 = vmul.f32 0.001953125, %v1057_v17  ;;  %vm1135_vm10 = vweird.f32 %v1107_v53 }
 0x1ec   :  { %v1093_v5 = vsub.f32 %v7029_v28, %v7132_v35  ;;  %v1096_v34 = vsub.f32 %v7068_v44, %v7132_v35  ;;  %v1102_v44 = vsub.f32 %v6972_v16, %v7112_v40  ;;  %v1103_v16 = vsub.f32 %v7005_v60, %v7112_v40 }
 0x1ed   :  { %v1082_v29 = vsub.f32 %v1074_v42, %v1078_v24  ;;  %v1094_v60 = vsub.f32 %v7032_v3, %v7132_v35 }
 0x1ef   :  { %v1086_v15 = vmax.f32 %v1082_v29, 0.0 }
 0x1f0   :  { %v1017_v59 = vpop.xlane.xlu2 %1016 }
 0x1f1   :  { %v7140_v27 = vmul.f32 0.001953125, %v1017_v59  ;;  %v5635_v36 = vpop.eup %5634  ;;  %v1106_v32 = vadd.f32 1e-05, %v1086_v15  ;;  %v7175_v15 = vmul.f32 %v7124_v4, %v1102_v44 }
 0x1f2   :  { %v1130_v41 = vmul.f32 %v5635_v36, %v1107_v53  ;;  %vm1136_vm15 = vweird.f32 %v5635_v36 }
 0x1f3   :  { %v1077_v52 = vmul.f32 %v7140_v27, %v7140_v27  ;;  %5636 = vrsqrt.f32 %v1106_v32  ;;  %vm1137_vm4 = vmor %vm1135_vm10, %vm1136_vm15  ;;  %vm1125_vm0 = vweird.f32 %v1106_v32  ;;  %v1089_v42 = vsub.f32 %v7074_v10, %v7140_v27 }
 0x1f4   :  { %v1131_v56 = vmul.f32 %v5635_v36, %v1130_v41  ;;  %v1092_v24 = vsub.f32 %v7103_v38, %v7140_v27  ;;  %v1099_v10 = vsub.f32 %v7050_v9, %v7116_v54  ;;  %v1098_v38 = vsub.f32 %v7045_v26, %v7116_v54 }
 0x1f5   :  { %v1081_v12 = vsub.f32 %v1073_v19, %v1077_v52  ;;  %v1090_v26 = vsub.f32 %v7077_v2, %v7140_v27  ;;  %v1095_v9 = vsub.f32 %v7061_v21, %v7132_v35  ;;  %v1091_v3 = vsub.f32 %v7096_v49, %v7140_v27  ;;  %v10503_v27 = vld [vmem:[#allocation26_spill] sm:$0xff] }
 0x1f6   :  { %v1132_v6 = vmul.f32 0.5, %v1131_v56 }
 0x1f7   :  { %v1085_v46 = vmax.f32 %v1081_v12, 0.0 }
 0x1f8   :  { %v1133_v57 = vsub.f32 1.5, %v1132_v6 }
 0x1f9   :  { %v1105_v39 = vadd.f32 1e-05, %v1085_v46  ;;  %v5637_v23 = vpop.eup %5636 }
 0x1fa   :  { %v1134_v30 = vmul.f32 %v5635_v36, %v1133_v57  ;;  %v1120_v58 = vmul.f32 %v5637_v23, %v1106_v32  ;;  %vm1126_vm1 = vweird.f32 %v5637_v23 }
 0x1fb   :  { %5638 = vrsqrt.f32 %v1105_v39  ;;  %vm1127_vm15 = vmor %vm1125_vm0, %vm1126_vm1  ;;  %vm10502_vm0 = vcmp.lt.s32.totalorder %v6085_v13, 17 }
 0x1fc   :  { %v1138_v37 = vsel %vm1137_vm4, %v5635_v36, %v1134_v30  ;;  %v1121_v7 = vmul.f32 %v5637_v23, %v1120_v58  ;;  %vm1115_vm4 = vweird.f32 %v1105_v39  ;;  %v7194_v36 = vmul.f32 %v7124_v4, %v1103_v16 }
 0x1fd   :  { %v7148_v18 = vmul.f32 %v1138_v37, %v1097_v50  ;;  %v7150_v63 = vmul.f32 %v1138_v37, %v1100_v43  ;;  %v7196_v32 = vmul.f32 %v1138_v37, %v1099_v10  ;;  %v7198_v41 = vmul.f32 %v1138_v37, %v1098_v38  ;;  %v7411_v10 = vld [vmem:[#allocation4 + $0x80] sm:$0xff] }
 0x1fe   :  { %v1122_v8 = vmul.f32 0.5, %v1121_v7  ;;  %v7349_v7 = vld [vmem:[#allocation4 + $0x8] sm:$0xff] }
 0x1ff   :  { %1174 = vrot.lane.b32.xlu1 %v7148_v18, %s5856_s16  ;;  %1198 = vrot.lane.b32.xlu0 %v7150_v63, %s5856_s16 }
 0x200   :  { %v1123_v55 = vsub.f32 1.5, %v1122_v8  ;;  %v7351_v8 = vld [vmem:[#allocation4 + $0x10] sm:$0xff] }
 0x201   :  { %v5639_v62 = vpop.eup %5638 }
 0x202   :  { %v1110_v1 = vmul.f32 %v5639_v62, %v1105_v39  ;;  %v1124_v47 = vmul.f32 %v5637_v23, %v1123_v55  ;;  %vm1116_vm10 = vweird.f32 %v5639_v62 }
 0x203   :  { %vm1117_vm1 = vmor %vm1115_vm4, %vm1116_vm10 }
 0x204   :  { %v1111_v14 = vmul.f32 %v5639_v62, %v1110_v1  ;;  %v1128_v31 = vsel %vm1127_vm15, %v5637_v23, %v1124_v47  ;;  %vm10504_vm15 = vnez %v10503_v27  ;;  %vm10505_vm10 = vmmov %vm10502_vm0  ;;  %v7369_v1 = vld [vmem:[#allocation4 + $0x18] sm:$0xff] }
 0x205   :  { %v7160_v33 = vmul.f32 %v1128_v31, %v1093_v5  ;;  %v7162_v11 = vmul.f32 %v1128_v31, %v1096_v34  ;;  %v7212_v40 = vmul.f32 %v1128_v31, %v1094_v60  ;;  %v7216_v4 = vmul.f32 %v1128_v31, %v1095_v9  ;;  %vm10506_vm4 = vmmov %vm10502_vm0 }
 0x206   :  { %v1112_v25 = vmul.f32 0.5, %v1111_v14 }
 0x207   :  { %1196 = vrot.lane.b32.xlu1 %v7162_v11, %s5856_s16  ;;  %1172 = vrot.lane.b32.xlu2 %v7160_v33, %s5856_s16 }
 0x208   :  { %v1113_v53 = vsub.f32 1.5, %v1112_v25 }
 0x20a   :  { %v1114_v28 = vmul.f32 %v5639_v62, %v1113_v53  ;;  %v1242_v53 = vld [vmem:[#allocation4] sm:$0xff] }
 0x20c   :  { %v1118_v29 = vsel %vm1117_vm1, %v5639_v62, %v1114_v28  ;;  %vm10507_vm1 = vmmov %vm10502_vm0  ;;  %v10508_v62 = vld [vmem:[#allocation30_spill] sm:$0xff] }
 0x20d   :  { %v7177_v17 = vmul.f32 %v1118_v29, %v1089_v42  ;;  %v7179_v59 = vmul.f32 %v1118_v29, %v1092_v24  ;;  %v7214_v54 = vmul.f32 %v1118_v29, %v1090_v26  ;;  %v7226_v2 = vmul.f32 %v1118_v29, %v1091_v3 }
 0x20f   :  { %1170 = vrot.lane.b32.xlu0 %v7177_v17, %s5856_s16  ;;  %1184 = vrot.lane.b32.xlu1 %v7175_v15, %s5856_s16 }
 0x210   :  { %1194 = vrot.lane.b32.xlu2 %v7179_v59, %s5856_s16 }
 0x217   :  { %1192 = vrot.lane.b32.xlu0 %v7194_v36, %s5856_s16  ;;  %1190 = vrot.lane.b32.xlu1 %v7196_v32, %s5856_s16 }
 0x218   :  { %1182 = vrot.lane.b32.xlu2 %v7198_v41, %s5856_s16 }
 0x21f   :  { %1178 = vrot.lane.b32.xlu1 %v7214_v54, %s5856_s16  ;;  %1180 = vrot.lane.b32.xlu0 %v7212_v40, %s5856_s16 }
 0x220   :  { %1188 = vrot.lane.b32.xlu2 %v7216_v4, %s5856_s16 }
 0x227   :  { %1525 = vrot.lane.b32.xlu1 %v7194_v36, %s5857_s17  ;;  %1186 = vrot.lane.b32.xlu0 %v7226_v2, %s5856_s16 }
 0x228   :  { %1517 = vrot.lane.b32.xlu2 %v7175_v15, %s5857_s17 }
 0x22f   :  { %1533 = vrot.lane.b32.xlu1 %v7130_v61, %s5857_s17  ;;  %1515 = vrot.lane.b32.xlu0 %v7198_v41, %s5857_s17 }
 0x230   :  { %1523 = vrot.lane.b32.xlu2 %v7196_v32, %s5857_s17 }
 0x237   :  { %1521 = vrot.lane.b32.xlu1 %v7216_v4, %s5857_s17  ;;  %1509 = vrot.lane.b32.xlu0 %v7127_v48, %s5857_s17 }
 0x238   :  { %1513 = vrot.lane.b32.xlu2 %v7212_v40, %s5857_s17 }
 0x23f   :  { %1511 = vrot.lane.b32.xlu1 %v7214_v54, %s5857_s17  ;;  %1531 = vrot.lane.b32.xlu0 %v7150_v63, %s5857_s17 }
 0x240   :  { %1507 = vrot.lane.b32.xlu2 %v7148_v18, %s5857_s17 }
 0x243   :  { %v1177_v21 = vpop.permute.xlu2 %1176 }
 0x247   :  { %1519 = vrot.lane.b32.xlu0 %v7226_v2, %s5857_s17  ;;  %1505 = vrot.lane.b32.xlu1 %v7160_v33, %s5857_s17 }
 0x248   :  { %1529 = vrot.lane.b32.xlu2 %v7162_v11, %s5857_s17 }
 0x24f   :  { %1527 = vrot.lane.b32.xlu0 %v7179_v59, %s5857_s17  ;;  %1738 = vrot.lane.b32.xlu1 %v7175_v15, %s5858_s0 }
 0x250   :  { %1503 = vrot.lane.b32.xlu2 %v7177_v17, %s5857_s17 }
 0x257   :  { %1746 = vrot.lane.b32.xlu0 %v7194_v36, %s5858_s0  ;;  %1744 = vrot.lane.b32.xlu1 %v7196_v32, %s5858_s0 }
 0x258   :  { %1736 = vrot.lane.b32.xlu2 %v7198_v41, %s5858_s0 }
 0x25b   :  { %v7270_v49 = vpop.permute.xlu0 %1200 }
 0x25c   :  { %v1217_v35 = vsel %vm10502_vm0, %v7270_v49, %v1177_v21 }
 0x25d   :  { %5087 = vmatpush.msk.msra.mxu0 %vm10504_vm15, %v1217_v35  ;;  %5533 = vmatpush.msk.msra.mxu1 %vm10504_vm15, %v1217_v35 }
 0x25e   :  { %5534 = vmatpush.msk.msra.mxu2 %vm10504_vm15, %v1217_v35  ;;  %5535 = vmatpush.msk.msra.mxu3 %vm10504_vm15, %v1217_v35 }
 0x25f   :  { %1754 = vrot.lane.b32.xlu0 %v7130_v61, %s5858_s0  ;;  %1734 = vrot.lane.b32.xlu1 %v7212_v40, %s5858_s0 }
 0x260   :  { %1730 = vrot.lane.b32.xlu2 %v7127_v48, %s5858_s0 }
 0x261   :  { %v7289_v19 = vpop.permute.xlu2 %1172 }
 0x267   :  { %1742 = vrot.lane.b32.xlu0 %v7216_v4, %s5858_s0  ;;  %1728 = vrot.lane.b32.xlu1 %v7148_v18, %s5858_s0 }
 0x268   :  { %1752 = vrot.lane.b32.xlu2 %v7150_v63, %s5858_s0 }
 0x26a   :  { %v7297_v52 = vpop.permute.xlu2 %1194 }
 0x26f   :  { %1732 = vrot.lane.b32.xlu0 %v7214_v54, %s5858_s0  ;;  %1750 = vrot.lane.b32.xlu1 %v7162_v11, %s5858_s0 }
 0x270   :  { %1740 = vrot.lane.b32.xlu2 %v7226_v2, %s5858_s0 }
 0x271   :  { %v1175_v56 = vpop.permute.xlu1 %1174  ;;  %v1199_v12 = vpop.permute.xlu0 %1198 }
 0x272   :  { %v1183_v6 = vpop.permute.xlu2 %1182  ;;  %v1216_v46 = vsel %vm10505_vm10, %v1199_v12, %v1175_v56  ;;  %vm10273_vm10 = vcmask 261120  }
 0x273   :  { %5088 = vmatpush.msk.msra.mxu0 %vm10504_vm15, %v1216_v46  ;;  %5536 = vmatpush.msk.msra.mxu1 %vm10504_vm15, %v1216_v46 }
 0x274   :  { %5537 = vmatpush.msk.msra.mxu2 %vm10504_vm15, %v1216_v46  ;;  %5538 = vmatpush.msk.msra.mxu3 %vm10504_vm15, %v1216_v46 }
 0x277   :  { %1726 = vrot.lane.b32.xlu0 %v7160_v33, %s5858_s0  ;;  %1724 = vrot.lane.b32.xlu1 %v7177_v17, %s5858_s0 }
 0x278   :  { %1748 = vrot.lane.b32.xlu2 %v7179_v59, %s5858_s0 }
 0x279   :  { %v1197_v57 = vpop.permute.xlu1 %1196 }
 0x27a   :  { %v1189_v39 = vpop.permute.xlu2 %1188  ;;  %v1215_v23 = vsel %vm10506_vm4, %v1197_v57, %v7289_v19  ;;  %vm10509_vm4 = vnez %v10508_v62  ;;  %v2463_v62 = vld [vmem:[#allocation4 + $0xd8] sm:$0xff] }
 0x27b   :  { %5089 = vmatpush.msk.msra.mxu0 %vm10504_vm15, %v1215_v23  ;;  %5539 = vmatpush.msk.msra.mxu1 %vm10504_vm15, %v1215_v23 }
 0x27c   :  { %5540 = vmatpush.msk.msra.mxu2 %vm10504_vm15, %v1215_v23  ;;  %5541 = vmatpush.msk.msra.mxu3 %vm10504_vm15, %v1215_v23 }
 0x27f   :  { %1959 = vrot.lane.b32.xlu0 %v7175_v15, %s5859_s19  ;;  %1957 = vrot.lane.b32.xlu1 %v7198_v41, %s5859_s19 }
 0x280   :  { %1967 = vrot.lane.b32.xlu2 %v7194_v36, %s5859_s19 }
 0x281   :  { %v1185_v30 = vpop.permute.xlu1 %1184  ;;  %v1171_v58 = vpop.permute.xlu0 %1170 }
 0x282   :  { %v7338_v50 = vpop.permute.xlu2 %1517  ;;  %v1214_v43 = vsel %vm10507_vm1, %v7297_v52, %v1171_v58  ;;  %v1213_v37 = vsel %vm10502_vm0, %v1177_v21, %v1185_v30  ;;  %vm10510_vm1 = vmmov %vm10502_vm0 }
 0x283   :  { %5090 = vmatpush.msk.msra.mxu0 %vm10504_vm15, %v1214_v43  ;;  %5542 = vmatpush.msk.msra.mxu1 %vm10504_vm15, %v1214_v43  ;;  %v1212_v55 = vsel %vm10510_vm1, %v1175_v56, %v1183_v6  ;;  %vm10511_vm1 = vmmov %vm10502_vm0  ;;  %v7452_v56 = vld [vmem:[#allocation4 + $0x88] sm:$0xff] }
 0x284   :  { %5543 = vmatpush.msk.msra.mxu2 %vm10504_vm15, %v1214_v43  ;;  %5544 = vmatpush.msk.msra.mxu3 %vm10504_vm15, %v1214_v43  ;;  %vm10514_vm15 = vmmov %vm10502_vm0 }
 0x285   :  { %5095 = vmatpush.msk.msrb.mxu1 %vm10509_vm4, %v1213_v37  ;;  %1399 = vmatpush.msrb.mxu0 %v7127_v48 }
 0x286   :  { %5092 = vmatmul.msk.f32.vlgmr.msra.gmra.mxu1 %vm10273_vm10, %v7349_v7  ;;  %5093 = vmatmul.msk.f32.vlgmr.msra.gmra.mxu2 %vm10273_vm10, %v7351_v8 }
 0x287   :  { %5096 = vmatpush.msk.msrb.mxu1 %vm10509_vm4, %v1212_v55  ;;  %1400 = vmatpush.msrb.mxu0 %v7148_v18 }
 0x288   :  { %1965 = vrot.lane.b32.xlu0 %v7196_v32, %s5859_s19  ;;  %1951 = vrot.lane.b32.xlu1 %v7127_v48, %s5859_s19 }
 0x289   :  { %1975 = vrot.lane.b32.xlu2 %v7130_v61, %s5859_s19  ;;  %1401 = vmatpush.msrb.mxu0 %v7160_v33  ;;  %v1191_v47 = vpop.permute.xlu1 %1190  ;;  %v1193_v5 = vpop.permute.xlu0 %1192 }
 0x28a   :  { %v7378_v34 = vpop.permute.xlu2 %1523  ;;  %v1209_v14 = vsel %vm10502_vm0, %v1185_v30, %v1193_v5  ;;  %v1205_v31 = vsel %vm10511_vm1, %v1193_v5, %v7270_v49  ;;  %5094 = vmatmul.msk.f32.vlgmr.msra.gmra.mxu3 %vm10273_vm10, %v7369_v1  ;;  %v1208_v44 = vsel %vm10514_vm15, %v1183_v6, %v1191_v47  ;;  %5091 = vmatmul.msk.f32.vlgmr.msra.gmra.mxu0 %vm10273_vm10, %v1242_v53  ;;  %vm10515_vm1 = vmmov %vm10502_vm0  ;;  %v10533_v5 = vld [vmem:[#allocation21_spill] sm:$0xff] }
 0x28b   :  { %1402 = vmatpush.msrb.mxu0 %v7177_v17  ;;  %5103 = vmatpush.msk.msrb.mxu2 %vm6198_vm2, %v1209_v14  ;;  %v1204_v42 = vsel %vm10502_vm0, %v1191_v47, %v1199_v12  ;;  %v1203_v24 = vsel %vm10515_vm1, %v1189_v39, %v1197_v57  ;;  %vm10516_vm15 = vmmov %vm10502_vm0  ;;  %v10531_v47 = vld [vmem:[#allocation19_spill] sm:$0xff]  ;;  %v7523_v14 = vld [vmem:[#allocation4 + $0x98] sm:$0xff] }
 0x28c   :  { %5111 = vmatpush.msk.msrb.mxu3 %vm6185_vm13, %v1205_v31  ;;  %vm10517_vm1 = vmmov %vm10502_vm0 }
 0x28d   :  { %5104 = vmatpush.msk.msrb.mxu2 %vm6198_vm2, %v1208_v44 }
 0x28e   :  { %5112 = vmatpush.msk.msrb.mxu3 %vm6185_vm13, %v1204_v42 }
 0x290   :  { %1955 = vrot.lane.b32.xlu0 %v7212_v40, %s5859_s19  ;;  %1973 = vrot.lane.b32.xlu1 %v7150_v63, %s5859_s19 }
 0x291   :  { %1963 = vrot.lane.b32.xlu2 %v7216_v4, %s5859_s19  ;;  %5113 = vmatpush.msk.msrb.mxu3 %vm6185_vm13, %v1203_v24  ;;  %v1179_v29 = vpop.permute.xlu1 %1178  ;;  %v1181_v16 = vpop.permute.xlu0 %1180 }
 0x292   :  { %v7413_v38 = vpop.permute.xlu2 %1513  ;;  %v1211_v60 = vsel %vm10516_vm15, %v7289_v19, %v1181_v16  ;;  %v1207_v26 = vsel %vm10502_vm0, %v1181_v16, %v1189_v39  ;;  %v1210_v9 = vsel %vm10517_vm1, %v1171_v58, %v1179_v29  ;;  %5119 = vmatmul.msk.f32.vlgmr.msrb.gmra.mxu0 %vm10273_vm10, %v7411_v10  ;;  %vm10518_vm15 = vmmov %vm10502_vm0  ;;  %vm10519_vm1 = vcmp.lt.s32.totalorder %v6085_v13, 16  ;;  %v7481_v39 = vld [vmem:[#allocation4 + $0x90] sm:$0xff] }
 0x293   :  { %5097 = vmatpush.msk.msrb.mxu1 %vm10509_vm4, %v1211_v60  ;;  %5105 = vmatpush.msk.msrb.mxu2 %vm6198_vm2, %v1207_v26 }
 0x295   :  { %5098 = vmatpush.msk.msrb.mxu1 %vm10509_vm4, %v1210_v9 }
 0x296   :  { %5099 = vmatmul.msk.f32.vlgmr.msrb.gmra.mxu1 %vm10273_vm10, %v1242_v53 }
 0x297   :  { %1428 = vmatpush.msra.mxu1 %v7175_v15 }
 0x298   :  { %1949 = vrot.lane.b32.xlu0 %v7148_v18, %s5859_s19  ;;  %1961 = vrot.lane.b32.xlu1 %v7226_v2, %s5859_s19 }
 0x299   :  { %1953 = vrot.lane.b32.xlu2 %v7214_v54, %s5859_s19  ;;  %1429 = vmatpush.msra.mxu1 %v7198_v41  ;;  %v1526_v3 = vpop.permute.xlu1 %1525  ;;  %v1187_v21 = vpop.permute.xlu0 %1186 }
 0x29a   :  { %v7439_v49 = vpop.permute.xlu2 %1507  ;;  %v1206_v35 = vsel %vm10518_vm15, %v1179_v29, %v1187_v21  ;;  %v1202_v19 = vsel %vm10502_vm0, %v1187_v21, %v7297_v52  ;;  %5120 = vmatmul.msk.f32.gmra.mxu0 %vm10273_vm10, %v7452_v56  ;;  %vm10520_vm15 = vmmov %vm10519_vm1  ;;  %vm10521_vm0 = vcmp.ge.s32.totalorder %v10419_v22, 1  ;;  %v1576_v21 = vld [vmem:[#allocation4 + $0x20] sm:$0xff] }
 0x29b   :  { %1430 = vmatpush.msra.mxu1 %v7212_v40  ;;  %5106 = vmatpush.msk.msrb.mxu2 %vm6198_vm2, %v1206_v35  ;;  %v1542_v57 = vsel %vm10520_vm15, %v7338_v50, %v1526_v3  ;;  %vm10525_vm2 = vmmov %vm10521_vm0 }
 0x29c   :  { %5114 = vmatpush.msk.msrb.mxu3 %vm6185_vm13, %v1202_v19  ;;  %5107 = vmatmul.msk.f32.vlgmr.msrb.gmra.mxu2 %vm10273_vm10, %v1242_v53  ;;  %vm10523_vm13 = vcmask 261120  }
 0x29d   :  { %5115 = vmatmul.msk.f32.vlgmr.msrb.gmra.mxu3 %vm10273_vm10, %v1242_v53  ;;  %1431 = vmatpush.msra.mxu1 %v7214_v54  ;;  %vm10524_vm15 = vmmov %vm10523_vm13 }
 0x29e   :  { %1457 = vmatpush.msra.mxu2 %v7194_v36  ;;  %1486 = vmatpush.msra.mxu3 %v7130_v61 }
 0x29f   :  { %5100 = vmatmul.msk.f32.gmra.mxu1 %vm10273_vm10, %v7349_v7  ;;  %vm10522_vm10 = vcmp.ge.s32.totalorder %v10426_v45, 1 }
 0x2a0   :  { %1458 = vmatpush.msra.mxu2 %v7196_v32  ;;  %1487 = vmatpush.msra.mxu3 %v7150_v63 }
 0x2a1   :  { %1971 = vrot.lane.b32.xlu0 %v7162_v11, %s5859_s19  ;;  %1969 = vrot.lane.b32.xlu1 %v7179_v59, %s5859_s19  ;;  %v1534_v52 = vpop.permute.xlu1 %1533  ;;  %v1516_v12 = vpop.permute.xlu0 %1515 }
 0x2a2   :  { %1947 = vrot.lane.b32.xlu2 %v7160_v33, %s5859_s19  ;;  %1459 = vmatpush.msra.mxu2 %v7216_v4  ;;  %v1530_v6 = vpop.permute.xlu2 %1529  ;;  %v1538_v46 = vsel %vm10519_vm1, %v1526_v3, %v1534_v52  ;;  %v1541_v23 = vsel %vm10519_vm1, %v1516_v12, %v7378_v34 }
 0x2a3   :  { %1488 = vmatpush.msra.mxu3 %v7162_v11 }
 0x2a4   :  { %1460 = vmatpush.msra.mxu2 %v7226_v2 }
 0x2a5   :  { %1489 = vmatpush.msra.mxu3 %v7179_v59  ;;  %5108 = vmatmul.msk.f32.gmra.mxu2 %vm10523_vm13, %v7349_v7 }
 0x2a6   :  { %5151 = vmatpush.msk.msrb.mxu2 %vm10521_vm0, %v1542_v57  ;;  %5116 = vmatmul.msk.f32.gmra.mxu3 %vm10524_vm15, %v7349_v7  ;;  %vm10526_vm0 = vmmov %vm10523_vm13  ;;  %vm10535_vm15 = vcmp.ge.s32.totalorder %v10419_v22, 1 }
 0x2a7   :  { %5159 = vmatpush.msk.msrb.mxu3 %vm10522_vm10, %v1538_v46  ;;  %5101 = vmatmul.msk.f32.gmra.mxu1 %vm10526_vm0, %v7351_v8  ;;  %vm10527_vm4 = vmmov %vm10526_vm0  ;;  %v1577_v46 = vld [vmem:[#allocation4 + $0x28] sm:$0xff] }
 0x2a8   :  { %5152 = vmatpush.msk.msrb.mxu2 %vm10525_vm2, %v1541_v23  ;;  %5121 = vmatmul.msk.f32.gmra.mxu0 %vm10527_vm4, %v7481_v39  ;;  %vm10528_vm2 = vmmov %vm10519_vm1  ;;  %vm10532_vm4 = vcmp.ge.s32.totalorder %v10531_v47, 1 }
 0x2a9   :  { %1945 = vrot.lane.b32.xlu0 %v7177_v17, %s5859_s19  ;;  %2196 = vrot.lane.b32.xlu1 %v7130_v61, %s5860_s20  ;;  %v1522_v30 = vpop.permute.xlu1 %1521  ;;  %v1510_v58 = vpop.permute.xlu0 %1509  ;;  %vm10529_vm13 = vmmov %vm10519_vm1 }
 0x2aa   :  { %2188 = vrot.lane.b32.xlu2 %v7194_v36, %s5860_s20  ;;  %v1504_v43 = vpop.permute.xlu2 %1503  ;;  %v1546_v37 = vsel %vm10528_vm2, %v1510_v58, %v7338_v50  ;;  %v1550_v7 = vsel %vm10529_vm13, %v1534_v52, %v1510_v58  ;;  %vm10530_vm10 = vmmov %vm10519_vm1  ;;  %vm10534_vm1 = vcmp.ge.s32.totalorder %v10533_v5, 1  ;;  %vm10538_vm13 = vcmask 261120  }
 0x2ab   :  { %v1540_v55 = vsel %vm10530_vm10, %v7413_v38, %v1522_v30  ;;  %5135 = vmatpush.msk.msra.mxu0 %vm10532_vm4, %v1550_v7  ;;  %5143 = vmatpush.msk.msrb.mxu1 %vm10534_vm1, %v1546_v37  ;;  %vm10536_vm0 = vmmov %vm10528_vm2  ;;  %v1578_v37 = vld [vmem:[#allocation4 + $0x30] sm:$0xff] }
 0x2ac   :  { %5153 = vmatpush.msk.msrb.mxu2 %vm10535_vm15, %v1540_v55  ;;  %v1545_v50 = vsel %vm10536_vm0, %v7439_v49, %v1516_v12  ;;  %vm10537_vm2 = vmmov %vm10534_vm1 }
 0x2ad   :  { %5144 = vmatpush.msk.msrb.mxu1 %vm10537_vm2, %v1545_v50  ;;  %5109 = vmatmul.msk.f32.gmra.mxu2 %vm10538_vm13, %v7351_v8  ;;  %vm10539_vm10 = vmmov %vm10538_vm13  ;;  %vm10543_vm2 = vcmp.ge.s32.totalorder %v10531_v47, 1  ;;  %vm10544_vm13 = vcmp.ge.s32.totalorder %v10426_v45, 1  ;;  %v2460_v50 = vld [vmem:[#allocation4 + $0xc0] sm:$0xff] }
 0x2ae   :  { %5117 = vmatmul.msk.f32.gmra.mxu3 %vm10539_vm10, %v7351_v8  ;;  %vm10540_vm4 = vmmov %vm10539_vm10 }
 0x2af   :  { %5102 = vmatmul.msk.f32.gmra.mxu1 %vm10540_vm4, %v7369_v1  ;;  %vm10541_vm1 = vmmov %vm10540_vm4 }
 0x2b0   :  { %5122 = vmatmul.msk.f32.gmra.mxu0 %vm10541_vm1, %v7523_v14  ;;  %vm10542_vm15 = vmmov %vm10536_vm0 }
 0x2b1   :  { %2172 = vrot.lane.b32.xlu0 %v7127_v48, %s5860_s20  ;;  %2194 = vrot.lane.b32.xlu1 %v7150_v63, %s5860_s20  ;;  %v1512_v31 = vpop.permute.xlu1 %1511  ;;  %v1532_v53 = vpop.permute.xlu0 %1531  ;;  %vm10545_vm10 = vmmov %vm10536_vm0 }
 0x2b2   :  { %2186 = vrot.lane.b32.xlu2 %v7196_v32, %s5860_s20  ;;  %v7539_v44 = vpop.permute.xlu2 %1736  ;;  %v1549_v8 = vsel %vm10542_vm15, %v1532_v53, %v7439_v49  ;;  %v1537_v42 = vsel %vm10536_vm0, %v7378_v34, %v1532_v53  ;;  %v1536_v24 = vsel %vm10545_vm10, %v1522_v30, %v1530_v6  ;;  %vm10546_vm4 = vmmov %vm10544_vm13 }
 0x2b3   :  { %5136 = vmatpush.msk.msra.mxu0 %vm10543_vm2, %v1549_v8  ;;  %5160 = vmatpush.msk.msrb.mxu3 %vm10544_vm13, %v1537_v42  ;;  %vm10547_vm15 = vmmov %vm10541_vm1 }
 0x2b4   :  { %vm10548_vm0 = vmmov %vm10541_vm1 }
 0x2b5   :  { %5161 = vmatpush.msk.msrb.mxu3 %vm10546_vm4, %v1536_v24  ;;  %5110 = vmatmul.msk.f32.gmra.mxu2 %vm10541_vm1, %v7369_v1  ;;  %vm10549_vm2 = vmmov %vm10545_vm10  ;;  %vm10552_vm4 = vcmp.ge.s32.totalorder %v10531_v47, 1  ;;  %vm10553_vm1 = vcmp.ge.s32.totalorder %v10533_v5, 1  ;;  %v1579_v24 = vld [vmem:[#allocation4 + $0x38] sm:$0xff] }
 0x2b6   :  { %5118 = vmatmul.msk.f32.gmra.mxu3 %vm10547_vm15, %v7369_v1  ;;  %vm10550_vm13 = vmmov %vm10549_vm2  ;;  %vm10554_vm15 = vcmp.ge.s32.totalorder %v10419_v22, 1 }
 0x2b7   :  { %5123 = vmatmul.msk.f32.vlgmr.msra.gmra.mxu1 %vm10548_vm0, %v7411_v10  ;;  %vm10551_vm10 = vmmov %vm10549_vm2 }
 0x2b8   :  { %vm10555_vm0 = vmmov %vm10549_vm2 }
 0x2b9   :  { %2170 = vrot.lane.b32.xlu0 %v7148_v18, %s5860_s20  ;;  %2184 = vrot.lane.b32.xlu1 %v7216_v4, %s5860_s20  ;;  %v1506_v34 = vpop.permute.xlu1 %1505  ;;  %v1520_v29 = vpop.permute.xlu0 %1519  ;;  %v1543_v9 = vsel %vm10555_vm0, %v1504_v43, %v1512_v31 }
 0x2ba   :  { %2180 = vrot.lane.b32.xlu2 %v7175_v15, %s5860_s20  ;;  %v1548_v16 = vsel %vm10549_vm2, %v1530_v6, %v1506_v34  ;;  %v1544_v1 = vsel %vm10550_vm13, %v1506_v34, %v7413_v38  ;;  %v1539_v60 = vsel %vm10551_vm10, %v1512_v31, %v1520_v29  ;;  %v1731_v26 = vpop.permute.xlu2 %1730  ;;  %vm10556_vm2 = vmmov %vm10553_vm1  ;;  %vm10557_vm13 = vcmask 261120   ;;  %v10576_v31 = vld [vmem:[#allocation40_spill] sm:$0xff] }
 0x2bb   :  { %5137 = vmatpush.msk.msra.mxu0 %vm10552_vm4, %v1548_v16  ;;  %5145 = vmatpush.msk.msrb.mxu1 %vm10553_vm1, %v1544_v1  ;;  %vm10558_vm10 = vmmov %vm10557_vm13  ;;  %vm10560_vm1 = vcmp.lt.s32.totalorder %v6085_v13, 15 }
 0x2bc   :  { %5154 = vmatpush.msk.msrb.mxu2 %vm10554_vm15, %v1539_v60  ;;  %vm10559_vm4 = vmmov %vm10558_vm10 }
 0x2bd   :  { %5146 = vmatpush.msk.msrb.mxu1 %vm10556_vm2, %v1543_v9  ;;  %5127 = vmatmul.msk.f32.vlgmr.msra.gmra.mxu2 %vm10557_vm13, %v7411_v10  ;;  %vm10561_vm15 = vmmov %vm10555_vm0  ;;  %vm10562_vm2 = vcmp.ge.s32.totalorder %v10531_v47, 1  ;;  %vm10563_vm13 = vcmp.ge.s32.totalorder %v10426_v45, 1 }
 0x2be   :  { %5131 = vmatmul.msk.f32.vlgmr.msra.gmra.mxu3 %vm10558_vm10, %v7411_v10  ;;  %vm10565_vm10 = vmmov %vm10559_vm4 }
 0x2bf   :  { %5124 = vmatmul.msk.f32.gmra.mxu1 %vm10559_vm4, %v7452_v56 }
 0x2c1   :  { %2192 = vrot.lane.b32.xlu0 %v7162_v11, %s5860_s20  ;;  %2178 = vrot.lane.b32.xlu1 %v7198_v41, %s5860_s20  ;;  %v1739_v38 = vpop.permute.xlu1 %1738  ;;  %v1528_v3 = vpop.permute.xlu0 %1527 }
 0x2c2   :  { %2168 = vrot.lane.b32.xlu2 %v7160_v33, %s5860_s20  ;;  %v1767_v49 = vsel %vm10560_vm1, %v1731_v26, %v1739_v38  ;;  %v1547_v10 = vsel %vm10561_vm15, %v1528_v3, %v1504_v43  ;;  %v1535_v35 = vsel %vm10555_vm0, %v1520_v29, %v1528_v3  ;;  %v1753_v19 = vpop.permute.xlu2 %1752  ;;  %vm10566_vm1 = vmmov %vm10559_vm4  ;;  %vm10568_vm0 = vcmp.lt.s32.totalorder %v6085_v13, 15 }
 0x2c3   :  { %5138 = vmatpush.msk.msra.mxu0 %vm10562_vm2, %v1547_v10  ;;  %5162 = vmatpush.msk.msrb.mxu3 %vm10563_vm13, %v1535_v35  ;;  %vm10567_vm15 = vmmov %vm10566_vm1 }
 0x2c4   :  { %5175 = vmatpush.msk.msra.mxu1 %vm6279_vm3, %v1767_v49  ;;  %5139 = vmatmul.msk.f32.vlgmr.msra.gmra.mxu0 %vm10565_vm10, %v1576_v21  ;;  %vm10570_vm2 = vmmov %vm10566_vm1 }
 0x2c5   :  { %5128 = vmatmul.msk.f32.gmra.mxu2 %vm10559_vm4, %v7452_v56  ;;  %vm10571_vm13 = vmmov %vm10568_vm0 }
 0x2c6   :  { %5132 = vmatmul.msk.f32.gmra.mxu3 %vm10566_vm1, %v7452_v56  ;;  %vm10572_vm10 = vmmov %vm10566_vm1 }
 0x2c7   :  { %5125 = vmatmul.msk.f32.gmra.mxu1 %vm10567_vm15, %v7481_v39  ;;  %vm10573_vm4 = vmmov %vm10566_vm1 }
 0x2c8   :  { %vm10574_vm15 = vmmov %vm10568_vm0 }
 0x2c9   :  { %2182 = vrot.lane.b32.xlu0 %v7226_v2, %s5860_s20  ;;  %2166 = vrot.lane.b32.xlu1 %v7177_v17, %s5860_s20  ;;  %v1745_v12 = vpop.permute.xlu1 %1744  ;;  %v1747_v6 = vpop.permute.xlu0 %1746 }
 0x2ca   :  { %2190 = vrot.lane.b32.xlu2 %v7179_v59, %s5860_s20  ;;  %v1763_v57 = vsel %vm10568_vm0, %v1739_v38, %v1747_v6  ;;  %v1741_v23 = vpop.permute.xlu2 %1740  ;;  %v1762_v30 = vsel %vm10571_vm13, %v7539_v44, %v1745_v12  ;;  %vm10578_vm13 = vmmov %vm10566_vm1 }
 0x2cb   :  { %5183 = vmatpush.msk.msra.mxu2 %vm6239_vm11, %v1763_v57 }
 0x2cc   :  { %5140 = vmatmul.msk.f32.gmra.mxu0 %vm10570_vm2, %v1577_v46  ;;  %vm10577_vm2 = vnez %v10576_v31 }
 0x2cd   :  { %5184 = vmatpush.msk.msra.mxu2 %vm6239_vm11, %v1762_v30 }
 0x2ce   :  { %5129 = vmatmul.msk.f32.gmra.mxu2 %vm10572_vm10, %v7481_v39  ;;  %5133 = vmatmul.msk.f32.gmra.mxu3 %vm10573_vm4, %v7481_v39  ;;  %vm10579_vm10 = vmmov %vm10568_vm0 }
 0x2cf   :  { %5126 = vmatmul.msk.f32.gmra.mxu1 %vm10566_vm1, %v7523_v14  ;;  %v1758_v53 = vsel %vm10579_vm10, %v1745_v12, %v1753_v19  ;;  %vm10580_vm4 = vmmov %vm10566_vm1 }
 0x2d0   :  { %vm10583_vm10 = vmmov %vm10568_vm0 }
 0x2d1   :  { %2176 = vrot.lane.b32.xlu0 %v7212_v40, %s5860_s20  ;;  %2409 = vrot.lane.b32.xlu1 %v7194_v36, %s5861_s21  ;;  %v1735_v58 = vpop.permute.xlu1 %1734  ;;  %v1755_v43 = vpop.permute.xlu0 %1754 }
 0x2d2   :  { %2174 = vrot.lane.b32.xlu2 %v7214_v54, %s5860_s20  ;;  %v1749_v7 = vpop.permute.xlu2 %1748  ;;  %v1759_v55 = vsel %vm10574_vm15, %v1747_v6, %v1755_v43  ;;  %v1771_v39 = vsel %vm10568_vm0, %v1755_v43, %v1731_v26  ;;  %vm10581_vm15 = vmmov %vm10566_vm1 }
 0x2d3   :  { %5167 = vmatpush.msk.msrb.mxu0 %vm6215_vm5, %v1771_v39  ;;  %5191 = vmatpush.msk.msra.mxu3 %vm10577_vm2, %v1759_v55 }
 0x2d4   :  { %5141 = vmatmul.msk.f32.gmra.mxu0 %vm10578_vm13, %v1578_v37  ;;  %vm10582_vm13 = vmmov %vm10568_vm0 }
 0x2d5   :  { %5192 = vmatpush.msk.msra.mxu3 %vm10577_vm2, %v1758_v53 }
 0x2d6   :  { %5130 = vmatmul.msk.f32.gmra.mxu2 %vm10580_vm4, %v7523_v14  ;;  %5134 = vmatmul.msk.f32.gmra.mxu3 %vm10566_vm1, %v7523_v14  ;;  %vm10584_vm4 = vmmov %vm10566_vm1 }
 0x2d7   :  { %5147 = vmatmul.msk.f32.vlgmr.msrb.gmra.mxu1 %vm10581_vm15, %v1576_v21  ;;  %vm10585_vm15 = vmmov %vm10566_vm1 }
 0x2d9   :  { %2417 = vrot.lane.b32.xlu0 %v7130_v61, %s5861_s21  ;;  %2407 = vrot.lane.b32.xlu1 %v7196_v32, %s5861_s21  ;;  %v1729_v8 = vpop.permute.xlu1 %1728  ;;  %v1743_v42 = vpop.permute.xlu0 %1742 }
 0x2da   :  { %2393 = vrot.lane.b32.xlu2 %v7127_v48, %s5861_s21  ;;  %v1968_v34 = vpop.permute.xlu2 %1967  ;;  %v1770_v29 = vsel %vm10568_vm0, %v1753_v19, %v1729_v8  ;;  %v1766_v14 = vsel %vm10582_vm13, %v1729_v8, %v7539_v44  ;;  %v1761_v16 = vsel %vm10583_vm10, %v1735_v58, %v1743_v42  ;;  %vm10586_vm0 = vmmov %vm10566_vm1 }
 0x2db   :  { %5168 = vmatpush.msk.msrb.mxu0 %vm6215_vm5, %v1770_v29  ;;  %5176 = vmatpush.msk.msra.mxu1 %vm6279_vm3, %v1766_v14  ;;  %vm10587_vm13 = vmmov %vm10583_vm10  ;;  %v10609_v29 = vld [vmem:[#allocation23_spill] sm:$0xff] }
 0x2dc   :  { %5185 = vmatpush.msk.msra.mxu2 %vm6239_vm11, %v1761_v16  ;;  %5142 = vmatmul.msk.f32.gmra.mxu0 %vm10584_vm4, %v1579_v24  ;;  %vm10588_vm4 = vmmov %vm10583_vm10  ;;  %v1799_v14 = vld [vmem:[#allocation4 + $0x50] sm:$0xff] }
 0x2dd   :  { %v1756_v38 = vsel %vm10588_vm4, %v1741_v23, %v1749_v7 }
 0x2de   :  { %5155 = vmatmul.msk.f32.vlgmr.msrb.gmra.mxu2 %vm10566_vm1, %v1576_v21  ;;  %5163 = vmatmul.msk.f32.vlgmr.msrb.gmra.mxu3 %vm10585_vm15, %v1576_v21  ;;  %vm10589_vm1 = vmmov %vm10586_vm0  ;;  %vm10590_vm15 = vcmp.lt.s32.totalorder %v6085_v13, 1 }
 0x2df   :  { %5148 = vmatmul.msk.f32.gmra.mxu1 %vm10586_vm0, %v1577_v46 }
 0x2e1   :  { %2415 = vrot.lane.b32.xlu0 %v7150_v63, %s5861_s21  ;;  %2401 = vrot.lane.b32.xlu1 %v7175_v15, %s5861_s21  ;;  %v1751_v44 = vpop.permute.xlu1 %1750  ;;  %v1733_v1 = vpop.permute.xlu0 %1732 }
 0x2e2   :  { %2391 = vrot.lane.b32.xlu2 %v7148_v18, %s5861_s21  ;;  %v1760_v26 = vsel %vm10587_vm13, %v1733_v1, %v1741_v23  ;;  %v1757_v9 = vsel %vm10583_vm10, %v1743_v42, %v1751_v44  ;;  %vm10591_vm13 = vmmov %vm10586_vm0 }
 0x2e3   :  { %v1976_v60 = vpop.permute.xlu2 %1975  ;;  %5186 = vmatpush.msk.msra.mxu2 %vm6239_vm11, %v1760_v26  ;;  %5193 = vmatpush.msk.msra.mxu3 %vm10577_vm2, %v1757_v9  ;;  %vm10593_vm10 = vmmov %vm10588_vm4  ;;  %v1800_v9 = vld [vmem:[#allocation4 + $0x58] sm:$0xff] }
 0x2e4   :  { %v1980_v3 = vsel %vm10590_vm15, %v1968_v34, %v1976_v60  ;;  %vm10595_vm15 = vmmov %vm10586_vm0 }
 0x2e5   :  { %5194 = vmatpush.msk.msra.mxu3 %vm10577_vm2, %v1756_v38 }
 0x2e6   :  { %5156 = vmatmul.msk.f32.gmra.mxu2 %vm10589_vm1, %v1577_v46  ;;  %5164 = vmatmul.msk.f32.gmra.mxu3 %vm10586_vm0, %v1577_v46  ;;  %vm10594_vm1 = vmmov %vm10588_vm4  ;;  %v1797_v46 = vld [vmem:[#allocation4 + $0x40] sm:$0xff] }
 0x2e7   :  { %5149 = vmatmul.msk.f32.gmra.mxu1 %vm10591_vm13, %v1578_v37  ;;  %5223 = vmatpush.msk.msrb.mxu3 %vm6129_vm6, %v1980_v3  ;;  %vm10596_vm0 = vmmov %vm10594_vm1 }
 0x2e9   :  { %2405 = vrot.lane.b32.xlu0 %v7216_v4, %s5861_s21  ;;  %2389 = vrot.lane.b32.xlu1 %v7160_v33, %s5861_s21  ;;  %v1725_v49 = vpop.permute.xlu1 %1724  ;;  %v1727_v10 = vpop.permute.xlu0 %1726 }
 0x2ea   :  { %2413 = vrot.lane.b32.xlu2 %v7162_v11, %s5861_s21  ;;  %v1769_v19 = vsel %vm10593_vm10, %v1751_v44, %v1727_v10  ;;  %v1765_v12 = vsel %vm10588_vm4, %v1727_v10, %v1735_v58  ;;  %v1768_v6 = vsel %vm10594_vm1, %v1749_v7, %v1725_v49  ;;  %v1764_v57 = vsel %vm10596_vm0, %v1725_v49, %v1733_v1  ;;  %vm10597_vm10 = vmmov %vm10591_vm13  ;;  %v1798_v7 = vld [vmem:[#allocation4 + $0x48] sm:$0xff] }
 0x2eb   :  { %v7715_v35 = vpop.permute.xlu2 %1963  ;;  %5169 = vmatpush.msk.msrb.mxu0 %vm6215_vm5, %v1769_v19  ;;  %5177 = vmatpush.msk.msra.mxu1 %vm6279_vm3, %v1765_v12  ;;  %vm10598_vm4 = vmmov %vm10597_vm10  ;;  %vm10599_vm1 = vcmp.lt.s32.totalorder %v6085_v13, 1 }
 0x2ec   :  { %vm10602_vm0 = vmmov %vm10598_vm4 }
 0x2ed   :  { %5170 = vmatpush.msk.msrb.mxu0 %vm6215_vm5, %v1768_v6  ;;  %5178 = vmatpush.msk.msra.mxu1 %vm6279_vm3, %v1764_v57 }
 0x2ee   :  { %5157 = vmatmul.msk.f32.gmra.mxu2 %vm10595_vm15, %v1578_v37  ;;  %5165 = vmatmul.msk.f32.gmra.mxu3 %vm10591_vm13, %v1578_v37  ;;  %vm10601_vm15 = vmmov %vm10598_vm4 }
 0x2ef   :  { %5150 = vmatmul.msk.f32.gmra.mxu1 %vm10597_vm10, %v1579_v24  ;;  %5171 = vmatmul.msk.f32.vlgmr.msrb.gmra.mxu0 %vm10598_vm4, %v1797_v46  ;;  %vm10603_vm13 = vmmov %vm10602_vm0 }
 0x2f0   :  { %vm10604_vm10 = vmmov %vm10602_vm0 }
 0x2f1   :  { %2399 = vrot.lane.b32.xlu0 %v7198_v41, %s5861_s21  ;;  %2411 = vrot.lane.b32.xlu1 %v7179_v59, %s5861_s21  ;;  %v1958_v23 = vpop.permute.xlu1 %1957  ;;  %v1960_v30 = vpop.permute.xlu0 %1959  ;;  %vm10605_vm4 = vmmov %vm10599_vm1 }
 0x2f2   :  { %2403 = vrot.lane.b32.xlu2 %v7226_v2, %s5861_s21  ;;  %v1984_v43 = vsel %vm10599_vm1, %v1960_v30, %v1968_v34  ;;  %v10607_v34 = vld [vmem:[#allocation22_spill] sm:$0xff] }
 0x2f3   :  { %v7743_v58 = vpop.permute.xlu2 %1953  ;;  %5215 = vmatpush.msk.msrb.mxu2 %vm6142_vm9, %v1984_v43 }
 0x2f6   :  { %5158 = vmatmul.msk.f32.gmra.mxu2 %vm10601_vm15, %v1579_v24  ;;  %5166 = vmatmul.msk.f32.gmra.mxu3 %vm10602_vm0, %v1579_v24  ;;  %vm10606_vm15 = vmmov %vm10599_vm1  ;;  %vm10608_vm0 = vnez %v10607_v34 }
 0x2f7   :  { %5172 = vmatmul.msk.f32.gmra.mxu0 %vm10603_vm13, %v1798_v7  ;;  %5179 = vmatmul.msk.f32.vlgmr.msra.gmra.mxu1 %vm10604_vm10, %v1797_v46  ;;  %vm10610_vm13 = vnez %v10609_v29 }
 0x2f9   :  { %2387 = vrot.lane.b32.xlu0 %v7177_v17, %s5861_s21  ;;  %2395 = vrot.lane.b32.xlu1 %v7214_v54, %s5861_s21 }
 0x2fa   :  { %2397 = vrot.lane.b32.xlu2 %v7212_v40, %s5861_s21  ;;  %v1952_v55 = vpop.permute.xlu1 %1951  ;;  %v1966_v39 = vpop.permute.xlu0 %1965 }
 0x2fb   :  { %v1988_v53 = vsel %vm10605_vm4, %v1952_v55, %v1960_v30  ;;  %v1992_v8 = vsel %vm10599_vm1, %v1976_v60, %v1952_v55  ;;  %v1983_v42 = vsel %vm10606_vm15, %v1958_v23, %v1966_v39  ;;  %vm10611_vm4 = vmmov %vm10604_vm10 }
 0x2fc   :  { %v1948_v24 = vpop.permute.xlu2 %1947  ;;  %5199 = vmatpush.msk.msra.mxu0 %vm10608_vm0, %v1992_v8  ;;  %5207 = vmatpush.msk.msrb.mxu1 %vm10610_vm13, %v1988_v53  ;;  %vm10612_vm2 = vmmov %vm10611_vm4 }
 0x2fd   :  { %5216 = vmatpush.msk.msrb.mxu2 %vm6142_vm9, %v1983_v42  ;;  %vm10613_vm1 = vmmov %vm10612_vm2 }
 0x2fe   :  { %5187 = vmatmul.msk.f32.vlgmr.msra.gmra.mxu2 %vm10604_vm10, %v1797_v46  ;;  %5195 = vmatmul.msk.f32.vlgmr.msra.gmra.mxu3 %vm10611_vm4, %v1797_v46  ;;  %vm10614_vm10 = vmmov %vm10606_vm15 }
 0x2ff   :  { %5173 = vmatmul.msk.f32.gmra.mxu0 %vm10612_vm2, %v1799_v14  ;;  %5180 = vmatmul.msk.f32.gmra.mxu1 %vm10613_vm1, %v1798_v7  ;;  %vm10615_vm2 = vmmov %vm10613_vm1 }
 0x300   :  { %vm10616_vm4 = vmmov %vm10613_vm1 }
 0x301   :  { %2630 = vrot.lane.b32.xlu0 %v7194_v36, %s5862_s22  ;;  %2614 = vrot.lane.b32.xlu1 %v7127_v48, %s5862_s22  ;;  %vm10617_vm11 = vmmov %vm10613_vm1 }
 0x302   :  { %2638 = vrot.lane.b32.xlu2 %v7130_v61, %s5862_s22  ;;  %v1974_v16 = vpop.permute.xlu1 %1973  ;;  %v1956_v44 = vpop.permute.xlu0 %1955 }
 0x303   :  { %v1982_v1 = vsel %vm10606_vm15, %v1956_v44, %v7715_v35  ;;  %v1979_v60 = vsel %vm10614_vm10, %v1966_v39, %v1974_v16  ;;  %v7798_v38 = vpop.f32.mrf.mxu1  ;;  %vm10618_vm15 = vmmov %vm10614_vm10 }
 0x304   :  { %v2189_v26 = vpop.permute.xlu2 %2188  ;;  %5217 = vmatpush.msk.msrb.mxu2 %vm6142_vm9, %v1982_v1  ;;  %5224 = vmatpush.msk.msrb.mxu3 %vm6129_vm6, %v1979_v60 }
 0x306   :  { %5188 = vmatmul.msk.f32.gmra.mxu2 %vm10615_vm2, %v1798_v7  ;;  %5196 = vmatmul.msk.f32.gmra.mxu3 %vm10616_vm4, %v1798_v7  ;;  %vm10620_vm2 = vmmov %vm10614_vm10 }
 0x307   :  { %5174 = vmatmul.msk.f32.gmra.mxu0 %vm10613_vm1, %v1800_v9  ;;  %5181 = vmatmul.msk.f32.gmra.mxu1 %vm10617_vm11, %v1799_v14  ;;  %vm10619_vm11 = vmmov %vm10614_vm10  ;;  %v1986_v46 = vsel %vm10620_vm2, %v1948_v24, %v1956_v44 }
 0x308   :  { %vm10621_vm4 = vmmov %vm10613_vm1 }
 0x309   :  { %2628 = vrot.lane.b32.xlu0 %v7196_v32, %s5862_s22  ;;  %2612 = vrot.lane.b32.xlu1 %v7148_v18, %s5862_s22  ;;  %v7841_v39 = vpop.f32.mrf.mxu2 }
 0x30a   :  { %2636 = vrot.lane.b32.xlu2 %v7150_v63, %s5862_s22  ;;  %v1962_v3 = vpop.permute.xlu1 %1961  ;;  %v1950_v49 = vpop.permute.xlu0 %1949 }
 0x30b   :  { %v1991_v10 = vsel %vm10618_vm15, %v1974_v16, %v1950_v49  ;;  %v1987_v19 = vsel %vm10614_vm10, %v1950_v49, %v1958_v23  ;;  %v1981_v12 = vsel %vm10619_vm11, %v7743_v58, %v1962_v3  ;;  %vm10622_vm15 = vmmov %vm10613_vm1 }
 0x30c   :  { %v7809_v6 = vpop.permute.xlu2 %2186  ;;  %5200 = vmatpush.msk.msra.mxu0 %vm10608_vm0, %v1991_v10  ;;  %5208 = vmatpush.msk.msrb.mxu1 %vm10610_vm13, %v1987_v19  ;;  %vm10623_vm10 = vmmov %vm10620_vm2  ;;  %v2019_v19 = vld [vmem:[#allocation4 + $0x68] sm:$0xff] }
 0x30d   :  { %5218 = vmatpush.msk.msrb.mxu2 %vm6142_vm9, %v1981_v12  ;;  %vm10624_vm11 = vmmov %vm10620_vm2  ;;  %v7844_v53 = vpop.f32.mrf.mxu3 }
 0x30e   :  { %5189 = vmatmul.msk.f32.gmra.mxu2 %vm10621_vm4, %v1799_v14  ;;  %5209 = vmatpush.msk.msrb.mxu1 %vm10610_vm13, %v1986_v46  ;;  %vm10625_vm2 = vmmov %vm10613_vm1 }
 0x30f   :  { %5197 = vmatmul.msk.f32.gmra.mxu3 %vm10613_vm1, %v1799_v14  ;;  %5182 = vmatmul.msk.f32.gmra.mxu1 %vm10622_vm15, %v1800_v9  ;;  %vm10626_vm4 = vmmov %vm10613_vm1  ;;  %vm10628_vm15 = vcmp.lt.s32.totalorder %v6085_v13, 127 }
 0x310   :  { %vm10627_vm1 = vmmov %vm10623_vm10 }
 0x311   :  { %2622 = vrot.lane.b32.xlu0 %v7175_v15, %s5862_s22  ;;  %2634 = vrot.lane.b32.xlu1 %v7162_v11, %s5862_s22 }
 0x312   :  { %2626 = vrot.lane.b32.xlu2 %v7216_v4, %s5862_s22 }
 0x313   :  { %v1970_v57 = vpop.permute.xlu1 %1969  ;;  %v1972_v23 = vpop.permute.xlu0 %1971 }
 0x314   :  { %v2181_v30 = vpop.permute.xlu2 %2180  ;;  %v7830_v43 = vpop.f32.mrf.mxu1  ;;  %v1990_v7 = vsel %vm10623_vm10, %v1972_v23, %v1948_v24  ;;  %v1978_v55 = vsel %vm10624_vm11, %v7715_v35, %v1972_v23  ;;  %v1977_v8 = vsel %vm10627_vm1, %v1962_v3, %v1970_v57  ;;  %v2018_v24 = vld [vmem:[#allocation4 + $0x60] sm:$0xff]  ;;  %vm10629_vm10 = vmmov %vm10627_vm1 }
 0x315   :  { %5201 = vmatpush.msk.msra.mxu0 %vm10608_vm0, %v1990_v7  ;;  %5225 = vmatpush.msk.msrb.mxu3 %vm6129_vm6, %v1978_v55  ;;  %vm10630_vm11 = vmmov %vm10627_vm1  ;;  %v10674_v55 = vld [vmem:[#allocation32_spill] sm:$0xff] }
 0x316   :  { %5190 = vmatmul.msk.f32.gmra.mxu2 %vm10625_vm2, %v1800_v9  ;;  %vm10632_vm1 = vmmov %vm10625_vm2 }
 0x317   :  { %5198 = vmatmul.msk.f32.gmra.mxu3 %vm10626_vm4, %v1800_v9  ;;  %vm10631_vm4 = vmmov %vm10628_vm15 }
 0x318   :  { %5226 = vmatpush.msk.msrb.mxu3 %vm6129_vm6, %v1977_v8  ;;  %v2205_v9 = vsel %vm10631_vm4, %v2181_v30, %v2189_v26 }
 0x319   :  { %2610 = vrot.lane.b32.xlu0 %v7160_v33, %s5862_s22  ;;  %2624 = vrot.lane.b32.xlu1 %v7226_v2, %s5862_s22 }
 0x31a   :  { %2620 = vrot.lane.b32.xlu2 %v7198_v41, %s5862_s22 }
 0x31b   :  { %v2197_v35 = vpop.permute.xlu1 %2196  ;;  %v1946_v42 = vpop.permute.xlu0 %1945 }
 0x31c   :  { %v2201_v14 = vsel %vm10628_vm15, %v2189_v26, %v2197_v35  ;;  %v7859_v16 = vpop.permute.xlu2 %2168  ;;  %v7861_v44 = vpop.f32.mrf.mxu1  ;;  %v1989_v1 = vsel %vm10629_vm10, %v1970_v57, %v1946_v42  ;;  %v1985_v60 = vsel %vm10630_vm11, %v1946_v42, %v7743_v58  ;;  %vm10633_vm15 = vmmov %vm10632_vm1 }
 0x31d   :  { %5202 = vmatpush.msk.msra.mxu0 %vm10608_vm0, %v1989_v1  ;;  %5210 = vmatpush.msk.msrb.mxu1 %vm10610_vm13, %v1985_v60  ;;  %vm10634_vm10 = vmmov %vm10632_vm1 }
 0x31e   :  { %5247 = vmatpush.msk.msra.mxu2 %vm6189_vm14, %v2201_v14  ;;  %5203 = vmatmul.msk.f32.vlgmr.msra.gmra.mxu0 %vm10625_vm2, %v2018_v24  ;;  %vm10636_vm11 = vmmov %vm10631_vm4 }
 0x31f   :  { %5211 = vmatmul.msk.f32.vlgmr.msrb.gmra.mxu1 %vm10632_vm1, %v2018_v24  ;;  %5219 = vmatmul.msk.f32.vlgmr.msrb.gmra.mxu2 %vm10633_vm15, %v2018_v24  ;;  %v7879_v3 = vpop.f32.mrf.mxu2  ;;  %vm10637_vm2 = vmmov %vm10631_vm4 }
 0x320   :  { %5227 = vmatmul.msk.f32.vlgmr.msrb.gmra.mxu3 %vm10634_vm10, %v2018_v24  ;;  %5239 = vmatpush.msk.msra.mxu1 %vm6219_vm12, %v2205_v9  ;;  %v7884_v49 = vpop.f32.mrf.mxu3  ;;  %vm10638_vm4 = vmmov %vm10637_vm2  ;;  %v2020_v24 = vld [vmem:[#allocation4 + $0x70] sm:$0xff] }
 0x321   :  { %2632 = vrot.lane.b32.xlu0 %v7179_v59, %s5862_s22  ;;  %2618 = vrot.lane.b32.xlu1 %v7212_v40, %s5862_s22  ;;  %vm10640_vm15 = vmmov %vm10632_vm1 }
 0x322   :  { %2608 = vrot.lane.b32.xlu2 %v7177_v17, %s5862_s22  ;;  %vm10641_vm10 = vmmov %vm10632_vm1 }
 0x323   :  { %v2195_v26 = vpop.permute.xlu1 %2194  ;;  %v2173_v10 = vpop.permute.xlu0 %2172 }
 0x324   :  { %v2191_v12 = vpop.permute.xlu2 %2190  ;;  %v2209_v46 = vsel %vm10636_vm11, %v2173_v10, %v2181_v30  ;;  %v2213_v57 = vsel %vm10637_vm2, %v2197_v35, %v2173_v10  ;;  %v2200_v23 = vsel %vm10638_vm4, %v7809_v6, %v2195_v26  ;;  %v7899_v7 = vpop.f32.mrf.mxu1  ;;  %vm10642_vm11 = vmmov %vm10632_vm1 }
 0x325   :  { %5231 = vmatpush.msk.msrb.mxu0 %vm10414_vm7, %v2209_v46  ;;  %5248 = vmatpush.msk.msra.mxu2 %vm6189_vm14, %v2200_v23  ;;  %vm10643_vm4 = vmmov %vm10632_vm1 }
 0x326   :  { %5255 = vmatpush.msk.msra.mxu3 %vm10417_vm8, %v2213_v57  ;;  %5204 = vmatmul.msk.f32.gmra.mxu0 %vm10632_vm1, %v2019_v19  ;;  %v2021_v57 = vld [vmem:[#allocation4 + $0x78] sm:$0xff] }
 0x327   :  { %5212 = vmatmul.msk.f32.gmra.mxu1 %vm10640_vm15, %v2019_v19  ;;  %5220 = vmatmul.msk.f32.gmra.mxu2 %vm10641_vm10, %v2019_v19  ;;  %vm10644_vm15 = vmmov %vm10632_vm1 }
 0x328   :  { %5228 = vmatmul.msk.f32.gmra.mxu3 %vm10642_vm11, %v2019_v19  ;;  %v7915_v30 = vpop.f32.mrf.mxu2  ;;  %vm10645_vm10 = vmmov %vm10632_vm1 }
 0x329   :  { %2616 = vrot.lane.b32.xlu0 %v7214_v54, %s5862_s22  ;;  %2859 = vrot.lane.b32.xlu1 %v7130_v61, %s5863_s3  ;;  %v7919_v8 = vpop.f32.mrf.mxu3  ;;  %v7932_v61 = vpop.f32.mrf.mxu0  ;;  %vm10646_vm11 = vmmov %vm10637_vm2 }
 0x32a   :  { %2851 = vrot.lane.b32.xlu2 %v7194_v36, %s5863_s3 }
 0x32b   :  { %v2185_v35 = vpop.permute.xlu1 %2184  ;;  %v2171_v42 = vpop.permute.xlu0 %2170 }
 0x32c   :  { %v7921_v14 = vpop.permute.xlu2 %2174  ;;  %v2212_v1 = vsel %vm10637_vm2, %v2195_v26, %v2171_v42  ;;  %v7927_v60 = vpop.f32.mrf.mxu1 }
 0x32d   :  { %5256 = vmatpush.msk.msra.mxu3 %vm10417_vm8, %v2212_v1 }
 0x32e   :  { %5205 = vmatmul.msk.f32.gmra.mxu0 %vm10643_vm4, %v2020_v24  ;;  %vm10647_vm4 = vmmov %vm10637_vm2 }
 0x32f   :  { %5213 = vmatmul.msk.f32.gmra.mxu1 %vm10632_vm1, %v2020_v24  ;;  %5221 = vmatmul.msk.f32.gmra.mxu2 %vm10644_vm15, %v2020_v24  ;;  %vm10648_vm1 = vmmov %vm10637_vm2 }
 0x330   :  { %5229 = vmatmul.msk.f32.gmra.mxu3 %vm10645_vm10, %v2020_v24  ;;  %v7939_v36 = vpop.f32.mrf.mxu2  ;;  %vm10649_vm15 = vmmov %vm10645_vm10 }
 0x331   :  { %2835 = vrot.lane.b32.xlu0 %v7127_v48, %s5863_s3  ;;  %2857 = vrot.lane.b32.xlu1 %v7150_v63, %s5863_s3  ;;  %v7943_v9 = vpop.f32.mrf.mxu3 }
 0x332   :  { %2849 = vrot.lane.b32.xlu2 %v7196_v32, %s5863_s3 }
 0x333   :  { %v2179_v26 = vpop.permute.xlu1 %2178  ;;  %v2193_v10 = vpop.permute.xlu0 %2192 }
 0x334   :  { %v7945_v19 = vpop.permute.xlu2 %2393  ;;  %v2208_v46 = vsel %vm10646_vm11, %v2171_v42, %v2179_v26  ;;  %v2204_v48 = vsel %vm10637_vm2, %v2179_v26, %v7809_v6  ;;  %v2199_v63 = vsel %vm10647_vm4, %v2185_v35, %v2193_v10  ;;  %v2211_v32 = vsel %vm10648_vm1, %v2193_v10, %v7859_v16  ;;  %v7967_v6 = vpop.f32.mrf.mxu1  ;;  %vm10650_vm11 = vmmov %vm10645_vm10 }
 0x335   :  { %5232 = vmatpush.msk.msrb.mxu0 %vm10414_vm7, %v2208_v46  ;;  %5240 = vmatpush.msk.msra.mxu1 %vm6219_vm12, %v2204_v48  ;;  %vm10651_vm2 = vmmov %vm10645_vm10  ;;  %v7977_v42 = vpop.f32.mrf.mxu0 }
 0x336   :  { %5249 = vmatpush.msk.msra.mxu2 %vm6189_vm14, %v2199_v63  ;;  %5257 = vmatpush.msk.msra.mxu3 %vm10417_vm8, %v2211_v32  ;;  %vm10652_vm4 = vmmov %vm10648_vm1 }
 0x337   :  { %5206 = vmatmul.msk.f32.gmra.mxu0 %vm10649_vm15, %v2021_v57  ;;  %5214 = vmatmul.msk.f32.gmra.mxu1 %vm10645_vm10, %v2021_v57  ;;  %vm10653_vm15 = vmmov %vm10651_vm2 }
 0x338   :  { %5222 = vmatmul.msk.f32.gmra.mxu2 %vm10650_vm11, %v2021_v57  ;;  %5230 = vmatmul.msk.f32.gmra.mxu3 %vm10651_vm2, %v2021_v57  ;;  %v7975_v23 = vpop.f32.mrf.mxu2  ;;  %vm10654_vm10 = vmmov %vm10651_vm2 }
 0x339   :  { %2833 = vrot.lane.b32.xlu0 %v7148_v18, %s5863_s3  ;;  %2847 = vrot.lane.b32.xlu1 %v7216_v4, %s5863_s3  ;;  %v7981_v24 = vpop.f32.mrf.mxu3  ;;  %v2239_v4 = vld [vmem:[#allocation4 + $0xa0] sm:$0xff]  ;;  %vm10655_vm11 = vmmov %vm10648_vm1 }
 0x33a   :  { %2843 = vrot.lane.b32.xlu2 %v7175_v15, %s5863_s3  ;;  %vm10656_vm2 = vmmov %vm10648_vm1 }
 0x33b   :  { %v2167_v1 = vpop.permute.xlu1 %2166  ;;  %v2183_v26 = vpop.permute.xlu0 %2182 }
 0x33c   :  { %v7983_v10 = vpop.permute.xlu2 %2391  ;;  %v2198_v46 = vsel %vm10652_vm4, %v2183_v26, %v2191_v12  ;;  %v2210_v18 = vsel %vm10648_vm1, %v2191_v12, %v2167_v1  ;;  %v8001_v12 = vpop.f32.mrf.mxu1  ;;  %vm10657_vm4 = vmmov %vm10648_vm1  ;;  %v2202_v20 = vsel %vm10648_vm1, %v7921_v14, %v2183_v26 }
 0x33d   :  { %5250 = vmatpush.msk.msra.mxu2 %vm6189_vm14, %v2198_v46  ;;  %5258 = vmatpush.msk.msra.mxu3 %vm10417_vm8, %v2210_v18  ;;  %v8007_v57 = vpop.f32.mrf.mxu0  ;;  %v2206_v18 = vsel %vm10657_vm4, %v2167_v1, %v7921_v14  ;;  %vm10661_vm4 = vcmp.lt.s32.totalorder %v6085_v13, 113  ;;  %vm10675_vm8 = vnez %v10674_v55 }
 0x33e   :  { %vm10662_vm1 = vmmov %vm10661_vm4 }
 0x340   :  { %5251 = vmatmul.msk.f32.vlgmr.msra.gmra.mxu2 %vm10653_vm15, %v2239_v4  ;;  %5259 = vmatmul.msk.f32.vlgmr.msra.gmra.mxu3 %vm10654_vm10, %v2239_v4  ;;  %v7999_v15 = vpop.f32.mrf.mxu2  ;;  %vm10658_vm15 = vmmov %vm10654_vm10 }
 0x341   :  { %2855 = vrot.lane.b32.xlu0 %v7162_v11, %s5863_s3  ;;  %2841 = vrot.lane.b32.xlu1 %v7198_v41, %s5863_s3  ;;  %v8005_v48 = vpop.f32.mrf.mxu3 }
 0x342   :  { %2831 = vrot.lane.b32.xlu2 %v7160_v33, %s5863_s3  ;;  %v2240_v33 = vld [vmem:[#allocation4 + $0xa8] sm:$0xff] }
 0x343   :  { %v2410_v63 = vpop.permute.xlu1 %2409  ;;  %v2177_v32 = vpop.permute.xlu0 %2176 }
 0x344   :  { %v8009_v46 = vpop.permute.xlu2 %2413  ;;  %v2207_v11 = vsel %vm10655_vm11, %v7859_v16, %v2177_v32  ;;  %v2203_v41 = vsel %vm10656_vm2, %v2177_v32, %v2185_v35  ;;  %vm10659_vm11 = vmmov %vm10654_vm10  ;;  %v8046_v1 = vpop.f32.mrf.mxu1  ;;  %v10665_v32 = vld [vmem:[#allocation16_spill] sm:$0xff] }
 0x345   :  { %5233 = vmatpush.msk.msrb.mxu0 %vm10414_vm7, %v2207_v11  ;;  %5241 = vmatpush.msk.msra.mxu1 %vm6219_vm12, %v2203_v41  ;;  %vm10660_vm2 = vmmov %vm10654_vm10  ;;  %v8059_v11 = vpop.f32.mrf.mxu0  ;;  %v3053_v41 = vld [vmem:[%s10149_s4 + $0x18] sm:$0xff] }
 0x347   :  { %5234 = vmatpush.msk.msrb.mxu0 %vm10414_vm7, %v2206_v18  ;;  %5242 = vmatpush.msk.msra.mxu1 %vm6219_vm12, %v2202_v20 }
 0x348   :  { %5252 = vmatmul.msk.f32.gmra.mxu2 %vm10658_vm15, %v2240_v33  ;;  %5260 = vmatmul.msk.f32.gmra.mxu3 %vm10654_vm10, %v2240_v33  ;;  %v8034_v16 = vpop.f32.mrf.mxu2  ;;  %vm10666_vm10 = vnez %v10665_v32  ;;  %v2462_v32 = vld [vmem:[#allocation4 + $0xd0] sm:$0xff] }
 0x349   :  { %5235 = vmatmul.msk.f32.vlgmr.msrb.gmra.mxu0 %vm10659_vm11, %v2239_v4  ;;  %5243 = vmatmul.msk.f32.vlgmr.msra.gmra.mxu1 %vm10660_vm2, %v2239_v4  ;;  %v8040_v35 = vpop.f32.mrf.mxu3  ;;  %vm10667_vm11 = vmmov %vm10660_vm2 }
 0x34a   :  { %2845 = vrot.lane.b32.xlu0 %v7226_v2, %s5863_s3  ;;  %2829 = vrot.lane.b32.xlu1 %v7177_v17, %s5863_s3  ;;  %v10663_v17 = vld [vmem:[#allocation28_spill] sm:$0xff] }
 0x34b   :  { %2853 = vrot.lane.b32.xlu2 %v7179_v59, %s5863_s3  ;;  %v8044_v20 = vpop.permute.xlu1 %2407  ;;  %v2418_v14 = vpop.permute.xlu0 %2417  ;;  %vm10664_vm15 = vnez %v10663_v17  ;;  %v2241_v59 = vld [vmem:[#allocation4 + $0xb0] sm:$0xff] }
 0x34c   :  { %v8048_v26 = vpop.permute.xlu2 %2403  ;;  %v2422_v4 = vsel %vm10661_vm4, %v2410_v63, %v2418_v14  ;;  %v2434_v2 = vsel %vm10662_vm1, %v2418_v14, %v7945_v19  ;;  %vm10668_vm4 = vmmov %vm10660_vm2  ;;  %v8091_v21 = vpop.f32.mrf.mxu1 }
 0x34d   :  { %5279 = vmatpush.msk.msrb.mxu2 %vm10664_vm15, %v2422_v4  ;;  %5287 = vmatpush.msk.msrb.mxu3 %vm10666_vm10, %v2434_v2  ;;  %vm10669_vm1 = vmmov %vm10660_vm2 }
 0x350   :  { %5253 = vmatmul.msk.f32.gmra.mxu2 %vm10667_vm11, %v2241_v59  ;;  %5261 = vmatmul.msk.f32.gmra.mxu3 %vm10660_vm2, %v2241_v59  ;;  %vm10670_vm11 = vcmp.lt.s32.totalorder %v6085_v13, 113 }
 0x351   :  { %5236 = vmatmul.msk.f32.gmra.mxu0 %vm10668_vm4, %v2240_v33  ;;  %5244 = vmatmul.msk.f32.gmra.mxu1 %vm10669_vm1, %v2240_v33  ;;  %v8068_v18 = vpop.f32.mrf.mxu2  ;;  %v8072_v14 = vpop.f32.mrf.mxu3  ;;  %vm10671_vm2 = vmmov %vm10670_vm11 }
 0x352   :  { %2839 = vrot.lane.b32.xlu0 %v7212_v40, %s5863_s3  ;;  %3071 = vperm.xlu1 %5565, %v3053_v41   ;;  %vm10672_vm4 = vmmov %vm10671_vm2 }
 0x353   :  { %2837 = vrot.lane.b32.xlu2 %v7214_v54, %s5863_s3  ;;  %v2402_v4 = vpop.permute.xlu1 %2401  ;;  %v2416_v2 = vpop.permute.xlu0 %2415  ;;  %vm10673_vm1 = vmmov %vm10671_vm2  ;;  %v10676_v54 = vld [vmem:[#allocation14_spill] sm:$0xff] }
 0x354   :  { %v2426_v0 = vsel %vm10670_vm11, %v2402_v4, %v2410_v63  ;;  %v2430_v33 = vsel %vm10671_vm2, %v7945_v19, %v2402_v4  ;;  %v2398_v58 = vpop.permute.xlu2 %2397  ;;  %v2421_v40 = vsel %vm10672_vm4, %v8044_v20, %v2416_v2  ;;  %v2433_v41 = vsel %vm10673_vm1, %v2416_v2, %v7983_v10  ;;  %v2242_v63 = vld [vmem:[#allocation4 + $0xb8] sm:$0xff]  ;;  %v3052_v19 = vld [vmem:[%s10149_s4 + $0x10] sm:$0xff]  ;;  %v3050_v4 = vld [vmem:[%s10149_s4] sm:$0xff]  ;;  %v8103_v2 = vpop.f32.mrf.mxu0 }
 0x355   :  { %5263 = vmatpush.msk.msra.mxu0 %vm10675_vm8, %v2430_v33  ;;  %vm10677_vm14 = vnez %v10676_v54  ;;  %5280 = vmatpush.msk.msrb.mxu2 %vm10664_vm15, %v2421_v40  ;;  %vm10678_vm11 = vcmask 261120  }
 0x356   :  { %5271 = vmatpush.msk.msrb.mxu1 %vm10677_vm14, %v2426_v0  ;;  %5288 = vmatpush.msk.msrb.mxu3 %vm10666_vm10, %v2433_v41  ;;  %vm10679_vm2 = vmmov %vm10678_vm11  ;;  %v3051_v0 = vld [vmem:[%s10149_s4 + $0x8] sm:$0xff] }
 0x357   :  { %vm10680_vm4 = vmmov %vm10679_vm2 }
 0x358   :  { %5254 = vmatmul.msk.f32.gmra.mxu2 %vm10678_vm11, %v2242_v63  ;;  %5262 = vmatmul.msk.f32.gmra.mxu3 %vm10679_vm2, %v2242_v63  ;;  %vm10681_vm1 = vmmov %vm10679_vm2  ;;  %vm10682_vm11 = vcmp.lt.s32.totalorder %v6085_v13, 113 }
 0x359   :  { %5237 = vmatmul.msk.f32.gmra.mxu0 %vm10680_vm4, %v2241_v59  ;;  %5245 = vmatmul.msk.f32.gmra.mxu1 %vm10681_vm1, %v2241_v59  ;;  %v8112_v33 = vpop.f32.mrf.mxu2  ;;  %v8114_v40 = vpop.f32.mrf.mxu3  ;;  %vm10683_vm2 = vmmov %vm10682_vm11 }
 0x35a   :  { %3066 = vperm.xlu0 %5564, %v3052_v19   ;;  %3056 = vperm.xlu1 %5565, %v3050_v4   ;;  %v8126_v59 = vpop.f32.mrf.mxu1  ;;  %vm10684_vm4 = vmmov %vm10681_vm1 }
 0x35b   :  { %3061 = vperm.xlu2 %5563, %v3051_v0   ;;  %v2390_v41 = vpop.permute.xlu1 %2389  ;;  %v2406_v37 = vpop.permute.xlu0 %2405 }
 0x35c   :  { %v2639_v34 = vpop.permute.xlu2 %2638  ;;  %v2420_v29 = vsel %vm10682_vm11, %v2406_v37, %v8009_v46  ;;  %v2432_v31 = vsel %vm10683_vm2, %v8009_v46, %v2390_v41  ;;  %v8132_v4 = vpop.f32.mrf.mxu0  ;;  %vm10685_vm11 = vmmov %vm10683_vm2 }
 0x35d   :  { %5281 = vmatpush.msk.msrb.mxu2 %vm10664_vm15, %v2420_v29  ;;  %5289 = vmatpush.msk.msrb.mxu3 %vm10666_vm10, %v2432_v31 }
 0x361   :  { %5238 = vmatmul.msk.f32.gmra.mxu0 %vm10684_vm4, %v2242_v63  ;;  %5246 = vmatmul.msk.f32.gmra.mxu1 %vm10681_vm1, %v2242_v63  ;;  %v8130_v19 = vpop.f32.mrf.mxu2  ;;  %v8134_v0 = vpop.f32.mrf.mxu3  ;;  %vm10686_vm4 = vmmov %vm10683_vm2 }
 0x362   :  { %vm10687_vm1 = vmmov %vm10683_vm2 }
 0x363   :  { %v2412_v56 = vpop.permute.xlu1 %2411  ;;  %v2400_v46 = vpop.permute.xlu0 %2399 }
 0x364   :  { %v2637_v52 = vpop.permute.xlu2 %2636  ;;  %v2429_v29 = vsel %vm10685_vm11, %v7983_v10, %v2400_v46  ;;  %v2425_v31 = vsel %vm10683_vm2, %v2400_v46, %v8044_v20  ;;  %v2419_v63 = vsel %vm10686_vm4, %v8048_v26, %v2412_v56  ;;  %v2428_v10 = vsel %vm10687_vm1, %v2390_v41, %v2398_v58  ;;  %vm10689_vm2 = vmmov %vm10687_vm1  ;;  %v8166_v41 = vpop.f32.mrf.mxu0 }
 0x365   :  { %5264 = vmatpush.msk.msra.mxu0 %vm10675_vm8, %v2429_v29  ;;  %5272 = vmatpush.msk.msrb.mxu1 %vm10677_vm14, %v2425_v31  ;;  %vm10688_vm11 = vcmask 261120   ;;  %v2424_v20 = vsel %vm10689_vm2, %v2398_v58, %v2406_v37  ;;  %v8162_v29 = vpop.f32.mrf.mxu1  ;;  %vm10693_vm4 = vmmov %vm10687_vm1  ;;  %vm10695_vm2 = vcmask 261120  }
 0x366   :  { %5282 = vmatpush.msk.msrb.mxu2 %vm10664_vm15, %v2419_v63  ;;  %10691 = vst [vmem:[#allocation48_spill] sm:$0xff] %v8162_v29  ;;  %vm10697_vm15 = vmmov %vm10695_vm2 }
 0x367   :  { %5283 = vmatmul.msk.f32.vlgmr.msrb.gmra.mxu2 %vm10688_vm11, %v2460_v50  ;;  %5265 = vmatpush.msk.msra.mxu0 %vm10675_vm8, %v2428_v10  ;;  %vm10694_vm11 = vmmov %vm10687_vm1 }
 0x368   :  { %5273 = vmatpush.msk.msrb.mxu1 %vm10677_vm14, %v2424_v20  ;;  %v2461_v20 = vld [vmem:[#allocation4 + $0xc8] sm:$0xff] }
 0x369   :  { %v8160_v46 = vpop.f32.mrf.mxu2  ;;  %v8164_v31 = vpop.f32.mrf.mxu3 }
 0x36a   :  { %10690 = vst [vmem:[#allocation42_spill] sm:$0xff] %v8160_v46 }
 0x36b   :  { %10692 = vst [vmem:[#allocation46_spill] sm:$0xff] %v8164_v31  ;;  %v2396_v63 = vpop.permute.xlu1 %2395  ;;  %v2388_v17 = vpop.permute.xlu0 %2387 }
 0x36c   :  { %v8168_v28 = vpop.permute.xlu2 %2626  ;;  %v2427_v10 = vsel %vm10693_vm4, %v2388_v17, %v2396_v63  ;;  %v2423_v37 = vsel %vm10687_vm1, %v2396_v63, %v8048_v26  ;;  %v2431_v58 = vsel %vm10694_vm11, %v2412_v56, %v2388_v17  ;;  %vm10696_vm4 = vmmov %vm10695_vm2  ;;  %vm10702_vm11 = vcmp.lt.s32.totalorder %v6085_v13, 112 }
 0x36d   :  { %5266 = vmatpush.msk.msra.mxu0 %vm10675_vm8, %v2427_v10  ;;  %5274 = vmatpush.msk.msrb.mxu1 %vm10677_vm14, %v2423_v37  ;;  %vm10698_vm1 = vmmov %vm10695_vm2  ;;  %v8191_v10 = vpop.f32.mrf.mxu1 }
 0x36e   :  { %5290 = vmatpush.msk.msrb.mxu3 %vm10666_vm10, %v2431_v58  ;;  %5267 = vmatmul.msk.f32.vlgmr.msra.gmra.mxu0 %vm10695_vm2, %v2460_v50  ;;  %10701 = vst [vmem:[#allocation52_spill] sm:$0xff] %v8191_v10  ;;  %vm10703_vm10 = vmmov %vm10702_vm11  ;;  %vm10704_vm2 = vcmp.lt.s32.totalorder %v10419_v22, 15 }
 0x36f   :  { %5275 = vmatmul.msk.f32.vlgmr.msrb.gmra.mxu1 %vm10696_vm4, %v2460_v50  ;;  %5284 = vmatmul.msk.f32.gmra.mxu2 %vm10697_vm15, %v2461_v20  ;;  %vm10705_vm15 = vcmp.lt.s32.totalorder %v10426_v45, 15  ;;  %vm10706_vm4 = vmmov %vm10698_vm1 }
 0x370   :  { %5291 = vmatmul.msk.f32.vlgmr.msrb.gmra.mxu3 %vm10698_vm1, %v2460_v50  ;;  %v8201_v50 = vpop.f32.mrf.mxu0  ;;  %vm10707_vm8 = vmmov %vm10698_vm1 }
 0x371   :  { %v8187_v26 = vpop.f32.mrf.mxu2  ;;  %v8189_v56 = vpop.f32.mrf.mxu3 }
 0x372   :  { %10699 = vst [vmem:[#allocation29_spill] sm:$0xff] %v8187_v26 }
 0x373   :  { %10700 = vst [vmem:[#allocation51_spill] sm:$0xff] %v8189_v56  ;;  %v2615_v17 = vpop.permute.xlu1 %2614  ;;  %v2631_v63 = vpop.permute.xlu0 %2630 }
 0x374   :  { %v2655_v37 = vsel %vm10702_vm11, %v2639_v34, %v2615_v17  ;;  %v2643_v58 = vsel %vm10703_vm10, %v2631_v63, %v2639_v34  ;;  %v2621_v55 = vpop.permute.xlu2 %2620  ;;  %vm10708_vm11 = vmmov %vm10698_vm1 }
 0x375   :  { %5311 = vmatpush.msk.msra.mxu2 %vm10704_vm2, %v2643_v58  ;;  %5319 = vmatpush.msk.msra.mxu3 %vm10705_vm15, %v2655_v37  ;;  %vm10710_vm2 = vmmov %vm10703_vm10  ;;  %vm10711_vm15 = vcmp.lt.s32.totalorder %v10419_v22, 15 }
 0x376   :  { %5268 = vmatmul.msk.f32.gmra.mxu0 %vm10706_vm4, %v2461_v20  ;;  %vm10714_vm4 = vmmov %vm10698_vm1 }
 0x377   :  { %5276 = vmatmul.msk.f32.gmra.mxu1 %vm10698_vm1, %v2461_v20  ;;  %5285 = vmatmul.msk.f32.gmra.mxu2 %vm10707_vm8, %v2462_v32  ;;  %vm10712_vm8 = vcmp.lt.s32.totalorder %v10426_v45, 15 }
 0x378   :  { %5292 = vmatmul.msk.f32.gmra.mxu3 %vm10708_vm11, %v2461_v20  ;;  %v8219_v20 = vpop.f32.mrf.mxu1  ;;  %vm10715_vm11 = vmmov %vm10698_vm1 }
 0x379   :  { %v8207_v54 = vpop.f32.mrf.mxu2  ;;  %v8209_v34 = vpop.f32.mrf.mxu3  ;;  %10713 = vst [vmem:[#allocation43_spill] sm:$0xff] %v8219_v20 }
 0x37a   :  { %10709 = vst [vmem:[#allocation15_spill] sm:$0xff] %v8209_v34  ;;  %v8224_v34 = vpop.f32.mrf.mxu0 }
 0x37b   :  { %v2613_v25 = vpop.permute.xlu1 %2612  ;;  %v2629_v58 = vpop.permute.xlu0 %2628 }
 0x37c   :  { %v2642_v37 = vsel %vm10703_vm10, %v2629_v58, %v2637_v52  ;;  %v2654_v27 = vsel %vm10710_vm2, %v2637_v52, %v2613_v25  ;;  %v2609_v56 = vpop.permute.xlu2 %2608  ;;  %vm10716_vm10 = vmmov %vm10698_vm1 }
 0x37d   :  { %5312 = vmatpush.msk.msra.mxu2 %vm10711_vm15, %v2642_v37  ;;  %5320 = vmatpush.msk.msra.mxu3 %vm10712_vm8, %v2654_v27  ;;  %vm10717_vm15 = vmmov %vm10710_vm2 }
 0x37e   :  { %5269 = vmatmul.msk.f32.gmra.mxu0 %vm10714_vm4, %v2462_v32  ;;  %vm10718_vm8 = vmmov %vm10710_vm2  ;;  %vm10719_vm4 = vcmp.lt.s32.totalorder %v10531_v47, 15 }
 0x37f   :  { %5277 = vmatmul.msk.f32.gmra.mxu1 %vm10698_vm1, %v2462_v32  ;;  %5286 = vmatmul.msk.f32.gmra.mxu2 %vm10715_vm11, %v2463_v62  ;;  %vm10720_vm1 = vcmp.lt.s32.totalorder %v10533_v5, 15  ;;  %vm10721_vm11 = vcmp.lt.s32.totalorder %v10419_v22, 15  ;;  %vm10722_vm14 = vmmov %vm10716_vm10 }
 0x380   :  { %5293 = vmatmul.msk.f32.gmra.mxu3 %vm10716_vm10, %v2462_v32  ;;  %v2650_v32 = vsel %vm10710_vm2, %v2613_v25, %v2621_v55 }
 0x381   :  { %v8227_v52 = vpop.f32.mrf.mxu2  ;;  %v8229_v26 = vpop.f32.mrf.mxu3 }
 0x383   :  { %v2635_v37 = vpop.permute.xlu1 %2634  ;;  %v2623_v31 = vpop.permute.xlu0 %2622 }
 0x384   :  { %v2647_v27 = vsel %vm10710_vm2, %v2623_v31, %v2631_v63  ;;  %v2651_v20 = vsel %vm10717_vm15, %v2615_v17, %v2623_v31  ;;  %v2641_v46 = vsel %vm10718_vm8, %v8168_v28, %v2635_v37  ;;  %vm10723_vm15 = vmmov %vm10719_vm4  ;;  %v8252_v17 = vpop.f32.mrf.mxu0  ;;  %v8254_v63 = vpop.f32.mrf.mxu1 }
 0x385   :  { %5295 = vmatpush.msk.msrb.mxu0 %vm10719_vm4, %v2651_v20  ;;  %5303 = vmatpush.msk.msra.mxu1 %vm10720_vm1, %v2647_v27  ;;  %vm10724_vm8 = vmmov %vm10710_vm2  ;;  %10725 = vst [vmem:[#allocation17_spill] sm:$0xff] %v8252_v17  ;;  %v2852_v25 = vpop.permute.xlu2 %2851 }
 0x386   :  { %5313 = vmatpush.msk.msra.mxu2 %vm10721_vm11, %v2641_v46  ;;  %5270 = vmatmul.msk.f32.gmra.mxu0 %vm10716_vm10, %v2463_v62  ;;  %v2646_v31 = vsel %vm10724_vm8, %v2621_v55, %v2629_v58  ;;  %10726 = vst [vmem:[#allocation13_spill] sm:$0xff] %v8254_v63  ;;  %vm10727_vm4 = vmmov %vm10716_vm10  ;;  %vm10731_vm11 = vcmp.lt.s32.totalorder %v10426_v45, 15 }
 0x387   :  { %5278 = vmatmul.msk.f32.gmra.mxu1 %vm10722_vm14, %v2463_v62  ;;  %5296 = vmatpush.msk.msrb.mxu0 %vm10723_vm15, %v2650_v32  ;;  %vm10730_vm14 = vmmov %vm10710_vm2 }
 0x388   :  { %5294 = vmatmul.msk.f32.gmra.mxu3 %vm10727_vm4, %v2463_v62  ;;  %5304 = vmatpush.msk.msra.mxu1 %vm10720_vm1, %v2646_v31  ;;  %vm10736_vm10 = vmmov %vm10710_vm2  ;;  %vm10739_vm4 = vcmp.lt.s32.totalorder %v10531_v47, 15 }
 0x389   :  { %v8259_v46 = vpop.f32.mrf.mxu2  ;;  %v8261_v20 = vpop.f32.mrf.mxu3  ;;  %vm10737_vm15 = vmmov %vm10710_vm2 }
 0x38a   :  { %10728 = vst [vmem:[#allocation47_spill] sm:$0xff] %v8259_v46  ;;  %vm10738_vm8 = vmmov %vm10710_vm2 }
 0x38b   :  { %10729 = vst [vmem:[#allocation53_spill] sm:$0xff] %v8261_v20  ;;  %v2625_v27 = vpop.permute.xlu1 %2624  ;;  %v2611_v10 = vpop.permute.xlu0 %2610 }
 0x38c   :  { %v2653_v32 = vsel %vm10730_vm14, %v2635_v37, %v2611_v10  ;;  %v8269_v58 = vpop.f32.mrf.mxu0  ;;  %v8271_v62 = vpop.f32.mrf.mxu1  ;;  %vm10740_vm14 = vcmp.lt.s32.totalorder %v10419_v22, 15 }
 0x38d   :  { %5321 = vmatpush.msk.msra.mxu3 %vm10731_vm11, %v2653_v32  ;;  %10733 = vst [vmem:[#allocation55_spill] sm:$0xff] %v8269_v58  ;;  %v8273_v46 = vpop.permute.xlu2 %2849 }
 0x38e   :  { %10734 = vst [vmem:[#allocation56_spill] sm:$0xff] %v8271_v62  ;;  %v2681_v62 = vld [vmem:[#allocation4 + $0xe0] sm:$0xff] }
 0x391   :  { %v8267_v55 = vpop.f32.mrf.mxu2 }
 0x392   :  { %10732 = vst [vmem:[#allocation54_spill] sm:$0xff] %v8267_v55  ;;  %v8275_v17 = vpop.f32.mrf.mxu3 }
 0x393   :  { %v2619_v31 = vpop.permute.xlu1 %2618  ;;  %v2633_v63 = vpop.permute.xlu0 %2632  ;;  %10735 = vst [vmem:[#allocation57_spill] sm:$0xff] %v8275_v17  ;;  %v2682_v17 = vld [vmem:[#allocation4 + $0xe8] sm:$0xff] }
 0x394   :  { %v2649_v20 = vsel %vm10736_vm10, %v2611_v10, %v2619_v31  ;;  %v2645_v37 = vsel %vm10710_vm2, %v2619_v31, %v8168_v28  ;;  %v2640_v32 = vsel %vm10737_vm15, %v2625_v27, %v2633_v63  ;;  %v2652_v55 = vsel %vm10738_vm8, %v2633_v63, %v2609_v56  ;;  %v8298_v63 = vpop.f32.mrf.mxu0  ;;  %v8302_v31 = vpop.f32.mrf.mxu1 }
 0x395   :  { %5297 = vmatpush.msk.msrb.mxu0 %vm10739_vm4, %v2649_v20  ;;  %5305 = vmatpush.msk.msra.mxu1 %vm10720_vm1, %v2645_v37  ;;  %vm10741_vm10 = vcmask 261120   ;;  %10743 = vst [vmem:[#allocation58_spill] sm:$0xff] %v8298_v63  ;;  %vm10744_vm15 = vcmp.lt.s32.totalorder %v6085_v13, 111  ;;  %vm10746_vm8 = vnez %v10488_v51  ;;  %vm10748_vm4 = vcmp.lt.s32.totalorder %v6085_v13, 112 }
 0x396   :  { %5314 = vmatpush.msk.msra.mxu2 %vm10740_vm14, %v2640_v32  ;;  %5322 = vmatpush.msk.msra.mxu3 %vm10731_vm11, %v2652_v55  ;;  %vm10742_vm2 = vmmov %vm10741_vm10  ;;  %10745 = vst [vmem:[#allocation59_spill] sm:$0xff] %v8302_v31  ;;  %v2844_v32 = vpop.permute.xlu2 %2843  ;;  %vm10750_vm14 = vcmp.lt.s32.totalorder %v10531_v47, 15  ;;  %vm10751_vm11 = vcmp.lt.s32.totalorder %v10533_v5, 15  ;;  %v10764_v31 = vld [vmem:[#allocation49_spill] sm:$0xff] }
 0x397   :  { %5315 = vmatmul.msk.f32.vlgmr.msra.gmra.mxu2 %vm10741_vm10, %v2681_v62  ;;  %5323 = vmatmul.msk.f32.vlgmr.msra.gmra.mxu3 %vm10742_vm2, %v2681_v62  ;;  %vm10749_vm1 = vmmov %vm10748_vm4 }
 0x398   :  { %vm10752_vm10 = vmmov %vm10742_vm2 }
 0x399   :  { %v8296_v28 = vpop.f32.mrf.mxu2  ;;  %vm10753_vm12 = vmmov %vm10742_vm2 }
 0x39a   :  { %v8306_v55 = vpop.f32.mrf.mxu3 }
 0x39b   :  { %v2860_v10 = vpop.permute.xlu1 %2859  ;;  %v2617_v37 = vpop.permute.xlu0 %2616  ;;  %10747 = vst [vmem:[#allocation60_spill] sm:$0xff] %v8306_v55  ;;  %v10762_v55 = vld [vmem:[#allocation45_spill] sm:$0xff] }
 0x39c   :  { %v2864_v20 = vsel %vm10744_vm15, %v2852_v25, %v2860_v10  ;;  %v2648_v45 = vsel %vm10748_vm4, %v2609_v56, %v2617_v37  ;;  %v2644_v22 = vsel %vm10749_vm1, %v2617_v37, %v2625_v27  ;;  %vm10754_vm4 = vmmov %vm10742_vm2  ;;  %v10755_v56 = vld [vmem:[#allocation44_spill] sm:$0xff]  ;;  %v8337_v47 = vpop.f32.mrf.mxu1 }
 0x39d   :  { %5343 = vmatpush.msk.msrb.mxu2 %vm10746_vm8, %v2864_v20  ;;  %5298 = vmatpush.msk.msrb.mxu0 %vm10750_vm14, %v2648_v45  ;;  %v2868_v20 = vsel %vm10744_vm15, %v2844_v32, %v2852_v25  ;;  %vm10756_vm1 = vnez %v10755_v56  ;;  %vm10757_vm14 = vmmov %vm10744_vm15  ;;  %10761 = vst [vmem:[#allocation62_spill] sm:$0xff] %v8337_v47 }
 0x39e   :  { %5306 = vmatpush.msk.msra.mxu1 %vm10751_vm11, %v2644_v22  ;;  %5299 = vmatmul.msk.f32.vlgmr.msrb.gmra.mxu0 %vm10752_vm10, %v2681_v62  ;;  %vm10763_vm10 = vnez %v10762_v55  ;;  %vm10767_vm15 = vmmov %vm10754_vm4 }
 0x39f   :  { %5307 = vmatmul.msk.f32.vlgmr.msra.gmra.mxu1 %vm10742_vm2, %v2681_v62  ;;  %5316 = vmatmul.msk.f32.gmra.mxu2 %vm10753_vm12, %v2682_v17  ;;  %v8331_v62 = vpop.f32.mrf.mxu0  ;;  %vm10759_vm12 = vmmov %vm10757_vm14  ;;  %vm10765_vm2 = vnez %v10764_v31 }
 0x3a0   :  { %5324 = vmatmul.msk.f32.gmra.mxu3 %vm10754_vm4, %v2682_v17  ;;  %5335 = vmatpush.msk.msrb.mxu1 %vm10756_vm1, %v2868_v20  ;;  %10758 = vst [vmem:[#allocation61_spill] sm:$0xff] %v8331_v62  ;;  %vm10760_vm11 = vmmov %vm10759_vm12  ;;  %v2683_v20 = vld [vmem:[#allocation4 + $0xf0] sm:$0xff] }
 0x3a1   :  { %vm10778_vm7 = vmmov %vm10760_vm11 }
 0x3a2   :  { %v8324_v27 = vpop.f32.mrf.mxu2 }
 0x3a3   :  { %v2858_v45 = vpop.permute.xlu1 %2857  ;;  %v2836_v37 = vpop.permute.xlu0 %2835 }
 0x3a4   :  { %v2863_v22 = vsel %vm10757_vm14, %v8273_v46, %v2858_v45  ;;  %v2872_v25 = vsel %vm10759_vm12, %v2836_v37, %v2844_v32  ;;  %v2876_v5 = vsel %vm10760_vm11, %v2860_v10, %v2836_v37  ;;  %v8343_v63 = vpop.f32.mrf.mxu3  ;;  %vm10768_vm14 = vmmov %vm10754_vm4  ;;  %v8355_v47 = vpop.f32.mrf.mxu1 }
 0x3a5   :  { %5344 = vmatpush.msk.msrb.mxu2 %vm10746_vm8, %v2863_v22  ;;  %5327 = vmatpush.msk.msra.mxu0 %vm10763_vm10, %v2872_v25  ;;  %10766 = vst [vmem:[#allocation63_spill] sm:$0xff] %v8343_v63  ;;  %vm10769_vm12 = vmmov %vm10754_vm4  ;;  %v2903_v63 = vld [vmem:[#allocation4 + $0x108] sm:$0xff] }
 0x3a6   :  { %5351 = vmatpush.msk.msrb.mxu3 %vm10765_vm2, %v2876_v5  ;;  %5300 = vmatmul.msk.f32.gmra.mxu0 %vm10767_vm15, %v2682_v17  ;;  %v2684_v5 = vld [vmem:[#allocation4 + $0xf8] sm:$0xff]  ;;  %10772 = vst [vmem:[#allocation66_spill] sm:$0xff] %v8355_v47  ;;  %vm10773_vm15 = vmmov %vm10754_vm4 }
 0x3a7   :  { %5308 = vmatmul.msk.f32.gmra.mxu1 %vm10754_vm4, %v2682_v17  ;;  %5317 = vmatmul.msk.f32.gmra.mxu2 %vm10768_vm14, %v2683_v20  ;;  %v8351_v37 = vpop.f32.mrf.mxu0  ;;  %v2832_v17 = vpop.permute.xlu2 %2831  ;;  %vm10774_vm14 = vmmov %vm10754_vm4 }
 0x3a8   :  { %5325 = vmatmul.msk.f32.gmra.mxu3 %vm10769_vm12, %v2683_v20  ;;  %10771 = vst [vmem:[#allocation65_spill] sm:$0xff] %v8351_v37  ;;  %vm10775_vm12 = vmmov %vm10754_vm4 }
 0x3aa   :  { %v8349_v10 = vpop.f32.mrf.mxu2 }
 0x3ab   :  { %10770 = vst [vmem:[#allocation64_spill] sm:$0xff] %v8349_v10  ;;  %v2848_v32 = vpop.permute.xlu1 %2847  ;;  %v2834_v22 = vpop.permute.xlu0 %2833 }
 0x3ac   :  { %v2875_v25 = vsel %vm10760_vm11, %v2858_v45, %v2834_v22  ;;  %v8363_v10 = vpop.f32.mrf.mxu3 }
 0x3ad   :  { %5352 = vmatpush.msk.msrb.mxu3 %vm10765_vm2, %v2875_v25  ;;  %10776 = vst [vmem:[#allocation67_spill] sm:$0xff] %v8363_v10 }
 0x3ae   :  { %5301 = vmatmul.msk.f32.gmra.mxu0 %vm10773_vm15, %v2683_v20  ;;  %vm10779_vm15 = vmmov %vm10778_vm7 }
 0x3af   :  { %5309 = vmatmul.msk.f32.gmra.mxu1 %vm10754_vm4, %v2683_v20  ;;  %5318 = vmatmul.msk.f32.gmra.mxu2 %vm10774_vm14, %v2684_v5  ;;  %vm10780_vm4 = vmmov %vm10778_vm7 }
 0x3b0   :  { %5326 = vmatmul.msk.f32.gmra.mxu3 %vm10775_vm12, %v2684_v5 }
 0x3b2   :  { %v8365_v37 = vpop.f32.mrf.mxu2 }
 0x3b3   :  { %10777 = vst [vmem:[#allocation68_spill] sm:$0xff] %v8365_v37  ;;  %v2842_v45 = vpop.permute.xlu1 %2841  ;;  %v2856_v62 = vpop.permute.xlu0 %2855 }
 0x3b4   :  { %v2867_v47 = vsel %vm10760_vm11, %v2842_v45, %v8273_v46  ;;  %v2871_v25 = vsel %vm10778_vm7, %v2834_v22, %v2842_v45  ;;  %v2862_v20 = vsel %vm10779_vm15, %v2848_v32, %v2856_v62  ;;  %v2874_v37 = vsel %vm10780_vm4, %v2856_v62, %v2832_v17  ;;  %v8384_v46 = vpop.f32.mrf.mxu0  ;;  %vm10782_vm7 = vmmov %vm10775_vm12  ;;  %v8388_v22 = vpop.f32.mrf.mxu1  ;;  %v2902_v62 = vld [vmem:[#allocation4 + $0x100] sm:$0xff] }
 0x3b5   :  { %5328 = vmatpush.msk.msra.mxu0 %vm10763_vm10, %v2871_v25  ;;  %5336 = vmatpush.msk.msrb.mxu1 %vm10756_vm1, %v2867_v47  ;;  %10781 = vst [vmem:[#allocation69_spill] sm:$0xff] %v8384_v46  ;;  %vm10783_vm14 = vmmov %vm10782_vm7  ;;  %v2854_v47 = vpop.permute.xlu2 %2853  ;;  %v8390_v25 = vpop.f32.mrf.mxu3 }
 0x3b6   :  { %5345 = vmatpush.msk.msrb.mxu2 %vm10746_vm8, %v2862_v20  ;;  %5353 = vmatpush.msk.msrb.mxu3 %vm10765_vm2, %v2874_v37  ;;  %10784 = vst [vmem:[#allocation70_spill] sm:$0xff] %v8388_v22  ;;  %vm10786_vm12 = vmmov %vm10780_vm4 }
 0x3b7   :  { %5302 = vmatmul.msk.f32.gmra.mxu0 %vm10782_vm7, %v2684_v5  ;;  %5310 = vmatmul.msk.f32.gmra.mxu1 %vm10783_vm14, %v2684_v5  ;;  %10785 = vst [vmem:[#allocation71_spill] sm:$0xff] %v8390_v25  ;;  %vm10787_vm11 = vmmov %vm10780_vm4 }
 0x3b8   :  { %vm10788_vm15 = vmmov %vm10782_vm7 }
 0x3b9   :  { %vm10789_vm4 = vmmov %vm10782_vm7 }
 0x3ba   :  { %vm10790_vm7 = vmmov %vm10787_vm11 }
 0x3bb   :  { %v2118_v45 = vpop.f32.mrf.mxu2  ;;  %vm10791_vm14 = vmmov %vm10790_vm7 }
 0x3bc   :  { %v2830_v10 = vpop.permute.xlu1 %2829  ;;  %v2846_v58 = vpop.permute.xlu0 %2845 }
 0x3bd   :  { %v2873_v20 = vsel %vm10786_vm12, %v2854_v47, %v2830_v10  ;;  %v2861_v37 = vsel %vm10787_vm11, %v2846_v58, %v2854_v47  ;;  %v8402_v5 = vpop.f32.mrf.mxu0  ;;  %v8404_v25 = vpop.f32.mrf.mxu1  ;;  %vm10792_vm12 = vmmov %vm10790_vm7 }
 0x3be   :  { %5354 = vmatpush.msk.msrb.mxu3 %vm10765_vm2, %v2873_v20  ;;  %5346 = vmatpush.msk.msrb.mxu2 %vm10746_vm8, %v2861_v37  ;;  %v8406_v29 = vpop.f32.mrf.mxu3  ;;  %v2838_v37 = vpop.permute.xlu2 %2837  ;;  %vm10793_vm11 = vmmov %vm10790_vm7 }
 0x3bf   :  { %5355 = vmatmul.msk.f32.vlgmr.msrb.gmra.mxu3 %vm10788_vm15, %v2902_v62  ;;  %5347 = vmatmul.msk.f32.vlgmr.msrb.gmra.mxu2 %vm10789_vm4, %v2902_v62  ;;  %v2869_v31 = vsel %vm10792_vm12, %v2830_v10, %v2838_v37  ;;  %v2865_v51 = vsel %vm10793_vm11, %v2838_v37, %v2846_v58  ;;  %vm10794_vm15 = vmmov %vm10789_vm4  ;;  %v2904_v58 = vld [vmem:[#allocation4 + $0x110] sm:$0xff] }
 0x3c0   :  { %vm10797_vm12 = vmmov %vm10789_vm4 }
 0x3c1   :  { %vm10798_vm11 = vmmov %vm10789_vm4 }
 0x3c3   :  { %v2330_v22 = vpop.f32.mrf.mxu2 }
 0x3c4   :  { %v2840_v46 = vpop.permute.xlu0 %2839 }
 0x3c5   :  { %v2866_v47 = vsel %vm10790_vm7, %v2840_v46, %v2848_v32  ;;  %v2870_v20 = vsel %vm10791_vm14, %v2832_v17, %v2840_v46  ;;  %vm10795_vm7 = vmmov %vm10789_vm4  ;;  %v8430_v10 = vpop.f32.mrf.mxu0  ;;  %v8432_v17 = vpop.f32.mrf.mxu1 }
 0x3c6   :  { %5329 = vmatpush.msk.msra.mxu0 %vm10763_vm10, %v2870_v20  ;;  %5337 = vmatpush.msk.msrb.mxu1 %vm10756_vm1, %v2866_v47  ;;  %vm10796_vm14 = vmmov %vm10789_vm4  ;;  %v8434_v46 = vpop.f32.mrf.mxu3  ;;  %v2905_v20 = vld [vmem:[#allocation4 + $0x118] sm:$0xff] }
 0x3c7   :  { %5348 = vmatmul.msk.f32.gmra.mxu2 %vm10794_vm15, %v2903_v63  ;;  %5356 = vmatmul.msk.f32.gmra.mxu3 %vm10789_vm4, %v2903_v63  ;;  %vm10799_vm15 = vmmov %vm10789_vm4 }
 0x3c8   :  { %5330 = vmatpush.msk.msra.mxu0 %vm10763_vm10, %v2869_v31  ;;  %5338 = vmatpush.msk.msrb.mxu1 %vm10756_vm1, %v2865_v51  ;;  %v1472_v31 = vadd.f32 %v8112_v33, %v7975_v23 }
 0x3c9   :  { %5331 = vmatmul.msk.f32.vlgmr.msra.gmra.mxu0 %vm10795_vm7, %v2902_v62  ;;  %5339 = vmatmul.msk.f32.vlgmr.msrb.gmra.mxu1 %vm10796_vm14, %v2902_v62  ;;  %vm10801_vm7 = vmmov %vm10789_vm4 }
 0x3ca   :  { %v1722_v37 = vadd.f32 %v8207_v54, %v1472_v31  ;;  %vm10802_vm14 = vmmov %vm10789_vm4  ;;  %v1463_v54 = vadd.f32 %v7999_v15, %v7879_v3 }
 0x3cb   :  { %v8428_v32 = vpop.f32.mrf.mxu2 }
 0x3cc   :  { %v1943_v55 = vadd.f32 %v8296_v28, %v1722_v37  ;;  %v1710_v28 = vadd.f32 %v8130_v19, %v1463_v54 }
 0x3cd   :  { %v8444_v62 = vpop.f32.mrf.mxu0  ;;  %v8446_v47 = vpop.f32.mrf.mxu1 }
 0x3ce   :  { %v2164_v56 = vadd.f32 %v2118_v45, %v1943_v55  ;;  %v1931_v45 = vadd.f32 %v8227_v52, %v1710_v28 }
 0x3cf   :  { %5349 = vmatmul.msk.f32.gmra.mxu2 %vm10797_vm12, %v2904_v58  ;;  %5357 = vmatmul.msk.f32.gmra.mxu3 %vm10798_vm11, %v2904_v58  ;;  %vm10803_vm12 = vmmov %vm10789_vm4 }
 0x3d0   :  { %vm10804_vm11 = vmmov %vm10789_vm4 }
 0x3d1   :  { %5332 = vmatmul.msk.f32.gmra.mxu0 %vm10799_vm15, %v2903_v63  ;;  %5340 = vmatmul.msk.f32.gmra.mxu1 %vm10789_vm4, %v2903_v63  ;;  %v8452_v63 = vpop.f32.mrf.mxu3  ;;  %vm10806_vm15 = vmmov %vm10789_vm4 }
 0x3d3   :  { %v8440_v51 = vpop.f32.mrf.mxu2 }
 0x3d4   :  { %10800 = vst [vmem:[#allocation72_spill] sm:$0xff] %v8440_v51 }
 0x3d5   :  { %v8458_v13 = vpop.f32.mrf.mxu0  ;;  %v8460_v51 = vpop.f32.mrf.mxu1 }
 0x3d7   :  { %5350 = vmatmul.msk.f32.gmra.mxu2 %vm10801_vm7, %v2905_v20  ;;  %5358 = vmatmul.msk.f32.gmra.mxu3 %vm10802_vm14, %v2905_v20 }
 0x3d9   :  { %5333 = vmatmul.msk.f32.gmra.mxu0 %vm10803_vm12, %v2904_v58  ;;  %5341 = vmatmul.msk.f32.gmra.mxu1 %vm10804_vm11, %v2904_v58  ;;  %v8467_v55 = vpop.f32.mrf.mxu3 }
 0x3da   :  { %10807 = vst [vmem:[#allocation74_spill] sm:$0xff] %v8467_v55  ;;  %v1411_v55 = vadd.f32 %v8059_v11, %v7841_v39  ;;  %v1440_v39 = vadd.f32 %v8046_v1, %v7899_v7  ;;  %v10832_v1 = vld [vmem:[#allocation42_spill] sm:$0xff] }
 0x3db   :  { %v2339_v23 = vpop.f32.mrf.mxu2  ;;  %v10833_v11 = vld [vmem:[#allocation46_spill] sm:$0xff] }
 0x3dc   :  { %v8456_v33 = vadd.f32 %v2339_v23, %v2164_v56  ;;  %v2152_v56 = vadd.f32 %v8324_v27, %v1931_v45  ;;  %v1716_v7 = vadd.f32 %v8201_v50, %v1411_v55 }
 0x3dd   :  { %v8471_v31 = vpop.f32.mrf.mxu0  ;;  %v8473_v37 = vpop.f32.mrf.mxu1 }
 0x3de   :  { %10805 = vst [vmem:[#allocation73_spill] sm:$0xff] %v8456_v33  ;;  %v2373_v58 = vadd.f32 %v2330_v22, %v2152_v56 }
 0x3df   :  { %10808 = vst [vmem:[#allocation75_spill] sm:$0xff] %v8471_v31  ;;  %v1408_v31 = vadd.f32 %v8007_v57, %v7798_v38 }
 0x3e0   :  { %10809 = vst [vmem:[#allocation76_spill] sm:$0xff] %v8473_v37 }
 0x3e1   :  { %5334 = vmatmul.msk.f32.gmra.mxu0 %vm10806_vm15, %v2905_v20  ;;  %5342 = vmatmul.msk.f32.gmra.mxu1 %vm10789_vm4, %v2905_v20  ;;  %v8477_v3 = vpop.f32.mrf.mxu3 }
 0x3e2   :  { %10810 = vst [vmem:[#allocation77_spill] sm:$0xff] %v8477_v3 }
 0x3e5   :  { %v8479_v15 = vpop.f32.mrf.mxu0  ;;  %v8481_v20 = vpop.f32.mrf.mxu1 }
 0x3e6   :  { %10811 = vst [vmem:[#allocation78_spill] sm:$0xff] %v8479_v15 }
 0x3e7   :  { %10812 = vst [vmem:[#allocation79_spill] sm:$0xff] %v8481_v20 }
 0x3ea   :  { %v2551_v23 = vpop.f32.mrf.mxu2 }
 0x3eb   :  { %v8475_v33 = vadd.f32 %v2551_v23, %v2373_v58 }
 0x3ed   :  { %v8485_v54 = vpop.f32.mrf.mxu0  ;;  %v8487_v52 = vpop.f32.mrf.mxu1 }
 0x3f2   :  { %v8491_v22 = vpop.f32.mrf.mxu2 }
 0x3f3   :  { %v8483_v19 = vpop.f32.mrf.mxu3  ;;  %10814 = vst [vmem:[#allocation81_spill] sm:$0xff] %v8491_v22 }
 0x3f5   :  { %v8493_v28 = vpop.f32.mrf.mxu0  ;;  %v8495_v45 = vpop.f32.mrf.mxu1 }
 0x3f6   :  { %10815 = vst [vmem:[#allocation82_spill] sm:$0xff] %v8493_v28 }
 0x3f7   :  { %10816 = vst [vmem:[#allocation83_spill] sm:$0xff] %v8495_v45 }
 0x3fa   :  { %v8499_v58 = vpop.f32.mrf.mxu2 }
 0x3fb   :  { %v8489_v27 = vpop.f32.mrf.mxu3  ;;  %10818 = vst [vmem:[#allocation85_spill] sm:$0xff] %v8499_v58 }
 0x3fc   :  { %10813 = vst [vmem:[#allocation80_spill] sm:$0xff] %v8489_v27 }
 0x3fd   :  { %v8501_v23 = vpop.f32.mrf.mxu0  ;;  %v8503_v20 = vpop.f32.mrf.mxu1 }
 0x3fe   :  { %10819 = vst [vmem:[#allocation86_spill] sm:$0xff] %v8501_v23 }
 0x3ff   :  { %10820 = vst [vmem:[#allocation87_spill] sm:$0xff] %v8503_v20 }
 0x402   :  { %v8507_v3 = vpop.f32.mrf.mxu2 }
 0x403   :  { %v8497_v56 = vpop.f32.mrf.mxu3  ;;  %10822 = vst [vmem:[#allocation89_spill] sm:$0xff] %v8507_v3 }
 0x404   :  { %10817 = vst [vmem:[#allocation84_spill] sm:$0xff] %v8497_v56 }
 0x405   :  { %v8509_v37 = vpop.f32.mrf.mxu0  ;;  %v8511_v27 = vpop.f32.mrf.mxu1 }
 0x406   :  { %10823 = vst [vmem:[#allocation90_spill] sm:$0xff] %v8509_v37 }
 0x407   :  { %10824 = vst [vmem:[#allocation91_spill] sm:$0xff] %v8511_v27  ;;  %v1405_v27 = vadd.f32 %v7977_v42, %v7932_v61  ;;  %v1437_v61 = vadd.f32 %v8001_v12, %v7861_v44  ;;  %v1712_v42 = vadd.f32 %v8166_v41, %v1408_v31  ;;  %v1469_v44 = vadd.f32 %v8068_v18, %v7939_v36  ;;  %v10837_v41 = vld [vmem:[#allocation63_spill] sm:$0xff] }
 0x408   :  { %v10839_v31 = vld [vmem:[#allocation55_spill] sm:$0xff] }
 0x409   :  { %v1708_v38 = vadd.f32 %v8132_v4, %v1405_v27  ;;  %v10835_v4 = vld [vmem:[#allocation17_spill] sm:$0xff] }
 0x40b   :  { %v8505_v15 = vpop.f32.mrf.mxu3 }
 0x40c   :  { %10821 = vst [vmem:[#allocation88_spill] sm:$0xff] %v8505_v15 }
 0x41a   :  { %v8513_v22 = vpop.f32.mrf.mxu3  ;;  %v8515_v28 = vpop.f32.mrf.mxu2 }
 0x41b   :  { %v8517_v45 = vpop.f32.mrf.mxu0 }
 0x41c   :  { %v8519_v56 = vpop.f32.mrf.mxu1 }
 0x422   :  { %v8523_v23 = vpop.f32.mrf.mxu2 }
 0x423   :  { %v8521_v58 = vpop.f32.mrf.mxu3  ;;  %v8525_v20 = vpop.f32.mrf.mxu0 }
 0x424   :  { %10825 = vst [vmem:[#allocation92_spill] sm:$0xff] %v8521_v58  ;;  %v8527_v15 = vpop.f32.mrf.mxu1  ;;  %v1414_v58 = vadd.f32 %v8103_v2, %v7844_v53  ;;  %v1466_v53 = vadd.f32 %v8034_v16, %v7915_v30  ;;  %v10830_v16 = vld [vmem:[#allocation48_spill] sm:$0xff]  ;;  %v10834_v2 = vld [vmem:[#allocation43_spill] sm:$0xff] }
 0x425   :  { %10826 = vst [vmem:[#allocation93_spill] sm:$0xff] %v8525_v20  ;;  %v1492_v20 = vadd.f32 %v8005_v48, %v7884_v49  ;;  %v1495_v49 = vadd.f32 %v8040_v35, %v7919_v8  ;;  %v1501_v8 = vadd.f32 %v8114_v40, %v7981_v24  ;;  %v1713_v35 = vadd.f32 %v10830_v16, %v1437_v61  ;;  %v10836_v40 = vld [vmem:[#allocation29_spill] sm:$0xff]  ;;  %v10845_v16 = vld [vmem:[#allocation59_spill] sm:$0xff] }
 0x426   :  { %10827 = vst [vmem:[#allocation94_spill] sm:$0xff] %v8527_v15  ;;  %v1720_v12 = vadd.f32 %v8224_v34, %v1414_v58  ;;  %v1714_v36 = vadd.f32 %v10832_v1, %v1466_v53  ;;  %v1929_v24 = vadd.f32 %v10835_v4, %v1708_v38  ;;  %v10838_v34 = vld [vmem:[#allocation51_spill] sm:$0xff]  ;;  %v10849_v4 = vld [vmem:[#allocation54_spill] sm:$0xff] }
 0x427   :  { %v1711_v48 = vadd.f32 %v8134_v0, %v1492_v20  ;;  %v1715_v18 = vadd.f32 %v10833_v11, %v1495_v49  ;;  %v1718_v0 = vadd.f32 %v10836_v40, %v1469_v44  ;;  %v10840_v20 = vld [vmem:[#allocation13_spill] sm:$0xff]  ;;  %v10841_v58 = vld [vmem:[#allocation15_spill] sm:$0xff]  ;;  %v10843_v49 = vld [vmem:[#allocation56_spill] sm:$0xff] }
 0x428   :  { %v1723_v61 = vadd.f32 %v10841_v58, %v1501_v8  ;;  %v10847_v11 = vld [vmem:[#allocation53_spill] sm:$0xff]  ;;  %v10856_v58 = vld [vmem:[#allocation64_spill] sm:$0xff] }
 0x429   :  { %v1932_v57 = vadd.f32 %v8229_v26, %v1711_v48  ;;  %v1934_v48 = vadd.f32 %v10843_v49, %v1713_v35  ;;  %v10850_v40 = vld [vmem:[#allocation57_spill] sm:$0xff] }
 0x42a   :  { %v8531_v37 = vpop.f32.mrf.mxu2 }
 0x42b   :  { %v8529_v3 = vpop.f32.mrf.mxu3  ;;  %10829 = vst [vmem:[#allocation96_spill] sm:$0xff] %v8531_v37  ;;  %v8543_v15 = vpop.f32.mrf.mxu0  ;;  %v1434_v37 = vadd.f32 %v7967_v6, %v7830_v43  ;;  %v1443_v43 = vadd.f32 %v8091_v21, %v7927_v60  ;;  %v1498_v6 = vadd.f32 %v8072_v14, %v7943_v9  ;;  %v10831_v21 = vld [vmem:[#allocation52_spill] sm:$0xff]  ;;  %v2153_v26 = vadd.f32 %v10837_v41, %v1932_v57 }
 0x42c   :  { %10828 = vst [vmem:[#allocation95_spill] sm:$0xff] %v8529_v3  ;;  %v8545_v3 = vpop.f32.mrf.mxu1  ;;  %v1717_v60 = vadd.f32 %v10831_v21, %v1440_v39  ;;  %v8576_v9 = vpop.permute.xlu1 %3071  ;;  %v10842_v39 = vld [vmem:[#allocation58_spill] sm:$0xff]  ;;  %v10846_v21 = vld [vmem:[#allocation47_spill] sm:$0xff]  ;;  %v10851_v41 = vld [vmem:[#allocation60_spill] sm:$0xff] }
 0x42d   :  { %v1709_v30 = vadd.f32 %v8126_v59, %v1434_v37  ;;  %v1721_v59 = vadd.f32 %v10834_v2, %v1443_v43  ;;  %v1719_v55 = vadd.f32 %v10838_v34, %v1498_v6  ;;  %v1933_v37 = vadd.f32 %v10839_v31, %v1712_v42  ;;  %v10844_v43 = vld [vmem:[#allocation61_spill] sm:$0xff]  ;;  %v10848_v2 = vld [vmem:[#allocation62_spill] sm:$0xff] }
 0x42e   :  { %v1937_v53 = vadd.f32 %v10842_v39, %v1716_v7  ;;  %v1941_v38 = vadd.f32 %v10844_v43, %v1720_v12  ;;  %v2374_v44 = vadd.f32 %v8434_v46, %v2153_v26  ;;  %v1938_v57 = vadd.f32 %v10845_v16, %v1717_v60  ;;  %v10852_v46 = vld [vmem:[#allocation65_spill] sm:$0xff]  ;;  %v10853_v26 = vld [vmem:[#allocation66_spill] sm:$0xff]  ;;  %v10857_v39 = vld [vmem:[#allocation67_spill] sm:$0xff] }
 0x42f   :  { %v1930_v27 = vadd.f32 %v10840_v20, %v1709_v30  ;;  %v1935_v1 = vadd.f32 %v10846_v21, %v1714_v36  ;;  %v1936_v6 = vadd.f32 %v10847_v11, %v1715_v18  ;;  %v1942_v42 = vadd.f32 %v10848_v2, %v1721_v59  ;;  %v10854_v31 = vld [vmem:[#allocation69_spill] sm:$0xff]  ;;  %v10855_v20 = vld [vmem:[#allocation70_spill] sm:$0xff]  ;;  %v10859_v16 = vld [vmem:[#allocation71_spill] sm:$0xff] }
 0x430   :  { %v1939_v30 = vadd.f32 %v10849_v4, %v1718_v0  ;;  %v1940_v8 = vadd.f32 %v10850_v40, %v1719_v55  ;;  %v1944_v7 = vadd.f32 %v10851_v41, %v1723_v61  ;;  %v2595_v35 = vadd.f32 %v8483_v19, %v2374_v44  ;;  %v10858_v44 = vld [vmem:[#allocation68_spill] sm:$0xff]  ;;  %v10861_v4 = vld [vmem:[#allocation74_spill] sm:$0xff]  ;;  %v10862_v40 = vld [vmem:[#allocation75_spill] sm:$0xff] }
 0x431   :  { %v2150_v60 = vadd.f32 %v10852_v46, %v1929_v24  ;;  %v2151_v36 = vadd.f32 %v10853_v26, %v1930_v27  ;;  %v2154_v18 = vadd.f32 %v10854_v31, %v1933_v37  ;;  %v2155_v59 = vadd.f32 %v10855_v20, %v1934_v48 }
 0x432   :  { %v8584_v50 = vpop.f32.mrf.mxu2  ;;  %v2156_v0 = vadd.f32 %v10856_v58, %v1935_v1  ;;  %v2157_v55 = vadd.f32 %v10857_v39, %v1936_v6  ;;  %v2158_v61 = vadd.f32 %v8402_v5, %v1937_v53  ;;  %v2816_v19 = vadd.f32 %v8513_v22, %v2595_v35  ;;  %v10864_v35 = vld [vmem:[#allocation81_spill] sm:$0xff]  ;;  %v10867_v58 = vld [vmem:[#allocation78_spill] sm:$0xff]  ;;  %v10868_v39 = vld [vmem:[#allocation79_spill] sm:$0xff] }
 0x433   :  { %v8578_v14 = vpop.f32.mrf.mxu3  ;;  %v2159_v49 = vadd.f32 %v8404_v25, %v1938_v57  ;;  %v2371_v43 = vadd.f32 %v8444_v62, %v2150_v60  ;;  %v2372_v24 = vadd.f32 %v8446_v47, %v2151_v36  ;;  %v2815_v27 = vadd.f32 %v8515_v28, %v8475_v33  ;;  %v10865_v60 = vld [vmem:[#allocation80_spill] sm:$0xff]  ;;  %v10866_v36 = vld [vmem:[#allocation77_spill] sm:$0xff] }
 0x434   :  { %v8602_v34 = vpop.f32.mrf.mxu0  ;;  %v8604_v12 = vpop.f32.mrf.mxu1  ;;  %v2160_v48 = vadd.f32 %v10858_v44, %v1939_v30  ;;  %v2161_v21 = vadd.f32 %v10859_v16, %v1940_v8  ;;  %v2162_v1 = vadd.f32 %v8430_v10, %v1941_v38  ;;  %v2163_v22 = vadd.f32 %v8432_v17, %v1942_v42  ;;  %v10871_v44 = vld [vmem:[#allocation83_spill] sm:$0xff] }
 0x435   :  { %v3057_v53 = vpop.permute.xlu1 %3056  ;;  %v2592_v25 = vadd.f32 %v8485_v54, %v2371_v43  ;;  %v2593_v62 = vadd.f32 %v8487_v52, %v2372_v24  ;;  %v2165_v57 = vadd.f32 %v8406_v29, %v1944_v7  ;;  %v2377_v33 = vadd.f32 %v8428_v32, %v2156_v0  ;;  %v10860_v52 = vld [vmem:[#allocation72_spill] sm:$0xff] }
 0x436   :  { %v2378_v28 = vadd.f32 %v8452_v63, %v2157_v55  ;;  %v2375_v10 = vadd.f32 %v8458_v13, %v2154_v18  ;;  %v2376_v54 = vadd.f32 %v8460_v51, %v2155_v59  ;;  %v2381_v42 = vadd.f32 %v10860_v52, %v2160_v48  ;;  %v10863_v7 = vld [vmem:[#allocation76_spill] sm:$0xff] }
 0x437   :  { %v2813_v38 = vadd.f32 %v8517_v45, %v2592_v25  ;;  %v2814_v17 = vadd.f32 %v8519_v56, %v2593_v62  ;;  %v2382_v29 = vadd.f32 %v10861_v4, %v2161_v21  ;;  %v2379_v8 = vadd.f32 %v10862_v40, %v2158_v61  ;;  %v10874_v62 = vld [vmem:[#allocation94_spill] sm:$0xff]  ;;  %v10876_v4 = vld [vmem:[#allocation87_spill] sm:$0xff]  ;;  %v10878_v40 = vld [vmem:[#allocation89_spill] sm:$0xff] }
 0x438   :  { %v2380_v56 = vadd.f32 %v10863_v7, %v2159_v49  ;;  %v2598_v46 = vadd.f32 %v10864_v35, %v2377_v33  ;;  %v2599_v51 = vadd.f32 %v10865_v60, %v2378_v28  ;;  %v8645_v31 = vadd.f32 %v10866_v36, %v2165_v57  ;;  %v10875_v33 = vld [vmem:[#allocation86_spill] sm:$0xff]  ;;  %v10881_v36 = vld [vmem:[#allocation91_spill] sm:$0xff] }
 0x439   :  { %v2383_v0 = vadd.f32 %v10867_v58, %v2162_v1  ;;  %v2384_v55 = vadd.f32 %v10868_v39, %v2163_v22  ;;  %v2597_v48 = vadd.f32 %v10871_v44, %v2376_v54  ;;  %v10872_v22 = vld [vmem:[#allocation85_spill] sm:$0xff]  ;;  %v2600_v28 = vadd.f32 %v10875_v33, %v2379_v8  ;;  %v10880_v35 = vld [vmem:[#allocation90_spill] sm:$0xff]  ;;  %v10882_v58 = vld [vmem:[#allocation96_spill] sm:$0xff] }
 0x43a   :  { %v2819_v61 = vadd.f32 %v8523_v23, %v2598_v46  ;;  %v10873_v23 = vld [vmem:[#allocation93_spill] sm:$0xff]  ;;  %v10884_v33 = vld [vmem:[#allocation88_spill] sm:$0xff] }
 0x43b   :  { %v2604_v46 = vadd.f32 %v10880_v35, %v2383_v0 }
 0x442   :  { %v3022_v37 = vpop.f32.mrf.mxu3  ;;  %v2993_v11 = vpop.f32.mrf.mxu2 }
 0x443   :  { %v3037_v5 = vadd.f32 %v3022_v37, %v2816_v19  ;;  %v3036_v47 = vadd.f32 %v2993_v11, %v2815_v27  ;;  %v10869_v19 = vld [vmem:[#allocation92_spill] sm:$0xff]  ;;  %v10870_v27 = vld [vmem:[#allocation82_spill] sm:$0xff] }
 0x444   :  { %v2820_v49 = vadd.f32 %v10869_v19, %v2599_v51  ;;  %v2596_v37 = vadd.f32 %v10870_v27, %v2375_v10  ;;  %v2821_v27 = vadd.f32 %v8543_v15, %v2600_v28  ;;  %v2607_v28 = vadd.f32 %v10884_v33, %v8645_v31 }
 0x445   :  { %v8628_v6 = vadd.f32 %v3057_v53, %v3037_v5  ;;  %v8633_v2 = vadd.f32 %v3057_v53, %v3036_v47  ;;  %v3062_v5 = vpop.permute.xlu2 %3061  ;;  %v2818_v47 = vadd.f32 %v10874_v62, %v2597_v48  ;;  %v2825_v31 = vadd.f32 %v8602_v34, %v2604_v46 }
 0x446   :  { %v2935_v30 = vpop.f32.mrf.mxu0  ;;  %v2964_v63 = vpop.f32.mrf.mxu1  ;;  %v2817_v25 = vadd.f32 %v10873_v23, %v2596_v37 }
 0x447   :  { %v3109_v32 = vmin.f32 %v8628_v6, 20.0  ;;  %v3108_v13 = vmin.f32 %v8633_v2, 20.0  ;;  %v3034_v41 = vadd.f32 %v2935_v30, %v2813_v38  ;;  %v3035_v45 = vadd.f32 %v2964_v63, %v2814_v17 }
 0x448   :  { %vm3092_vm7 = vcmp.gt.f32.partialorder %v8633_v2, 20.0  ;;  %vm3093_vm12 = vcmp.gt.f32.partialorder %v8628_v6, 20.0 }
 0x449   :  { %v3128_v26 = vmul.f32 1.442695, %v3109_v32  ;;  %v3126_v18 = vmul.f32 1.442695, %v3108_v13  ;;  %v8647_v20 = vadd.f32 %v3057_v53, %v3034_v41  ;;  %v8649_v59 = vadd.f32 %v3057_v53, %v3035_v45  ;;  %v10879_v41 = vld [vmem:[#allocation84_spill] sm:$0xff] }
 0x44a   :  { %v2996_v43 = vpop.f32.mrf.mxu2  ;;  %v3025_v24 = vpop.f32.mrf.mxu3  ;;  %v2602_v53 = vadd.f32 %v10872_v22, %v2381_v42  ;;  %v2601_v32 = vadd.f32 %v10876_v4, %v2380_v56  ;;  %v10877_v42 = vld [vmem:[#allocation73_spill] sm:$0xff]  ;;  %v2603_v45 = vadd.f32 %v10879_v41, %v2382_v29 }
 0x44b   :  { %5640 = vpow2.f32 %v3126_v18  ;;  %v3106_v16 = vmin.f32 %v8647_v20, 20.0  ;;  %v3107_v21 = vmin.f32 %v8649_v59, 20.0  ;;  %v3040_v11 = vadd.f32 %v2996_v43, %v2819_v61  ;;  %v10883_v43 = vld [vmem:[#allocation95_spill] sm:$0xff] }
 0x44c   :  { %5642 = vpow2.f32 %v3128_v26  ;;  %v3041_v1 = vadd.f32 %v3025_v24, %v2820_v49  ;;  %v2606_v13 = vadd.f32 %v10878_v40, %v10877_v42  ;;  %v2605_v18 = vadd.f32 %v10881_v36, %v2384_v55 }
 0x44d   :  { %v3122_v57 = vmul.f32 1.442695, %v3106_v16  ;;  %v3124_v10 = vmul.f32 1.442695, %v3107_v21  ;;  %v8663_v38 = vadd.f32 %v3062_v5, %v3040_v11  ;;  %v2823_v39 = vadd.f32 %v10882_v58, %v2602_v53  ;;  %v3067_v21 = vpop.permute.xlu0 %3066 }
 0x44e   :  { %v8665_v17 = vadd.f32 %v3062_v5, %v3041_v1  ;;  %v2938_v54 = vpop.f32.mrf.mxu0  ;;  %v2967_v52 = vpop.f32.mrf.mxu1  ;;  %v2824_v24 = vadd.f32 %v10883_v43, %v2603_v45  ;;  %v2822_v44 = vadd.f32 %v8545_v3, %v2601_v32  ;;  %vm3090_vm14 = vcmp.gt.f32.partialorder %v8647_v20, 20.0 }
 0x44f   :  { %5644 = vpow2.f32 %v3122_v57  ;;  %v3038_v30 = vadd.f32 %v2938_v54, %v2817_v25  ;;  %v3039_v63 = vadd.f32 %v2967_v52, %v2818_v47  ;;  %v3112_v8 = vmin.f32 %v8663_v38, 20.0 }
 0x450   :  { %5646 = vpow2.f32 %v3124_v10  ;;  %v3113_v60 = vmin.f32 %v8665_v17, 20.0  ;;  %v2827_v52 = vadd.f32 %v8584_v50, %v2606_v13  ;;  %vm3091_vm11 = vcmp.gt.f32.partialorder %v8649_v59, 20.0 }
 0x451   :  { %v5641_v7 = vpop.eup %5640  ;;  %v8674_v51 = vadd.f32 %v3062_v5, %v3038_v30  ;;  %v8676_v26 = vadd.f32 %v3062_v5, %v3039_v63  ;;  %v3134_v19 = vmul.f32 1.442695, %v3112_v8  ;;  %v2828_v63 = vadd.f32 %v8578_v14, %v2607_v28 }
 0x452   :  { %v5643_v56 = vpop.eup %5642  ;;  %v3156_v61 = vadd.f32 1.0, %v5641_v7  ;;  %v2999_v29 = vpop.f32.mrf.mxu2  ;;  %v3136_v0 = vmul.f32 1.442695, %v3113_v60  ;;  %v2826_v7 = vadd.f32 %v8604_v12, %v2605_v18 }
 0x453   :  { %v3028_v49 = vpop.f32.mrf.mxu3  ;;  %v3110_v37 = vmin.f32 %v8674_v51, 20.0  ;;  %v3111_v48 = vmin.f32 %v8676_v26, 20.0  ;;  %v3044_v16 = vadd.f32 %v2999_v29, %v2823_v39  ;;  %v3157_v11 = vadd.f32 1.0, %v5643_v56 }
 0x454   :  { %5648 = vlog2.f32 %v3156_v61  ;;  %v3045_v5 = vadd.f32 %v3028_v49, %v2824_v24  ;;  %vm3094_vm15 = vcmp.gt.f32.partialorder %v8674_v51, 20.0  ;;  %vm3095_vm4 = vcmp.gt.f32.partialorder %v8676_v26, 20.0 }
 0x455   :  { %v5645_v55 = vpop.eup %5644  ;;  %5650 = vpow2.f32 %v3134_v19  ;;  %v3130_v1 = vmul.f32 1.442695, %v3110_v37  ;;  %v3132_v23 = vmul.f32 1.442695, %v3111_v48  ;;  %v8685_v15 = vadd.f32 %v3067_v21, %v3044_v16 }
 0x456   :  { %v5647_v22 = vpop.eup %5646  ;;  %v3154_v53 = vadd.f32 1.0, %v5645_v55  ;;  %5652 = vpow2.f32 %v3136_v0  ;;  %v2941_v25 = vpop.f32.mrf.mxu0  ;;  %v8687_v3 = vadd.f32 %v3067_v21, %v3045_v5 }
 0x457   :  { %v2970_v62 = vpop.f32.mrf.mxu1  ;;  %v3155_v47 = vadd.f32 1.0, %v5647_v22  ;;  %5654 = vpow2.f32 %v3130_v1  ;;  %v3042_v57 = vadd.f32 %v2941_v25, %v2821_v27  ;;  %v3116_v10 = vmin.f32 %v8685_v15, 20.0 }
 0x458   :  { %5656 = vlog2.f32 %v3154_v53  ;;  %v3043_v54 = vadd.f32 %v2970_v62, %v2822_v44  ;;  %v3117_v4 = vmin.f32 %v8687_v3, 20.0 }
 0x459   :  { %5658 = vlog2.f32 %v3155_v47  ;;  %v8694_v32 = vadd.f32 %v3067_v21, %v3042_v57  ;;  %v3142_v42 = vmul.f32 1.442695, %v3116_v10 }
 0x45a   :  { %v5649_v30 = vpop.eup %5648  ;;  %5660 = vpow2.f32 %v3132_v23  ;;  %v8697_v40 = vadd.f32 %v3067_v21, %v3043_v54  ;;  %v3144_v45 = vmul.f32 1.442695, %v3117_v4  ;;  %v3002_v50 = vpop.f32.mrf.mxu2 }
 0x45b   :  { %v5651_v41 = vpop.eup %5650  ;;  %5662 = vlog2.f32 %v3157_v11  ;;  %v3114_v8 = vmin.f32 %v8694_v32, 20.0  ;;  %v3031_v14 = vpop.f32.mrf.mxu3  ;;  %v3048_v61 = vadd.f32 %v3002_v50, %v2827_v52  ;;  %v3175_v21 = vmul.f32 0.6931472, %v5649_v30 }
 0x45c   :  { %v5653_v13 = vpop.eup %5652  ;;  %v3160_v35 = vadd.f32 1.0, %v5651_v41  ;;  %5664 = vpow2.f32 %v3142_v42  ;;  %v3115_v60 = vmin.f32 %v8697_v40, 20.0  ;;  %v3049_v18 = vadd.f32 %v3031_v14, %v2828_v63 }
 0x45d   :  { %v5655_v56 = vpop.eup %5654  ;;  %v3161_v36 = vadd.f32 1.0, %v5653_v13  ;;  %5666 = vpow2.f32 %v3144_v45  ;;  %v3138_v58 = vmul.f32 1.442695, %v3114_v8  ;;  %v8706_v27 = vadd.f32 %v8576_v9, %v3048_v61 }
 0x45e   :  { %v5657_v34 = vpop.eup %5656  ;;  %5668 = vlog2.f32 %v3160_v35  ;;  %v3158_v46 = vadd.f32 1.0, %v5655_v56  ;;  %v3140_v39 = vmul.f32 1.442695, %v3115_v60  ;;  %v2944_v19 = vpop.f32.mrf.mxu0  ;;  %v8710_v48 = vadd.f32 %v8576_v9, %v3049_v18 }
 0x45f   :  { %v2973_v29 = vpop.f32.mrf.mxu1  ;;  %v5659_v49 = vpop.eup %5658  ;;  %v3171_v12 = vmul.f32 0.6931472, %v5657_v34  ;;  %5670 = vlog2.f32 %v3161_v36  ;;  %v3046_v0 = vadd.f32 %v2944_v19, %v2825_v31  ;;  %v3120_v5 = vmin.f32 %v8706_v27, 20.0 }
 0x460   :  { %v5661_v43 = vpop.eup %5660  ;;  %v3173_v24 = vmul.f32 0.6931472, %v5659_v49  ;;  %5672 = vlog2.f32 %v3158_v46  ;;  %v3047_v16 = vadd.f32 %v2973_v29, %v2826_v7  ;;  %v3121_v25 = vmin.f32 %v8710_v48, 20.0 }
 0x461   :  { %v5663_v37 = vpop.eup %5662  ;;  %v3159_v44 = vadd.f32 1.0, %v5661_v43  ;;  %5674 = vpow2.f32 %v3138_v58  ;;  %v8719_v53 = vsel %vm3090_vm14, %v8647_v20, %v3171_v12  ;;  %v8726_v62 = vadd.f32 %v8576_v9, %v3046_v0 }
 0x462   :  { %v5665_v55 = vpop.eup %5664  ;;  %5676 = vpow2.f32 %v3140_v39  ;;  %v8722_v23 = vsel %vm3091_vm11, %v8649_v59, %v3173_v24  ;;  %v3150_v33 = vmul.f32 1.442695, %v3120_v5  ;;  %v8729_v28 = vadd.f32 %v8576_v9, %v3047_v16 }
 0x463   :  { %v5667_v11 = vpop.eup %5666  ;;  %5678 = vlog2.f32 %v3159_v44  ;;  %v3164_v1 = vadd.f32 1.0, %v5665_v55  ;;  %v3177_v10 = vmul.f32 0.6931472, %v5663_v37  ;;  %v8734_v20 = vsel %vm3092_vm7, %v8633_v2, %v3175_v21 }
 0x464   :  { %v5669_v22 = vpop.eup %5668  ;;  %v3165_v57 = vadd.f32 1.0, %v5667_v11  ;;  %vm3096_vm14 = vcmp.gt.f32.partialorder %v8663_v38, 20.0  ;;  %v3152_v59 = vmul.f32 1.442695, %v3121_v25  ;;  %v3118_v52 = vmin.f32 %v8726_v62, 20.0 }
 0x465   :  { %v5671_v47 = vpop.eup %5670  ;;  %5680 = vlog2.f32 %v3164_v1  ;;  %v3242_v30 = vmul.f32 %v8719_v53, %v8719_v53  ;;  %v3243_v9 = vmul.f32 %v8722_v23, %v8722_v23  ;;  %v3119_v31 = vmin.f32 %v8729_v28, 20.0 }
 0x466   :  { %v5673_v54 = vpop.eup %5672  ;;  %5682 = vpow2.f32 %v3150_v33  ;;  %v3146_v2 = vmul.f32 1.442695, %v3118_v52  ;;  %v3218_v13 = vadd.f32 %v8722_v23, %v8719_v53  ;;  %v8753_v60 = vsel %vm3093_vm12, %v8628_v6, %v3177_v10 }
 0x467   :  { %v5675_v4 = vpop.eup %5674  ;;  %v3179_v63 = vmul.f32 0.6931472, %v5673_v54  ;;  %5684 = vpow2.f32 %v3152_v59  ;;  %v3148_v35 = vmul.f32 1.442695, %v3119_v31  ;;  %v3183_v14 = vmul.f32 0.6931472, %v5669_v22 }
 0x468   :  { %v5677_v42 = vpop.eup %5676  ;;  %v3162_v41 = vadd.f32 1.0, %v5675_v4  ;;  %5686 = vlog2.f32 %v3165_v57  ;;  %v3244_v34 = vmul.f32 %v8734_v20, %v8734_v20  ;;  %v3258_v46 = vadd.f32 %v3243_v9, %v3242_v30 }
 0x469   :  { %v5679_v45 = vpop.eup %5678  ;;  %v8746_v8 = vsel %vm3094_vm15, %v8674_v51, %v3179_v63  ;;  %v3163_v50 = vadd.f32 1.0, %v5677_v42  ;;  %v3219_v51 = vadd.f32 %v3218_v13, %v8734_v20  ;;  %v3245_v61 = vmul.f32 %v8753_v60, %v8753_v60 }
 0x46a   :  { %v3181_v7 = vmul.f32 0.6931472, %v5679_v45  ;;  %5688 = vlog2.f32 %v3162_v41  ;;  %v3246_v56 = vmul.f32 %v8746_v8, %v8746_v8  ;;  %v3185_v19 = vmul.f32 0.6931472, %v5671_v47 }
 0x46b   :  { %5690 = vlog2.f32 %v3163_v50  ;;  %v5681_v36 = vpop.eup %5680  ;;  %v3220_v39 = vadd.f32 %v3219_v51, %v8753_v60  ;;  %v8775_v24 = vsel %vm3096_vm14, %v8663_v38, %v3183_v14  ;;  %vm3097_vm7 = vcmp.gt.f32.partialorder %v8665_v17, 20.0 }
 0x46c   :  { %v8761_v58 = vsel %vm3095_vm4, %v8676_v26, %v3181_v7  ;;  %5692 = vpow2.f32 %v3146_v2  ;;  %v5683_v6 = vpop.eup %5682  ;;  %v3259_v26 = vadd.f32 %v3258_v46, %v3244_v34  ;;  %vm3100_vm12 = vcmp.gt.f32.partialorder %v8685_v15, 20.0 }
 0x46d   :  { %5694 = vpow2.f32 %v3148_v35  ;;  %v5685_v29 = vpop.eup %5684  ;;  %v3247_v49 = vmul.f32 %v8761_v58, %v8761_v58  ;;  %v3168_v12 = vadd.f32 1.0, %v5683_v6  ;;  %v3223_v18 = vadd.f32 %v8761_v58, %v8746_v8  ;;  %3221 = vadd.xlane.f32.xlu1 %v3220_v39 }
 0x46e   :  { %v5687_v43 = vpop.eup %5686  ;;  %v3169_v37 = vadd.f32 1.0, %v5685_v29  ;;  %v3260_v44 = vadd.f32 %v3259_v26, %v3245_v61  ;;  %v3191_v21 = vmul.f32 0.6931472, %v5681_v36  ;;  %vm3098_vm11 = vcmp.gt.f32.partialorder %v8694_v32, 20.0 }
 0x46f   :  { %v3224_v16 = vadd.f32 %v3223_v18, %v8775_v24  ;;  %v8782_v1 = vsel %vm3097_vm7, %v8665_v17, %v3185_v19  ;;  %5696 = vlog2.f32 %v3168_v12  ;;  %v3263_v25 = vadd.f32 %v3247_v49, %v3246_v56 }
 0x470   :  { %v5689_v0 = vpop.eup %5688  ;;  %3261 = vadd.xlane.f32.xlu2 %v3260_v44  ;;  %vm3099_vm15 = vcmp.gt.f32.partialorder %v8697_v40, 20.0  ;;  %v3248_v10 = vmul.f32 %v8775_v24, %v8775_v24  ;;  %5698 = vlog2.f32 %v3169_v37  ;;  %v3193_v59 = vmul.f32 0.6931472, %v5687_v43 }
 0x471   :  { %v5691_v55 = vpop.eup %5690  ;;  %v3187_v11 = vmul.f32 0.6931472, %v5689_v0  ;;  %v3225_v22 = vadd.f32 %v3224_v16, %v8782_v1  ;;  %v8803_v30 = vsel %vm3100_vm12, %v8685_v15, %v3191_v21  ;;  %vm3101_vm4 = vcmp.gt.f32.partialorder %v8687_v3, 20.0 }
 0x472   :  { %v5693_v38 = vpop.eup %5692  ;;  %v3189_v5 = vmul.f32 0.6931472, %v5691_v55  ;;  %v3249_v42 = vmul.f32 %v8782_v1, %v8782_v1  ;;  %v8810_v41 = vsel %vm3101_vm4, %v8687_v3, %v3193_v59  ;;  %v3252_v7 = vmul.f32 %v8803_v30, %v8803_v30 }
 0x473   :  { %v5695_v47 = vpop.eup %5694  ;;  %v8786_v57 = vsel %vm3098_vm11, %v8694_v32, %v3187_v11  ;;  %v3166_v33 = vadd.f32 1.0, %v5693_v38  ;;  %3226 = vadd.xlane.f32.xlu0 %v3225_v22  ;;  %vm3102_vm14 = vcmp.gt.f32.partialorder %v8726_v62, 20.0  ;;  %vm3104_vm7 = vcmp.gt.f32.partialorder %v8706_v27, 20.0 }
 0x474   :  { %v8792_v17 = vsel %vm3099_vm15, %v8697_v40, %v3189_v5  ;;  %v3167_v54 = vadd.f32 1.0, %v5695_v47  ;;  %v3250_v52 = vmul.f32 %v8786_v57, %v8786_v57  ;;  %v3264_v40 = vadd.f32 %v3263_v25, %v3248_v10 }
 0x475   :  { %v3251_v32 = vmul.f32 %v8792_v17, %v8792_v17  ;;  %5700 = vlog2.f32 %v3166_v33  ;;  %v3228_v4 = vadd.f32 %v8792_v17, %v8786_v57  ;;  %v5697_v63 = vpop.eup %5696  ;;  %vm3103_vm12 = vcmp.gt.f32.partialorder %v8729_v28, 20.0 }
 0x476   :  { %5702 = vlog2.f32 %v3167_v54  ;;  %v5699_v45 = vpop.eup %5698  ;;  %v3265_v50 = vadd.f32 %v3264_v40, %v3249_v42  ;;  %v3199_v13 = vmul.f32 0.6931472, %v5697_v63  ;;  %v3253_v39 = vmul.f32 %v8810_v41, %v8810_v41 }
 0x477   :  { %v3229_v9 = vadd.f32 %v3228_v4, %v8803_v30  ;;  %v3268_v31 = vadd.f32 %v3251_v32, %v3250_v52  ;;  %v3201_v51 = vmul.f32 0.6931472, %v5699_v45  ;;  %vm3105_vm11 = vcmp.gt.f32.partialorder %v8710_v48, 20.0 }
 0x478   :  { %v8822_v34 = vsel %vm3104_vm7, %v8706_v27, %v3199_v13 }
 0x479   :  { %v3230_v2 = vadd.f32 %v3229_v9, %v8810_v41  ;;  %v3269_v3 = vadd.f32 %v3268_v31, %v3252_v7  ;;  %v8837_v27 = vsel %vm3105_vm11, %v8710_v48, %v3201_v51 }
 0x47a   :  { %v3257_v26 = vmul.f32 %v8837_v27, %v8837_v27 }
 0x47b   :  { %v5701_v15 = vpop.eup %5700  ;;  %3231 = vadd.xlane.f32.xlu2 %v3230_v2  ;;  %3266 = vadd.xlane.f32.xlu0 %v3265_v50  ;;  %v3270_v19 = vadd.f32 %v3269_v3, %v3253_v39 }
 0x47c   :  { %v5703_v35 = vpop.eup %5702  ;;  %v3195_v14 = vmul.f32 0.6931472, %v5701_v15 }
 0x47d   :  { %v3197_v56 = vmul.f32 0.6931472, %v5703_v35 }
 0x47e   :  { %v8818_v36 = vsel %vm3102_vm14, %v8726_v62, %v3195_v14 }
 0x47f   :  { %v3254_v46 = vmul.f32 %v8818_v36, %v8818_v36  ;;  %v8827_v6 = vsel %vm3103_vm12, %v8729_v28, %v3197_v56  ;;  %v3256_v28 = vmul.f32 %v8822_v34, %v8822_v34 }
 0x480   :  { %v3255_v62 = vmul.f32 %v8827_v6, %v8827_v6  ;;  %v3233_v61 = vadd.f32 %v8827_v6, %v8818_v36 }
 0x482   :  { %v3234_v29 = vadd.f32 %v3233_v61, %v8822_v34  ;;  %v3273_v49 = vadd.f32 %v3255_v62, %v3254_v46 }
 0x483   :  { %3271 = vadd.xlane.f32.xlu2 %v3270_v19 }
 0x484   :  { %v3235_v12 = vadd.f32 %v3234_v29, %v8837_v27  ;;  %v3274_v18 = vadd.f32 %v3273_v49, %v3256_v28  ;;  %v10885_v28 = vld [vmem:[#allocation18_spill] sm:$0xff] }
 0x486   :  { %3236 = vadd.xlane.f32.xlu0 %v3235_v12  ;;  %v3275_v43 = vadd.f32 %v3274_v18, %v3257_v26 }
 0x488   :  { %3276 = vadd.xlane.f32.xlu1 %v3275_v43 }
 0x4e0   :  { %v3222_v0 = vpop.xlane.xlu1 %3221 }
 0x4e1   :  { %v3238_v48 = vmul.f32 0.001953125, %v3222_v0 }
 0x4e3   :  { %v3262_v37 = vpop.xlane.xlu2 %3261  ;;  %v3282_v16 = vmul.f32 %v3238_v48, %v3238_v48  ;;  %v3294_v10 = vsub.f32 %v8719_v53, %v3238_v48  ;;  %v3295_v54 = vsub.f32 %v8722_v23, %v3238_v48  ;;  %v3296_v59 = vsub.f32 %v8734_v20, %v3238_v48 }
 0x4e4   :  { %v3278_v44 = vmul.f32 0.001953125, %v3262_v37  ;;  %v3297_v53 = vsub.f32 %v8753_v60, %v3238_v48 }
 0x4e6   :  { %v3286_v55 = vsub.f32 %v3278_v44, %v3282_v16  ;;  %v3227_v20 = vpop.xlane.xlu0 %3226 }
 0x4e7   :  { %v3239_v9 = vmul.f32 0.001953125, %v3227_v20 }
 0x4e8   :  { %v3290_v21 = vmax.f32 %v3286_v55, 0.0 }
 0x4e9   :  { %v3283_v42 = vmul.f32 %v3239_v9, %v3239_v9  ;;  %v3300_v51 = vsub.f32 %v8775_v24, %v3239_v9  ;;  %v3299_v3 = vsub.f32 %v8761_v58, %v3239_v9  ;;  %v3298_v61 = vsub.f32 %v8746_v8, %v3239_v9 }
 0x4ea   :  { %v3310_v11 = vadd.f32 1e-05, %v3290_v21  ;;  %v3301_v24 = vsub.f32 %v8782_v1, %v3239_v9 }
 0x4ec   :  { %5704 = vrsqrt.f32 %v3310_v11  ;;  %vm3320_vm4 = vweird.f32 %v3310_v11 }
 0x4ee   :  { %v3267_v60 = vpop.xlane.xlu0 %3266  ;;  %v3232_v62 = vpop.xlane.xlu2 %3231 }
 0x4ef   :  { %v3279_v63 = vmul.f32 0.001953125, %v3267_v60  ;;  %v8951_v12 = vmul.f32 0.001953125, %v3232_v62 }
 0x4f1   :  { %v3287_v2 = vsub.f32 %v3279_v63, %v3283_v42  ;;  %v3284_v18 = vmul.f32 %v8951_v12, %v8951_v12 }
 0x4f2   :  { %v5705_v38 = vpop.eup %5704 }
 0x4f3   :  { %v3315_v5 = vmul.f32 %v5705_v38, %v3310_v11  ;;  %vm3321_vm15 = vweird.f32 %v5705_v38  ;;  %v3291_v31 = vmax.f32 %v3287_v2, 0.0 }
 0x4f4   :  { %vm3322_vm14 = vmor %vm3320_vm4, %vm3321_vm15  ;;  %vm10886_vm15 = vcmp.lt.s32.totalorder %v10885_v28, 17 }
 0x4f5   :  { %v3316_v22 = vmul.f32 %v5705_v38, %v3315_v5  ;;  %v3311_v45 = vadd.f32 1e-05, %v3291_v31  ;;  %vm10887_vm4 = vmmov %vm10886_vm15 }
 0x4f6   :  { %v3272_v29 = vpop.xlane.xlu2 %3271 }
 0x4f7   :  { %v3317_v25 = vmul.f32 0.5, %v3316_v22  ;;  %5706 = vrsqrt.f32 %v3311_v45  ;;  %vm3330_vm12 = vweird.f32 %v3311_v45  ;;  %v3280_v26 = vmul.f32 0.001953125, %v3272_v29 }
 0x4f9   :  { %v3318_v47 = vsub.f32 1.5, %v3317_v25  ;;  %v8961_v43 = vpop.xlane.xlu0 %3236  ;;  %v3288_v48 = vsub.f32 %v3280_v26, %v3284_v18  ;;  %v3303_v26 = vsub.f32 %v8792_v17, %v8951_v12  ;;  %v3304_v17 = vsub.f32 %v8803_v30, %v8951_v12 }
 0x4fb   :  { %v3319_v33 = vmul.f32 %v5705_v38, %v3318_v47  ;;  %v8963_v0 = vpop.xlane.xlu1 %3276  ;;  %v3292_v44 = vmax.f32 %v3288_v48, 0.0 }
 0x4fd   :  { %v3323_v52 = vsel %vm3322_vm14, %v5705_v38, %v3319_v33  ;;  %v5707_v50 = vpop.eup %5706  ;;  %v3312_v21 = vadd.f32 1e-05, %v3292_v44  ;;  %vm10888_vm14 = vmmov %vm10887_vm4 }
 0x4fe   :  { %v8848_v32 = vmul.f32 %v3323_v52, %v3294_v10  ;;  %v8850_v4 = vmul.f32 %v3323_v52, %v3295_v54  ;;  %v8852_v40 = vmul.f32 %v3323_v52, %v3296_v59  ;;  %v8861_v23 = vmul.f32 %v3323_v52, %v3297_v53 }
 0x4ff   :  { %v3325_v15 = vmul.f32 %v5707_v50, %v3311_v45  ;;  %vm3331_vm7 = vweird.f32 %v5707_v50  ;;  %5708 = vrsqrt.f32 %v3312_v21 }
 0x500   :  { %3380 = vrot.lane.b32.xlu1 %v8850_v4, %s5856_s16  ;;  %3372 = vrot.lane.b32.xlu0 %v8848_v32, %s5856_s16  ;;  %vm3332_vm11 = vmor %vm3330_vm12, %vm3331_vm7  ;;  %vm10890_vm12 = vcmp.lt.s32.totalorder %v10885_v28, 1 }
 0x501   :  { %3388 = vrot.lane.b32.xlu2 %v8852_v40, %s5856_s16  ;;  %v3326_v13 = vmul.f32 %v5707_v50, %v3325_v15  ;;  %vm10889_vm7 = vmmov %vm10887_vm4 }
 0x503   :  { %v3327_v7 = vmul.f32 0.5, %v3326_v13 }
 0x505   :  { %v3328_v35 = vsub.f32 1.5, %v3327_v7  ;;  %v5709_v59 = vpop.eup %5708 }
 0x506   :  { %v3335_v52 = vmul.f32 %v5709_v59, %v3312_v21 }
 0x507   :  { %v3329_v14 = vmul.f32 %v5707_v50, %v3328_v35 }
 0x508   :  { %3772 = vrot.lane.b32.xlu1 %v8852_v40, %s5858_s0  ;;  %3619 = vrot.lane.b32.xlu0 %v8852_v40, %s5857_s17  ;;  %v3336_v63 = vmul.f32 %v5709_v59, %v3335_v52 }
 0x509   :  { %3396 = vrot.lane.b32.xlu2 %v8861_v23, %s5856_s16  ;;  %v3333_v56 = vsel %vm3332_vm11, %v5707_v50, %v3329_v14  ;;  %vm10892_vm11 = vcmp.lt.s32.totalorder %v10885_v28, 16 }
 0x50a   :  { %v8913_v46 = vmul.f32 %v3333_v56, %v3300_v51  ;;  %v8915_v39 = vmul.f32 %v3333_v56, %v3299_v3  ;;  %v8925_v19 = vmul.f32 %v3333_v56, %v3298_v61  ;;  %v8927_v58 = vmul.f32 %v3333_v56, %v3301_v24 }
 0x50b   :  { %v3337_v31 = vmul.f32 0.5, %v3336_v63 }
 0x50d   :  { %v3338_v7 = vsub.f32 1.5, %v3337_v31 }
 0x50f   :  { %v3339_v56 = vmul.f32 %v5709_v59, %v3338_v7 }
 0x510   :  { %3780 = vrot.lane.b32.xlu1 %v8861_v23, %s5858_s0  ;;  %3627 = vrot.lane.b32.xlu0 %v8861_v23, %s5857_s17 }
 0x511   :  { %3611 = vrot.lane.b32.xlu2 %v8850_v4, %s5857_s17 }
 0x518   :  { %3756 = vrot.lane.b32.xlu1 %v8848_v32, %s5858_s0  ;;  %3603 = vrot.lane.b32.xlu0 %v8848_v32, %s5857_s17 }
 0x519   :  { %3925 = vrot.lane.b32.xlu2 %v8852_v40, %s5859_s19 }
 0x520   :  { %3917 = vrot.lane.b32.xlu1 %v8850_v4, %s5859_s19  ;;  %3764 = vrot.lane.b32.xlu0 %v8850_v4, %s5858_s0 }
 0x521   :  { %3933 = vrot.lane.b32.xlu2 %v8861_v23, %s5859_s19 }
 0x528   :  { %4086 = vrot.lane.b32.xlu1 %v8861_v23, %s5860_s20  ;;  %4078 = vrot.lane.b32.xlu0 %v8852_v40, %s5860_s20 }
 0x529   :  { %3909 = vrot.lane.b32.xlu2 %v8848_v32, %s5859_s19 }
 0x530   :  { %4231 = vrot.lane.b32.xlu1 %v8852_v40, %s5861_s21  ;;  %4070 = vrot.lane.b32.xlu0 %v8850_v4, %s5860_s20 }
 0x531   :  { %4062 = vrot.lane.b32.xlu2 %v8848_v32, %s5860_s20 }
 0x538   :  { %4223 = vrot.lane.b32.xlu1 %v8850_v4, %s5861_s21  ;;  %4215 = vrot.lane.b32.xlu0 %v8848_v32, %s5861_s21 }
 0x539   :  { %4239 = vrot.lane.b32.xlu2 %v8861_v23, %s5861_s21 }
 0x540   :  { %4368 = vrot.lane.b32.xlu1 %v8848_v32, %s5862_s22  ;;  %4392 = vrot.lane.b32.xlu0 %v8861_v23, %s5862_s22 }
 0x541   :  { %4384 = vrot.lane.b32.xlu2 %v8852_v40, %s5862_s22 }
 0x548   :  { %3390 = vrot.lane.b32.xlu1 %v8913_v46, %s5856_s16  ;;  %3382 = vrot.lane.b32.xlu0 %v8915_v39, %s5856_s16 }
 0x549   :  { %4376 = vrot.lane.b32.xlu2 %v8850_v4, %s5862_s22 }
 0x550   :  { %3374 = vrot.lane.b32.xlu1 %v8925_v19, %s5856_s16  ;;  %3398 = vrot.lane.b32.xlu0 %v8927_v58, %s5856_s16 }
 0x551   :  { %3621 = vrot.lane.b32.xlu2 %v8913_v46, %s5857_s17 }
 0x558   :  { %3613 = vrot.lane.b32.xlu1 %v8915_v39, %s5857_s17  ;;  %3774 = vrot.lane.b32.xlu0 %v8913_v46, %s5858_s0 }
 0x559   :  { %3605 = vrot.lane.b32.xlu2 %v8925_v19, %s5857_s17 }
 0x55b   :  { %v3389_v8 = vpop.permute.xlu2 %3388 }
 0x560   :  { %3629 = vrot.lane.b32.xlu1 %v8927_v58, %s5857_s17  ;;  %3758 = vrot.lane.b32.xlu0 %v8925_v19, %s5858_s0 }
 0x561   :  { %3766 = vrot.lane.b32.xlu2 %v8915_v39, %s5858_s0 }
 0x563   :  { %v3397_v1 = vpop.permute.xlu2 %3396 }
 0x564   :  { %v8949_v49 = vsel %vm10886_vm15, %v3389_v8, %v3397_v1  ;;  %vm10893_vm15 = vcmp.lt.s32.totalorder %v10885_v28, 15 }
 0x568   :  { %3927 = vrot.lane.b32.xlu1 %v8913_v46, %s5859_s19  ;;  %3919 = vrot.lane.b32.xlu0 %v8915_v39, %s5859_s19 }
 0x569   :  { %3782 = vrot.lane.b32.xlu2 %v8927_v58, %s5858_s0 }
 0x56b   :  { %v3612_v37 = vpop.permute.xlu2 %3611 }
 0x570   :  { %3911 = vrot.lane.b32.xlu1 %v8925_v19, %s5859_s19  ;;  %3935 = vrot.lane.b32.xlu0 %v8927_v58, %s5859_s19 }
 0x571   :  { %4080 = vrot.lane.b32.xlu2 %v8913_v46, %s5860_s20 }
 0x572   :  { %v3381_v16 = vpop.permute.xlu1 %3380  ;;  %v3373_v55 = vpop.permute.xlu0 %3372 }
 0x573   :  { %v8973_v11 = vsel %vm10887_vm4, %v3381_v16, %v3389_v8  ;;  %v3926_v38 = vpop.permute.xlu2 %3925  ;;  %v8977_v5 = vsel %vm10888_vm14, %v3373_v55, %v3381_v16  ;;  %v8981_v22 = vsel %vm10889_vm7, %v3397_v1, %v3373_v55  ;;  %vm10895_vm4 = vmmov %vm10890_vm12 }
 0x574   :  { %vm10897_vm14 = vmmov %vm10892_vm11 }
 0x575   :  { %vm10898_vm7 = vmmov %vm10893_vm15 }
 0x578   :  { %4064 = vrot.lane.b32.xlu1 %v8925_v19, %s5860_s20  ;;  %4088 = vrot.lane.b32.xlu0 %v8927_v58, %s5860_s20 }
 0x579   :  { %4217 = vrot.lane.b32.xlu2 %v8925_v19, %s5861_s21 }
 0x57a   :  { %v3773_v25 = vpop.permute.xlu1 %3772  ;;  %v3620_v33 = vpop.permute.xlu0 %3619 }
 0x57b   :  { %v3934_v47 = vpop.permute.xlu2 %3933  ;;  %v8995_v54 = vsel %vm10892_vm11, %v3612_v37, %v3620_v33 }
 0x57c   :  { %v8991_v10 = vsel %vm10890_vm12, %v3926_v38, %v3934_v47  ;;  %vm10899_vm12 = vmmov %vm10892_vm11 }
 0x57d   :  { %10891 = vst [vmem:[#allocation48_spill] sm:$0xff] %v8991_v10 }
 0x580   :  { %4241 = vrot.lane.b32.xlu1 %v8927_v58, %s5861_s21  ;;  %4072 = vrot.lane.b32.xlu0 %v8915_v39, %s5860_s20 }
 0x581   :  { %4394 = vrot.lane.b32.xlu2 %v8927_v58, %s5862_s22 }
 0x582   :  { %v3781_v53 = vpop.permute.xlu1 %3780  ;;  %v3628_v9 = vpop.permute.xlu0 %3627 }
 0x583   :  { %v9005_v20 = vsel %vm10893_vm15, %v3773_v25, %v3781_v53  ;;  %v3910_v60 = vpop.permute.xlu2 %3909  ;;  %v9013_v2 = vsel %vm10897_vm14, %v3620_v33, %v3628_v9  ;;  %vm3341_vm15 = vweird.f32 %v5709_v59 }
 0x584   :  { %10894 = vst [vmem:[#allocation52_spill] sm:$0xff] %v9005_v20  ;;  %v9009_v42 = vsel %vm10895_vm4, %v3934_v47, %v3910_v60  ;;  %vm3340_vm4 = vweird.f32 %v3312_v21  ;;  %v3305_v21 = vsub.f32 %v8810_v41, %v8951_v12 }
 0x585   :  { %10896 = vst [vmem:[#allocation42_spill] sm:$0xff] %v9009_v42  ;;  %vm3342_vm14 = vmor %vm3340_vm4, %vm3341_vm15  ;;  %vm10907_vm15 = vcmp.lt.s32.totalorder %v10885_v28, 127  ;;  %vm10911_vm4 = vcmp.lt.s32.totalorder %v10885_v28, 113 }
 0x586   :  { %v3343_v29 = vsel %vm3342_vm14, %v5709_v59, %v3339_v56  ;;  %v3302_v59 = vsub.f32 %v8786_v57, %v8951_v12  ;;  %vm10913_vm14 = vcmp.lt.s32.totalorder %v10885_v28, 112 }
 0x587   :  { %v9057_v18 = vmul.f32 %v3343_v29, %v3303_v26  ;;  %v3281_v26 = vmul.f32 0.001953125, %v8963_v0 }
 0x588   :  { %4225 = vrot.lane.b32.xlu1 %v8915_v39, %s5861_s21  ;;  %4233 = vrot.lane.b32.xlu0 %v8913_v46, %s5861_s21 }
 0x589   :  { %4378 = vrot.lane.b32.xlu2 %v8915_v39, %s5862_s22 }
 0x58a   :  { %v3757_v45 = vpop.permute.xlu1 %3756  ;;  %v3604_v13 = vpop.permute.xlu0 %3603 }
 0x58b   :  { %v9023_v50 = vsel %vm10898_vm7, %v3781_v53, %v3757_v45  ;;  %v4063_v15 = vpop.permute.xlu2 %4062  ;;  %v9027_v35 = vsel %vm10899_vm12, %v3604_v13, %v3612_v37  ;;  %v9031_v14 = vsel %vm10892_vm11, %v3628_v9, %v3604_v13  ;;  %vm10900_vm7 = vcmp.lt.s32.totalorder %v10885_v28, 1 }
 0x58c   :  { %vm10902_vm12 = vmmov %vm10900_vm7  ;;  %vm10904_vm11 = vcmp.lt.s32.totalorder %v10885_v28, 15  ;;  %v9105_v9 = vmul.f32 %v3343_v29, %v3302_v59  ;;  %v9132_v13 = vmul.f32 0.001953125, %v8961_v43 }
 0x58d   :  { %vm10906_vm2 = vmmov %vm10904_vm11 }
 0x58e   :  { %v3285_v43 = vmul.f32 %v9132_v13, %v9132_v13 }
 0x590   :  { %4386 = vrot.lane.b32.xlu1 %v8913_v46, %s5862_s22  ;;  %4370 = vrot.lane.b32.xlu0 %v8925_v19, %s5862_s22 }
 0x591   :  { %4539 = vrot.lane.b32.xlu2 %v8913_v46, %s5863_s3 }
 0x592   :  { %v3918_v51 = vpop.permute.xlu1 %3917  ;;  %v3765_v24 = vpop.permute.xlu0 %3764 }
 0x593   :  { %v9041_v3 = vsel %vm10900_vm7, %v3918_v51, %v3926_v38  ;;  %v9045_v62 = vsel %vm10902_vm12, %v3910_v60, %v3918_v51  ;;  %v4240_v61 = vpop.permute.xlu2 %4239  ;;  %v9049_v8 = vsel %vm10904_vm11, %v3765_v24, %v3773_v25  ;;  %v9053_v1 = vsel %vm10906_vm2, %v3757_v45, %v3765_v24  ;;  %vm10909_vm2 = vmmov %vm10907_vm15 }
 0x594   :  { %10901 = vst [vmem:[#allocation46_spill] sm:$0xff] %v9041_v3  ;;  %v9077_v38 = vmul.f32 %v3343_v29, %v3304_v17  ;;  %v9079_v25 = vmul.f32 %v3343_v29, %v3305_v21  ;;  %vm10915_vm7 = vmmov %vm10909_vm2 }
 0x595   :  { %10903 = vst [vmem:[#allocation43_spill] sm:$0xff] %v9045_v62  ;;  %vm10917_vm12 = vmmov %vm10909_vm2 }
 0x596   :  { %10905 = vst [vmem:[#allocation17_spill] sm:$0xff] %v9049_v8  ;;  %vm10919_vm11 = vmmov %vm10911_vm4 }
 0x598   :  { %4523 = vrot.lane.b32.xlu1 %v8925_v19, %s5863_s3  ;;  %4547 = vrot.lane.b32.xlu0 %v8927_v58, %s5863_s3 }
 0x599   :  { %3384 = vrot.lane.b32.xlu2 %v9057_v18, %s5856_s16 }
 0x59a   :  { %v4087_v48 = vpop.permute.xlu1 %4086  ;;  %v4079_v16 = vpop.permute.xlu0 %4078 }
 0x59b   :  { %v9067_v37 = vsel %vm10907_vm15, %v4087_v48, %v4063_v15  ;;  %v4385_v44 = vpop.permute.xlu2 %4384  ;;  %v9073_v55 = vsel %vm10909_vm2, %v4079_v16, %v4087_v48  ;;  %vm10921_vm15 = vmmov %vm10911_vm4  ;;  %v3289_v48 = vsub.f32 %v3281_v26, %v3285_v43 }
 0x59c   :  { %10908 = vst [vmem:[#allocation29_spill] sm:$0xff] %v9067_v37  ;;  %vm10923_vm2 = vmmov %vm10911_vm4  ;;  %v3307_v37 = vsub.f32 %v8827_v6, %v9132_v13 }
 0x59d   :  { %10910 = vst [vmem:[#allocation63_spill] sm:$0xff] %v9073_v55  ;;  %v3293_v0 = vmax.f32 %v3289_v48, 0.0 }
 0x5a0   :  { %3623 = vrot.lane.b32.xlu1 %v9077_v38, %s5857_s17  ;;  %3392 = vrot.lane.b32.xlu0 %v9077_v38, %s5856_s16 }
 0x5a1   :  { %3400 = vrot.lane.b32.xlu2 %v9079_v25, %s5856_s16 }
 0x5a2   :  { %v4232_v30 = vpop.permute.xlu1 %4231  ;;  %v4071_v41 = vpop.permute.xlu0 %4070 }
 0x5a3   :  { %v9089_v47 = vsel %vm10911_vm4, %v4232_v30, %v4240_v61  ;;  %v4377_v33 = vpop.permute.xlu2 %4376  ;;  %v9099_v53 = vsel %vm10915_vm7, %v4071_v41, %v4079_v16  ;;  %v9103_v60 = vsel %vm10917_vm12, %v4063_v15, %v4071_v41  ;;  %vm10925_vm4 = vmmov %vm10913_vm14  ;;  %vm10931_vm12 = vcmp.lt.s32.totalorder %v10885_v28, 17 }
 0x5a4   :  { %10912 = vst [vmem:[#allocation51_spill] sm:$0xff] %v9089_v47  ;;  %v9095_v52 = vsel %vm10913_vm14, %v4377_v33, %v4385_v44  ;;  %vm10927_vm14 = vmmov %vm10925_vm4 }
 0x5a5   :  { %10914 = vst [vmem:[#allocation55_spill] sm:$0xff] %v9095_v52  ;;  %vm10929_vm7 = vmmov %vm10925_vm4 }
 0x5a6   :  { %10916 = vst [vmem:[#allocation13_spill] sm:$0xff] %v9099_v53 }
 0x5a7   :  { %10918 = vst [vmem:[#allocation15_spill] sm:$0xff] %v9103_v60 }
 0x5a8   :  { %3607 = vrot.lane.b32.xlu1 %v9105_v9, %s5857_s17  ;;  %3376 = vrot.lane.b32.xlu0 %v9105_v9, %s5856_s16 }
 0x5a9   :  { %3776 = vrot.lane.b32.xlu2 %v9077_v38, %s5858_s0 }
 0x5aa   :  { %v4224_v57 = vpop.permute.xlu1 %4223  ;;  %v4216_v31 = vpop.permute.xlu0 %4215 }
 0x5ab   :  { %v9115_v12 = vsel %vm10919_vm11, %v4224_v57, %v4232_v30  ;;  %v3622_v63 = vpop.permute.xlu2 %3621  ;;  %v9119_v45 = vsel %vm10921_vm15, %v4216_v31, %v4224_v57  ;;  %v9123_v15 = vsel %vm10923_vm2, %v4240_v61, %v4216_v31  ;;  %v3313_v30 = vadd.f32 1e-05, %v3293_v0  ;;  %vm10932_vm11 = vmmov %vm10931_vm12 }
 0x5ac   :  { %10920 = vst [vmem:[#allocation58_spill] sm:$0xff] %v9115_v12  ;;  %vm10933_vm15 = vmmov %vm10932_vm11 }
 0x5ad   :  { %10922 = vst [vmem:[#allocation56_spill] sm:$0xff] %v9119_v45  ;;  %vm10934_vm2 = vmmov %vm10932_vm11  ;;  %5710 = vrsqrt.f32 %v3313_v30 }
 0x5ae   :  { %10924 = vst [vmem:[#allocation61_spill] sm:$0xff] %v9123_v15 }
 0x5b0   :  { %3768 = vrot.lane.b32.xlu1 %v9057_v18, %s5858_s0  ;;  %3615 = vrot.lane.b32.xlu0 %v9057_v18, %s5857_s17 }
 0x5b1   :  { %3760 = vrot.lane.b32.xlu2 %v9105_v9, %s5858_s0 }
 0x5b2   :  { %v4369_v7 = vpop.permute.xlu1 %4368  ;;  %v4393_v61 = vpop.permute.xlu0 %4392 }
 0x5b3   :  { %v9136_v56 = vsel %vm10925_vm4, %v4369_v7, %v4377_v33  ;;  %v3606_v51 = vpop.permute.xlu2 %3605  ;;  %v9140_v24 = vsel %vm10927_vm14, %v4385_v44, %v4393_v61  ;;  %v9144_v29 = vsel %vm10929_vm7, %v4393_v61, %v4369_v7  ;;  %vm10935_vm4 = vcmp.lt.s32.totalorder %v10885_v28, 16 }
 0x5b4   :  { %10926 = vst [vmem:[#allocation59_spill] sm:$0xff] %v9136_v56  ;;  %vm10936_vm14 = vmmov %vm10935_vm4  ;;  %vm10937_vm7 = vcmp.lt.s32.totalorder %v10885_v28, 15 }
 0x5b5   :  { %10928 = vst [vmem:[#allocation47_spill] sm:$0xff] %v9140_v24 }
 0x5b6   :  { %10930 = vst [vmem:[#allocation53_spill] sm:$0xff] %v9144_v29 }
 0x5b8   :  { %3784 = vrot.lane.b32.xlu1 %v9079_v25, %s5858_s0  ;;  %3631 = vrot.lane.b32.xlu0 %v9079_v25, %s5857_s17 }
 0x5b9   :  { %3921 = vrot.lane.b32.xlu2 %v9057_v18, %s5859_s19 }
 0x5ba   :  { %v3391_v44 = vpop.permute.xlu1 %3390  ;;  %v3383_v17 = vpop.permute.xlu0 %3382 }
 0x5bb   :  { %v3767_v16 = vpop.permute.xlu2 %3766  ;;  %v9157_v21 = vsel %vm10931_vm12, %v3383_v17, %v3391_v44  ;;  %vm10939_vm12 = vmmov %vm10937_vm7 }
 0x5c0   :  { %4082 = vrot.lane.b32.xlu1 %v9077_v38, %s5860_s20  ;;  %3929 = vrot.lane.b32.xlu0 %v9077_v38, %s5859_s19 }
 0x5c1   :  { %3937 = vrot.lane.b32.xlu2 %v9079_v25, %s5859_s19 }
 0x5c2   :  { %v3375_v33 = vpop.permute.xlu1 %3374  ;;  %v3399_v57 = vpop.permute.xlu0 %3398 }
 0x5c3   :  { %v3783_v41 = vpop.permute.xlu2 %3782  ;;  %v9167_v59 = vsel %vm10932_vm11, %v3375_v33, %v3383_v17  ;;  %v9171_v31 = vsel %vm10933_vm15, %v3391_v44, %v3399_v57  ;;  %v9175_v7 = vsel %vm10934_vm2, %v3399_v57, %v3375_v33  ;;  %v5711_v17 = vpop.eup %5710  ;;  %vm10941_vm11 = vmmov %vm10935_vm4 }
 0x5c4   :  { %v3345_v57 = vmul.f32 %v5711_v17, %v3313_v30  ;;  %vm10942_vm15 = vmmov %vm10935_vm4 }
 0x5c5   :  { %vm10943_vm2 = vmmov %vm10937_vm7 }
 0x5c6   :  { %v3346_v52 = vmul.f32 %v5711_v17, %v3345_v57 }
 0x5c8   :  { %4219 = vrot.lane.b32.xlu1 %v9105_v9, %s5861_s21  ;;  %3913 = vrot.lane.b32.xlu0 %v9105_v9, %s5859_s19  ;;  %v3347_v47 = vmul.f32 0.5, %v3346_v52 }
 0x5c9   :  { %4090 = vrot.lane.b32.xlu2 %v9079_v25, %s5860_s20 }
 0x5ca   :  { %v3614_v61 = vpop.permute.xlu1 %3613  ;;  %v3775_v44 = vpop.permute.xlu0 %3774 }
 0x5cb   :  { %v9183_v26 = vpop.permute.xlu2 %4080  ;;  %v9187_v43 = vsel %vm10935_vm4, %v3614_v61, %v3622_v63  ;;  %v9191_v48 = vsel %vm10936_vm14, %v3606_v51, %v3614_v61  ;;  %v9195_v0 = vsel %vm10937_vm7, %v3775_v44, %v3783_v41  ;;  %v9199_v33 = vsel %vm10939_vm12, %v3767_v16, %v3775_v44  ;;  %vm10944_vm4 = vmmov %vm10943_vm2 }
 0x5cc   :  { %10938 = vst [vmem:[#allocation62_spill] sm:$0xff] %v9195_v0  ;;  %vm10945_vm14 = vcmp.lt.s32.totalorder %v10885_v28, 1  ;;  %vm3351_vm7 = vweird.f32 %v5711_v17  ;;  %vm3350_vm12 = vweird.f32 %v3313_v30 }
 0x5cd   :  { %10940 = vst [vmem:[#allocation54_spill] sm:$0xff] %v9199_v33 }
 0x5d0   :  { %4396 = vrot.lane.b32.xlu1 %v9079_v25, %s5862_s22  ;;  %4066 = vrot.lane.b32.xlu0 %v9105_v9, %s5860_s20 }
 0x5d1   :  { %4074 = vrot.lane.b32.xlu2 %v9057_v18, %s5860_s20 }
 0x5d2   :  { %v3630_v61 = vpop.permute.xlu1 %3629  ;;  %v3759_v24 = vpop.permute.xlu0 %3758 }
 0x5d3   :  { %v4218_v56 = vpop.permute.xlu2 %4217  ;;  %v9209_v29 = vsel %vm10941_vm11, %v3622_v63, %v3630_v61  ;;  %v9213_v44 = vsel %vm10942_vm15, %v3630_v61, %v3606_v51  ;;  %v9217_v15 = vsel %vm10943_vm2, %v3759_v24, %v3767_v16  ;;  %v9221_v45 = vsel %vm10944_vm4, %v3783_v41, %v3759_v24  ;;  %vm3352_vm11 = vmor %vm3350_vm12, %vm3351_vm7 }
 0x5d4   :  { %v3348_v51 = vsub.f32 1.5, %v3347_v47  ;;  %vm10947_vm15 = vmmov %vm10945_vm14  ;;  %vm10958_vm12 = vcmp.lt.s32.totalorder %v10885_v28, 113 }
 0x5d5   :  { %vm10949_vm2 = vmmov %vm10945_vm14 }
 0x5d6   :  { %v3349_v24 = vmul.f32 %v5711_v17, %v3348_v51  ;;  %vm10951_vm4 = vmmov %vm10949_vm2 }
 0x5d8   :  { %4380 = vrot.lane.b32.xlu1 %v9057_v18, %s5862_s22  ;;  %4243 = vrot.lane.b32.xlu0 %v9079_v25, %s5861_s21  ;;  %v3353_v52 = vsel %vm3352_vm11, %v5711_v17, %v3349_v24 }
 0x5d9   :  { %4235 = vrot.lane.b32.xlu2 %v9077_v38, %s5861_s21  ;;  %v9253_v60 = vmul.f32 %v3353_v52, %v3307_v37 }
 0x5da   :  { %v3928_v63 = vpop.permute.xlu1 %3927  ;;  %v3920_v61 = vpop.permute.xlu0 %3919 }
 0x5db   :  { %v4395_v57 = vpop.permute.xlu2 %4394  ;;  %v9231_v16 = vsel %vm10945_vm14, %v3920_v61, %v3928_v63  ;;  %vm10954_vm14 = vcmp.lt.s32.totalorder %v10885_v28, 127 }
 0x5dc   :  { %10946 = vst [vmem:[#allocation57_spill] sm:$0xff] %v9231_v16  ;;  %vm10956_vm7 = vmmov %vm10954_vm14 }
 0x5dd   :  { %vm10960_vm11 = vmmov %vm10956_vm7 }
 0x5e0   :  { %4541 = vrot.lane.b32.xlu1 %v9077_v38, %s5863_s3  ;;  %4227 = vrot.lane.b32.xlu0 %v9057_v18, %s5861_s21 }
 0x5e1   :  { %4372 = vrot.lane.b32.xlu2 %v9105_v9, %s5862_s22 }
 0x5e2   :  { %v3912_v47 = vpop.permute.xlu1 %3911  ;;  %v3936_v51 = vpop.permute.xlu0 %3935 }
 0x5e3   :  { %v4379_v41 = vpop.permute.xlu2 %4378  ;;  %v9241_v12 = vsel %vm10947_vm15, %v3912_v47, %v3920_v61  ;;  %v9247_v30 = vsel %vm10949_vm2, %v3928_v63, %v3936_v51  ;;  %v9251_v53 = vsel %vm10951_vm4, %v3936_v51, %v3912_v47  ;;  %v3309_v61 = vsub.f32 %v8837_v27, %v9132_v13  ;;  %vm10962_vm15 = vmmov %vm10956_vm7 }
 0x5e4   :  { %10948 = vst [vmem:[#allocation60_spill] sm:$0xff] %v9241_v12  ;;  %v3306_v47 = vsub.f32 %v8818_v36, %v9132_v13  ;;  %vm10964_vm2 = vmmov %vm10958_vm12 }
 0x5e5   :  { %10950 = vst [vmem:[#allocation65_spill] sm:$0xff] %v9247_v30  ;;  %v9276_v51 = vmul.f32 %v3353_v52, %v3309_v61  ;;  %vm10966_vm4 = vmmov %vm10964_vm2 }
 0x5e6   :  { %10952 = vst [vmem:[#allocation66_spill] sm:$0xff] %v9251_v53  ;;  %v9278_v55 = vmul.f32 %v3353_v52, %v3306_v47 }
 0x5e8   :  { %3386 = vrot.lane.b32.xlu1 %v9253_v60, %s5856_s16  ;;  %4388 = vrot.lane.b32.xlu0 %v9077_v38, %s5862_s22 }
 0x5e9   :  { %4549 = vrot.lane.b32.xlu2 %v9079_v25, %s5863_s3 }
 0x5ea   :  { %v4065_v6 = vpop.permute.xlu1 %4064  ;;  %v4089_v63 = vpop.permute.xlu0 %4088 }
 0x5eb   :  { %v9261_v17 = vpop.permute.xlu2 %4539  ;;  %v9268_v37 = vsel %vm10954_vm14, %v9183_v26, %v4089_v63  ;;  %v9272_v24 = vsel %vm10956_vm7, %v4089_v63, %v4065_v6  ;;  %vm10968_vm14 = vmmov %vm10964_vm2  ;;  %vm10970_vm7 = vcmp.lt.s32.totalorder %v10885_v28, 112 }
 0x5ec   :  { %10953 = vst [vmem:[#allocation69_spill] sm:$0xff] %v9261_v17 }
 0x5ed   :  { %10955 = vst [vmem:[#allocation70_spill] sm:$0xff] %v9268_v37 }
 0x5ee   :  { %10957 = vst [vmem:[#allocation64_spill] sm:$0xff] %v9272_v24  ;;  %v3308_v24 = vsub.f32 %v8822_v34, %v9132_v13 }
 0x5f0   :  { %3402 = vrot.lane.b32.xlu1 %v9276_v51, %s5856_s16  ;;  %4525 = vrot.lane.b32.xlu0 %v9105_v9, %s5863_s3  ;;  %v9301_v37 = vmul.f32 %v3353_v52, %v3308_v24 }
 0x5f1   :  { %3378 = vrot.lane.b32.xlu2 %v9278_v55, %s5856_s16 }
 0x5f2   :  { %v4242_v27 = vpop.permute.xlu1 %4241  ;;  %v4073_v36 = vpop.permute.xlu0 %4072 }
 0x5f3   :  { %v3385_v17 = vpop.permute.xlu2 %3384  ;;  %v9288_v63 = vsel %vm10958_vm12, %v4242_v27, %v4218_v56  ;;  %v9293_v61 = vsel %vm10960_vm11, %v4073_v36, %v9183_v26  ;;  %v9297_v47 = vsel %vm10962_vm15, %v4065_v6, %v4073_v36  ;;  %vm10972_vm12 = vmmov %vm10970_vm7 }
 0x5f4   :  { %10959 = vst [vmem:[#allocation67_spill] sm:$0xff] %v9288_v63  ;;  %vm10974_vm11 = vmmov %vm10970_vm7 }
 0x5f5   :  { %10961 = vst [vmem:[#allocation68_spill] sm:$0xff] %v9293_v61  ;;  %vm10976_vm15 = vmmov %vm10970_vm7 }
 0x5f6   :  { %10963 = vst [vmem:[#allocation71_spill] sm:$0xff] %v9297_v47 }
 0x5f8   :  { %3617 = vrot.lane.b32.xlu1 %v9253_v60, %s5857_s17  ;;  %3394 = vrot.lane.b32.xlu0 %v9301_v37, %s5856_s16 }
 0x5f9   :  { %3625 = vrot.lane.b32.xlu2 %v9301_v37, %s5857_s17 }
 0x5fa   :  { %v4226_v26 = vpop.permute.xlu1 %4225  ;;  %v4234_v36 = vpop.permute.xlu0 %4233 }
 0x5fb   :  { %v3401_v63 = vpop.permute.xlu2 %3400  ;;  %v9311_v6 = vsel %vm10964_vm2, %v4218_v56, %v4226_v26  ;;  %v9315_v34 = vsel %vm10966_vm4, %v4234_v36, %v4242_v27  ;;  %v9319_v13 = vsel %vm10968_vm14, %v4226_v26, %v4234_v36  ;;  %vm10980_vm2 = vcmp.lt.s32.totalorder %v10885_v28, 17 }
 0x5fc   :  { %10965 = vst [vmem:[#allocation72_spill] sm:$0xff] %v9311_v6  ;;  %vm10981_vm4 = vmmov %vm10980_vm2 }
 0x5fd   :  { %10967 = vst [vmem:[#allocation74_spill] sm:$0xff] %v9315_v34  ;;  %vm10982_vm14 = vmmov %vm10980_vm2 }
 0x5fe   :  { %10969 = vst [vmem:[#allocation75_spill] sm:$0xff] %v9319_v13 }
 0x600   :  { %3770 = vrot.lane.b32.xlu1 %v9253_v60, %s5858_s0  ;;  %3609 = vrot.lane.b32.xlu0 %v9278_v55, %s5857_s17 }
 0x601   :  { %3633 = vrot.lane.b32.xlu2 %v9276_v51, %s5857_s17 }
 0x602   :  { %v4387_v56 = vpop.permute.xlu1 %4386  ;;  %v4371_v26 = vpop.permute.xlu0 %4370 }
 0x603   :  { %v3777_v52 = vpop.permute.xlu2 %3776  ;;  %v9329_v24 = vsel %vm10970_vm7, %v4387_v56, %v4395_v57  ;;  %v9333_v27 = vsel %vm10972_vm12, %v4379_v41, %v4387_v56  ;;  %v9337_v36 = vsel %vm10974_vm11, %v4371_v26, %v4379_v41  ;;  %v9341_v6 = vsel %vm10976_vm15, %v4395_v57, %v4371_v26  ;;  %vm10983_vm7 = vmmov %vm10980_vm2 }
 0x604   :  { %10971 = vst [vmem:[#allocation76_spill] sm:$0xff] %v9329_v24  ;;  %vm10984_vm12 = vcmp.lt.s32.totalorder %v10885_v28, 15  ;;  %vm10986_vm15 = vcmp.lt.s32.totalorder %v10885_v28, 16 }
 0x605   :  { %10973 = vst [vmem:[#allocation81_spill] sm:$0xff] %v9333_v27  ;;  %vm10985_vm11 = vmmov %vm10984_vm12 }
 0x606   :  { %10975 = vst [vmem:[#allocation80_spill] sm:$0xff] %v9337_v36 }
 0x607   :  { %10977 = vst [vmem:[#allocation77_spill] sm:$0xff] %v9341_v6 }
 0x608   :  { %3762 = vrot.lane.b32.xlu1 %v9278_v55, %s5858_s0  ;;  %3786 = vrot.lane.b32.xlu0 %v9276_v51, %s5858_s0 }
 0x609   :  { %3778 = vrot.lane.b32.xlu2 %v9301_v37, %s5858_s0 }
 0x60a   :  { %v9349_v56 = vpop.permute.xlu1 %4523  ;;  %v9351_v24 = vpop.permute.xlu0 %4547 }
 0x60b   :  { %10978 = vst [vmem:[#allocation78_spill] sm:$0xff] %v9349_v56  ;;  %v3761_v27 = vpop.permute.xlu2 %3760 }
 0x60c   :  { %10979 = vst [vmem:[#allocation79_spill] sm:$0xff] %v9351_v24 }
 0x610   :  { %3939 = vrot.lane.b32.xlu1 %v9276_v51, %s5859_s19  ;;  %3931 = vrot.lane.b32.xlu0 %v9301_v37, %s5859_s19 }
 0x611   :  { %3923 = vrot.lane.b32.xlu2 %v9253_v60, %s5859_s19 }
 0x612   :  { %v3624_v57 = vpop.permute.xlu1 %3623  ;;  %v3393_v26 = vpop.permute.xlu0 %3392 }
 0x613   :  { %v3922_v41 = vpop.permute.xlu2 %3921  ;;  %v9361_v36 = vsel %vm10980_vm2, %v3393_v26, %v3401_v63  ;;  %v9365_v56 = vsel %vm10981_vm4, %v3385_v17, %v3393_v26  ;;  %vm10987_vm2 = vmmov %vm10986_vm15 }
 0x614   :  { %vm10988_vm4 = vmmov %vm10985_vm11 }
 0x618   :  { %4092 = vrot.lane.b32.xlu1 %v9276_v51, %s5860_s20  ;;  %4084 = vrot.lane.b32.xlu0 %v9301_v37, %s5860_s20 }
 0x619   :  { %3915 = vrot.lane.b32.xlu2 %v9278_v55, %s5859_s19 }
 0x61a   :  { %v3608_v24 = vpop.permute.xlu1 %3607  ;;  %v3377_v34 = vpop.permute.xlu0 %3376 }
 0x61b   :  { %v3938_v6 = vpop.permute.xlu2 %3937  ;;  %v9375_v13 = vsel %vm10982_vm14, %v3377_v34, %v3385_v17  ;;  %v9379_v26 = vsel %vm10983_vm7, %v3401_v63, %v3377_v34  ;;  %vm10989_vm14 = vmmov %vm10988_vm4 }
 0x61c   :  { %vm10990_vm7 = vmmov %vm10987_vm2 }
 0x620   :  { %4076 = vrot.lane.b32.xlu1 %v9253_v60, %s5860_s20  ;;  %4068 = vrot.lane.b32.xlu0 %v9278_v55, %s5860_s20 }
 0x621   :  { %4245 = vrot.lane.b32.xlu2 %v9276_v51, %s5861_s21 }
 0x622   :  { %v3769_v61 = vpop.permute.xlu1 %3768  ;;  %v3616_v63 = vpop.permute.xlu0 %3615 }
 0x623   :  { %v4091_v47 = vpop.permute.xlu2 %4090  ;;  %v9389_v10 = vsel %vm10984_vm12, %v3769_v61, %v3777_v52  ;;  %v9393_v17 = vsel %vm10985_vm11, %v3761_v27, %v3769_v61  ;;  %v9397_v34 = vsel %vm10986_vm15, %v3616_v63, %v3624_v57  ;;  %v9401_v3 = vsel %vm10987_vm2, %v3608_v24, %v3616_v63  ;;  %vm10991_vm12 = vmmov %vm10987_vm2 }
 0x624   :  { %vm10992_vm11 = vcmp.lt.s32.totalorder %v10885_v28, 127  ;;  %vm10996_vm2 = vcmp.lt.s32.totalorder %v10885_v28, 1 }
 0x625   :  { %vm10994_vm15 = vmmov %vm10992_vm11 }
 0x628   :  { %4237 = vrot.lane.b32.xlu1 %v9301_v37, %s5861_s21  ;;  %4398 = vrot.lane.b32.xlu0 %v9276_v51, %s5862_s22 }
 0x629   :  { %4229 = vrot.lane.b32.xlu2 %v9253_v60, %s5861_s21 }
 0x62a   :  { %v3785_v61 = vpop.permute.xlu1 %3784  ;;  %v3632_v63 = vpop.permute.xlu0 %3631 }
 0x62b   :  { %v4075_v30 = vpop.permute.xlu2 %4074  ;;  %v9411_v16 = vsel %vm10988_vm4, %v3777_v52, %v3785_v61  ;;  %v9415_v42 = vsel %vm10989_vm14, %v3785_v61, %v3761_v27  ;;  %v9419_v62 = vsel %vm10990_vm7, %v3624_v57, %v3632_v63  ;;  %v9423_v53 = vsel %vm10991_vm12, %v3632_v63, %v3608_v24  ;;  %vm10998_vm4 = vmmov %vm10996_vm2 }
 0x62c   :  { %vm11000_vm14 = vmmov %vm10996_vm2  ;;  %vm11004_vm12 = vcmp.lt.s32.totalorder %v10885_v28, 112 }
 0x62d   :  { %vm11002_vm7 = vmmov %vm10996_vm2 }
 0x630   :  { %4221 = vrot.lane.b32.xlu1 %v9278_v55, %s5861_s21  ;;  %4537 = vrot.lane.b32.xlu0 %v8852_v40, %s5863_s3 }
 0x631   :  { %4390 = vrot.lane.b32.xlu2 %v9301_v37, %s5862_s22 }
 0x632   :  { %v4083_v52 = vpop.permute.xlu1 %4082  ;;  %v3930_v24 = vpop.permute.xlu0 %3929 }
 0x633   :  { %v4236_v27 = vpop.permute.xlu2 %4235  ;;  %v9433_v61 = vsel %vm10992_vm11, %v4083_v52, %v4091_v47  ;;  %v9437_v57 = vsel %vm10994_vm15, %v4075_v30, %v4083_v52  ;;  %v9441_v63 = vsel %vm10996_vm2, %v3930_v24, %v3938_v6  ;;  %v9445_v12 = vsel %vm10998_vm4, %v3922_v41, %v3930_v24  ;;  %vm11007_vm15 = vmmov %vm10992_vm11 }
 0x634   :  { %10993 = vst [vmem:[#allocation92_spill] sm:$0xff] %v9433_v61  ;;  %vm11009_vm2 = vmmov %vm11004_vm12  ;;  %vm11011_vm4 = vcmp.lt.s32.totalorder %v10885_v28, 113 }
 0x635   :  { %10995 = vst [vmem:[#allocation82_spill] sm:$0xff] %v9437_v57 }
 0x636   :  { %10997 = vst [vmem:[#allocation83_spill] sm:$0xff] %v9441_v63 }
 0x637   :  { %10999 = vst [vmem:[#allocation85_spill] sm:$0xff] %v9445_v12 }
 0x638   :  { %4545 = vrot.lane.b32.xlu1 %v8861_v23, %s5863_s3  ;;  %4382 = vrot.lane.b32.xlu0 %v9253_v60, %s5862_s22 }
 0x639   :  { %4374 = vrot.lane.b32.xlu2 %v9278_v55, %s5862_s22 }
 0x63a   :  { %v4220_v52 = vpop.permute.xlu1 %4219  ;;  %v3914_v57 = vpop.permute.xlu0 %3913 }
 0x63b   :  { %v9455_v61 = vsel %vm11000_vm14, %v3914_v57, %v3922_v41  ;;  %v9459_v63 = vsel %vm11002_vm7, %v3938_v6, %v3914_v57  ;;  %v4373_v24 = vpop.permute.xlu2 %4372  ;;  %vm11013_vm14 = vmmov %vm11011_vm4 }
 0x63c   :  { %11001 = vst [vmem:[#allocation93_spill] sm:$0xff] %v9455_v61  ;;  %vm11016_vm7 = vmmov %vm11011_vm4 }
 0x63d   :  { %11003 = vst [vmem:[#allocation94_spill] sm:$0xff] %v9459_v63 }
 0x640   :  { %4551 = vrot.lane.b32.xlu1 %v9276_v51, %s5863_s3  ;;  %4543 = vrot.lane.b32.xlu0 %v9301_v37, %s5863_s3 }
 0x641   :  { %4533 = vrot.lane.b32.xlu2 %v9057_v18, %s5863_s3 }
 0x642   :  { %v4397_v12 = vpop.permute.xlu1 %4396  ;;  %v4067_v41 = vpop.permute.xlu0 %4066 }
 0x643   :  { %v9469_v20 = vsel %vm11004_vm12, %v4397_v12, %v4373_v24  ;;  %v9473_v6 = vsel %vm10992_vm11, %v4067_v41, %v4075_v30  ;;  %v9477_v57 = vsel %vm11007_vm15, %v4091_v47, %v4067_v41  ;;  %v9479_v8 = vpop.permute.xlu2 %4549  ;;  %vm11017_vm12 = vmmov %vm11011_vm4  ;;  %vm11018_vm11 = vcmp.lt.s32.totalorder %v10885_v28, 17 }
 0x644   :  { %11005 = vst [vmem:[#allocation86_spill] sm:$0xff] %v9469_v20  ;;  %vm11019_vm15 = vmmov %vm11009_vm2 }
 0x645   :  { %11006 = vst [vmem:[#allocation87_spill] sm:$0xff] %v9473_v6 }
 0x646   :  { %11008 = vst [vmem:[#allocation73_spill] sm:$0xff] %v9477_v57  ;;  %v4674_v57 = vld [vmem:[%s10151_s6] sm:$0x3] }
 0x648   :  { %4535 = vrot.lane.b32.xlu1 %v9253_v60, %s5863_s3  ;;  %4527 = vrot.lane.b32.xlu0 %v9278_v55, %s5863_s3 }
 0x649   :  { %4521 = vrot.lane.b32.xlu2 %v8848_v32, %s5863_s3 }
 0x64a   :  { %v4381_v20 = vpop.permute.xlu1 %4380  ;;  %v4244_v6 = vpop.permute.xlu0 %4243 }
 0x64b   :  { %v9489_v30 = vsel %vm11009_vm2, %v4373_v24, %v4381_v20  ;;  %v9493_v47 = vsel %vm11011_vm4, %v4236_v27, %v4244_v6  ;;  %v9497_v41 = vsel %vm11013_vm14, %v4244_v6, %v4220_v52  ;;  %v3379_v63 = vpop.permute.xlu2 %3378  ;;  %vm11022_vm14 = vmmov %vm11018_vm11 }
 0x64c   :  { %11010 = vst [vmem:[#allocation89_spill] sm:$0xff] %v9489_v30 }
 0x64d   :  { %11012 = vst [vmem:[#allocation84_spill] sm:$0xff] %v9493_v47 }
 0x64e   :  { %11014 = vst [vmem:[#allocation90_spill] sm:$0xff] %v9497_v41 }
 0x650   :  { %4529 = vrot.lane.b32.xlu1 %v8850_v4, %s5863_s3  ;;  %4531 = vrot.lane.b32.xlu0 %v8915_v39, %s5863_s3 }
 0x651   :  { %4677 = vperm.xlu2 %5563, %v4674_v57  }
 0x652   :  { %v9506_v24 = vpop.permute.xlu1 %4541  ;;  %v4228_v30 = vpop.permute.xlu0 %4227 }
 0x653   :  { %11015 = vst [vmem:[#allocation91_spill] sm:$0xff] %v9506_v24  ;;  %v9510_v47 = vsel %vm11016_vm7, %v4228_v30, %v4236_v27  ;;  %v9514_v6 = vsel %vm11017_vm12, %v4220_v52, %v4228_v30  ;;  %v9516_v61 = vpop.permute.xlu2 %3625  ;;  %v11020_v27 = vld [vmem:[#allocation30_spill] sm:$0xff]  ;;  %vm11023_vm7 = vcmp.lt.s32.totalorder %v10885_v28, 111 }
 0x654   :  { %vm11021_vm4 = vnez %v11020_v27  ;;  %v11152_v27 = vld [vmem:[#allocation58_spill] sm:$0xff] }
 0x65a   :  { %v3387_v41 = vpop.permute.xlu1 %3386  ;;  %v4389_v33 = vpop.permute.xlu0 %4388 }
 0x65b   :  { %v3415_v0 = vsel %vm11018_vm11, %v3379_v63, %v3387_v41  ;;  %v9522_v57 = vsel %vm11019_vm15, %v4389_v33, %v4397_v12  ;;  %v9526_v24 = vsel %vm11009_vm2, %v4381_v20, %v4389_v33  ;;  %v11024_v33 = vld [vmem:[#allocation26_spill] sm:$0xff]  ;;  %vm11026_vm11 = vcmask 261120   ;;  %vm11027_vm15 = vmmov %vm11022_vm14 }
 0x65c   :  { %5365 = vmatpush.msk.msra.mxu1 %vm11021_vm4, %v3415_v0  ;;  %v3436_v0 = vld [vmem:[%s10150_s5] sm:$0x3]  ;;  %vm11025_vm12 = vnez %v11024_v33  ;;  %vm11028_vm2 = vmmov %vm11022_vm14 }
 0x65d   :  { %v11095_v33 = vld [vmem:[#allocation85_spill] sm:$0xff] }
 0x65e   :  { %5366 = vmatpush.msk.msra.mxu1 %vm11021_vm4, %v9375_v13 }
 0x660   :  { %5367 = vmatpush.msk.msra.mxu1 %vm11021_vm4, %v9167_v59 }
 0x662   :  { %v3403_v52 = vpop.permute.xlu1 %3402  ;;  %5368 = vmatpush.msk.msra.mxu1 %vm11021_vm4, %v8977_v5  ;;  %v9541_v12 = vpop.permute.xlu0 %4525  ;;  %vm11029_vm4 = vmmov %vm11026_vm11 }
 0x663   :  { %v3419_v20 = vsel %vm11022_vm14, %v3403_v52, %v3379_v63  ;;  %v9551_v59 = vsel %vm11023_vm7, %v9479_v8, %v9541_v12  ;;  %5369 = vmatmul.msk.f32.vlgmr.msra.gmra.mxu1 %vm11026_vm11, %v3436_v0  ;;  %v3634_v5 = vpop.permute.xlu2 %3633  ;;  %vm11030_vm14 = vmmov %vm11029_vm4  ;;  %vm11035_vm11 = vcmp.lt.s32.totalorder %v10885_v28, 16  ;;  %v11088_v63 = vld [vmem:[#allocation60_spill] sm:$0xff] }
 0x664   :  { %3555 = vmatpush.msrb.mxu1 %v9253_v60  ;;  %5360 = vmatpush.msk.msrb.mxu0 %vm11025_vm12, %v3419_v20  ;;  %v11093_v20 = vld [vmem:[#allocation43_spill] sm:$0xff] }
 0x666   :  { %3556 = vmatpush.msrb.mxu1 %v9057_v18  ;;  %5361 = vmatpush.msk.msrb.mxu0 %vm11025_vm12, %v9379_v26  ;;  %v5359_v18 = vld [vmem:[%s10150_s5 + $0x8] sm:$0x3] }
 0x667   :  { %v11084_v26 = vld [vmem:[#allocation94_spill] sm:$0xff] }
 0x668   :  { %3557 = vmatpush.msrb.mxu1 %v8915_v39  ;;  %5362 = vmatpush.msk.msrb.mxu0 %vm11025_vm12, %v9175_v7 }
 0x66a   :  { %3558 = vmatpush.msrb.mxu1 %v8850_v4  ;;  %v3618_v60 = vpop.permute.xlu1 %3617  ;;  %5363 = vmatpush.msk.msrb.mxu0 %vm11025_vm12, %v8981_v22  ;;  %v3395_v13 = vpop.permute.xlu0 %3394  ;;  %v11031_v4 = vld [vmem:[#allocation35_spill] sm:$0xff]  ;;  %v11033_v22 = vld [vmem:[#allocation33_spill] sm:$0xff] }
 0x66b   :  { %v3407_v39 = vsel %vm11027_vm15, %v3395_v13, %v3403_v52  ;;  %v3411_v7 = vsel %vm11028_vm2, %v3387_v41, %v3395_v13  ;;  %5364 = vmatmul.msk.f32.vlgmr.msrb.gmra.mxu0 %vm11029_vm4, %v3436_v0  ;;  %5381 = vmatmul.msk.f32.vlgmr.msrb.gmra.mxu1 %vm11030_vm14, %v5359_v18  ;;  %vm11032_vm7 = vnez %v11031_v4  ;;  %vm11034_vm12 = vnez %v11033_v22  ;;  %vm11036_vm15 = vmmov %vm11035_vm11  ;;  %v11090_v41 = vld [vmem:[#allocation66_spill] sm:$0xff]  ;;  %v11104_v22 = vld [vmem:[#allocation65_spill] sm:$0xff] }
 0x66c   :  { %3535 = vmatpush.msra.mxu0 %v9278_v55  ;;  %5370 = vmatpush.msk.msra.mxu2 %vm11032_vm7, %v3411_v7  ;;  %v3779_v55 = vpop.permute.xlu2 %3778  ;;  %vm11037_vm2 = vmmov %vm11029_vm4  ;;  %v11102_v7 = vld [vmem:[#allocation57_spill] sm:$0xff]  ;;  %v11153_v52 = vld [vmem:[#allocation90_spill] sm:$0xff] }
 0x66d   :  { %5375 = vmatpush.msk.msra.mxu3 %vm11034_vm12, %v3407_v39  ;;  %vm11038_vm4 = vmmov %vm11037_vm2 }
 0x66e   :  { %3536 = vmatpush.msra.mxu0 %v9105_v9  ;;  %5371 = vmatpush.msk.msra.mxu2 %vm11032_vm7, %v9365_v56  ;;  %v11082_v56 = vld [vmem:[#allocation62_spill] sm:$0xff] }
 0x66f   :  { %5376 = vmatpush.msk.msra.mxu3 %vm11034_vm12, %v9361_v36 }
 0x670   :  { %3537 = vmatpush.msra.mxu0 %v8925_v19  ;;  %5372 = vmatpush.msk.msra.mxu2 %vm11032_vm7, %v9157_v21 }
 0x671   :  { %5377 = vmatpush.msk.msra.mxu3 %vm11034_vm12, %v9171_v31 }
 0x672   :  { %3538 = vmatpush.msra.mxu0 %v8848_v32  ;;  %v3771_v9 = vpop.permute.xlu1 %3770  ;;  %5373 = vmatpush.msk.msra.mxu2 %vm11032_vm7, %v8973_v11  ;;  %v3610_v19 = vpop.permute.xlu0 %3609  ;;  %v11039_v32 = vld [vmem:[#allocation19_spill] sm:$0xff]  ;;  %v11041_v11 = vld [vmem:[#allocation21_spill] sm:$0xff] }
 0x673   :  { %5378 = vmatpush.msk.msra.mxu3 %vm11034_vm12, %v8949_v49  ;;  %v3646_v36 = vsel %vm11035_vm11, %v3610_v19, %v3618_v60  ;;  %v3650_v21 = vsel %vm11036_vm15, %v3634_v5, %v3610_v19  ;;  %5374 = vmatmul.msk.f32.vlgmr.msra.gmra.mxu2 %vm11037_vm2, %v3436_v0  ;;  %vm11040_vm14 = vcmp.ge.s32.totalorder %v11039_v32, 1  ;;  %vm11042_vm7 = vcmp.ge.s32.totalorder %v11041_v11, 1 }
 0x674   :  { %5379 = vmatmul.msk.f32.vlgmr.msra.gmra.mxu3 %vm11038_vm4, %v3436_v0  ;;  %3575 = vmatpush.msrb.mxu2 %v9301_v37  ;;  %vm11043_vm12 = vmmov %vm11040_vm14  ;;  %v3924_v49 = vpop.permute.xlu2 %3923  ;;  %vm11047_vm4 = vcmp.lt.s32.totalorder %v10885_v28, 16  ;;  %v11081_v37 = vld [vmem:[#allocation54_spill] sm:$0xff] }
 0x675   :  { %3595 = vmatpush.msrb.mxu3 %v9276_v51  ;;  %5385 = vmatpush.msk.msrb.mxu0 %vm11040_vm14, %v3650_v21  ;;  %vm11044_vm11 = vmmov %vm11042_vm7  ;;  %v11094_v0 = vld [vmem:[#allocation42_spill] sm:$0xff] }
 0x676   :  { %5390 = vmatpush.msk.msra.mxu1 %vm11042_vm7, %v3646_v36  ;;  %3576 = vmatpush.msrb.mxu2 %v9077_v38  ;;  %vm11045_vm15 = vmmov %vm11043_vm12  ;;  %v11109_v36 = vld [vmem:[#allocation46_spill] sm:$0xff] }
 0x677   :  { %3596 = vmatpush.msrb.mxu3 %v9079_v25  ;;  %5386 = vmatpush.msk.msrb.mxu0 %vm11043_vm12, %v9423_v53  ;;  %vm11046_vm2 = vmmov %vm11042_vm7  ;;  %v11110_v21 = vld [vmem:[#allocation38_spill] sm:$0xff] }
 0x678   :  { %5391 = vmatpush.msk.msra.mxu1 %vm11044_vm11, %v9401_v3  ;;  %3577 = vmatpush.msrb.mxu2 %v8913_v46  ;;  %v3638_v46 = vsel %vm11047_vm4, %v9516_v61, %v3634_v5  ;;  %vm11048_vm14 = vmmov %vm11047_vm4  ;;  %v5405_v5 = vld [vmem:[%s10150_s5 + $0x4] sm:$0x3] }
 0x679   :  { %3597 = vmatpush.msrb.mxu3 %v8927_v58  ;;  %5387 = vmatpush.msk.msrb.mxu0 %vm11045_vm15, %v9213_v44  ;;  %v3642_v58 = vsel %vm11048_vm14, %v3618_v60, %v9516_v61  ;;  %vm11049_vm7 = vmmov %vm11043_vm12  ;;  %vm11057_vm14 = vcmask 261120   ;;  %v11087_v61 = vld [vmem:[#allocation52_spill] sm:$0xff]  ;;  %v11096_v60 = vld [vmem:[#allocation83_spill] sm:$0xff] }
 0x67a   :  { %5392 = vmatpush.msk.msra.mxu1 %vm11046_vm2, %v9191_v48  ;;  %v3763_v38 = vpop.permute.xlu1 %3762  ;;  %3578 = vmatpush.msrb.mxu2 %v8852_v40  ;;  %v3787_v25 = vpop.permute.xlu0 %3786  ;;  %vm11050_vm12 = vmmov %vm11046_vm2  ;;  %v11051_v40 = vld [vmem:[#allocation24_spill] sm:$0xff]  ;;  %vm11055_vm2 = vcmp.lt.s32.totalorder %v10885_v28, 15  ;;  %v11134_v44 = vld [vmem:[#allocation29_spill] sm:$0xff] }
 0x67b   :  { %3598 = vmatpush.msrb.mxu3 %v8861_v23  ;;  %5388 = vmatpush.msk.msrb.mxu0 %vm11049_vm7, %v9031_v14  ;;  %vm11052_vm11 = vcmp.ge.s32.totalorder %v11051_v40, 1  ;;  %v11053_v23 = vld [vmem:[#allocation20_spill] sm:$0xff]  ;;  %v3803_v3 = vsel %vm11055_vm2, %v3787_v25, %v3763_v38  ;;  %vm11056_vm4 = vmmov %vm11055_vm2  ;;  %v11121_v14 = vld [vmem:[#allocation73_spill] sm:$0xff] }
 0x67c   :  { %5393 = vmatpush.msk.msra.mxu1 %vm11050_vm12, %v9027_v35  ;;  %5395 = vmatpush.msk.msra.mxu2 %vm11052_vm11, %v3642_v58  ;;  %vm11054_vm15 = vcmp.ge.s32.totalorder %v11053_v23, 1  ;;  %v3799_v53 = vsel %vm11056_vm4, %v3763_v38, %v3771_v9  ;;  %vm11058_vm10 = vmmov %vm11057_vm14  ;;  %v11112_v38 = vld [vmem:[#allocation48_spill] sm:$0xff]  ;;  %v11117_v58 = vld [vmem:[#allocation87_spill] sm:$0xff] }
 0x67d   :  { %5400 = vmatpush.msk.msra.mxu3 %vm11054_vm15, %v3638_v46  ;;  %5382 = vmatmul.msk.f32.vlgmr.msrb.gmra.mxu2 %vm11057_vm14, %v5359_v18  ;;  %vm11059_vm7 = vmmov %vm11058_vm10  ;;  %v11115_v46 = vld [vmem:[#allocation36_spill] sm:$0xff]  ;;  %v11119_v35 = vld [vmem:[#allocation82_spill] sm:$0xff] }
 0x67e   :  { %5383 = vmatmul.msk.f32.vlgmr.msrb.gmra.mxu3 %vm11058_vm10, %v5359_v18  ;;  %5380 = vmatmul.msk.f32.vlgmr.msra.gmra.mxu0 %vm11059_vm7, %v5359_v18  ;;  %vm11060_vm12 = vmmov %vm11052_vm11 }
 0x67f   :  { %5396 = vmatpush.msk.msra.mxu2 %vm11060_vm12, %v9397_v34  ;;  %vm11061_vm11 = vmmov %vm11054_vm15  ;;  %5406 = vmatpush.msk.msra.mxu0 %vm6215_vm5, %v3803_v3  ;;  %v11118_v3 = vld [vmem:[#allocation92_spill] sm:$0xff] }
 0x680   :  { %5401 = vmatpush.msk.msra.mxu3 %vm11061_vm11, %v9419_v62  ;;  %5411 = vmatpush.msk.msrb.mxu1 %vm6279_vm3, %v3799_v53  ;;  %vm11064_vm15 = vmmov %vm11060_vm12  ;;  %v3916_v62 = vpop.permute.xlu2 %3915  ;;  %v5426_v53 = vld [vmem:[%s10150_s5 + $0x6] sm:$0x3] }
 0x681   :  { %5397 = vmatpush.msk.msra.mxu2 %vm11064_vm15, %v9187_v43  ;;  %vm11065_vm10 = vmmov %vm11061_vm11  ;;  %5407 = vmatpush.msk.msra.mxu0 %vm6215_vm5, %v9415_v42  ;;  %v3795_v43 = vsel %vm11056_vm4, %v3771_v9, %v3779_v55  ;;  %vm11073_vm15 = vcmask 261120   ;;  %v11106_v9 = vld [vmem:[#allocation31_spill] sm:$0xff] }
 0x682   :  { %5402 = vmatpush.msk.msra.mxu3 %vm11065_vm10, %v9209_v29  ;;  %v3940_v31 = vpop.permute.xlu1 %3939  ;;  %5412 = vmatpush.msk.msrb.mxu1 %vm6279_vm3, %v9393_v17  ;;  %vm11066_vm2 = vmmov %vm11060_vm12  ;;  %v3932_v48 = vpop.permute.xlu0 %3931  ;;  %v11071_v29 = vld [vmem:[#allocation40_spill] sm:$0xff]  ;;  %v11085_v17 = vld [vmem:[#allocation17_spill] sm:$0xff] }
 0x683   :  { %5398 = vmatpush.msk.msra.mxu2 %vm11066_vm2, %v8995_v54  ;;  %vm11067_vm14 = vmmov %vm11065_vm10  ;;  %5408 = vmatpush.msk.msra.mxu0 %vm6215_vm5, %v9221_v45  ;;  %v11069_v54 = vld [vmem:[#allocation39_spill] sm:$0xff]  ;;  %vm11072_vm11 = vnez %v11071_v29  ;;  %vm11074_vm10 = vcmp.lt.s32.totalorder %v10885_v28, 1 }
 0x684   :  { %5403 = vmatpush.msk.msra.mxu3 %vm11067_vm14, %v9013_v2  ;;  %vm11068_vm7 = vmmov %vm11056_vm4  ;;  %5413 = vmatpush.msk.msrb.mxu1 %vm6279_vm3, %v9217_v15  ;;  %vm11070_vm12 = vnez %v11069_v54  ;;  %v5384_v2 = vld [vmem:[%s10150_s5 + $0x2] sm:$0x3]  ;;  %v3956_v45 = vsel %vm11074_vm10, %v3940_v31, %v3916_v62  ;;  %v11129_v29 = vld [vmem:[#allocation63_spill] sm:$0xff] }
 0x685   :  { %v3791_v42 = vsel %vm11068_vm7, %v3779_v55, %v3787_v25  ;;  %5416 = vmatpush.msk.msrb.mxu2 %vm11070_vm12, %v3795_v43  ;;  %5409 = vmatpush.msk.msra.mxu0 %vm6215_vm5, %v9023_v50  ;;  %vm11075_vm2 = vmmov %vm11073_vm15  ;;  %v11113_v25 = vld [vmem:[#allocation34_spill] sm:$0xff]  ;;  %v11126_v43 = vld [vmem:[#allocation71_spill] sm:$0xff] }
 0x686   :  { %5421 = vmatpush.msk.msrb.mxu3 %vm11072_vm11, %v3791_v42  ;;  %5414 = vmatpush.msk.msrb.mxu1 %vm6279_vm3, %v9053_v1  ;;  %vm11076_vm4 = vmmov %vm11075_vm2  ;;  %v11127_v42 = vld [vmem:[#allocation68_spill] sm:$0xff]  ;;  %v11133_v1 = vld [vmem:[#allocation13_spill] sm:$0xff] }
 0x687   :  { %5399 = vmatmul.msk.f32.vlgmr.msra.gmra.mxu2 %vm11073_vm15, %v5384_v2  ;;  %5394 = vmatmul.msk.f32.vlgmr.msra.gmra.mxu1 %vm11075_vm2, %v5384_v2  ;;  %vm11077_vm14 = vmmov %vm11074_vm10 }
 0x688   :  { %5404 = vmatmul.msk.f32.vlgmr.msra.gmra.mxu3 %vm11076_vm4, %v5384_v2  ;;  %v3952_v50 = vsel %vm11077_vm14, %v3916_v62, %v3924_v49  ;;  %5417 = vmatpush.msk.msrb.mxu2 %vm11070_vm12, %v9389_v10  ;;  %vm11079_vm3 = vmmov %vm11075_vm2  ;;  %v11083_v10 = vld [vmem:[#allocation93_spill] sm:$0xff]  ;;  %vm11107_vm4 = vnez %v11106_v9  ;;  %v5489_v9 = vld [vmem:[%s10150_s5 + $0xe] sm:$0x3] }
 0x689   :  { %5422 = vmatpush.msk.msrb.mxu3 %vm11072_vm11, %v9411_v16  ;;  %5432 = vmatpush.msk.msra.mxu1 %vm10610_vm13, %v3952_v50  ;;  %v9734_v16 = vpop.permute.xlu2 %4245  ;;  %vm11086_vm5 = vmmov %vm11074_vm10  ;;  %v11132_v50 = vld [vmem:[#allocation15_spill] sm:$0xff] }
 0x68a   :  { %5389 = vmatmul.msk.f32.vlgmr.msrb.gmra.mxu0 %vm11079_vm3, %v5384_v2  ;;  %v4093_v15 = vpop.permute.xlu1 %4092  ;;  %5418 = vmatpush.msk.msrb.mxu2 %vm11070_vm12, %v11081_v37  ;;  %v4085_v51 = vpop.permute.xlu0 %4084  ;;  %v3948_v34 = vsel %vm11086_vm5, %v3924_v49, %v3932_v48  ;;  %vm11089_vm7 = vmmov %vm11086_vm5  ;;  %vm11111_vm3 = vnez %v11110_v21  ;;  %vm11114_vm5 = vnez %v11113_v25  ;;  %v11130_v2 = vld [vmem:[#allocation64_spill] sm:$0xff]  ;;  %v11135_v37 = vld [vmem:[#allocation14_spill] sm:$0xff] }
 0x68b   :  { %5427 = vmatpush.msk.msrb.mxu0 %vm10608_vm0, %v3956_v45  ;;  %5423 = vmatpush.msk.msrb.mxu3 %vm11072_vm11, %v11082_v56  ;;  %v3944_v30 = vsel %vm11089_vm7, %v3932_v48, %v3940_v31  ;;  %vm11101_vm15 = vmmov %vm11075_vm2  ;;  %vm11116_vm7 = vnez %v11115_v46  ;;  %v11124_v48 = vld [vmem:[#allocation70_spill] sm:$0xff]  ;;  %v11137_v56 = vld [vmem:[#allocation28_spill] sm:$0xff] }
 0x68c   :  { %5433 = vmatpush.msk.msra.mxu1 %vm10610_vm13, %v11083_v10  ;;  %5419 = vmatpush.msk.msrb.mxu2 %vm11070_vm12, %v11085_v17  ;;  %vm11097_vm12 = vmmov %vm11075_vm2  ;;  %v11182_v21 = vld [vmem:[#allocation77_spill] sm:$0xff] }
 0x68d   :  { %5428 = vmatpush.msk.msrb.mxu0 %vm10608_vm0, %v11084_v26  ;;  %5424 = vmatpush.msk.msrb.mxu3 %vm11072_vm11, %v11087_v61  ;;  %vm11099_vm11 = vmmov %vm11075_vm2  ;;  %v11145_v61 = vld [vmem:[#allocation84_spill] sm:$0xff]  ;;  %v11186_v25 = vld [vmem:[#allocation81_spill] sm:$0xff] }
 0x68e   :  { %5434 = vmatpush.msk.msra.mxu1 %vm10610_vm13, %v11088_v63  ;;  %5437 = vmatpush.msk.msra.mxu2 %vm6142_vm9, %v3948_v34  ;;  %v11146_v63 = vld [vmem:[#allocation32_spill] sm:$0xff] }
 0x68f   :  { %5429 = vmatpush.msk.msrb.mxu0 %vm10608_vm0, %v11090_v41  ;;  %5442 = vmatpush.msk.msra.mxu3 %vm6129_vm6, %v3944_v30  ;;  %v11148_v30 = vld [vmem:[#allocation75_spill] sm:$0xff]  ;;  %v11151_v41 = vld [vmem:[#allocation74_spill] sm:$0xff] }
 0x690   :  { %5435 = vmatpush.msk.msra.mxu1 %vm10610_vm13, %v11093_v20  ;;  %5438 = vmatpush.msk.msra.mxu2 %vm6142_vm9, %v11095_v33  ;;  %vm11098_vm13 = vmmov %vm11075_vm2  ;;  %v11156_v33 = vld [vmem:[#allocation72_spill] sm:$0xff] }
 0x691   :  { %5430 = vmatpush.msk.msrb.mxu0 %vm10608_vm0, %v11094_v0  ;;  %5443 = vmatpush.msk.msra.mxu3 %vm6129_vm6, %v11096_v60  ;;  %vm11100_vm0 = vcmp.lt.s32.totalorder %v10885_v28, 127  ;;  %v4230_v49 = vpop.permute.xlu2 %4229  ;;  %v11155_v0 = vld [vmem:[#allocation51_spill] sm:$0xff] }
 0x692   :  { %5415 = vmatmul.msk.f32.vlgmr.msrb.gmra.mxu1 %vm11097_vm12, %v5405_v5  ;;  %v4077_v13 = vpop.permute.xlu1 %4076  ;;  %5420 = vmatmul.msk.f32.vlgmr.msrb.gmra.mxu2 %vm11098_vm13, %v5405_v5  ;;  %v4069_v39 = vpop.permute.xlu0 %4068  ;;  %vm11103_vm10 = vmmov %vm11100_vm0  ;;  %v11160_v60 = vld [vmem:[#allocation67_spill] sm:$0xff] }
 0x693   :  { %5425 = vmatmul.msk.f32.vlgmr.msrb.gmra.mxu3 %vm11099_vm11, %v5405_v5  ;;  %v4101_v18 = vsel %vm11100_vm0, %v4077_v13, %v4085_v51  ;;  %5410 = vmatmul.msk.f32.vlgmr.msra.gmra.mxu0 %vm11101_vm15, %v5405_v5  ;;  %v4105_v4 = vsel %vm11103_vm10, %v4069_v39, %v4077_v13  ;;  %vm11105_vm2 = vmmov %vm11100_vm0  ;;  %vm11136_vm15 = vnez %v11135_v37  ;;  %vm11138_vm10 = vnez %v11137_v56 }
 0x694   :  { %5439 = vmatpush.msk.msra.mxu2 %vm6142_vm9, %v11102_v7  ;;  %5444 = vmatpush.msk.msra.mxu3 %vm6129_vm6, %v11104_v22  ;;  %v4109_v55 = vsel %vm11105_vm2, %v4093_v15, %v4069_v39  ;;  %vm11108_vm14 = vmmov %vm11100_vm0  ;;  %v11164_v7 = vld [vmem:[#allocation61_spill] sm:$0xff] }
 0x695   :  { %5448 = vmatpush.msk.msra.mxu0 %vm11107_vm4, %v4105_v4  ;;  %v4097_v19 = vsel %vm11108_vm14, %v4085_v51, %v4093_v15  ;;  %5453 = vmatpush.msk.msrb.mxu1 %vm11111_vm3, %v4101_v18  ;;  %v5447_v15 = vld [vmem:[%s10150_s5 + $0xa] sm:$0x3]  ;;  %v11162_v18 = vld [vmem:[#allocation56_spill] sm:$0xff] }
 0x696   :  { %5440 = vmatpush.msk.msra.mxu2 %vm6142_vm9, %v11109_v36  ;;  %5445 = vmatpush.msk.msra.mxu3 %vm6129_vm6, %v11112_v38  ;;  %vm11120_vm6 = vmmov %vm11099_vm11  ;;  %vm11128_vm11 = vcmp.lt.s32.totalorder %v10885_v28, 113  ;;  %v11178_v36 = vld [vmem:[#allocation89_spill] sm:$0xff]  ;;  %v11184_v38 = vld [vmem:[#allocation80_spill] sm:$0xff] }
 0x697   :  { %5449 = vmatpush.msk.msra.mxu0 %vm11107_vm4, %v11117_v58  ;;  %5454 = vmatpush.msk.msrb.mxu1 %vm11111_vm3, %v11119_v35  ;;  %vm11122_vm9 = vmmov %vm11120_vm6  ;;  %v11196_v35 = vld [vmem:[#allocation91_spill] sm:$0xff]  ;;  %v4735_v58 = vld [vmem:[#allocation6 + $0xe0] sm:$0xff] }
 0x698   :  { %5458 = vmatpush.msk.msrb.mxu2 %vm11114_vm5, %v4097_v19  ;;  %5463 = vmatpush.msk.msrb.mxu3 %vm11116_vm7, %v4109_v55  ;;  %vm11123_vm12 = vmmov %vm11120_vm6  ;;  %v11173_v55 = vld [vmem:[#allocation47_spill] sm:$0xff]  ;;  %v11176_v19 = vld [vmem:[#allocation86_spill] sm:$0xff] }
 0x699   :  { %vm11125_vm13 = vmmov %vm11120_vm6  ;;  %5450 = vmatpush.msk.msra.mxu0 %vm11107_vm4, %v11126_v43  ;;  %5455 = vmatpush.msk.msrb.mxu1 %vm11111_vm3, %v11127_v42  ;;  %v4391_v51 = vpop.permute.xlu2 %4390 }
 0x69a   :  { %5459 = vmatpush.msk.msrb.mxu2 %vm11114_vm5, %v11118_v3  ;;  %5436 = vmatmul.msk.f32.vlgmr.msra.gmra.mxu1 %vm11120_vm6, %v5426_v53  ;;  %v4238_v31 = vpop.permute.xlu1 %4237  ;;  %v4399_v62 = vpop.permute.xlu0 %4398  ;;  %vm11131_vm0 = vmmov %vm11128_vm11  ;;  %v11192_v3 = vld [vmem:[#allocation59_spill] sm:$0xff] }
 0x69b   :  { %5464 = vmatpush.msk.msrb.mxu3 %vm11116_vm7, %v11121_v14  ;;  %5441 = vmatmul.msk.f32.vlgmr.msra.gmra.mxu2 %vm11122_vm9, %v5426_v53  ;;  %v4254_v54 = vsel %vm11128_vm11, %v4230_v49, %v4238_v31  ;;  %v4250_v45 = vsel %vm11131_vm0, %v4238_v31, %v9734_v16  ;;  %vm11139_vm2 = vmmov %vm11120_vm6  ;;  %vm11147_vm6 = vnez %v11146_v63  ;;  %vm11158_vm11 = vcmp.lt.s32.totalorder %v11051_v40, 15  ;;  %v11202_v31 = vld [vmem:[#allocation69_spill] sm:$0xff] }
 0x69c   :  { %5446 = vmatmul.msk.f32.vlgmr.msra.gmra.mxu3 %vm11123_vm12, %v5426_v53  ;;  %5460 = vmatpush.msk.msrb.mxu2 %vm11114_vm5, %v11124_v48  ;;  %vm11141_vm14 = vmmov %vm11139_vm2  ;;  %vm11154_vm12 = vcmp.lt.s32.totalorder %v10885_v28, 112 }
 0x69d   :  { %5431 = vmatmul.msk.f32.vlgmr.msrb.gmra.mxu0 %vm11125_vm13, %v5426_v53  ;;  %5465 = vmatpush.msk.msrb.mxu3 %vm11116_vm7, %v11130_v2  ;;  %v4403_v20 = vsel %vm11154_vm12, %v4391_v51, %v4399_v62  ;;  %vm11157_vm13 = vmmov %vm11139_vm2  ;;  %v11194_v53 = vld [vmem:[#allocation55_spill] sm:$0xff] }
 0x69e   :  { %5461 = vmatpush.msk.msrb.mxu2 %vm11114_vm5, %v11129_v29  ;;  %5451 = vmatpush.msk.msra.mxu0 %vm11107_vm4, %v11132_v50  ;;  %vm11140_vm4 = vmmov %vm11139_vm2  ;;  %v11211_v50 = vld [vmem:[#allocation45_spill] sm:$0xff] }
 0x69f   :  { %5456 = vmatpush.msk.msrb.mxu1 %vm11111_vm3, %v11133_v1  ;;  %5466 = vmatpush.msk.msrb.mxu3 %vm11116_vm7, %v11134_v44  ;;  %vm11142_vm3 = vmmov %vm11131_vm0  ;;  %v11216_v44 = vld [vmem:[#allocation78_spill] sm:$0xff] }
 0x6a0   :  { %5479 = vmatpush.msk.msra.mxu2 %vm11138_vm10, %v4250_v45  ;;  %vm11143_vm5 = vmmov %vm11131_vm0 }
 0x6a1   :  { %5474 = vmatpush.msk.msra.mxu1 %vm11136_vm15, %v4254_v54  ;;  %vm11144_vm7 = vmmov %vm11139_vm2  ;;  %v4375_v5 = vpop.permute.xlu2 %4374 }
 0x6a2   :  { %5457 = vmatmul.msk.f32.vlgmr.msrb.gmra.mxu1 %vm11139_vm2, %v5447_v15  ;;  %v4222_v10 = vpop.permute.xlu1 %4221  ;;  %v9869_v34 = vpop.permute.xlu0 %4537  ;;  %5480 = vmatpush.msk.msra.mxu2 %vm11138_vm10, %v11145_v61  ;;  %vm11159_vm0 = vmmov %vm11139_vm2 }
 0x6a3   :  { %5462 = vmatmul.msk.f32.vlgmr.msrb.gmra.mxu2 %vm11140_vm4, %v5447_v15  ;;  %v4258_v26 = vsel %vm11142_vm3, %v4222_v10, %v4230_v49  ;;  %v4262_v17 = vsel %vm11143_vm5, %v9734_v16, %v4222_v10  ;;  %5475 = vmatpush.msk.msra.mxu1 %vm11136_vm15, %v9510_v47  ;;  %v11149_v16 = vld [vmem:[#allocation16_spill] sm:$0xff]  ;;  %v5468_v47 = vld [vmem:[%s10150_s5 + $0xc] sm:$0x3]  ;;  %vm11166_vm4 = vmmov %vm11159_vm0 }
 0x6a4   :  { %5467 = vmatmul.msk.f32.vlgmr.msrb.gmra.mxu3 %vm11141_vm14, %v5447_v15  ;;  %5469 = vmatpush.msk.msrb.mxu0 %vm11147_vm6, %v4258_v26  ;;  %vm11150_vm9 = vnez %v11149_v16  ;;  %vm11169_vm3 = vmmov %vm11158_vm11 }
 0x6a5   :  { %5452 = vmatmul.msk.f32.vlgmr.msra.gmra.mxu0 %vm11144_vm7, %v5447_v15  ;;  %5476 = vmatpush.msk.msra.mxu1 %vm11136_vm15, %v11148_v30  ;;  %vm11170_vm5 = vmmov %vm11159_vm0  ;;  %vm11171_vm7 = vcmp.lt.s32.totalorder %v11053_v23, 15  ;;  %v11214_v15 = vld [vmem:[#allocation49_spill] sm:$0xff] }
 0x6a6   :  { %5484 = vmatpush.msk.msra.mxu3 %vm11150_vm9, %v4262_v17  ;;  %5481 = vmatpush.msk.msra.mxu2 %vm11138_vm10, %v11151_v41 }
 0x6a7   :  { %5470 = vmatpush.msk.msrb.mxu0 %vm11147_vm6, %v9514_v6  ;;  %5477 = vmatpush.msk.msra.mxu1 %vm11136_vm15, %v11152_v27  ;;  %vm11161_vm15 = vmmov %vm11158_vm11 }
 0x6a8   :  { %5485 = vmatpush.msk.msra.mxu3 %vm11150_vm9, %v11153_v52  ;;  %5482 = vmatpush.msk.msra.mxu2 %vm11138_vm10, %v11155_v0  ;;  %vm11163_vm10 = vmmov %vm11154_vm12  ;;  %vm11175_vm12 = vcmp.lt.s32.totalorder %v11041_v11, 15  ;;  %v4722_v0 = vld [vmem:[#allocation6 + $0x78] sm:$0xff] }
 0x6a9   :  { %5471 = vmatpush.msk.msrb.mxu0 %vm11147_vm6, %v11156_v33  ;;  %vm11165_vm2 = vmmov %vm11163_vm10  ;;  %v4534_v23 = vpop.permute.xlu2 %4533  ;;  %v4721_v33 = vld [vmem:[#allocation6 + $0x70] sm:$0xff] }
 0x6aa   :  { %5478 = vmatmul.msk.f32.vlgmr.msra.gmra.mxu1 %vm11157_vm13, %v5468_v47  ;;  %5500 = vmatpush.msk.msrb.mxu2 %vm11158_vm11, %v4403_v20  ;;  %v4546_v6 = vpop.permute.xlu1 %4545  ;;  %v4383_v13 = vpop.permute.xlu0 %4382  ;;  %vm11167_vm14 = vmmov %vm11165_vm2 }
 0x6ab   :  { %5483 = vmatmul.msk.f32.vlgmr.msra.gmra.mxu2 %vm11159_vm0, %v5468_v47  ;;  %5486 = vmatpush.msk.msra.mxu3 %vm11150_vm9, %v11160_v60  ;;  %v4411_v39 = vsel %vm11163_vm10, %v4375_v5, %v4383_v13  ;;  %v4407_v4 = vsel %vm11165_vm2, %v4383_v13, %v4391_v51  ;;  %v4415_v22 = vsel %vm11167_vm14, %v4399_v62, %v4375_v5  ;;  %vm11177_vm13 = vmmov %vm11171_vm7  ;;  %vm11188_vm14 = vcmp.lt.s32.totalorder %v10885_v28, 111  ;;  %v4770_v13 = vld [vmem:[#allocation6 + $0x1f8] sm:$0xff] }
 0x6ac   :  { %5501 = vmatpush.msk.msrb.mxu2 %vm11161_vm15, %v9522_v57  ;;  %5472 = vmatpush.msk.msrb.mxu0 %vm11147_vm6, %v11162_v18  ;;  %v11168_v57 = vld [vmem:[#allocation76_spill] sm:$0xff]  ;;  %vm11172_vm6 = vcmp.lt.s32.totalorder %v11039_v32, 15  ;;  %vm11180_vm0 = vmmov %vm11175_vm12  ;;  %v11201_v32 = vld [vmem:[#allocation79_spill] sm:$0xff] }
 0x6ad   :  { %5487 = vmatpush.msk.msra.mxu3 %vm11150_vm9, %v11164_v7  ;;  %5473 = vmatmul.msk.f32.vlgmr.msrb.gmra.mxu0 %vm11166_vm4, %v5468_v47  ;;  %vm11174_vm9 = vmmov %vm11169_vm3  ;;  %v4738_v7 = vld [vmem:[#allocation6 + $0xf8] sm:$0xff] }
 0x6ae   :  { %5502 = vmatpush.msk.msrb.mxu2 %vm11169_vm3, %v11168_v57  ;;  %5488 = vmatmul.msk.f32.vlgmr.msra.gmra.mxu3 %vm11170_vm5, %v5468_v47  ;;  %vm11179_vm11 = vmmov %vm11172_vm6  ;;  %v4719_v57 = vld [vmem:[#allocation6 + $0x60] sm:$0xff] }
 0x6af   :  { %5505 = vmatpush.msk.msrb.mxu3 %vm11171_vm7, %v4415_v22  ;;  %5490 = vmatpush.msk.msra.mxu0 %vm11172_vm6, %v4411_v39  ;;  %vm11181_vm15 = vmmov %vm11166_vm4  ;;  %v4720_v39 = vld [vmem:[#allocation6 + $0x68] sm:$0xff]  ;;  %v4769_v22 = vld [vmem:[#allocation6 + $0x1f0] sm:$0xff] }
 0x6b0   :  { %5503 = vmatpush.msk.msrb.mxu2 %vm11174_vm9, %v11173_v55  ;;  %5495 = vmatpush.msk.msrb.mxu1 %vm11175_vm12, %v4407_v4  ;;  %vm11183_vm10 = vmmov %vm11171_vm7  ;;  %v4753_v4 = vld [vmem:[#allocation6 + $0x170] sm:$0xff] }
 0x6b1   :  { %5506 = vmatpush.msk.msrb.mxu3 %vm11177_vm13, %v11176_v19  ;;  %5491 = vmatpush.msk.msra.mxu0 %vm11179_vm11, %v11178_v36  ;;  %vm11185_vm2 = vmmov %vm11172_vm6  ;;  %v4522_v51 = vpop.permute.xlu2 %4521  ;;  %v4737_v55 = vld [vmem:[#allocation6 + $0xf0] sm:$0xff]  ;;  %v4752_v19 = vld [vmem:[#allocation6 + $0x168] sm:$0xff] }
 0x6b2   :  { %5496 = vmatpush.msk.msrb.mxu1 %vm11180_vm0, %v9526_v24  ;;  %v4552_v40 = vpop.permute.xlu1 %4551  ;;  %v4544_v49 = vpop.permute.xlu0 %4543  ;;  %vm11187_vm4 = vmmov %vm11180_vm0  ;;  %v11189_v24 = vld [vmem:[#allocation53_spill] sm:$0xff]  ;;  %v4768_v36 = vld [vmem:[#allocation6 + $0x1e8] sm:$0xff] }
 0x6b3   :  { %5504 = vmatmul.msk.f32.vlgmr.msrb.gmra.mxu2 %vm11181_vm15, %v5489_v9  ;;  %5507 = vmatpush.msk.msrb.mxu3 %vm11183_vm10, %v11182_v21  ;;  %v4556_v46 = vsel %vm11188_vm14, %v4544_v49, %v4552_v40  ;;  %vm11190_vm3 = vmmov %vm11171_vm7 }
 0x6b4   :  { %5492 = vmatpush.msk.msra.mxu0 %vm11185_vm2, %v11184_v38  ;;  %5497 = vmatpush.msk.msrb.mxu1 %vm11187_vm4, %v11186_v25  ;;  %vm11193_vm5 = vmmov %vm11185_vm2  ;;  %v4736_v38 = vld [vmem:[#allocation6 + $0xe8] sm:$0xff]  ;;  %v4751_v25 = vld [vmem:[#allocation6 + $0x160] sm:$0xff] }
 0x6b5   :  { %5508 = vmatpush.msk.msrb.mxu3 %vm11190_vm3, %v11189_v24  ;;  %5521 = vmatpush.msk.msra.mxu2 %vm10746_vm8, %v4556_v46  ;;  %vm11195_vm7 = vmmov %vm11180_vm0  ;;  %vm11212_vm3 = vnez %v11211_v50  ;;  %v4767_v46 = vld [vmem:[#allocation6 + $0x1e0] sm:$0xff]  ;;  %v4717_v24 = vld [vmem:[#allocation6 + $0x50] sm:$0xff] }
 0x6b6   :  { %5493 = vmatpush.msk.msra.mxu0 %vm11193_vm5, %v11192_v3  ;;  %5498 = vmatpush.msk.msrb.mxu1 %vm11195_vm7, %v11194_v53  ;;  %vm11197_vm6 = vmmov %vm11188_vm14  ;;  %vm11215_vm5 = vnez %v11214_v15  ;;  %v4750_v3 = vld [vmem:[#allocation6 + $0x158] sm:$0xff]  ;;  %v4731_v50 = vld [vmem:[#allocation6 + $0xc0] sm:$0xff] }
 0x6b7   :  { %v4555_v14 = vsel %vm11197_vm6, %v11196_v35, %v9479_v8  ;;  %vm11198_vm9 = vmmov %vm11181_vm15  ;;  %v5510_v8 = vld [vmem:[%s10150_s5 + $0x10] sm:$0x3]  ;;  %v4766_v53 = vld [vmem:[#allocation6 + $0x1d8] sm:$0xff] }
 0x6b8   :  { %5494 = vmatmul.msk.f32.vlgmr.msra.gmra.mxu0 %vm11198_vm9, %v5489_v9  ;;  %vm11199_vm12 = vmmov %vm11198_vm9  ;;  %5522 = vmatpush.msk.msra.mxu2 %vm10746_vm8, %v4555_v14  ;;  %v4734_v14 = vld [vmem:[#allocation6 + $0xd8] sm:$0xff] }
 0x6b9   :  { %5499 = vmatmul.msk.f32.vlgmr.msrb.gmra.mxu1 %vm11199_vm12, %v5489_v9  ;;  %vm11200_vm13 = vmmov %vm11198_vm9 }
 0x6ba   :  { %5509 = vmatmul.msk.f32.vlgmr.msrb.gmra.mxu3 %vm11200_vm13, %v5489_v9  ;;  %vm11203_vm11 = vmmov %vm11197_vm6  ;;  %v4536_v62 = vpop.permute.xlu1 %4535  ;;  %v4528_v42 = vpop.permute.xlu0 %4527 }
 0x6bb   :  { %v4554_v11 = vsel %vm11203_vm11, %v11202_v31, %v11201_v32  ;;  %vm11204_vm0 = vmmov %vm11197_vm6 }
 0x6bc   :  { %5523 = vmatpush.msk.msra.mxu2 %vm10746_vm8, %v4554_v11  ;;  %v4553_v48 = vsel %vm11204_vm0, %v9869_v34, %v4546_v6  ;;  %vm11205_vm15 = vmmov %vm11204_vm0  ;;  %v4715_v11 = vld [vmem:[#allocation6 + $0x40] sm:$0xff] }
 0x6bd   :  { %v4560_v43 = vsel %vm11205_vm15, %v4536_v62, %v4544_v49  ;;  %vm11206_vm10 = vmmov %vm11204_vm0 }
 0x6be   :  { %5524 = vmatpush.msk.msra.mxu2 %vm10746_vm8, %v4553_v48  ;;  %v4564_v54 = vsel %vm11206_vm10, %v4528_v42, %v4536_v62  ;;  %vm11207_vm2 = vmmov %vm11204_vm0  ;;  %5516 = vmatpush.msk.msra.mxu1 %vm10756_vm1, %v4560_v43  ;;  %v4733_v62 = vld [vmem:[#allocation6 + $0xd0] sm:$0xff]  ;;  %v4764_v48 = vld [vmem:[#allocation6 + $0x1c8] sm:$0xff] }
 0x6bf   :  { %v4568_v29 = vsel %vm11207_vm2, %v4552_v40, %v4528_v42  ;;  %vm11209_vm4 = vmmov %vm11204_vm0  ;;  %5511 = vmatpush.msk.msrb.mxu0 %vm11212_vm3, %v4564_v54  ;;  %v4718_v40 = vld [vmem:[#allocation6 + $0x58] sm:$0xff]  ;;  %v4732_v42 = vld [vmem:[#allocation6 + $0xc8] sm:$0xff] }
 0x6c0   :  { %v4559_v45 = vsel %vm11209_vm4, %v4534_v23, %v11196_v35  ;;  %vm11210_vm14 = vmmov %vm11198_vm9  ;;  %5526 = vmatpush.msk.msra.mxu3 %vm11215_vm5, %v4568_v29  ;;  %v4716_v35 = vld [vmem:[#allocation6 + $0x48] sm:$0xff]  ;;  %v4714_v43 = vld [vmem:[#allocation6 + $0x38] sm:$0xff] }
 0x6c1   :  { %5525 = vmatmul.msk.f32.vlgmr.msra.gmra.mxu2 %vm11210_vm14, %v5510_v8  ;;  %vm11213_vm8 = vmmov %vm11204_vm0  ;;  %5517 = vmatpush.msk.msra.mxu1 %vm10756_vm1, %v4559_v45  ;;  %v4747_v54 = vld [vmem:[#allocation6 + $0x140] sm:$0xff]  ;;  %v4713_v45 = vld [vmem:[#allocation6 + $0x30] sm:$0xff]  ;;  %vm5072_vm14 = vcmask 1041408  }
 0x6c2   :  { %v4563_v1 = vsel %vm11213_vm8, %v9541_v12, %v4534_v23  ;;  %5527 = vmatpush.msk.msra.mxu3 %vm11215_vm5, %v9551_v59  ;;  %vm11217_vm7 = vmmov %vm11204_vm0  ;;  %v4530_v56 = vpop.permute.xlu1 %4529  ;;  %v4532_v10 = vpop.permute.xlu0 %4531  ;;  %v4763_v29 = vld [vmem:[#allocation6 + $0x1c0] sm:$0xff]  ;;  %vm5076_vm8 = vcmask 1043456  }
 0x6c3   :  { %5512 = vmatpush.msk.msrb.mxu0 %vm11212_vm3, %v4563_v1  ;;  %v4566_v37 = vsel %vm11217_vm7, %v11201_v32, %v11216_v44  ;;  %vm11218_vm6 = vmmov %vm11204_vm0  ;;  %v4557_v61 = vsel %vm11204_vm0, %v4530_v56, %v9869_v34  ;;  %v4749_v32 = vld [vmem:[#allocation6 + $0x150] sm:$0xff] }
 0x6c4   :  { %5528 = vmatpush.msk.msra.mxu3 %vm11215_vm5, %v4566_v37  ;;  %v4565_v12 = vsel %vm11218_vm6, %v4546_v6, %v4522_v51  ;;  %vm11219_vm9 = vmmov %vm11204_vm0  ;;  %v4754_v6 = vld [vmem:[#allocation6 + $0x178] sm:$0xff] }
 0x6c5   :  { %v4558_v59 = vsel %vm11219_vm9, %v4532_v10, %v11202_v31  ;;  %vm11220_vm12 = vmmov %vm11204_vm0  ;;  %4815 = vmatpush.msrb.mxu2 %v4754_v6  ;;  %v4765_v31 = vld [vmem:[#allocation6 + $0x1d0] sm:$0xff]  ;;  %v4762_v37 = vld [vmem:[#allocation6 + $0x1b8] sm:$0xff] }
 0x6c6   :  { %5529 = vmatpush.msk.msra.mxu3 %vm11215_vm5, %v4565_v12  ;;  %v4562_v26 = vsel %vm11220_vm12, %v11216_v44, %v4532_v10  ;;  %vm11221_vm11 = vmmov %vm11204_vm0  ;;  %5518 = vmatpush.msk.msra.mxu1 %vm10756_vm1, %v4558_v59  ;;  %v4746_v44 = vld [vmem:[#allocation6 + $0x138] sm:$0xff]  ;;  %v4745_v10 = vld [vmem:[#allocation6 + $0x130] sm:$0xff] }
 0x6c7   :  { %5530 = vmatmul.msk.f32.vlgmr.msra.gmra.mxu3 %vm11200_vm13, %v5510_v8  ;;  %5513 = vmatpush.msk.msrb.mxu0 %vm11212_vm3, %v4562_v26  ;;  %v4561_v17 = vsel %vm11221_vm11, %v4522_v51, %v4530_v56  ;;  %vm11222_vm15 = vmmov %vm11200_vm13  ;;  %v4712_v51 = vld [vmem:[#allocation6 + $0x28] sm:$0xff]  ;;  %v4730_v12 = vld [vmem:[#allocation6 + $0xb8] sm:$0xff] }
 0x6c8   :  { %5519 = vmatpush.msk.msra.mxu1 %vm10756_vm1, %v4557_v61  ;;  %vm11223_vm10 = vmmov %vm11200_vm13  ;;  %4835 = vmatpush.msrb.mxu3 %v4770_v13  ;;  %v4761_v59 = vld [vmem:[#allocation6 + $0x1b0] sm:$0xff]  ;;  %v4711_v26 = vld [vmem:[#allocation6 + $0x20] sm:$0xff]  ;;  %vm4702_vm1 = vcmask 1040384  }
 0x6c9   :  { %5514 = vmatpush.msk.msrb.mxu0 %vm11212_vm3, %v4561_v17  ;;  %5520 = vmatmul.msk.f32.vlgmr.msra.gmra.mxu1 %vm11223_vm10, %v5510_v8  ;;  %v4729_v17 = vld [vmem:[#allocation6 + $0xb0] sm:$0xff]  ;;  %v4744_v61 = vld [vmem:[#allocation6 + $0x128] sm:$0xff]  ;;  %v4743_v13 = vld [vmem:[#allocation6 + $0x120] sm:$0xff]  ;;  %vm5074_vm3 = vcmask 1045508  }
 0x6ca   :  { %5515 = vmatmul.msk.f32.vlgmr.msrb.gmra.mxu0 %vm11222_vm15, %v5510_v8  ;;  %4795 = vmatpush.msrb.mxu1 %v4738_v7  ;;  %v4748_v8 = vld [vmem:[#allocation6 + $0x148] sm:$0xff] }
 0x6cb   :  { %4775 = vmatpush.msra.mxu0 %v4722_v0  ;;  %4816 = vmatpush.msrb.mxu2 %v4753_v4  ;;  %v4760_v0 = vld [vmem:[#allocation6 + $0x1a8] sm:$0xff]  ;;  %v4709_v4 = vld [vmem:[#allocation6 + $0x10] sm:$0xff] }
 0x6cc   :  { %4836 = vmatpush.msrb.mxu3 %v4769_v22  ;;  %4796 = vmatpush.msrb.mxu1 %v4737_v55  ;;  %v4728_v6 = vld [vmem:[#allocation6 + $0xa8] sm:$0xff]  ;;  %v4727_v22 = vld [vmem:[#allocation6 + $0xa0] sm:$0xff]  ;;  %v4742_v55 = vld [vmem:[#allocation6 + $0x118] sm:$0xff] }
 0x6cd   :  { %4776 = vmatpush.msra.mxu0 %v4721_v33  ;;  %4817 = vmatpush.msrb.mxu2 %v4752_v19  ;;  %v4710_v33 = vld [vmem:[#allocation6 + $0x18] sm:$0xff] }
 0x6ce   :  { %4837 = vmatpush.msrb.mxu3 %v4768_v36  ;;  %4797 = vmatpush.msrb.mxu1 %v4736_v38  ;;  %v4758_v19 = vld [vmem:[#allocation6 + $0x198] sm:$0xff]  ;;  %v4708_v36 = vld [vmem:[#allocation6 + $0x8] sm:$0xff] }
 0x6cf   :  { %4777 = vmatpush.msra.mxu0 %v4720_v39  ;;  %4818 = vmatpush.msrb.mxu2 %v4751_v25  ;;  %v4759_v39 = vld [vmem:[#allocation6 + $0x1a0] sm:$0xff] }
 0x6d0   :  { %4838 = vmatpush.msrb.mxu3 %v4767_v46  ;;  %4798 = vmatpush.msrb.mxu1 %v4735_v58  ;;  %v4741_v46 = vld [vmem:[#allocation6 + $0x110] sm:$0xff]  ;;  %v4707_v58 = vld [vmem:[#allocation6] sm:$0xff] }
 0x6d1   :  { %4778 = vmatpush.msra.mxu0 %v4719_v57  ;;  %4819 = vmatpush.msrb.mxu2 %v4750_v3  ;;  %v4725_v3 = vld [vmem:[#allocation6 + $0x90] sm:$0xff] }
 0x6d2   :  { %4839 = vmatpush.msrb.mxu3 %v4766_v53  ;;  %4799 = vmatpush.msrb.mxu1 %v4734_v14  ;;  %v4740_v53 = vld [vmem:[#allocation6 + $0x108] sm:$0xff] }
 0x6d3   :  { %4779 = vmatpush.msra.mxu0 %v4718_v40  ;;  %4820 = vmatpush.msrb.mxu2 %v4749_v32  ;;  %v4726_v40 = vld [vmem:[#allocation6 + $0x98] sm:$0xff]  ;;  %v4724_v32 = vld [vmem:[#allocation6 + $0x88] sm:$0xff] }
 0x6d4   :  { %4840 = vmatpush.msrb.mxu3 %v4765_v31  ;;  %4800 = vmatpush.msrb.mxu1 %v4733_v62  ;;  %v4755_v62 = vld [vmem:[#allocation6 + $0x180] sm:$0xff] }
 0x6d5   :  { %4780 = vmatpush.msra.mxu0 %v4717_v24  ;;  %4821 = vmatpush.msrb.mxu2 %v4748_v8  ;;  %v4757_v24 = vld [vmem:[#allocation6 + $0x190] sm:$0xff] }
 0x6d6   :  { %4841 = vmatpush.msrb.mxu3 %v4764_v48  ;;  %4801 = vmatpush.msrb.mxu1 %v4732_v42 }
 0x6d7   :  { %4781 = vmatpush.msra.mxu0 %v4716_v35  ;;  %4822 = vmatpush.msrb.mxu2 %v4747_v54  ;;  %v4756_v35 = vld [vmem:[#allocation6 + $0x188] sm:$0xff] }
 0x6d8   :  { %4842 = vmatpush.msrb.mxu3 %v4763_v29  ;;  %4802 = vmatpush.msrb.mxu1 %v4731_v50 }
 0x6d9   :  { %4782 = vmatpush.msra.mxu0 %v4715_v11  ;;  %4823 = vmatpush.msrb.mxu2 %v4746_v44  ;;  %v4739_v11 = vld [vmem:[#allocation6 + $0x100] sm:$0xff] }
 0x6da   :  { %4843 = vmatpush.msrb.mxu3 %v4762_v37  ;;  %4803 = vmatpush.msrb.mxu1 %v4730_v12 }
 0x6db   :  { %4783 = vmatpush.msra.mxu0 %v4714_v43  ;;  %4824 = vmatpush.msrb.mxu2 %v4745_v10  ;;  %v4723_v43 = vld [vmem:[#allocation6 + $0x80] sm:$0xff] }
 0x6dc   :  { %4844 = vmatpush.msrb.mxu3 %v4761_v59  ;;  %4804 = vmatpush.msrb.mxu1 %v4729_v17  ;;  %v4678_v59 = vpop.permute.xlu2 %4677 }
 0x6dd   :  { %4784 = vmatpush.msra.mxu0 %v4713_v45  ;;  %4825 = vmatpush.msrb.mxu2 %v4744_v61 }
 0x6de   :  { %4845 = vmatpush.msrb.mxu3 %v4760_v0  ;;  %4805 = vmatpush.msrb.mxu1 %v4728_v6 }
 0x6df   :  { %4785 = vmatpush.msra.mxu0 %v4712_v51  ;;  %4826 = vmatpush.msrb.mxu2 %v4743_v13 }
 0x6e0   :  { %v10064_v16 = vpop.f32.mrf.mxu1  ;;  %4846 = vmatpush.msrb.mxu3 %v4759_v39  ;;  %4806 = vmatpush.msrb.mxu1 %v4727_v22 }
 0x6e1   :  { %4786 = vmatpush.msra.mxu0 %v4711_v26  ;;  %4827 = vmatpush.msrb.mxu2 %v4742_v55 }
 0x6e2   :  { %4847 = vmatpush.msrb.mxu3 %v4758_v19  ;;  %4807 = vmatpush.msrb.mxu1 %v4726_v40 }
 0x6e3   :  { %4787 = vmatpush.msra.mxu0 %v4710_v33  ;;  %4828 = vmatpush.msrb.mxu2 %v4741_v46 }
 0x6e4   :  { %4848 = vmatpush.msrb.mxu3 %v4757_v24  ;;  %4808 = vmatpush.msrb.mxu1 %v4725_v3  ;;  %v4877_v3 = vld [vmem:[#allocation7 + $0x70] sm:$0xff] }
 0x6e5   :  { %4788 = vmatpush.msra.mxu0 %v4709_v4  ;;  %4829 = vmatpush.msrb.mxu2 %v4740_v53  ;;  %v4876_v53 = vld [vmem:[#allocation7 + $0x68] sm:$0xff] }
 0x6e6   :  { %4849 = vmatpush.msrb.mxu3 %v4756_v35  ;;  %4809 = vmatpush.msrb.mxu1 %v4724_v32  ;;  %v4875_v35 = vld [vmem:[#allocation7 + $0x60] sm:$0xff]  ;;  %v4873_v32 = vld [vmem:[#allocation7 + $0x50] sm:$0xff] }
 0x6e7   :  { %4789 = vmatpush.msra.mxu0 %v4708_v36  ;;  %4830 = vmatpush.msrb.mxu2 %v4739_v11  ;;  %v4871_v11 = vld [vmem:[#allocation7 + $0x40] sm:$0xff] }
 0x6e8   :  { %v10062_v30 = vpop.f32.mrf.mxu0  ;;  %v10072_v47 = vpop.f32.mrf.mxu1  ;;  %4850 = vmatpush.msrb.mxu3 %v4755_v62  ;;  %4810 = vmatpush.msrb.mxu1 %v4723_v43  ;;  %v5566_v62 = vld [vmem:[%s10153_s8] ss:$0 sm:$0xff]  ;;  %v4869_v43 = vld [vmem:[#allocation7 + $0x30] sm:$0xff] }
 0x6e9   :  { %4790 = vmatpush.msra.mxu0 %v4707_v58  ;;  %v3561_v8 = vadd.f32 %v10072_v47, %v10064_v16  ;;  %v4878_v58 = vld [vmem:[#allocation7 + $0x78] sm:$0xff] }
 0x6eb   :  { %4883 = vmatpush.msrb.mxu0 %v4878_v58  ;;  %v4939_v58 = vld [vmem:[#allocation9 + $0xe0] sm:$0xff] }
 0x6ed   :  { %4884 = vmatpush.msrb.mxu0 %v4877_v3  ;;  %v4940_v3 = vld [vmem:[#allocation9 + $0xe8] sm:$0xff] }
 0x6ef   :  { %4885 = vmatpush.msrb.mxu0 %v4876_v53  ;;  %v4941_v53 = vld [vmem:[#allocation9 + $0xf0] sm:$0xff] }
 0x6f1   :  { %4886 = vmatpush.msrb.mxu0 %v4875_v35  ;;  %v4942_v35 = vld [vmem:[#allocation9 + $0xf8] sm:$0xff] }
 0x6f6   :  { %v10060_v63 = vpop.f32.mrf.mxu2 }
 0x6f7   :  { %v10066_v41 = vpop.f32.mrf.mxu3 }
 0x6fb   :  { %v10070_v34 = vpop.f32.mrf.mxu0 }
 0x6fc   :  { %v3541_v31 = vadd.f32 %v10070_v34, %v10062_v30 }
 0x700   :  { %v10068_v28 = vpop.f32.mrf.mxu2 }
 0x701   :  { %v10074_v27 = vpop.f32.mrf.mxu3  ;;  %v3581_v14 = vadd.f32 %v10068_v28, %v10060_v63 }
 0x702   :  { %v3601_v16 = vadd.f32 %v10074_v27, %v10066_v41 }
 0x704   :  { %v10080_v5 = vpop.f32.mrf.mxu1 }
 0x705   :  { %v3753_v34 = vadd.f32 %v10080_v5, %v3561_v8 }
 0x707   :  { %v10078_v20 = vpop.f32.mrf.mxu0 }
 0x708   :  { %v3752_v28 = vadd.f32 %v10078_v20, %v3541_v31  ;;  %v4872_v31 = vld [vmem:[#allocation7 + $0x48] sm:$0xff] }
 0x70a   :  { %v10076_v52 = vpop.f32.mrf.mxu2 }
 0x70b   :  { %v10082_v60 = vpop.f32.mrf.mxu3  ;;  %v3754_v63 = vadd.f32 %v10076_v52, %v3581_v14  ;;  %v4874_v14 = vld [vmem:[#allocation7 + $0x58] sm:$0xff] }
 0x70c   :  { %v3755_v20 = vadd.f32 %v10082_v60, %v3601_v16  ;;  %4887 = vmatpush.msrb.mxu0 %v4874_v14  ;;  %v4967_v16 = vld [vmem:[#allocation9 + $0x1c0] sm:$0xff] }
 0x70d   :  { %v4935_v14 = vld [vmem:[#allocation9 + $0xc0] sm:$0xff] }
 0x70e   :  { %4888 = vmatpush.msrb.mxu0 %v4873_v32  ;;  %v4936_v32 = vld [vmem:[#allocation9 + $0xc8] sm:$0xff] }
 0x70f   :  { %v10088_v21 = vpop.f32.mrf.mxu1 }
 0x710   :  { %v10086_v9 = vpop.f32.mrf.mxu0  ;;  %v3906_v52 = vadd.f32 %v10088_v21, %v3753_v34  ;;  %4889 = vmatpush.msrb.mxu0 %v4872_v31  ;;  %v4972_v34 = vld [vmem:[#allocation9 + $0x1e8] sm:$0xff]  ;;  %v4937_v31 = vld [vmem:[#allocation9 + $0xd0] sm:$0xff] }
 0x711   :  { %v3905_v45 = vadd.f32 %v10086_v9, %v3752_v28  ;;  %5005 = vmatpush.msra.mxu2 %v4972_v34  ;;  %v4930_v34 = vld [vmem:[#allocation9 + $0x98] sm:$0xff] }
 0x712   :  { %4890 = vmatpush.msrb.mxu0 %v4871_v11  ;;  %v4938_v11 = vld [vmem:[#allocation9 + $0xd8] sm:$0xff] }
 0x715   :  { %v10084_v18 = vpop.f32.mrf.mxu2 }
 0x716   :  { %v10090_v49 = vpop.f32.mrf.mxu3  ;;  %v3907_v54 = vadd.f32 %v10084_v18, %v3754_v63  ;;  %v4868_v63 = vld [vmem:[#allocation7 + $0x28] sm:$0xff] }
 0x717   :  { %v10096_v1 = vpop.f32.mrf.mxu1  ;;  %v3908_v18 = vadd.f32 %v10090_v49, %v3755_v20 }
 0x718   :  { %v4059_v12 = vadd.f32 %v10096_v1, %v3906_v52  ;;  %v4968_v52 = vld [vmem:[#allocation9 + $0x1c8] sm:$0xff] }
 0x719   :  { %5006 = vmatpush.msra.mxu2 %v4968_v52  ;;  %v4919_v52 = vld [vmem:[#allocation9 + $0x40] sm:$0xff] }
 0x71a   :  { %v10094_v2 = vpop.f32.mrf.mxu0 }
 0x71b   :  { %v4058_v5 = vadd.f32 %v10094_v2, %v3905_v45  ;;  %v4866_v45 = vld [vmem:[#allocation7 + $0x18] sm:$0xff] }
 0x71e   :  { %v10092_v23 = vpop.f32.mrf.mxu2 }
 0x71f   :  { %v10098_v15 = vpop.f32.mrf.mxu3  ;;  %v10104_v57 = vpop.f32.mrf.mxu1  ;;  %v4060_v47 = vadd.f32 %v10092_v23, %v3907_v54  ;;  %v4867_v54 = vld [vmem:[#allocation7 + $0x20] sm:$0xff] }
 0x720   :  { %v4061_v21 = vadd.f32 %v10098_v15, %v3908_v18 }
 0x722   :  { %v10102_v7 = vpop.f32.mrf.mxu0 }
 0x723   :  { %v4211_v27 = vadd.f32 %v10102_v7, %v4058_v5  ;;  %v4965_v5 = vld [vmem:[#allocation9 + $0x1b0] sm:$0xff] }
 0x726   :  { %v10100_v56 = vpop.f32.mrf.mxu2 }
 0x727   :  { %v4208_v38 = vpop.f32.mrf.mxu3  ;;  %v4321_v42 = vpop.f32.mrf.mxu1  ;;  %v4213_v50 = vadd.f32 %v10100_v56, %v4060_v47  ;;  %v4212_v56 = vadd.f32 %v10104_v57, %v4059_v12  ;;  %v4865_v12 = vld [vmem:[#allocation7 + $0x10] sm:$0xff] }
 0x728   :  { %v4214_v26 = vadd.f32 %v4208_v38, %v4061_v21 }
 0x729   :  { %v4365_v17 = vadd.f32 %v4321_v42, %v4212_v56  ;;  %v4974_v56 = vld [vmem:[#allocation9 + $0x1f8] sm:$0xff] }
 0x72a   :  { %v4301_v48 = vpop.f32.mrf.mxu0 }
 0x72b   :  { %v4364_v60 = vadd.f32 %v4301_v48, %v4211_v27  ;;  %v4870_v48 = vld [vmem:[#allocation7 + $0x38] sm:$0xff]  ;;  %v4864_v27 = vld [vmem:[#allocation7 + $0x8] sm:$0xff] }
 0x72c   :  { %4891 = vmatpush.msrb.mxu0 %v4870_v48  ;;  %v4933_v48 = vld [vmem:[#allocation9 + $0xb0] sm:$0xff] }
 0x72e   :  { %v4341_v25 = vpop.f32.mrf.mxu2  ;;  %4892 = vmatpush.msrb.mxu0 %v4869_v43  ;;  %v4934_v43 = vld [vmem:[#allocation9 + $0xb8] sm:$0xff] }
 0x72f   :  { %v4366_v44 = vadd.f32 %v4341_v25, %v4213_v50  ;;  %v4969_v50 = vld [vmem:[#allocation9 + $0x1d0] sm:$0xff] }
 0x730   :  { %4893 = vmatpush.msrb.mxu0 %v4868_v63  ;;  %v4927_v63 = vld [vmem:[#allocation9 + $0x80] sm:$0xff] }
 0x731   :  { %v4361_v30 = vpop.f32.mrf.mxu3 }
 0x732   :  { %v4367_v0 = vadd.f32 %v4361_v30, %v4214_v26  ;;  %v4971_v30 = vld [vmem:[#allocation9 + $0x1e0] sm:$0xff]  ;;  %4894 = vmatpush.msrb.mxu0 %v4867_v54 }
 0x733   :  { %4985 = vmatpush.msra.mxu1 %v4971_v30  ;;  %v4929_v30 = vld [vmem:[#allocation9 + $0x90] sm:$0xff]  ;;  %v4923_v54 = vld [vmem:[#allocation9 + $0x60] sm:$0xff] }
 0x734   :  { %4895 = vmatpush.msrb.mxu0 %v4866_v45 }
 0x735   :  { %v4454_v37 = vpop.f32.mrf.mxu0  ;;  %4986 = vmatpush.msra.mxu1 %v4967_v16  ;;  %v4925_v16 = vld [vmem:[#allocation9 + $0x70] sm:$0xff] }
 0x736   :  { %v4494_v29 = vpop.f32.mrf.mxu2  ;;  %v4474_v51 = vpop.f32.mrf.mxu1  ;;  %v4517_v2 = vadd.f32 %v4454_v37, %v4364_v60  ;;  %v4964_v37 = vld [vmem:[#allocation9 + $0x1a8] sm:$0xff]  ;;  %4896 = vmatpush.msrb.mxu0 %v4865_v12  ;;  %v4966_v60 = vld [vmem:[#allocation9 + $0x1b8] sm:$0xff]  ;;  %v4917_v12 = vld [vmem:[#allocation9 + $0x30] sm:$0xff] }
 0x737   :  { %v4519_v41 = vadd.f32 %v4494_v29, %v4366_v44  ;;  %v4518_v49 = vadd.f32 %v4474_v51, %v4365_v17  ;;  %v4973_v29 = vld [vmem:[#allocation9 + $0x1f0] sm:$0xff]  ;;  %v4963_v44 = vld [vmem:[#allocation9 + $0x1a0] sm:$0xff]  ;;  %5007 = vmatpush.msra.mxu2 %v4964_v37  ;;  %v4922_v37 = vld [vmem:[#allocation9 + $0x58] sm:$0xff] }
 0x738   :  { %5025 = vmatpush.msra.mxu3 %v4973_v29  ;;  %4987 = vmatpush.msra.mxu1 %v4963_v44  ;;  %v4924_v29 = vld [vmem:[#allocation9 + $0x68] sm:$0xff]  ;;  %v4921_v44 = vld [vmem:[#allocation9 + $0x50] sm:$0xff] }
 0x739   :  { %4897 = vmatpush.msrb.mxu0 %v4864_v27  ;;  %v4911_v27 = vld [vmem:[#allocation9] sm:$0xff] }
 0x73a   :  { %5026 = vmatpush.msra.mxu3 %v4969_v50  ;;  %v4920_v50 = vld [vmem:[#allocation9 + $0x48] sm:$0xff] }
 0x73c   :  { %5027 = vmatpush.msra.mxu3 %v4965_v5  ;;  %v4915_v5 = vld [vmem:[#allocation9 + $0x20] sm:$0xff] }
 0x73d   :  { %v4514_v23 = vpop.f32.mrf.mxu3 }
 0x73e   :  { %v4520_v13 = vadd.f32 %v4514_v23, %v4367_v0  ;;  %v4959_v0 = vld [vmem:[#allocation9 + $0x180] sm:$0xff] }
 0x73f   :  { %4988 = vmatpush.msra.mxu1 %v4959_v0 }
 0x744   :  { %v4647_v9 = vpop.f32.mrf.mxu2 }
 0x745   :  { %v4672_v10 = vadd.f32 %v4647_v9, %v4519_v41  ;;  %v4863_v9 = vld [vmem:[#allocation7] sm:$0xff] }
 0x746   :  { %v4627_v6 = vpop.f32.mrf.mxu1  ;;  %4898 = vmatpush.msrb.mxu0 %v4863_v9 }
 0x747   :  { %v4682_v61 = vadd.f32 %v4678_v59, %v4672_v10  ;;  %v4607_v33 = vpop.f32.mrf.mxu0  ;;  %v4671_v39 = vadd.f32 %v4627_v6, %v4518_v49  ;;  %v4970_v10 = vld [vmem:[#allocation9 + $0x1d8] sm:$0xff]  ;;  %v4960_v49 = vld [vmem:[#allocation9 + $0x188] sm:$0xff]  ;;  %v4955_v6 = vld [vmem:[#allocation9 + $0x160] sm:$0xff] }
 0x748   :  { %v4670_v1 = vadd.f32 %v4607_v33, %v4517_v2  ;;  %v4961_v33 = vld [vmem:[#allocation9 + $0x190] sm:$0xff]  ;;  %5008 = vmatpush.msra.mxu2 %v4960_v49  ;;  %4989 = vmatpush.msra.mxu1 %v4955_v6 }
 0x749   :  { %v4694_v7 = vrot.slane %v4682_v61, 7  ;;  %v4681_v22 = vadd.f32 %v4678_v59, %v4671_v39  ;;  %5028 = vmatpush.msra.mxu3 %v4961_v33  ;;  %v4957_v39 = vld [vmem:[#allocation9 + $0x170] sm:$0xff] }
 0x74a   :  { %v4680_v4 = vadd.f32 %v4678_v59, %v4670_v1  ;;  %v4667_v15 = vpop.f32.mrf.mxu3  ;;  %v4962_v1 = vld [vmem:[#allocation9 + $0x198] sm:$0xff] }
 0x74b   :  { %v4673_v57 = vadd.f32 %v4667_v15, %v4520_v13  ;;  %v4687_v36 = vrot.slane %v4681_v22, 1  ;;  %v4956_v13 = vld [vmem:[#allocation9 + $0x168] sm:$0xff]  ;;  %5029 = vmatpush.msra.mxu3 %v4957_v39 }
 0x74c   :  { %v4686_v55 = vrot.slane %v4680_v4, 1  ;;  %v4703_v19 = vsel %vm4702_vm1, %v4680_v4, %v4694_v7  ;;  %5009 = vmatpush.msra.mxu2 %v4956_v13  ;;  %v4958_v7 = vld [vmem:[#allocation9 + $0x178] sm:$0xff]  ;;  %v4951_v4 = vld [vmem:[#allocation9 + $0x140] sm:$0xff]  ;;  %v4952_v15 = vld [vmem:[#allocation9 + $0x148] sm:$0xff] }
 0x74d   :  { %v4683_v40 = vadd.f32 %v4678_v59, %v4673_v57  ;;  %4791 = vmatmul.f32.vlgmr.msra.gmra.mxu0 %v4703_v19  ;;  %4990 = vmatpush.msra.mxu1 %v4951_v4  ;;  %v4954_v57 = vld [vmem:[#allocation9 + $0x158] sm:$0xff]  ;;  %v4948_v19 = vld [vmem:[#allocation9 + $0x128] sm:$0xff] }
 0x74e   :  { %v4705_v38 = vsel %vm4702_vm1, %v4686_v55, %v4682_v61  ;;  %5045 = vmatpush.msra.mxu0 %v4974_v56  ;;  %5010 = vmatpush.msra.mxu2 %v4952_v15  ;;  %v4947_v55 = vld [vmem:[#allocation9 + $0x120] sm:$0xff]  ;;  %v4914_v56 = vld [vmem:[#allocation9 + $0x18] sm:$0xff] }
 0x74f   :  { %v4695_v25 = vrot.slane %v4683_v40, 7  ;;  %4831 = vmatmul.f32.vlgmr.msrb.gmra.mxu2 %v4705_v38  ;;  %v4706_v46 = vsel %vm4702_vm1, %v4687_v36, %v4683_v40  ;;  %v4949_v36 = vld [vmem:[#allocation9 + $0x130] sm:$0xff]  ;;  %4991 = vmatpush.msra.mxu1 %v4947_v55  ;;  %v4950_v40 = vld [vmem:[#allocation9 + $0x138] sm:$0xff]  ;;  %v4943_v38 = vld [vmem:[#allocation9 + $0x100] sm:$0xff] }
 0x750   :  { %4851 = vmatmul.f32.vlgmr.msrb.gmra.mxu3 %v4706_v46  ;;  %5046 = vmatpush.msra.mxu0 %v4970_v10  ;;  %v4945_v46 = vld [vmem:[#allocation9 + $0x110] sm:$0xff] }
 0x751   :  { %v4704_v24 = vsel %vm4702_vm1, %v4681_v22, %v4695_v25  ;;  %v4953_v22 = vld [vmem:[#allocation9 + $0x150] sm:$0xff]  ;;  %5011 = vmatpush.msra.mxu2 %v4948_v19  ;;  %v4944_v25 = vld [vmem:[#allocation9 + $0x108] sm:$0xff]  ;;  %4992 = vmatpush.msra.mxu1 %v4943_v38 }
 0x752   :  { %4811 = vmatmul.f32.vlgmr.msrb.gmra.mxu1 %v4704_v24  ;;  %5047 = vmatpush.msra.mxu0 %v4966_v60  ;;  %v4946_v24 = vld [vmem:[#allocation9 + $0x118] sm:$0xff] }
 0x753   :  { %5030 = vmatpush.msra.mxu3 %v4953_v22  ;;  %5012 = vmatpush.msra.mxu2 %v4944_v25 }
 0x754   :  { %5048 = vmatpush.msra.mxu0 %v4962_v1  ;;  %4993 = vmatpush.msra.mxu1 %v4939_v58 }
 0x755   :  { %5031 = vmatpush.msra.mxu3 %v4949_v36  ;;  %5013 = vmatpush.msra.mxu2 %v4940_v3 }
 0x756   :  { %5049 = vmatpush.msra.mxu0 %v4958_v7  ;;  %4994 = vmatpush.msra.mxu1 %v4935_v14 }
 0x757   :  { %5032 = vmatpush.msra.mxu3 %v4945_v46  ;;  %5014 = vmatpush.msra.mxu2 %v4936_v32 }
 0x758   :  { %5050 = vmatpush.msra.mxu0 %v4954_v57 }
 0x759   :  { %5033 = vmatpush.msra.mxu3 %v4941_v53 }
 0x75a   :  { %5051 = vmatpush.msra.mxu0 %v4950_v40 }
 0x75b   :  { %5034 = vmatpush.msra.mxu3 %v4937_v31 }
 0x75c   :  { %5052 = vmatpush.msra.mxu0 %v4946_v24 }
 0x75d   :  { %5035 = vmatpush.msra.mxu3 %v4933_v48 }
 0x75e   :  { %5053 = vmatpush.msra.mxu0 %v4942_v35 }
 0x75f   :  { %5036 = vmatpush.msra.mxu3 %v4929_v30 }
 0x760   :  { %5054 = vmatpush.msra.mxu0 %v4938_v11 }
 0x761   :  { %5037 = vmatpush.msra.mxu3 %v4925_v16 }
 0x762   :  { %5055 = vmatpush.msra.mxu0 %v4934_v43 }
 0x763   :  { %5038 = vmatpush.msra.mxu3 %v4921_v44 }
 0x764   :  { %5056 = vmatpush.msra.mxu0 %v4930_v34 }
 0x765   :  { %5039 = vmatpush.msra.mxu3 %v4917_v12 }
 0x7ca   :  { %v4792_v8 = vpop.f32.mrf.mxu0 }
 0x7cb   :  { %v4793_v28 = vadd.f32 %v5566_v62, %v4792_v8  ;;  %v4931_v62 = vld [vmem:[#allocation9 + $0xa0] sm:$0xff]  ;;  %v4932_v8 = vld [vmem:[#allocation9 + $0xa8] sm:$0xff] }
 0x7cc   :  { %4995 = vmatpush.msra.mxu1 %v4931_v62  ;;  %5015 = vmatpush.msra.mxu2 %v4932_v8 }
 0x7ce   :  { %4996 = vmatpush.msra.mxu1 %v4927_v63 }
 0x7cf   :  { %v4812_v42 = vpop.f32.mrf.mxu1 }
 0x7d0   :  { %v4813_v47 = vadd.f32 %v4812_v42, %v4793_v28  ;;  %v4928_v28 = vld [vmem:[#allocation9 + $0x88] sm:$0xff]  ;;  %v5567_v42 = vld [vmem:[%s10155_s10] ss:$0 sm:$0xff]  ;;  %4997 = vmatpush.msra.mxu1 %v4923_v54 }
 0x7d1   :  { %5016 = vmatpush.msra.mxu2 %v4928_v28 }
 0x7d2   :  { %v4832_v20 = vpop.f32.mrf.mxu2  ;;  %4998 = vmatpush.msra.mxu1 %v4919_v52 }
 0x7d3   :  { %v4833_v51 = vadd.f32 %v4832_v20, %v4813_v47  ;;  %v4852_v18 = vpop.f32.mrf.mxu3  ;;  %v4926_v47 = vld [vmem:[#allocation9 + $0x78] sm:$0xff]  ;;  %5017 = vmatpush.msra.mxu2 %v4924_v29 }
 0x7d4   :  { %5057 = vmatpush.msra.mxu0 %v4926_v47  ;;  %4999 = vmatpush.msra.mxu1 %v4915_v5 }
 0x7d5   :  { %v4853_v41 = vadd.f32 %v4852_v18, %v4833_v51  ;;  %v4916_v51 = vld [vmem:[#allocation9 + $0x28] sm:$0xff]  ;;  %5018 = vmatpush.msra.mxu2 %v4920_v50 }
 0x7d6   :  { %5058 = vmatpush.msra.mxu0 %v4922_v37  ;;  %5000 = vmatpush.msra.mxu1 %v4911_v27 }
 0x7d7   :  { %v4856_v23 = vmin.f32 %v4853_v41, 20.0  ;;  %vm4855_vm2 = vcmp.gt.f32.partialorder %v4853_v41, 20.0  ;;  %5019 = vmatpush.msra.mxu2 %v4916_v51 }
 0x7d9   :  { %v4857_v21 = vmul.f32 1.442695, %v4856_v23  ;;  %v4912_v23 = vld [vmem:[#allocation9 + $0x8] sm:$0xff] }
 0x7da   :  { %5020 = vmatpush.msra.mxu2 %v4912_v23 }
 0x7db   :  { %5712 = vpow2.f32 %v4857_v21  ;;  %v4913_v21 = vld [vmem:[#allocation9 + $0x10] sm:$0xff] }
 0x7dc   :  { %5040 = vmatpush.msra.mxu3 %v4913_v21 }
 0x7e1   :  { %v5713_v59 = vpop.eup %5712 }
 0x7e2   :  { %v4859_v26 = vadd.f32 1.0, %v5713_v59 }
 0x7e4   :  { %5714 = vlog2.f32 %v4859_v26 }
 0x7ea   :  { %v5715_v17 = vpop.eup %5714 }
 0x7eb   :  { %v4861_v2 = vmul.f32 0.6931472, %v5715_v17 }
 0x7ed   :  { %v4862_v61 = vsel %vm4855_vm2, %v4853_v41, %v4861_v2  ;;  %v4918_v41 = vld [vmem:[#allocation9 + $0x38] sm:$0xff]  ;;  %v4975_v2 = vld [vmem:[%s10157_s12] sm:$0xf] }
 0x7ee   :  { %4899 = vmatmul.f32.vlgmr.msrb.gmra.mxu0 %v4862_v61  ;;  %v4980_v61 = vperm.slane %v4975_v2, 3  ;;  %v4978_v49 = vperm.slane %v4975_v2, 1  ;;  %v4979_v33 = vperm.slane %v4975_v2, 2  ;;  %v4977_v1 = vperm.slane %v4975_v2, 0 }
 0x7ef   :  { %5059 = vmatpush.msra.mxu0 %v4918_v41 }
 0x7f1   :  { %5060 = vmatpush.msra.mxu0 %v4914_v56 }
 0x86b   :  { %v4900_v45 = vpop.f32.mrf.mxu0 }
 0x86c   :  { %v4901_v20 = vadd.f32 %v5567_v42, %v4900_v45 }
 0x86e   :  { %v4904_v18 = vmin.f32 %v4901_v20, 20.0  ;;  %vm4903_vm4 = vcmp.gt.f32.partialorder %v4901_v20, 20.0 }
 0x870   :  { %v4905_v9 = vmul.f32 1.442695, %v4904_v18 }
 0x872   :  { %5716 = vpow2.f32 %v4905_v9 }
 0x878   :  { %v5717_v10 = vpop.eup %5716 }
 0x879   :  { %v4907_v60 = vadd.f32 1.0, %v5717_v10 }
 0x87b   :  { %5718 = vlog2.f32 %v4907_v60 }
 0x881   :  { %v5719_v59 = vpop.eup %5718 }
 0x882   :  { %v4909_v26 = vmul.f32 0.6931472, %v5719_v59 }
 0x884   :  { %v4910_v17 = vsel %vm4903_vm4, %v4901_v20, %v4909_v26 }
 0x885   :  { %5001 = vmatmul.f32.vlgmr.msra.gmra.mxu1 %v4910_v17  ;;  %5021 = vmatmul.f32.vlgmr.msra.gmra.mxu2 %v4910_v17 }
 0x886   :  { %5041 = vmatmul.f32.vlgmr.msra.gmra.mxu3 %v4910_v17  ;;  %5061 = vmatmul.f32.vlgmr.msra.gmra.mxu0 %v4910_v17 }
 0x902   :  { %v5002_v6 = vpop.f32.mrf.mxu1 }
 0x903   :  { %v5062_v0 = vpop.f32.mrf.mxu0  ;;  %v5003_v22 = vadd.f32 %v5002_v6, %v4977_v1 }
 0x904   :  { %v5063_v13 = vadd.f32 %v5062_v0, %v4980_v61 }
 0x906   :  { %v5071_v55 = vrot.slane %v5063_v13, 2 }
 0x908   :  { %v5022_v39 = vpop.f32.mrf.mxu2 }
 0x909   :  { %v5023_v7 = vadd.f32 %v5022_v39, %v4978_v49  ;;  %v5042_v4 = vpop.f32.mrf.mxu3 }
 0x90a   :  { %v5043_v15 = vadd.f32 %v5042_v4, %v4979_v33 }
 0x90b   :  { %v5069_v57 = vrot.slane %v5023_v7, 6 }
 0x90c   :  { %v5070_v19 = vrot.slane %v5043_v15, 4 }
 0x90d   :  { %v5073_v36 = vsel %vm5072_vm14, %v5003_v22, %v5069_v57 }
 0x90e   :  { %v5075_v40 = vsel %vm5074_vm3, %v5070_v19, %v5071_v55 }
 0x90f   :  { %v5077_v38 = vsel %vm5076_vm8, %v5073_v36, %v5075_v40 }
 0x910   :  { %5079 = vst [vmem:[%s10158_s13] sm:$0xff] %v5077_v38 }
 0x911   :  { %5084 = vsyncpa [#allocation3], 1 }
 0x912   :  { %5085 = vsyncpa [#allocation5], 1 }
 0x913   :  { %5086 = vsyncpa [#allocation8], 1 }

</bundles_post_ra>
